<compile_context>
chip_gen: v5e
topology: v5e:2x2
jax: 0.10.0
libtpu: 0.0.40
codegen_flags: <defaults>
</compile_context>

<pallas_src>
import functools

import jax
import jax.numpy as jnp
from jax.experimental import pallas as pl
from jax.experimental.pallas import tpu as pltpu


def _round_up(x, m):
    return (x + m - 1) // m * m


# ----------------------------- Pallas kernel ------------------------------ #
def _lstm_chunk_kernel(len_ref, x_ref, w_ih_ref, w_hh_ref, b_g_ref,
                       w_p_ref, b_p_ref, out_ref,
                       gates_scr, hout_scr, h_scr, c_scr):
    """One grid step == one (batch tile, time chunk) of the LSTM + projection.

    grid = (batch_tiles, time_chunks); time (axis 1) is the serial axis.

    len_ref  : (b_tile, 1)  int32 sequence lengths (0 for padded batch rows)
    x_ref    : (t_chunk, b_tile, d_model)  bf16 time-major input chunk
    w_ih_ref : (d_model, 4*G)  bf16, gate blocks at lane offsets k*G
    w_hh_ref : (G, 4*G)        f32  (recurrent path kept f32)
    b_g_ref  : (1, 4*G)        f32  (b_ih + b_hh, zero on pad lanes)
    w_p_ref  : (G, d_model)    bf16 (zero rows for padded d_rnn lanes)
    b_p_ref  : (1, d_model)    f32
    out_ref  : (t_chunk, b_tile, d_model)  f32
    gates_scr: (t_chunk*b_tile, 4*G) f32 VMEM   hoisted x-projection
    hout_scr : (t_chunk*b_tile, G)   bf16 VMEM  per-step masked h outputs
    h_scr, c_scr : (b_tile, G) f32 VMEM, carried across time chunks
    """
    chunk = pl.program_id(1)                       # time-chunk index (serial)
    t_chunk, b_tile, d_model = x_ref.shape
    G = h_scr.shape[1]                             # padded d_rnn (mult of 128)

    # Re-init the carried state at the start of every batch tile's time walk.
    @pl.when(chunk == 0)
    def _init():
        h_scr[...] = jnp.zeros_like(h_scr)
        c_scr[...] = jnp.zeros_like(c_scr)

    lengths = len_ref[...]                         # (b_tile, 1) int32
    t0 = chunk * t_chunk

    # ---- hoisted input projection: ONE big MXU matmul per chunk, result
    # ---- written straight to VMEM scratch (not kept live in vregs).
    x_flat = x_ref[...].reshape(t_chunk * b_tile, d_model)        # leading merge
    gates_scr[...] = (jnp.dot(x_flat, w_ih_ref[...],
                              preferred_element_type=jnp.float32)
                      + b_g_ref[...])                             # (T*B, 4G) f32

    # Hoisted loads for the serial loop.
    w_hh = w_hh_ref[...]                           # (G, 4G) f32
    h = h_scr[...]
    c = c_scr[...]

    # ---- serial recurrence (fully unrolled; per-step state lives in VMEM
    # ---- scratch slabs so vreg live ranges stay bounded at any t_chunk).
    for t in range(t_chunk):
        gx = gates_scr[t * b_tile:(t + 1) * b_tile, :]            # (b_tile, 4G)
        gates = gx + jnp.dot(h, w_hh, preferred_element_type=jnp.float32)

        # PyTorch LSTM gate order: i, f, g, o (slices are 128-lane aligned).
        i_g = jax.nn.sigmoid(gates[:, 0 * G:1 * G])
        f_g = jax.nn.sigmoid(gates[:, 1 * G:2 * G])
        g_g = jnp.tanh(gates[:, 2 * G:3 * G])
        o_g = jax.nn.sigmoid(gates[:, 3 * G:4 * G])

        c_new = f_g * c + i_g * g_g
        h_new = o_g * jnp.tanh(c_new)

        valid = lengths > (t0 + t)                                # (b_tile, 1)
        # packed-sequence semantics: state advances only for valid timesteps.
        h = jnp.where(valid, h_new, h)
        c = jnp.where(valid, c_new, c)
        # pad_packed_sequence pads the LSTM output with 0.
        hout_scr[t * b_tile:(t + 1) * b_tile, :] = jnp.where(
            valid, h_new, 0.0).astype(hout_scr.dtype)

    h_scr[...] = h
    c_scr[...] = c

    # ---- hoisted output projection: ONE big MXU matmul per chunk ----------
    proj = (jnp.dot(hout_scr[...], w_p_ref[...],
                    preferred_element_type=jnp.float32)
            + b_p_ref[...])                                       # (T*B, d_model)
    out_ref[...] = proj.reshape(t_chunk, b_tile, d_model).astype(out_ref.dtype)


# ---------------------------- parameter prep ------------------------------- #
def prepare_params(w_ih, w_hh, b_ih, b_hh, w_proj, b_proj,
                   mxu_dtype=jnp.bfloat16):
    """Transpose, zero-pad d_rnn to a multiple of 128 (lane-aligned gate
    slices) and cast the big one-shot matmul weights to the MXU dtype.
    W_hh stays float32: its operand (h) compounds rounding error over
    timesteps.  Biases stay f32.  Zero padding is exact: padded gate
    pre-activations are 0 -> padded c/h stay 0 and contribute nothing."""
    four_d_rnn, d_model = w_ih.shape
    d_rnn = four_d_rnn // 4
    G = _round_up(d_rnn, 128)

    def pad_gate_cols(w_t):                 # (rows, 4*d_rnn) -> (rows, 4*G)
        rows = w_t.shape[0]
        out = jnp.zeros((rows, 4 * G), w_t.dtype)
        for k in range(4):
            out = out.at[:, k * G:k * G + d_rnn].set(
                w_t[:, k * d_rnn:(k + 1) * d_rnn])
        return out

    w_ih_T = pad_gate_cols(w_ih.T)                                   # (d_model, 4G)
    w_hh_T = jnp.zeros((G, 4 * G), w_hh.dtype)
    w_hh_T = w_hh_T.at[:d_rnn, :].set(pad_gate_cols(w_hh.T))         # (G, 4G)
    b_gates = pad_gate_cols((b_ih + b_hh)[None, :])                  # (1, 4G)
    w_p_T = jnp.zeros((G, d_model), w_proj.dtype).at[:d_rnn, :].set(w_proj.T)

    return {
        "w_ih_T": w_ih_T.astype(mxu_dtype),
        "w_hh_T": w_hh_T.astype(jnp.float32),      # recurrent path stays f32
        "b_gates": b_gates.astype(jnp.float32),
        "w_proj_T": w_p_T.astype(mxu_dtype),
        "b_proj": b_proj[None, :].astype(jnp.float32),
    }


# ------------------------------- wrapper ----------------------------------- #
@functools.partial(jax.jit,
                   static_argnames=("t_chunk", "b_tile", "vmem_limit_bytes"))
def rnn_layers_forward(data, non_pad_mask, params, *, t_chunk=32, b_tile=None,
                       vmem_limit_bytes=32 * 1024 * 1024):
    """data: (B, S, d_model) f32; non_pad_mask: (B, S, 1).

    Returns the full padded (B, S, d_model) output (positions with
    t >= lengths[b] hold the projection bias, exactly as projecting
    pad_packed_sequence's zeros).  Trimming to max(lengths) is left to the
    caller (keeps the jitted forward free of host syncs).

    t_chunk : timesteps per grid step (>=16 on v5e, >=32 on v6e/v7x).
    b_tile  : batch rows per grid step (multiple of 8).  Default: whole
              (padded) batch in one tile.  Use B_pad//2 on v7x to engage the
              second TensorCore via the parallel batch axis.
    """
    B, S, d_model = data.shape
    G = params["w_hh_T"].shape[0]
    four_g = params["w_hh_T"].shape[1]

    if b_tile is None:
        b_tile = _round_up(max(B, 8), 8)
    assert b_tile % 8 == 0, "b_tile must be a multiple of 8 (sublane tile)"
    B_pad = _round_up(max(B, b_tile), b_tile)
    S_pad = _round_up(S, t_chunk)
    nb = B_pad // b_tile
    nc = S_pad // t_chunk

    lengths = jnp.sum(non_pad_mask[..., 0].astype(jnp.int32), axis=1)   # (B,)
    len_col = jnp.zeros((B_pad, 1), jnp.int32).at[:B, 0].set(lengths)

    # Single pad + bf16-cast + batch_first->time_major copy (fused by XLA);
    # padded batch rows have length 0 so they stay masked inside the kernel.
    x = jnp.zeros((S_pad, B_pad, d_model), jnp.bfloat16)
    x = x.at[:S, :B, :].set(
        jnp.transpose(data, (1, 0, 2)).astype(jnp.bfloat16))

    out_tm = pl.pallas_call(
        _lstm_chunk_kernel,
        grid=(nb, nc),                       # (batch tiles, time chunks)
        in_specs=[
            pl.BlockSpec((b_tile, 1), lambda b, c: (b, 0)),                 # lengths
            pl.BlockSpec((t_chunk, b_tile, d_model), lambda b, c: (c, b, 0)),  # x
            pl.BlockSpec(params["w_ih_T"].shape, lambda b, c: (0, 0)),      # W_ih^T
            pl.BlockSpec(params["w_hh_T"].shape, lambda b, c: (0, 0)),      # W_hh^T
            pl.BlockSpec(params["b_gates"].shape, lambda b, c: (0, 0)),     # b_ih+b_hh
            pl.BlockSpec(params["w_proj_T"].shape, lambda b, c: (0, 0)),    # W_proj^T
            pl.BlockSpec(params["b_proj"].shape, lambda b, c: (0, 0)),      # b_proj
        ],
        out_specs=pl.BlockSpec((t_chunk, b_tile, d_model), lambda b, c: (c, b, 0)),
        out_shape=jax.ShapeDtypeStruct((S_pad, B_pad, d_model), jnp.float32),
        scratch_shapes=[
            pltpu.VMEM((t_chunk * b_tile, four_g), jnp.float32),  # gates_x
            pltpu.VMEM((t_chunk * b_tile, G), jnp.bfloat16),      # per-step h out
            pltpu.VMEM((b_tile, G), jnp.float32),                 # h state
            pltpu.VMEM((b_tile, G), jnp.float32),                 # c state
        ],
        compiler_params=pltpu.CompilerParams(
            # batch tiles are independent (v7x 2nd TensorCore); the time
            # recurrence is serial.
            dimension_semantics=("parallel", "arbitrary"),
            vmem_limit_bytes=vmem_limit_bytes),
    )(len_col, x, params["w_ih_T"], params["w_hh_T"], params["b_gates"],
      params["w_proj_T"], params["b_proj"])

    return jnp.transpose(out_tm[:S, :B, :], (1, 0, 2))   # (B, S, d_model)


# --------------------------- pure-JAX reference ----------------------------- #
def rnn_layers_reference(data, non_pad_mask, w_ih, w_hh, b_ih, b_hh, w_p, b_p):
    B, S, d_model = data.shape
    d_rnn = w_hh.shape[1]
    lengths = jnp.sum(non_pad_mask[..., 0].astype(jnp.int32), axis=1)
    w_ih_T, w_hh_T, b_g = w_ih.T, w_hh.T, b_ih + b_hh

    def step(carry, inp):
        h, c = carry
        xt, t = inp
        gates = xt @ w_ih_T + h @ w_hh_T + b_g
        i_g = jax.nn.sigmoid(gates[:, 0 * d_rnn:1 * d_rnn])
        f_g = jax.nn.sigmoid(gates[:, 1 * d_rnn:2 * d_rnn])
        g_g = jnp.tanh(gates[:, 2 * d_rnn:3 * d_rnn])
        o_g = jax.nn.sigmoid(gates[:, 3 * d_rnn:4 * d_rnn])
        c_new = f_g * c + i_g * g_g
        h_new = o_g * jnp.tanh(c_new)
        valid = (lengths > t)[:, None]
        h = jnp.where(valid, h_new, h)
        c = jnp.where(valid, c_new, c)
        return (h, c), jnp.where(valid, h_new, 0.0)

    x_tm = jnp.transpose(data, (1, 0, 2))
    init = (jnp.zeros((B, d_rnn), jnp.float32),
            jnp.zeros((B, d_rnn), jnp.float32))
    _, hs = jax.lax.scan(step, init, (x_tm, jnp.arange(S)))
    out = hs @ w_p.T + b_p                     # (S, B, d_model)
    return jnp.transpose(out, (1, 0, 2))       # (B, S, d_model)


# --------------------------------- main ------------------------------------ #
if __name__ == "__main__":
    B, S, d_model, d_rnn = 4, 16, 32, 48
    T_CHUNK = 16    # S == 16, so one full-size chunk (default is 32)

    key = jax.random.PRNGKey(0)
    k_data, k_wih, k_whh, k_bih, k_bhh, k_wp, k_bp = jax.random.split(key, 7)

    # PyTorch-style uniform(-1/sqrt(d_rnn), 1/sqrt(d_rnn)) init.
    bound = 1.0 / (d_rnn ** 0.5)
    w_ih = jax.random.uniform(k_wih, (4 * d_rnn, d_model), jnp.float32, -bound, bound)
    w_hh = jax.random.uniform(k_whh, (4 * d_rnn, d_rnn), jnp.float32, -bound, bound)
    b_ih = jax.random.uniform(k_bih, (4 * d_rnn,), jnp.float32, -bound, bound)
    b_hh = jax.random.uniform(k_bhh, (4 * d_rnn,), jnp.float32, -bound, bound)
    w_p = jax.random.uniform(k_wp, (d_model, d_rnn), jnp.float32, -bound, bound)
    b_p = jax.random.uniform(k_bp, (d_model,), jnp.float32, -bound, bound)

    params = prepare_params(w_ih, w_hh, b_ih, b_hh, w_p, b_p)

    data = jax.random.normal(k_data, (B, S, d_model), jnp.float32)

    # Variable-length sequences; longest fills the full sequence axis.
    seq_lens = [16, 11, 16, 7]
    lengths = jnp.array(seq_lens, dtype=jnp.int32)
    non_pad_mask = (jnp.arange(S)[None, :] < lengths[:, None]).astype(jnp.float32)
    non_pad_mask = non_pad_mask[:, :, None]            # (B, S, 1)

    out = jax.block_until_ready(
        rnn_layers_forward(data, non_pad_mask, params, t_chunk=T_CHUNK))
    ref = jax.block_until_ready(
        rnn_layers_reference(data, non_pad_mask, w_ih, w_hh, b_ih, b_hh, w_p, b_p))

    # pad_packed_sequence pads only up to the longest sequence; trim on the
    # host here (known statically), keeping the jitted forward sync-free.
    max_len = max(seq_lens)
    out_t = out[:, :max_len, :]
    ref_t = ref[:, :max_len, :]

    assert out_t.shape == ref_t.shape, (out_t.shape, ref_t.shape)
    err = float(jnp.max(jnp.abs(out_t - ref_t)))
    # bf16 x / W_ih / W_proj (f32 accumulation, f32 recurrent path) vs pure-f32 ref.
    assert err < 2e-2, err
    print("KERNEL_OK")
</pallas_src>

<mosaic_0001>
module attributes {stable_mosaic.version = 11 : i64} {
  func.func @_lstm_chunk_kernel(%arg0: i32, %arg1: i32, %arg2: memref<8x1xi32, #tpu.memory_space<vmem>>, %arg3: memref<16x8x32xbf16, #tpu.memory_space<vmem>>, %arg4: memref<32x512xbf16, #tpu.memory_space<vmem>>, %arg5: memref<128x512xf32, #tpu.memory_space<vmem>>, %arg6: memref<1x512xf32, #tpu.memory_space<vmem>>, %arg7: memref<128x32xbf16, #tpu.memory_space<vmem>>, %arg8: memref<1x32xf32, #tpu.memory_space<vmem>>, %arg9: memref<16x8x32xf32, #tpu.memory_space<vmem>>, %arg10: memref<128x512xf32, #tpu.memory_space<vmem>>, %arg11: memref<128x128xbf16, #tpu.memory_space<vmem>>, %arg12: memref<8x128xf32, #tpu.memory_space<vmem>>, %arg13: memref<8x128xf32, #tpu.memory_space<vmem>>) attributes {dimension_semantics = [#tpu.dimension_semantics<parallel>, #tpu.dimension_semantics<arbitrary>], iteration_bounds = array<i64: 1, 1>, scalar_prefetch = 0 : i64, scratch_operands = 4 : i64, tpu.core_type = #tpu.core_type<tc>, window_params = [{transform_indices = @transform_0, window_bounds = array<i64: 8, 1>}, {transform_indices = @transform_1, window_bounds = array<i64: 16, 8, 32>}, {pipeline_mode = #tpu.pipeline_mode<synchronous>, transform_indices = @transform_2, window_bounds = array<i64: 32, 512>}, {pipeline_mode = #tpu.pipeline_mode<synchronous>, transform_indices = @transform_3, window_bounds = array<i64: 128, 512>}, {pipeline_mode = #tpu.pipeline_mode<synchronous>, transform_indices = @transform_4, window_bounds = array<i64: 1, 512>}, {pipeline_mode = #tpu.pipeline_mode<synchronous>, transform_indices = @transform_5, window_bounds = array<i64: 128, 32>}, {pipeline_mode = #tpu.pipeline_mode<synchronous>, transform_indices = @transform_6, window_bounds = array<i64: 1, 32>}, {transform_indices = @transform_7, window_bounds = array<i64: 16, 8, 32>}]} {
    %c0_i32 = arith.constant 0 : i32
    %0 = arith.cmpi eq, %arg1, %c0_i32 : i32
    %1 = arith.extui %0 : i1 to i32
    %c0_i32_0 = arith.constant 0 : i32
    %2 = arith.cmpi ne, %1, %c0_i32_0 : i32
    scf.if %2 {
      %cst_161 = arith.constant 0.000000e+00 : f32
      %714 = vector.broadcast %cst_161 : f32 to vector<8x128xf32>
      %c0_162 = arith.constant 0 : index
      %c0_163 = arith.constant 0 : index
      %715 = vector.load %arg12[%c0_162, %c0_163] : memref<8x128xf32, #tpu.memory_space<vmem>>, vector<8x128xf32>
      tpu.vector_store %arg12[%c0_162, %c0_163], %714 {strides = array<i32>} : memref<8x128xf32, #tpu.memory_space<vmem>>, vector<8x128xf32>,
      %cst_164 = arith.constant 0.000000e+00 : f32
      %716 = vector.broadcast %cst_164 : f32 to vector<8x128xf32>
      %c0_165 = arith.constant 0 : index
      %c0_166 = arith.constant 0 : index
      %717 = vector.load %arg13[%c0_165, %c0_166] : memref<8x128xf32, #tpu.memory_space<vmem>>, vector<8x128xf32>
      tpu.vector_store %arg13[%c0_165, %c0_166], %716 {strides = array<i32>} : memref<8x128xf32, #tpu.memory_space<vmem>>, vector<8x128xf32>,
    } else {
    }
    %c0 = arith.constant 0 : index
    %c0_1 = arith.constant 0 : index
    %3 = vector.load %arg2[%c0, %c0_1] : memref<8x1xi32, #tpu.memory_space<vmem>>, vector<8x1xi32>
    %c16_i32 = arith.constant 16 : i32
    %4 = arith.muli %arg1, %c16_i32 : i32
    %c0_2 = arith.constant 0 : index
    %c0_3 = arith.constant 0 : index
    %c0_4 = arith.constant 0 : index
    %5 = vector.load %arg3[%c0_2, %c0_3, %c0_4] : memref<16x8x32xbf16, #tpu.memory_space<vmem>>, vector<16x8x32xbf16>
    %6 = vector.shape_cast %5 : vector<16x8x32xbf16> to vector<128x32xbf16>
    %c0_5 = arith.constant 0 : index
    %c0_6 = arith.constant 0 : index
    %7 = vector.load %arg4[%c0_5, %c0_6] : memref<32x512xbf16, #tpu.memory_space<vmem>>, vector<32x512xbf16>
    %cst = arith.constant dense<0.000000e+00> : vector<128x512xf32>
    %8 = tpu.matmul %6, %7, %cst {dimension_numbers = #tpu.dot_dimension_numbers<[1], [0], [0], [1], [0, 0, 1, 1], [], []>} : vector<128x32xbf16>, vector<32x512xbf16>, vector<128x512xf32> -> vector<128x512xf32>
    %c0_7 = arith.constant 0 : index
    %c0_8 = arith.constant 0 : index
    %9 = vector.load %arg6[%c0_7, %c0_8] : memref<1x512xf32, #tpu.memory_space<vmem>>, vector<1x512xf32>
    %10 = vector.broadcast %9 : vector<1x512xf32> to vector<128x512xf32>
    %11 = arith.addf %8, %10 : vector<128x512xf32>
    %c0_9 = arith.constant 0 : index
    %c0_10 = arith.constant 0 : index
    %12 = vector.load %arg10[%c0_9, %c0_10] : memref<128x512xf32, #tpu.memory_space<vmem>>, vector<128x512xf32>
    tpu.vector_store %arg10[%c0_9, %c0_10], %11 {strides = array<i32>} : memref<128x512xf32, #tpu.memory_space<vmem>>, vector<128x512xf32>,
    %c0_11 = arith.constant 0 : index
    %c0_12 = arith.constant 0 : index
    %13 = vector.load %arg5[%c0_11, %c0_12] : memref<128x512xf32, #tpu.memory_space<vmem>>, vector<128x512xf32>
    %c0_13 = arith.constant 0 : index
    %c0_14 = arith.constant 0 : index
    %14 = vector.load %arg12[%c0_13, %c0_14] : memref<8x128xf32, #tpu.memory_space<vmem>>, vector<8x128xf32>
    %c0_15 = arith.constant 0 : index
    %c0_16 = arith.constant 0 : index
    %15 = vector.load %arg13[%c0_15, %c0_16] : memref<8x128xf32, #tpu.memory_space<vmem>>, vector<8x128xf32>
    %c0_17 = arith.constant 0 : index
    %c0_18 = arith.constant 0 : index
    %16 = vector.load %arg10[%c0_17, %c0_18] : memref<128x512xf32, #tpu.memory_space<vmem>>, vector<8x512xf32>
    %cst_19 = arith.constant dense<0.000000e+00> : vector<8x512xf32>
    %17 = tpu.matmul %14, %13, %cst_19 {dimension_numbers = #tpu.dot_dimension_numbers<[1], [0], [0], [1], [0, 0, 1, 1], [], []>} : vector<8x128xf32>, vector<128x512xf32>, vector<8x512xf32> -> vector<8x512xf32>
    %18 = arith.addf %16, %17 : vector<8x512xf32>
    %19 = vector.extract_strided_slice %18 {offsets = [0, 0], sizes = [8, 128], strides = [1, 1]} : vector<8x512xf32> to vector<8x128xf32>
    %20 = arith.negf %19 : vector<8x128xf32>
    %21 = math.exp %20 : vector<8x128xf32>
    %cst_20 = arith.constant 1.000000e+00 : f32
    %22 = vector.broadcast %cst_20 : f32 to vector<8x128xf32>
    %23 = arith.addf %22, %21 : vector<8x128xf32>
    %24 = arith.divf %22, %23 : vector<8x128xf32>
    %25 = vector.extract_strided_slice %18 {offsets = [0, 128], sizes = [8, 128], strides = [1, 1]} : vector<8x512xf32> to vector<8x128xf32>
    %26 = arith.negf %25 : vector<8x128xf32>
    %27 = math.exp %26 : vector<8x128xf32>
    %cst_21 = arith.constant 1.000000e+00 : f32
    %28 = vector.broadcast %cst_21 : f32 to vector<8x128xf32>
    %29 = arith.addf %28, %27 : vector<8x128xf32>
    %30 = arith.divf %28, %29 : vector<8x128xf32>
    %31 = vector.extract_strided_slice %18 {offsets = [0, 256], sizes = [8, 128], strides = [1, 1]} : vector<8x512xf32> to vector<8x128xf32>
    %32 = math.tanh %31 : vector<8x128xf32>
    %33 = vector.extract_strided_slice %18 {offsets = [0, 384], sizes = [8, 128], strides = [1, 1]} : vector<8x512xf32> to vector<8x128xf32>
    %34 = arith.negf %33 : vector<8x128xf32>
    %35 = math.exp %34 : vector<8x128xf32>
    %cst_22 = arith.constant 1.000000e+00 : f32
    %36 = vector.broadcast %cst_22 : f32 to vector<8x128xf32>
    %37 = arith.addf %36, %35 : vector<8x128xf32>
    %38 = arith.divf %36, %37 : vector<8x128xf32>
    %39 = arith.mulf %30, %15 : vector<8x128xf32>
    %40 = arith.mulf %24, %32 : vector<8x128xf32>
    %41 = arith.addf %39, %40 : vector<8x128xf32>
    %42 = math.tanh %41 : vector<8x128xf32>
    %43 = arith.mulf %38, %42 : vector<8x128xf32>
    %c0_i32_23 = arith.constant 0 : i32
    %44 = arith.addi %4, %c0_i32_23 : i32
    %45 = vector.broadcast %44 : i32 to vector<8x1xi32>
    %46 = arith.cmpi sgt, %3, %45 : vector<8x1xi32>
    %47 = vector.shape_cast %46 : vector<8x1xi1> to vector<8x1xi1>
    %48 = vector.broadcast %47 : vector<8x1xi1> to vector<8x128xi1>
    %49 = arith.select %48, %43, %14 : vector<8x128xi1>, vector<8x128xf32>
    %50 = vector.shape_cast %46 : vector<8x1xi1> to vector<8x1xi1>
    %51 = vector.broadcast %50 : vector<8x1xi1> to vector<8x128xi1>
    %52 = arith.select %51, %41, %15 : vector<8x128xi1>, vector<8x128xf32>
    %cst_24 = arith.constant 0.000000e+00 : f32
    %53 = vector.shape_cast %46 : vector<8x1xi1> to vector<8x1xi1>
    %54 = vector.broadcast %53 : vector<8x1xi1> to vector<8x128xi1>
    %55 = vector.broadcast %cst_24 : f32 to vector<8x128xf32>
    %56 = arith.select %54, %43, %55 : vector<8x128xi1>, vector<8x128xf32>
    %57 = arith.truncf %56 : vector<8x128xf32> to vector<8x128xbf16>
    %c0_25 = arith.constant 0 : index
    %c0_26 = arith.constant 0 : index
    %58 = vector.load %arg11[%c0_25, %c0_26] : memref<128x128xbf16, #tpu.memory_space<vmem>>, vector<8x128xbf16>
    tpu.vector_store %arg11[%c0_25, %c0_26], %57 {strides = array<i32>} : memref<128x128xbf16, #tpu.memory_space<vmem>>, vector<8x128xbf16>,
    %c8 = arith.constant 8 : index
    %c0_27 = arith.constant 0 : index
    %59 = vector.load %arg10[%c8, %c0_27] : memref<128x512xf32, #tpu.memory_space<vmem>>, vector<8x512xf32>
    %cst_28 = arith.constant dense<0.000000e+00> : vector<8x512xf32>
    %60 = tpu.matmul %49, %13, %cst_28 {dimension_numbers = #tpu.dot_dimension_numbers<[1], [0], [0], [1], [0, 0, 1, 1], [], []>} : vector<8x128xf32>, vector<128x512xf32>, vector<8x512xf32> -> vector<8x512xf32>
    %61 = arith.addf %59, %60 : vector<8x512xf32>
    %62 = vector.extract_strided_slice %61 {offsets = [0, 0], sizes = [8, 128], strides = [1, 1]} : vector<8x512xf32> to vector<8x128xf32>
    %63 = arith.negf %62 : vector<8x128xf32>
    %64 = math.exp %63 : vector<8x128xf32>
    %cst_29 = arith.constant 1.000000e+00 : f32
    %65 = vector.broadcast %cst_29 : f32 to vector<8x128xf32>
    %66 = arith.addf %65, %64 : vector<8x128xf32>
    %67 = arith.divf %65, %66 : vector<8x128xf32>
    %68 = vector.extract_strided_slice %61 {offsets = [0, 128], sizes = [8, 128], strides = [1, 1]} : vector<8x512xf32> to vector<8x128xf32>
    %69 = arith.negf %68 : vector<8x128xf32>
    %70 = math.exp %69 : vector<8x128xf32>
    %cst_30 = arith.constant 1.000000e+00 : f32
    %71 = vector.broadcast %cst_30 : f32 to vector<8x128xf32>
    %72 = arith.addf %71, %70 : vector<8x128xf32>
    %73 = arith.divf %71, %72 : vector<8x128xf32>
    %74 = vector.extract_strided_slice %61 {offsets = [0, 256], sizes = [8, 128], strides = [1, 1]} : vector<8x512xf32> to vector<8x128xf32>
    %75 = math.tanh %74 : vector<8x128xf32>
    %76 = vector.extract_strided_slice %61 {offsets = [0, 384], sizes = [8, 128], strides = [1, 1]} : vector<8x512xf32> to vector<8x128xf32>
    %77 = arith.negf %76 : vector<8x128xf32>
    %78 = math.exp %77 : vector<8x128xf32>
    %cst_31 = arith.constant 1.000000e+00 : f32
    %79 = vector.broadcast %cst_31 : f32 to vector<8x128xf32>
    %80 = arith.addf %79, %78 : vector<8x128xf32>
    %81 = arith.divf %79, %80 : vector<8x128xf32>
    %82 = arith.mulf %73, %52 : vector<8x128xf32>
    %83 = arith.mulf %67, %75 : vector<8x128xf32>
    %84 = arith.addf %82, %83 : vector<8x128xf32>
    %85 = math.tanh %84 : vector<8x128xf32>
    %86 = arith.mulf %81, %85 : vector<8x128xf32>
    %c1_i32 = arith.constant 1 : i32
    %87 = arith.addi %4, %c1_i32 : i32
    %88 = vector.broadcast %87 : i32 to vector<8x1xi32>
    %89 = arith.cmpi sgt, %3, %88 : vector<8x1xi32>
    %90 = vector.shape_cast %89 : vector<8x1xi1> to vector<8x1xi1>
    %91 = vector.broadcast %90 : vector<8x1xi1> to vector<8x128xi1>
    %92 = arith.select %91, %86, %49 : vector<8x128xi1>, vector<8x128xf32>
    %93 = vector.shape_cast %89 : vector<8x1xi1> to vector<8x1xi1>
    %94 = vector.broadcast %93 : vector<8x1xi1> to vector<8x128xi1>
    %95 = arith.select %94, %84, %52 : vector<8x128xi1>, vector<8x128xf32>
    %cst_32 = arith.constant 0.000000e+00 : f32
    %96 = vector.shape_cast %89 : vector<8x1xi1> to vector<8x1xi1>
    %97 = vector.broadcast %96 : vector<8x1xi1> to vector<8x128xi1>
    %98 = vector.broadcast %cst_32 : f32 to vector<8x128xf32>
    %99 = arith.select %97, %86, %98 : vector<8x128xi1>, vector<8x128xf32>
    %100 = arith.truncf %99 : vector<8x128xf32> to vector<8x128xbf16>
    %c8_33 = arith.constant 8 : index
    %c0_34 = arith.constant 0 : index
    %101 = vector.load %arg11[%c8_33, %c0_34] : memref<128x128xbf16, #tpu.memory_space<vmem>>, vector<8x128xbf16>
    tpu.vector_store %arg11[%c8_33, %c0_34], %100 {strides = array<i32>} : memref<128x128xbf16, #tpu.memory_space<vmem>>, vector<8x128xbf16>,
    %c16 = arith.constant 16 : index
    %c0_35 = arith.constant 0 : index
    %102 = vector.load %arg10[%c16, %c0_35] : memref<128x512xf32, #tpu.memory_space<vmem>>, vector<8x512xf32>
    %cst_36 = arith.constant dense<0.000000e+00> : vector<8x512xf32>
    %103 = tpu.matmul %92, %13, %cst_36 {dimension_numbers = #tpu.dot_dimension_numbers<[1], [0], [0], [1], [0, 0, 1, 1], [], []>} : vector<8x128xf32>, vector<128x512xf32>, vector<8x512xf32> -> vector<8x512xf32>
    %104 = arith.addf %102, %103 : vector<8x512xf32>
    %105 = vector.extract_strided_slice %104 {offsets = [0, 0], sizes = [8, 128], strides = [1, 1]} : vector<8x512xf32> to vector<8x128xf32>
    %106 = arith.negf %105 : vector<8x128xf32>
    %107 = math.exp %106 : vector<8x128xf32>
    %cst_37 = arith.constant 1.000000e+00 : f32
    %108 = vector.broadcast %cst_37 : f32 to vector<8x128xf32>
    %109 = arith.addf %108, %107 : vector<8x128xf32>
    %110 = arith.divf %108, %109 : vector<8x128xf32>
    %111 = vector.extract_strided_slice %104 {offsets = [0, 128], sizes = [8, 128], strides = [1, 1]} : vector<8x512xf32> to vector<8x128xf32>
    %112 = arith.negf %111 : vector<8x128xf32>
    %113 = math.exp %112 : vector<8x128xf32>
    %cst_38 = arith.constant 1.000000e+00 : f32
    %114 = vector.broadcast %cst_38 : f32 to vector<8x128xf32>
    %115 = arith.addf %114, %113 : vector<8x128xf32>
    %116 = arith.divf %114, %115 : vector<8x128xf32>
    %117 = vector.extract_strided_slice %104 {offsets = [0, 256], sizes = [8, 128], strides = [1, 1]} : vector<8x512xf32> to vector<8x128xf32>
    %118 = math.tanh %117 : vector<8x128xf32>
    %119 = vector.extract_strided_slice %104 {offsets = [0, 384], sizes = [8, 128], strides = [1, 1]} : vector<8x512xf32> to vector<8x128xf32>
    %120 = arith.negf %119 : vector<8x128xf32>
    %121 = math.exp %120 : vector<8x128xf32>
    %cst_39 = arith.constant 1.000000e+00 : f32
    %122 = vector.broadcast %cst_39 : f32 to vector<8x128xf32>
    %123 = arith.addf %122, %121 : vector<8x128xf32>
    %124 = arith.divf %122, %123 : vector<8x128xf32>
    %125 = arith.mulf %116, %95 : vector<8x128xf32>
    %126 = arith.mulf %110, %118 : vector<8x128xf32>
    %127 = arith.addf %125, %126 : vector<8x128xf32>
    %128 = math.tanh %127 : vector<8x128xf32>
    %129 = arith.mulf %124, %128 : vector<8x128xf32>
    %c2_i32 = arith.constant 2 : i32
    %130 = arith.addi %4, %c2_i32 : i32
    %131 = vector.broadcast %130 : i32 to vector<8x1xi32>
    %132 = arith.cmpi sgt, %3, %131 : vector<8x1xi32>
    %133 = vector.shape_cast %132 : vector<8x1xi1> to vector<8x1xi1>
    %134 = vector.broadcast %133 : vector<8x1xi1> to vector<8x128xi1>
    %135 = arith.select %134, %129, %92 : vector<8x128xi1>, vector<8x128xf32>
    %136 = vector.shape_cast %132 : vector<8x1xi1> to vector<8x1xi1>
    %137 = vector.broadcast %136 : vector<8x1xi1> to vector<8x128xi1>
    %138 = arith.select %137, %127, %95 : vector<8x128xi1>, vector<8x128xf32>
    %cst_40 = arith.constant 0.000000e+00 : f32
    %139 = vector.shape_cast %132 : vector<8x1xi1> to vector<8x1xi1>
    %140 = vector.broadcast %139 : vector<8x1xi1> to vector<8x128xi1>
    %141 = vector.broadcast %cst_40 : f32 to vector<8x128xf32>
    %142 = arith.select %140, %129, %141 : vector<8x128xi1>, vector<8x128xf32>
    %143 = arith.truncf %142 : vector<8x128xf32> to vector<8x128xbf16>
    %c16_41 = arith.constant 16 : index
    %c0_42 = arith.constant 0 : index
    %144 = vector.load %arg11[%c16_41, %c0_42] : memref<128x128xbf16, #tpu.memory_space<vmem>>, vector<8x128xbf16>
    tpu.vector_store %arg11[%c16_41, %c0_42], %143 {strides = array<i32>} : memref<128x128xbf16, #tpu.memory_space<vmem>>, vector<8x128xbf16>,
    %c24 = arith.constant 24 : index
    %c0_43 = arith.constant 0 : index
    %145 = vector.load %arg10[%c24, %c0_43] : memref<128x512xf32, #tpu.memory_space<vmem>>, vector<8x512xf32>
    %cst_44 = arith.constant dense<0.000000e+00> : vector<8x512xf32>
    %146 = tpu.matmul %135, %13, %cst_44 {dimension_numbers = #tpu.dot_dimension_numbers<[1], [0], [0], [1], [0, 0, 1, 1], [], []>} : vector<8x128xf32>, vector<128x512xf32>, vector<8x512xf32> -> vector<8x512xf32>
    %147 = arith.addf %145, %146 : vector<8x512xf32>
    %148 = vector.extract_strided_slice %147 {offsets = [0, 0], sizes = [8, 128], strides = [1, 1]} : vector<8x512xf32> to vector<8x128xf32>
    %149 = arith.negf %148 : vector<8x128xf32>
    %150 = math.exp %149 : vector<8x128xf32>
    %cst_45 = arith.constant 1.000000e+00 : f32
    %151 = vector.broadcast %cst_45 : f32 to vector<8x128xf32>
    %152 = arith.addf %151, %150 : vector<8x128xf32>
    %153 = arith.divf %151, %152 : vector<8x128xf32>
    %154 = vector.extract_strided_slice %147 {offsets = [0, 128], sizes = [8, 128], strides = [1, 1]} : vector<8x512xf32> to vector<8x128xf32>
    %155 = arith.negf %154 : vector<8x128xf32>
    %156 = math.exp %155 : vector<8x128xf32>
    %cst_46 = arith.constant 1.000000e+00 : f32
    %157 = vector.broadcast %cst_46 : f32 to vector<8x128xf32>
    %158 = arith.addf %157, %156 : vector<8x128xf32>
    %159 = arith.divf %157, %158 : vector<8x128xf32>
    %160 = vector.extract_strided_slice %147 {offsets = [0, 256], sizes = [8, 128], strides = [1, 1]} : vector<8x512xf32> to vector<8x128xf32>
    %161 = math.tanh %160 : vector<8x128xf32>
    %162 = vector.extract_strided_slice %147 {offsets = [0, 384], sizes = [8, 128], strides = [1, 1]} : vector<8x512xf32> to vector<8x128xf32>
    %163 = arith.negf %162 : vector<8x128xf32>
    %164 = math.exp %163 : vector<8x128xf32>
    %cst_47 = arith.constant 1.000000e+00 : f32
    %165 = vector.broadcast %cst_47 : f32 to vector<8x128xf32>
    %166 = arith.addf %165, %164 : vector<8x128xf32>
    %167 = arith.divf %165, %166 : vector<8x128xf32>
    %168 = arith.mulf %159, %138 : vector<8x128xf32>
    %169 = arith.mulf %153, %161 : vector<8x128xf32>
    %170 = arith.addf %168, %169 : vector<8x128xf32>
    %171 = math.tanh %170 : vector<8x128xf32>
    %172 = arith.mulf %167, %171 : vector<8x128xf32>
    %c3_i32 = arith.constant 3 : i32
    %173 = arith.addi %4, %c3_i32 : i32
    %174 = vector.broadcast %173 : i32 to vector<8x1xi32>
    %175 = arith.cmpi sgt, %3, %174 : vector<8x1xi32>
    %176 = vector.shape_cast %175 : vector<8x1xi1> to vector<8x1xi1>
    %177 = vector.broadcast %176 : vector<8x1xi1> to vector<8x128xi1>
    %178 = arith.select %177, %172, %135 : vector<8x128xi1>, vector<8x128xf32>
    %179 = vector.shape_cast %175 : vector<8x1xi1> to vector<8x1xi1>
    %180 = vector.broadcast %179 : vector<8x1xi1> to vector<8x128xi1>
    %181 = arith.select %180, %170, %138 : vector<8x128xi1>, vector<8x128xf32>
    %cst_48 = arith.constant 0.000000e+00 : f32
    %182 = vector.shape_cast %175 : vector<8x1xi1> to vector<8x1xi1>
    %183 = vector.broadcast %182 : vector<8x1xi1> to vector<8x128xi1>
    %184 = vector.broadcast %cst_48 : f32 to vector<8x128xf32>
    %185 = arith.select %183, %172, %184 : vector<8x128xi1>, vector<8x128xf32>
    %186 = arith.truncf %185 : vector<8x128xf32> to vector<8x128xbf16>
    %c24_49 = arith.constant 24 : index
    %c0_50 = arith.constant 0 : index
    %187 = vector.load %arg11[%c24_49, %c0_50] : memref<128x128xbf16, #tpu.memory_space<vmem>>, vector<8x128xbf16>
    tpu.vector_store %arg11[%c24_49, %c0_50], %186 {strides = array<i32>} : memref<128x128xbf16, #tpu.memory_space<vmem>>, vector<8x128xbf16>,
    %c32 = arith.constant 32 : index
    %c0_51 = arith.constant 0 : index
    %188 = vector.load %arg10[%c32, %c0_51] : memref<128x512xf32, #tpu.memory_space<vmem>>, vector<8x512xf32>
    %cst_52 = arith.constant dense<0.000000e+00> : vector<8x512xf32>
    %189 = tpu.matmul %178, %13, %cst_52 {dimension_numbers = #tpu.dot_dimension_numbers<[1], [0], [0], [1], [0, 0, 1, 1], [], []>} : vector<8x128xf32>, vector<128x512xf32>, vector<8x512xf32> -> vector<8x512xf32>
    %190 = arith.addf %188, %189 : vector<8x512xf32>
    %191 = vector.extract_strided_slice %190 {offsets = [0, 0], sizes = [8, 128], strides = [1, 1]} : vector<8x512xf32> to vector<8x128xf32>
    %192 = arith.negf %191 : vector<8x128xf32>
    %193 = math.exp %192 : vector<8x128xf32>
    %cst_53 = arith.constant 1.000000e+00 : f32
    %194 = vector.broadcast %cst_53 : f32 to vector<8x128xf32>
    %195 = arith.addf %194, %193 : vector<8x128xf32>
    %196 = arith.divf %194, %195 : vector<8x128xf32>
    %197 = vector.extract_strided_slice %190 {offsets = [0, 128], sizes = [8, 128], strides = [1, 1]} : vector<8x512xf32> to vector<8x128xf32>
    %198 = arith.negf %197 : vector<8x128xf32>
    %199 = math.exp %198 : vector<8x128xf32>
    %cst_54 = arith.constant 1.000000e+00 : f32
    %200 = vector.broadcast %cst_54 : f32 to vector<8x128xf32>
    %201 = arith.addf %200, %199 : vector<8x128xf32>
    %202 = arith.divf %200, %201 : vector<8x128xf32>
    %203 = vector.extract_strided_slice %190 {offsets = [0, 256], sizes = [8, 128], strides = [1, 1]} : vector<8x512xf32> to vector<8x128xf32>
    %204 = math.tanh %203 : vector<8x128xf32>
    %205 = vector.extract_strided_slice %190 {offsets = [0, 384], sizes = [8, 128], strides = [1, 1]} : vector<8x512xf32> to vector<8x128xf32>
    %206 = arith.negf %205 : vector<8x128xf32>
    %207 = math.exp %206 : vector<8x128xf32>
    %cst_55 = arith.constant 1.000000e+00 : f32
    %208 = vector.broadcast %cst_55 : f32 to vector<8x128xf32>
    %209 = arith.addf %208, %207 : vector<8x128xf32>
    %210 = arith.divf %208, %209 : vector<8x128xf32>
    %211 = arith.mulf %202, %181 : vector<8x128xf32>
    %212 = arith.mulf %196, %204 : vector<8x128xf32>
    %213 = arith.addf %211, %212 : vector<8x128xf32>
    %214 = math.tanh %213 : vector<8x128xf32>
    %215 = arith.mulf %210, %214 : vector<8x128xf32>
    %c4_i32 = arith.constant 4 : i32
    %216 = arith.addi %4, %c4_i32 : i32
    %217 = vector.broadcast %216 : i32 to vector<8x1xi32>
    %218 = arith.cmpi sgt, %3, %217 : vector<8x1xi32>
    %219 = vector.shape_cast %218 : vector<8x1xi1> to vector<8x1xi1>
    %220 = vector.broadcast %219 : vector<8x1xi1> to vector<8x128xi1>
    %221 = arith.select %220, %215, %178 : vector<8x128xi1>, vector<8x128xf32>
    %222 = vector.shape_cast %218 : vector<8x1xi1> to vector<8x1xi1>
    %223 = vector.broadcast %222 : vector<8x1xi1> to vector<8x128xi1>
    %224 = arith.select %223, %213, %181 : vector<8x128xi1>, vector<8x128xf32>
    %cst_56 = arith.constant 0.000000e+00 : f32
    %225 = vector.shape_cast %218 : vector<8x1xi1> to vector<8x1xi1>
    %226 = vector.broadcast %225 : vector<8x1xi1> to vector<8x128xi1>
    %227 = vector.broadcast %cst_56 : f32 to vector<8x128xf32>
    %228 = arith.select %226, %215, %227 : vector<8x128xi1>, vector<8x128xf32>
    %229 = arith.truncf %228 : vector<8x128xf32> to vector<8x128xbf16>
    %c32_57 = arith.constant 32 : index
    %c0_58 = arith.constant 0 : index
    %230 = vector.load %arg11[%c32_57, %c0_58] : memref<128x128xbf16, #tpu.memory_space<vmem>>, vector<8x128xbf16>
    tpu.vector_store %arg11[%c32_57, %c0_58], %229 {strides = array<i32>} : memref<128x128xbf16, #tpu.memory_space<vmem>>, vector<8x128xbf16>,
    %c40 = arith.constant 40 : index
    %c0_59 = arith.constant 0 : index
    %231 = vector.load %arg10[%c40, %c0_59] : memref<128x512xf32, #tpu.memory_space<vmem>>, vector<8x512xf32>
    %cst_60 = arith.constant dense<0.000000e+00> : vector<8x512xf32>
    %232 = tpu.matmul %221, %13, %cst_60 {dimension_numbers = #tpu.dot_dimension_numbers<[1], [0], [0], [1], [0, 0, 1, 1], [], []>} : vector<8x128xf32>, vector<128x512xf32>, vector<8x512xf32> -> vector<8x512xf32>
    %233 = arith.addf %231, %232 : vector<8x512xf32>
    %234 = vector.extract_strided_slice %233 {offsets = [0, 0], sizes = [8, 128], strides = [1, 1]} : vector<8x512xf32> to vector<8x128xf32>
    %235 = arith.negf %234 : vector<8x128xf32>
    %236 = math.exp %235 : vector<8x128xf32>
    %cst_61 = arith.constant 1.000000e+00 : f32
    %237 = vector.broadcast %cst_61 : f32 to vector<8x128xf32>
    %238 = arith.addf %237, %236 : vector<8x128xf32>
    %239 = arith.divf %237, %238 : vector<8x128xf32>
    %240 = vector.extract_strided_slice %233 {offsets = [0, 128], sizes = [8, 128], strides = [1, 1]} : vector<8x512xf32> to vector<8x128xf32>
    %241 = arith.negf %240 : vector<8x128xf32>
    %242 = math.exp %241 : vector<8x128xf32>
    %cst_62 = arith.constant 1.000000e+00 : f32
    %243 = vector.broadcast %cst_62 : f32 to vector<8x128xf32>
    %244 = arith.addf %243, %242 : vector<8x128xf32>
    %245 = arith.divf %243, %244 : vector<8x128xf32>
    %246 = vector.extract_strided_slice %233 {offsets = [0, 256], sizes = [8, 128], strides = [1, 1]} : vector<8x512xf32> to vector<8x128xf32>
    %247 = math.tanh %246 : vector<8x128xf32>
    %248 = vector.extract_strided_slice %233 {offsets = [0, 384], sizes = [8, 128], strides = [1, 1]} : vector<8x512xf32> to vector<8x128xf32>
    %249 = arith.negf %248 : vector<8x128xf32>
    %250 = math.exp %249 : vector<8x128xf32>
    %cst_63 = arith.constant 1.000000e+00 : f32
    %251 = vector.broadcast %cst_63 : f32 to vector<8x128xf32>
    %252 = arith.addf %251, %250 : vector<8x128xf32>
    %253 = arith.divf %251, %252 : vector<8x128xf32>
    %254 = arith.mulf %245, %224 : vector<8x128xf32>
    %255 = arith.mulf %239, %247 : vector<8x128xf32>
    %256 = arith.addf %254, %255 : vector<8x128xf32>
    %257 = math.tanh %256 : vector<8x128xf32>
    %258 = arith.mulf %253, %257 : vector<8x128xf32>
    %c5_i32 = arith.constant 5 : i32
    %259 = arith.addi %4, %c5_i32 : i32
    %260 = vector.broadcast %259 : i32 to vector<8x1xi32>
    %261 = arith.cmpi sgt, %3, %260 : vector<8x1xi32>
    %262 = vector.shape_cast %261 : vector<8x1xi1> to vector<8x1xi1>
    %263 = vector.broadcast %262 : vector<8x1xi1> to vector<8x128xi1>
    %264 = arith.select %263, %258, %221 : vector<8x128xi1>, vector<8x128xf32>
    %265 = vector.shape_cast %261 : vector<8x1xi1> to vector<8x1xi1>
    %266 = vector.broadcast %265 : vector<8x1xi1> to vector<8x128xi1>
    %267 = arith.select %266, %256, %224 : vector<8x128xi1>, vector<8x128xf32>
    %cst_64 = arith.constant 0.000000e+00 : f32
    %268 = vector.shape_cast %261 : vector<8x1xi1> to vector<8x1xi1>
    %269 = vector.broadcast %268 : vector<8x1xi1> to vector<8x128xi1>
    %270 = vector.broadcast %cst_64 : f32 to vector<8x128xf32>
    %271 = arith.select %269, %258, %270 : vector<8x128xi1>, vector<8x128xf32>
    %272 = arith.truncf %271 : vector<8x128xf32> to vector<8x128xbf16>
    %c40_65 = arith.constant 40 : index
    %c0_66 = arith.constant 0 : index
    %273 = vector.load %arg11[%c40_65, %c0_66] : memref<128x128xbf16, #tpu.memory_space<vmem>>, vector<8x128xbf16>
    tpu.vector_store %arg11[%c40_65, %c0_66], %272 {strides = array<i32>} : memref<128x128xbf16, #tpu.memory_space<vmem>>, vector<8x128xbf16>,
    %c48 = arith.constant 48 : index
    %c0_67 = arith.constant 0 : index
    %274 = vector.load %arg10[%c48, %c0_67] : memref<128x512xf32, #tpu.memory_space<vmem>>, vector<8x512xf32>
    %cst_68 = arith.constant dense<0.000000e+00> : vector<8x512xf32>
    %275 = tpu.matmul %264, %13, %cst_68 {dimension_numbers = #tpu.dot_dimension_numbers<[1], [0], [0], [1], [0, 0, 1, 1], [], []>} : vector<8x128xf32>, vector<128x512xf32>, vector<8x512xf32> -> vector<8x512xf32>
    %276 = arith.addf %274, %275 : vector<8x512xf32>
    %277 = vector.extract_strided_slice %276 {offsets = [0, 0], sizes = [8, 128], strides = [1, 1]} : vector<8x512xf32> to vector<8x128xf32>
    %278 = arith.negf %277 : vector<8x128xf32>
    %279 = math.exp %278 : vector<8x128xf32>
    %cst_69 = arith.constant 1.000000e+00 : f32
    %280 = vector.broadcast %cst_69 : f32 to vector<8x128xf32>
    %281 = arith.addf %280, %279 : vector<8x128xf32>
    %282 = arith.divf %280, %281 : vector<8x128xf32>
    %283 = vector.extract_strided_slice %276 {offsets = [0, 128], sizes = [8, 128], strides = [1, 1]} : vector<8x512xf32> to vector<8x128xf32>
    %284 = arith.negf %283 : vector<8x128xf32>
    %285 = math.exp %284 : vector<8x128xf32>
    %cst_70 = arith.constant 1.000000e+00 : f32
    %286 = vector.broadcast %cst_70 : f32 to vector<8x128xf32>
    %287 = arith.addf %286, %285 : vector<8x128xf32>
    %288 = arith.divf %286, %287 : vector<8x128xf32>
    %289 = vector.extract_strided_slice %276 {offsets = [0, 256], sizes = [8, 128], strides = [1, 1]} : vector<8x512xf32> to vector<8x128xf32>
    %290 = math.tanh %289 : vector<8x128xf32>
    %291 = vector.extract_strided_slice %276 {offsets = [0, 384], sizes = [8, 128], strides = [1, 1]} : vector<8x512xf32> to vector<8x128xf32>
    %292 = arith.negf %291 : vector<8x128xf32>
    %293 = math.exp %292 : vector<8x128xf32>
    %cst_71 = arith.constant 1.000000e+00 : f32
    %294 = vector.broadcast %cst_71 : f32 to vector<8x128xf32>
    %295 = arith.addf %294, %293 : vector<8x128xf32>
    %296 = arith.divf %294, %295 : vector<8x128xf32>
    %297 = arith.mulf %288, %267 : vector<8x128xf32>
    %298 = arith.mulf %282, %290 : vector<8x128xf32>
    %299 = arith.addf %297, %298 : vector<8x128xf32>
    %300 = math.tanh %299 : vector<8x128xf32>
    %301 = arith.mulf %296, %300 : vector<8x128xf32>
    %c6_i32 = arith.constant 6 : i32
    %302 = arith.addi %4, %c6_i32 : i32
    %303 = vector.broadcast %302 : i32 to vector<8x1xi32>
    %304 = arith.cmpi sgt, %3, %303 : vector<8x1xi32>
    %305 = vector.shape_cast %304 : vector<8x1xi1> to vector<8x1xi1>
    %306 = vector.broadcast %305 : vector<8x1xi1> to vector<8x128xi1>
    %307 = arith.select %306, %301, %264 : vector<8x128xi1>, vector<8x128xf32>
    %308 = vector.shape_cast %304 : vector<8x1xi1> to vector<8x1xi1>
    %309 = vector.broadcast %308 : vector<8x1xi1> to vector<8x128xi1>
    %310 = arith.select %309, %299, %267 : vector<8x128xi1>, vector<8x128xf32>
    %cst_72 = arith.constant 0.000000e+00 : f32
    %311 = vector.shape_cast %304 : vector<8x1xi1> to vector<8x1xi1>
    %312 = vector.broadcast %311 : vector<8x1xi1> to vector<8x128xi1>
    %313 = vector.broadcast %cst_72 : f32 to vector<8x128xf32>
    %314 = arith.select %312, %301, %313 : vector<8x128xi1>, vector<8x128xf32>
    %315 = arith.truncf %314 : vector<8x128xf32> to vector<8x128xbf16>
    %c48_73 = arith.constant 48 : index
    %c0_74 = arith.constant 0 : index
    %316 = vector.load %arg11[%c48_73, %c0_74] : memref<128x128xbf16, #tpu.memory_space<vmem>>, vector<8x128xbf16>
    tpu.vector_store %arg11[%c48_73, %c0_74], %315 {strides = array<i32>} : memref<128x128xbf16, #tpu.memory_space<vmem>>, vector<8x128xbf16>,
    %c56 = arith.constant 56 : index
    %c0_75 = arith.constant 0 : index
    %317 = vector.load %arg10[%c56, %c0_75] : memref<128x512xf32, #tpu.memory_space<vmem>>, vector<8x512xf32>
    %cst_76 = arith.constant dense<0.000000e+00> : vector<8x512xf32>
    %318 = tpu.matmul %307, %13, %cst_76 {dimension_numbers = #tpu.dot_dimension_numbers<[1], [0], [0], [1], [0, 0, 1, 1], [], []>} : vector<8x128xf32>, vector<128x512xf32>, vector<8x512xf32> -> vector<8x512xf32>
    %319 = arith.addf %317, %318 : vector<8x512xf32>
    %320 = vector.extract_strided_slice %319 {offsets = [0, 0], sizes = [8, 128], strides = [1, 1]} : vector<8x512xf32> to vector<8x128xf32>
    %321 = arith.negf %320 : vector<8x128xf32>
    %322 = math.exp %321 : vector<8x128xf32>
    %cst_77 = arith.constant 1.000000e+00 : f32
    %323 = vector.broadcast %cst_77 : f32 to vector<8x128xf32>
    %324 = arith.addf %323, %322 : vector<8x128xf32>
    %325 = arith.divf %323, %324 : vector<8x128xf32>
    %326 = vector.extract_strided_slice %319 {offsets = [0, 128], sizes = [8, 128], strides = [1, 1]} : vector<8x512xf32> to vector<8x128xf32>
    %327 = arith.negf %326 : vector<8x128xf32>
    %328 = math.exp %327 : vector<8x128xf32>
    %cst_78 = arith.constant 1.000000e+00 : f32
    %329 = vector.broadcast %cst_78 : f32 to vector<8x128xf32>
    %330 = arith.addf %329, %328 : vector<8x128xf32>
    %331 = arith.divf %329, %330 : vector<8x128xf32>
    %332 = vector.extract_strided_slice %319 {offsets = [0, 256], sizes = [8, 128], strides = [1, 1]} : vector<8x512xf32> to vector<8x128xf32>
    %333 = math.tanh %332 : vector<8x128xf32>
    %334 = vector.extract_strided_slice %319 {offsets = [0, 384], sizes = [8, 128], strides = [1, 1]} : vector<8x512xf32> to vector<8x128xf32>
    %335 = arith.negf %334 : vector<8x128xf32>
    %336 = math.exp %335 : vector<8x128xf32>
    %cst_79 = arith.constant 1.000000e+00 : f32
    %337 = vector.broadcast %cst_79 : f32 to vector<8x128xf32>
    %338 = arith.addf %337, %336 : vector<8x128xf32>
    %339 = arith.divf %337, %338 : vector<8x128xf32>
    %340 = arith.mulf %331, %310 : vector<8x128xf32>
    %341 = arith.mulf %325, %333 : vector<8x128xf32>
    %342 = arith.addf %340, %341 : vector<8x128xf32>
    %343 = math.tanh %342 : vector<8x128xf32>
    %344 = arith.mulf %339, %343 : vector<8x128xf32>
    %c7_i32 = arith.constant 7 : i32
    %345 = arith.addi %4, %c7_i32 : i32
    %346 = vector.broadcast %345 : i32 to vector<8x1xi32>
    %347 = arith.cmpi sgt, %3, %346 : vector<8x1xi32>
    %348 = vector.shape_cast %347 : vector<8x1xi1> to vector<8x1xi1>
    %349 = vector.broadcast %348 : vector<8x1xi1> to vector<8x128xi1>
    %350 = arith.select %349, %344, %307 : vector<8x128xi1>, vector<8x128xf32>
    %351 = vector.shape_cast %347 : vector<8x1xi1> to vector<8x1xi1>
    %352 = vector.broadcast %351 : vector<8x1xi1> to vector<8x128xi1>
    %353 = arith.select %352, %342, %310 : vector<8x128xi1>, vector<8x128xf32>
    %cst_80 = arith.constant 0.000000e+00 : f32
    %354 = vector.shape_cast %347 : vector<8x1xi1> to vector<8x1xi1>
    %355 = vector.broadcast %354 : vector<8x1xi1> to vector<8x128xi1>
    %356 = vector.broadcast %cst_80 : f32 to vector<8x128xf32>
    %357 = arith.select %355, %344, %356 : vector<8x128xi1>, vector<8x128xf32>
    %358 = arith.truncf %357 : vector<8x128xf32> to vector<8x128xbf16>
    %c56_81 = arith.constant 56 : index
    %c0_82 = arith.constant 0 : index
    %359 = vector.load %arg11[%c56_81, %c0_82] : memref<128x128xbf16, #tpu.memory_space<vmem>>, vector<8x128xbf16>
    tpu.vector_store %arg11[%c56_81, %c0_82], %358 {strides = array<i32>} : memref<128x128xbf16, #tpu.memory_space<vmem>>, vector<8x128xbf16>,
    %c64 = arith.constant 64 : index
    %c0_83 = arith.constant 0 : index
    %360 = vector.load %arg10[%c64, %c0_83] : memref<128x512xf32, #tpu.memory_space<vmem>>, vector<8x512xf32>
    %cst_84 = arith.constant dense<0.000000e+00> : vector<8x512xf32>
    %361 = tpu.matmul %350, %13, %cst_84 {dimension_numbers = #tpu.dot_dimension_numbers<[1], [0], [0], [1], [0, 0, 1, 1], [], []>} : vector<8x128xf32>, vector<128x512xf32>, vector<8x512xf32> -> vector<8x512xf32>
    %362 = arith.addf %360, %361 : vector<8x512xf32>
    %363 = vector.extract_strided_slice %362 {offsets = [0, 0], sizes = [8, 128], strides = [1, 1]} : vector<8x512xf32> to vector<8x128xf32>
    %364 = arith.negf %363 : vector<8x128xf32>
    %365 = math.exp %364 : vector<8x128xf32>
    %cst_85 = arith.constant 1.000000e+00 : f32
    %366 = vector.broadcast %cst_85 : f32 to vector<8x128xf32>
    %367 = arith.addf %366, %365 : vector<8x128xf32>
    %368 = arith.divf %366, %367 : vector<8x128xf32>
    %369 = vector.extract_strided_slice %362 {offsets = [0, 128], sizes = [8, 128], strides = [1, 1]} : vector<8x512xf32> to vector<8x128xf32>
    %370 = arith.negf %369 : vector<8x128xf32>
    %371 = math.exp %370 : vector<8x128xf32>
    %cst_86 = arith.constant 1.000000e+00 : f32
    %372 = vector.broadcast %cst_86 : f32 to vector<8x128xf32>
    %373 = arith.addf %372, %371 : vector<8x128xf32>
    %374 = arith.divf %372, %373 : vector<8x128xf32>
    %375 = vector.extract_strided_slice %362 {offsets = [0, 256], sizes = [8, 128], strides = [1, 1]} : vector<8x512xf32> to vector<8x128xf32>
    %376 = math.tanh %375 : vector<8x128xf32>
    %377 = vector.extract_strided_slice %362 {offsets = [0, 384], sizes = [8, 128], strides = [1, 1]} : vector<8x512xf32> to vector<8x128xf32>
    %378 = arith.negf %377 : vector<8x128xf32>
    %379 = math.exp %378 : vector<8x128xf32>
    %cst_87 = arith.constant 1.000000e+00 : f32
    %380 = vector.broadcast %cst_87 : f32 to vector<8x128xf32>
    %381 = arith.addf %380, %379 : vector<8x128xf32>
    %382 = arith.divf %380, %381 : vector<8x128xf32>
    %383 = arith.mulf %374, %353 : vector<8x128xf32>
    %384 = arith.mulf %368, %376 : vector<8x128xf32>
    %385 = arith.addf %383, %384 : vector<8x128xf32>
    %386 = math.tanh %385 : vector<8x128xf32>
    %387 = arith.mulf %382, %386 : vector<8x128xf32>
    %c8_i32 = arith.constant 8 : i32
    %388 = arith.addi %4, %c8_i32 : i32
    %389 = vector.broadcast %388 : i32 to vector<8x1xi32>
    %390 = arith.cmpi sgt, %3, %389 : vector<8x1xi32>
    %391 = vector.shape_cast %390 : vector<8x1xi1> to vector<8x1xi1>
    %392 = vector.broadcast %391 : vector<8x1xi1> to vector<8x128xi1>
    %393 = arith.select %392, %387, %350 : vector<8x128xi1>, vector<8x128xf32>
    %394 = vector.shape_cast %390 : vector<8x1xi1> to vector<8x1xi1>
    %395 = vector.broadcast %394 : vector<8x1xi1> to vector<8x128xi1>
    %396 = arith.select %395, %385, %353 : vector<8x128xi1>, vector<8x128xf32>
    %cst_88 = arith.constant 0.000000e+00 : f32
    %397 = vector.shape_cast %390 : vector<8x1xi1> to vector<8x1xi1>
    %398 = vector.broadcast %397 : vector<8x1xi1> to vector<8x128xi1>
    %399 = vector.broadcast %cst_88 : f32 to vector<8x128xf32>
    %400 = arith.select %398, %387, %399 : vector<8x128xi1>, vector<8x128xf32>
    %401 = arith.truncf %400 : vector<8x128xf32> to vector<8x128xbf16>
    %c64_89 = arith.constant 64 : index
    %c0_90 = arith.constant 0 : index
    %402 = vector.load %arg11[%c64_89, %c0_90] : memref<128x128xbf16, #tpu.memory_space<vmem>>, vector<8x128xbf16>
    tpu.vector_store %arg11[%c64_89, %c0_90], %401 {strides = array<i32>} : memref<128x128xbf16, #tpu.memory_space<vmem>>, vector<8x128xbf16>,
    %c72 = arith.constant 72 : index
    %c0_91 = arith.constant 0 : index
    %403 = vector.load %arg10[%c72, %c0_91] : memref<128x512xf32, #tpu.memory_space<vmem>>, vector<8x512xf32>
    %cst_92 = arith.constant dense<0.000000e+00> : vector<8x512xf32>
    %404 = tpu.matmul %393, %13, %cst_92 {dimension_numbers = #tpu.dot_dimension_numbers<[1], [0], [0], [1], [0, 0, 1, 1], [], []>} : vector<8x128xf32>, vector<128x512xf32>, vector<8x512xf32> -> vector<8x512xf32>
    %405 = arith.addf %403, %404 : vector<8x512xf32>
    %406 = vector.extract_strided_slice %405 {offsets = [0, 0], sizes = [8, 128], strides = [1, 1]} : vector<8x512xf32> to vector<8x128xf32>
    %407 = arith.negf %406 : vector<8x128xf32>
    %408 = math.exp %407 : vector<8x128xf32>
    %cst_93 = arith.constant 1.000000e+00 : f32
    %409 = vector.broadcast %cst_93 : f32 to vector<8x128xf32>
    %410 = arith.addf %409, %408 : vector<8x128xf32>
    %411 = arith.divf %409, %410 : vector<8x128xf32>
    %412 = vector.extract_strided_slice %405 {offsets = [0, 128], sizes = [8, 128], strides = [1, 1]} : vector<8x512xf32> to vector<8x128xf32>
    %413 = arith.negf %412 : vector<8x128xf32>
    %414 = math.exp %413 : vector<8x128xf32>
    %cst_94 = arith.constant 1.000000e+00 : f32
    %415 = vector.broadcast %cst_94 : f32 to vector<8x128xf32>
    %416 = arith.addf %415, %414 : vector<8x128xf32>
    %417 = arith.divf %415, %416 : vector<8x128xf32>
    %418 = vector.extract_strided_slice %405 {offsets = [0, 256], sizes = [8, 128], strides = [1, 1]} : vector<8x512xf32> to vector<8x128xf32>
    %419 = math.tanh %418 : vector<8x128xf32>
    %420 = vector.extract_strided_slice %405 {offsets = [0, 384], sizes = [8, 128], strides = [1, 1]} : vector<8x512xf32> to vector<8x128xf32>
    %421 = arith.negf %420 : vector<8x128xf32>
    %422 = math.exp %421 : vector<8x128xf32>
    %cst_95 = arith.constant 1.000000e+00 : f32
    %423 = vector.broadcast %cst_95 : f32 to vector<8x128xf32>
    %424 = arith.addf %423, %422 : vector<8x128xf32>
    %425 = arith.divf %423, %424 : vector<8x128xf32>
    %426 = arith.mulf %417, %396 : vector<8x128xf32>
    %427 = arith.mulf %411, %419 : vector<8x128xf32>
    %428 = arith.addf %426, %427 : vector<8x128xf32>
    %429 = math.tanh %428 : vector<8x128xf32>
    %430 = arith.mulf %425, %429 : vector<8x128xf32>
    %c9_i32 = arith.constant 9 : i32
    %431 = arith.addi %4, %c9_i32 : i32
    %432 = vector.broadcast %431 : i32 to vector<8x1xi32>
    %433 = arith.cmpi sgt, %3, %432 : vector<8x1xi32>
    %434 = vector.shape_cast %433 : vector<8x1xi1> to vector<8x1xi1>
    %435 = vector.broadcast %434 : vector<8x1xi1> to vector<8x128xi1>
    %436 = arith.select %435, %430, %393 : vector<8x128xi1>, vector<8x128xf32>
    %437 = vector.shape_cast %433 : vector<8x1xi1> to vector<8x1xi1>
    %438 = vector.broadcast %437 : vector<8x1xi1> to vector<8x128xi1>
    %439 = arith.select %438, %428, %396 : vector<8x128xi1>, vector<8x128xf32>
    %cst_96 = arith.constant 0.000000e+00 : f32
    %440 = vector.shape_cast %433 : vector<8x1xi1> to vector<8x1xi1>
    %441 = vector.broadcast %440 : vector<8x1xi1> to vector<8x128xi1>
    %442 = vector.broadcast %cst_96 : f32 to vector<8x128xf32>
    %443 = arith.select %441, %430, %442 : vector<8x128xi1>, vector<8x128xf32>
    %444 = arith.truncf %443 : vector<8x128xf32> to vector<8x128xbf16>
    %c72_97 = arith.constant 72 : index
    %c0_98 = arith.constant 0 : index
    %445 = vector.load %arg11[%c72_97, %c0_98] : memref<128x128xbf16, #tpu.memory_space<vmem>>, vector<8x128xbf16>
    tpu.vector_store %arg11[%c72_97, %c0_98], %444 {strides = array<i32>} : memref<128x128xbf16, #tpu.memory_space<vmem>>, vector<8x128xbf16>,
    %c80 = arith.constant 80 : index
    %c0_99 = arith.constant 0 : index
    %446 = vector.load %arg10[%c80, %c0_99] : memref<128x512xf32, #tpu.memory_space<vmem>>, vector<8x512xf32>
    %cst_100 = arith.constant dense<0.000000e+00> : vector<8x512xf32>
    %447 = tpu.matmul %436, %13, %cst_100 {dimension_numbers = #tpu.dot_dimension_numbers<[1], [0], [0], [1], [0, 0, 1, 1], [], []>} : vector<8x128xf32>, vector<128x512xf32>, vector<8x512xf32> -> vector<8x512xf32>
    %448 = arith.addf %446, %447 : vector<8x512xf32>
    %449 = vector.extract_strided_slice %448 {offsets = [0, 0], sizes = [8, 128], strides = [1, 1]} : vector<8x512xf32> to vector<8x128xf32>
    %450 = arith.negf %449 : vector<8x128xf32>
    %451 = math.exp %450 : vector<8x128xf32>
    %cst_101 = arith.constant 1.000000e+00 : f32
    %452 = vector.broadcast %cst_101 : f32 to vector<8x128xf32>
    %453 = arith.addf %452, %451 : vector<8x128xf32>
    %454 = arith.divf %452, %453 : vector<8x128xf32>
    %455 = vector.extract_strided_slice %448 {offsets = [0, 128], sizes = [8, 128], strides = [1, 1]} : vector<8x512xf32> to vector<8x128xf32>
    %456 = arith.negf %455 : vector<8x128xf32>
    %457 = math.exp %456 : vector<8x128xf32>
    %cst_102 = arith.constant 1.000000e+00 : f32
    %458 = vector.broadcast %cst_102 : f32 to vector<8x128xf32>
    %459 = arith.addf %458, %457 : vector<8x128xf32>
    %460 = arith.divf %458, %459 : vector<8x128xf32>
    %461 = vector.extract_strided_slice %448 {offsets = [0, 256], sizes = [8, 128], strides = [1, 1]} : vector<8x512xf32> to vector<8x128xf32>
    %462 = math.tanh %461 : vector<8x128xf32>
    %463 = vector.extract_strided_slice %448 {offsets = [0, 384], sizes = [8, 128], strides = [1, 1]} : vector<8x512xf32> to vector<8x128xf32>
    %464 = arith.negf %463 : vector<8x128xf32>
    %465 = math.exp %464 : vector<8x128xf32>
    %cst_103 = arith.constant 1.000000e+00 : f32
    %466 = vector.broadcast %cst_103 : f32 to vector<8x128xf32>
    %467 = arith.addf %466, %465 : vector<8x128xf32>
    %468 = arith.divf %466, %467 : vector<8x128xf32>
    %469 = arith.mulf %460, %439 : vector<8x128xf32>
    %470 = arith.mulf %454, %462 : vector<8x128xf32>
    %471 = arith.addf %469, %470 : vector<8x128xf32>
    %472 = math.tanh %471 : vector<8x128xf32>
    %473 = arith.mulf %468, %472 : vector<8x128xf32>
    %c10_i32 = arith.constant 10 : i32
    %474 = arith.addi %4, %c10_i32 : i32
    %475 = vector.broadcast %474 : i32 to vector<8x1xi32>
    %476 = arith.cmpi sgt, %3, %475 : vector<8x1xi32>
    %477 = vector.shape_cast %476 : vector<8x1xi1> to vector<8x1xi1>
    %478 = vector.broadcast %477 : vector<8x1xi1> to vector<8x128xi1>
    %479 = arith.select %478, %473, %436 : vector<8x128xi1>, vector<8x128xf32>
    %480 = vector.shape_cast %476 : vector<8x1xi1> to vector<8x1xi1>
    %481 = vector.broadcast %480 : vector<8x1xi1> to vector<8x128xi1>
    %482 = arith.select %481, %471, %439 : vector<8x128xi1>, vector<8x128xf32>
    %cst_104 = arith.constant 0.000000e+00 : f32
    %483 = vector.shape_cast %476 : vector<8x1xi1> to vector<8x1xi1>
    %484 = vector.broadcast %483 : vector<8x1xi1> to vector<8x128xi1>
    %485 = vector.broadcast %cst_104 : f32 to vector<8x128xf32>
    %486 = arith.select %484, %473, %485 : vector<8x128xi1>, vector<8x128xf32>
    %487 = arith.truncf %486 : vector<8x128xf32> to vector<8x128xbf16>
    %c80_105 = arith.constant 80 : index
    %c0_106 = arith.constant 0 : index
    %488 = vector.load %arg11[%c80_105, %c0_106] : memref<128x128xbf16, #tpu.memory_space<vmem>>, vector<8x128xbf16>
    tpu.vector_store %arg11[%c80_105, %c0_106], %487 {strides = array<i32>} : memref<128x128xbf16, #tpu.memory_space<vmem>>, vector<8x128xbf16>,
    %c88 = arith.constant 88 : index
    %c0_107 = arith.constant 0 : index
    %489 = vector.load %arg10[%c88, %c0_107] : memref<128x512xf32, #tpu.memory_space<vmem>>, vector<8x512xf32>
    %cst_108 = arith.constant dense<0.000000e+00> : vector<8x512xf32>
    %490 = tpu.matmul %479, %13, %cst_108 {dimension_numbers = #tpu.dot_dimension_numbers<[1], [0], [0], [1], [0, 0, 1, 1], [], []>} : vector<8x128xf32>, vector<128x512xf32>, vector<8x512xf32> -> vector<8x512xf32>
    %491 = arith.addf %489, %490 : vector<8x512xf32>
    %492 = vector.extract_strided_slice %491 {offsets = [0, 0], sizes = [8, 128], strides = [1, 1]} : vector<8x512xf32> to vector<8x128xf32>
    %493 = arith.negf %492 : vector<8x128xf32>
    %494 = math.exp %493 : vector<8x128xf32>
    %cst_109 = arith.constant 1.000000e+00 : f32
    %495 = vector.broadcast %cst_109 : f32 to vector<8x128xf32>
    %496 = arith.addf %495, %494 : vector<8x128xf32>
    %497 = arith.divf %495, %496 : vector<8x128xf32>
    %498 = vector.extract_strided_slice %491 {offsets = [0, 128], sizes = [8, 128], strides = [1, 1]} : vector<8x512xf32> to vector<8x128xf32>
    %499 = arith.negf %498 : vector<8x128xf32>
    %500 = math.exp %499 : vector<8x128xf32>
    %cst_110 = arith.constant 1.000000e+00 : f32
    %501 = vector.broadcast %cst_110 : f32 to vector<8x128xf32>
    %502 = arith.addf %501, %500 : vector<8x128xf32>
    %503 = arith.divf %501, %502 : vector<8x128xf32>
    %504 = vector.extract_strided_slice %491 {offsets = [0, 256], sizes = [8, 128], strides = [1, 1]} : vector<8x512xf32> to vector<8x128xf32>
    %505 = math.tanh %504 : vector<8x128xf32>
    %506 = vector.extract_strided_slice %491 {offsets = [0, 384], sizes = [8, 128], strides = [1, 1]} : vector<8x512xf32> to vector<8x128xf32>
    %507 = arith.negf %506 : vector<8x128xf32>
    %508 = math.exp %507 : vector<8x128xf32>
    %cst_111 = arith.constant 1.000000e+00 : f32
    %509 = vector.broadcast %cst_111 : f32 to vector<8x128xf32>
    %510 = arith.addf %509, %508 : vector<8x128xf32>
    %511 = arith.divf %509, %510 : vector<8x128xf32>
    %512 = arith.mulf %503, %482 : vector<8x128xf32>
    %513 = arith.mulf %497, %505 : vector<8x128xf32>
    %514 = arith.addf %512, %513 : vector<8x128xf32>
    %515 = math.tanh %514 : vector<8x128xf32>
    %516 = arith.mulf %511, %515 : vector<8x128xf32>
    %c11_i32 = arith.constant 11 : i32
    %517 = arith.addi %4, %c11_i32 : i32
    %518 = vector.broadcast %517 : i32 to vector<8x1xi32>
    %519 = arith.cmpi sgt, %3, %518 : vector<8x1xi32>
    %520 = vector.shape_cast %519 : vector<8x1xi1> to vector<8x1xi1>
    %521 = vector.broadcast %520 : vector<8x1xi1> to vector<8x128xi1>
    %522 = arith.select %521, %516, %479 : vector<8x128xi1>, vector<8x128xf32>
    %523 = vector.shape_cast %519 : vector<8x1xi1> to vector<8x1xi1>
    %524 = vector.broadcast %523 : vector<8x1xi1> to vector<8x128xi1>
    %525 = arith.select %524, %514, %482 : vector<8x128xi1>, vector<8x128xf32>
    %cst_112 = arith.constant 0.000000e+00 : f32
    %526 = vector.shape_cast %519 : vector<8x1xi1> to vector<8x1xi1>
    %527 = vector.broadcast %526 : vector<8x1xi1> to vector<8x128xi1>
    %528 = vector.broadcast %cst_112 : f32 to vector<8x128xf32>
    %529 = arith.select %527, %516, %528 : vector<8x128xi1>, vector<8x128xf32>
    %530 = arith.truncf %529 : vector<8x128xf32> to vector<8x128xbf16>
    %c88_113 = arith.constant 88 : index
    %c0_114 = arith.constant 0 : index
    %531 = vector.load %arg11[%c88_113, %c0_114] : memref<128x128xbf16, #tpu.memory_space<vmem>>, vector<8x128xbf16>
    tpu.vector_store %arg11[%c88_113, %c0_114], %530 {strides = array<i32>} : memref<128x128xbf16, #tpu.memory_space<vmem>>, vector<8x128xbf16>,
    %c96 = arith.constant 96 : index
    %c0_115 = arith.constant 0 : index
    %532 = vector.load %arg10[%c96, %c0_115] : memref<128x512xf32, #tpu.memory_space<vmem>>, vector<8x512xf32>
    %cst_116 = arith.constant dense<0.000000e+00> : vector<8x512xf32>
    %533 = tpu.matmul %522, %13, %cst_116 {dimension_numbers = #tpu.dot_dimension_numbers<[1], [0], [0], [1], [0, 0, 1, 1], [], []>} : vector<8x128xf32>, vector<128x512xf32>, vector<8x512xf32> -> vector<8x512xf32>
    %534 = arith.addf %532, %533 : vector<8x512xf32>
    %535 = vector.extract_strided_slice %534 {offsets = [0, 0], sizes = [8, 128], strides = [1, 1]} : vector<8x512xf32> to vector<8x128xf32>
    %536 = arith.negf %535 : vector<8x128xf32>
    %537 = math.exp %536 : vector<8x128xf32>
    %cst_117 = arith.constant 1.000000e+00 : f32
    %538 = vector.broadcast %cst_117 : f32 to vector<8x128xf32>
    %539 = arith.addf %538, %537 : vector<8x128xf32>
    %540 = arith.divf %538, %539 : vector<8x128xf32>
    %541 = vector.extract_strided_slice %534 {offsets = [0, 128], sizes = [8, 128], strides = [1, 1]} : vector<8x512xf32> to vector<8x128xf32>
    %542 = arith.negf %541 : vector<8x128xf32>
    %543 = math.exp %542 : vector<8x128xf32>
    %cst_118 = arith.constant 1.000000e+00 : f32
    %544 = vector.broadcast %cst_118 : f32 to vector<8x128xf32>
    %545 = arith.addf %544, %543 : vector<8x128xf32>
    %546 = arith.divf %544, %545 : vector<8x128xf32>
    %547 = vector.extract_strided_slice %534 {offsets = [0, 256], sizes = [8, 128], strides = [1, 1]} : vector<8x512xf32> to vector<8x128xf32>
    %548 = math.tanh %547 : vector<8x128xf32>
    %549 = vector.extract_strided_slice %534 {offsets = [0, 384], sizes = [8, 128], strides = [1, 1]} : vector<8x512xf32> to vector<8x128xf32>
    %550 = arith.negf %549 : vector<8x128xf32>
    %551 = math.exp %550 : vector<8x128xf32>
    %cst_119 = arith.constant 1.000000e+00 : f32
    %552 = vector.broadcast %cst_119 : f32 to vector<8x128xf32>
    %553 = arith.addf %552, %551 : vector<8x128xf32>
    %554 = arith.divf %552, %553 : vector<8x128xf32>
    %555 = arith.mulf %546, %525 : vector<8x128xf32>
    %556 = arith.mulf %540, %548 : vector<8x128xf32>
    %557 = arith.addf %555, %556 : vector<8x128xf32>
    %558 = math.tanh %557 : vector<8x128xf32>
    %559 = arith.mulf %554, %558 : vector<8x128xf32>
    %c12_i32 = arith.constant 12 : i32
    %560 = arith.addi %4, %c12_i32 : i32
    %561 = vector.broadcast %560 : i32 to vector<8x1xi32>
    %562 = arith.cmpi sgt, %3, %561 : vector<8x1xi32>
    %563 = vector.shape_cast %562 : vector<8x1xi1> to vector<8x1xi1>
    %564 = vector.broadcast %563 : vector<8x1xi1> to vector<8x128xi1>
    %565 = arith.select %564, %559, %522 : vector<8x128xi1>, vector<8x128xf32>
    %566 = vector.shape_cast %562 : vector<8x1xi1> to vector<8x1xi1>
    %567 = vector.broadcast %566 : vector<8x1xi1> to vector<8x128xi1>
    %568 = arith.select %567, %557, %525 : vector<8x128xi1>, vector<8x128xf32>
    %cst_120 = arith.constant 0.000000e+00 : f32
    %569 = vector.shape_cast %562 : vector<8x1xi1> to vector<8x1xi1>
    %570 = vector.broadcast %569 : vector<8x1xi1> to vector<8x128xi1>
    %571 = vector.broadcast %cst_120 : f32 to vector<8x128xf32>
    %572 = arith.select %570, %559, %571 : vector<8x128xi1>, vector<8x128xf32>
    %573 = arith.truncf %572 : vector<8x128xf32> to vector<8x128xbf16>
    %c96_121 = arith.constant 96 : index
    %c0_122 = arith.constant 0 : index
    %574 = vector.load %arg11[%c96_121, %c0_122] : memref<128x128xbf16, #tpu.memory_space<vmem>>, vector<8x128xbf16>
    tpu.vector_store %arg11[%c96_121, %c0_122], %573 {strides = array<i32>} : memref<128x128xbf16, #tpu.memory_space<vmem>>, vector<8x128xbf16>,
    %c104 = arith.constant 104 : index
    %c0_123 = arith.constant 0 : index
    %575 = vector.load %arg10[%c104, %c0_123] : memref<128x512xf32, #tpu.memory_space<vmem>>, vector<8x512xf32>
    %cst_124 = arith.constant dense<0.000000e+00> : vector<8x512xf32>
    %576 = tpu.matmul %565, %13, %cst_124 {dimension_numbers = #tpu.dot_dimension_numbers<[1], [0], [0], [1], [0, 0, 1, 1], [], []>} : vector<8x128xf32>, vector<128x512xf32>, vector<8x512xf32> -> vector<8x512xf32>
    %577 = arith.addf %575, %576 : vector<8x512xf32>
    %578 = vector.extract_strided_slice %577 {offsets = [0, 0], sizes = [8, 128], strides = [1, 1]} : vector<8x512xf32> to vector<8x128xf32>
    %579 = arith.negf %578 : vector<8x128xf32>
    %580 = math.exp %579 : vector<8x128xf32>
    %cst_125 = arith.constant 1.000000e+00 : f32
    %581 = vector.broadcast %cst_125 : f32 to vector<8x128xf32>
    %582 = arith.addf %581, %580 : vector<8x128xf32>
    %583 = arith.divf %581, %582 : vector<8x128xf32>
    %584 = vector.extract_strided_slice %577 {offsets = [0, 128], sizes = [8, 128], strides = [1, 1]} : vector<8x512xf32> to vector<8x128xf32>
    %585 = arith.negf %584 : vector<8x128xf32>
    %586 = math.exp %585 : vector<8x128xf32>
    %cst_126 = arith.constant 1.000000e+00 : f32
    %587 = vector.broadcast %cst_126 : f32 to vector<8x128xf32>
    %588 = arith.addf %587, %586 : vector<8x128xf32>
    %589 = arith.divf %587, %588 : vector<8x128xf32>
    %590 = vector.extract_strided_slice %577 {offsets = [0, 256], sizes = [8, 128], strides = [1, 1]} : vector<8x512xf32> to vector<8x128xf32>
    %591 = math.tanh %590 : vector<8x128xf32>
    %592 = vector.extract_strided_slice %577 {offsets = [0, 384], sizes = [8, 128], strides = [1, 1]} : vector<8x512xf32> to vector<8x128xf32>
    %593 = arith.negf %592 : vector<8x128xf32>
    %594 = math.exp %593 : vector<8x128xf32>
    %cst_127 = arith.constant 1.000000e+00 : f32
    %595 = vector.broadcast %cst_127 : f32 to vector<8x128xf32>
    %596 = arith.addf %595, %594 : vector<8x128xf32>
    %597 = arith.divf %595, %596 : vector<8x128xf32>
    %598 = arith.mulf %589, %568 : vector<8x128xf32>
    %599 = arith.mulf %583, %591 : vector<8x128xf32>
    %600 = arith.addf %598, %599 : vector<8x128xf32>
    %601 = math.tanh %600 : vector<8x128xf32>
    %602 = arith.mulf %597, %601 : vector<8x128xf32>
    %c13_i32 = arith.constant 13 : i32
    %603 = arith.addi %4, %c13_i32 : i32
    %604 = vector.broadcast %603 : i32 to vector<8x1xi32>
    %605 = arith.cmpi sgt, %3, %604 : vector<8x1xi32>
    %606 = vector.shape_cast %605 : vector<8x1xi1> to vector<8x1xi1>
    %607 = vector.broadcast %606 : vector<8x1xi1> to vector<8x128xi1>
    %608 = arith.select %607, %602, %565 : vector<8x128xi1>, vector<8x128xf32>
    %609 = vector.shape_cast %605 : vector<8x1xi1> to vector<8x1xi1>
    %610 = vector.broadcast %609 : vector<8x1xi1> to vector<8x128xi1>
    %611 = arith.select %610, %600, %568 : vector<8x128xi1>, vector<8x128xf32>
    %cst_128 = arith.constant 0.000000e+00 : f32
    %612 = vector.shape_cast %605 : vector<8x1xi1> to vector<8x1xi1>
    %613 = vector.broadcast %612 : vector<8x1xi1> to vector<8x128xi1>
    %614 = vector.broadcast %cst_128 : f32 to vector<8x128xf32>
    %615 = arith.select %613, %602, %614 : vector<8x128xi1>, vector<8x128xf32>
    %616 = arith.truncf %615 : vector<8x128xf32> to vector<8x128xbf16>
    %c104_129 = arith.constant 104 : index
    %c0_130 = arith.constant 0 : index
    %617 = vector.load %arg11[%c104_129, %c0_130] : memref<128x128xbf16, #tpu.memory_space<vmem>>, vector<8x128xbf16>
    tpu.vector_store %arg11[%c104_129, %c0_130], %616 {strides = array<i32>} : memref<128x128xbf16, #tpu.memory_space<vmem>>, vector<8x128xbf16>,
    %c112 = arith.constant 112 : index
    %c0_131 = arith.constant 0 : index
    %618 = vector.load %arg10[%c112, %c0_131] : memref<128x512xf32, #tpu.memory_space<vmem>>, vector<8x512xf32>
    %cst_132 = arith.constant dense<0.000000e+00> : vector<8x512xf32>
    %619 = tpu.matmul %608, %13, %cst_132 {dimension_numbers = #tpu.dot_dimension_numbers<[1], [0], [0], [1], [0, 0, 1, 1], [], []>} : vector<8x128xf32>, vector<128x512xf32>, vector<8x512xf32> -> vector<8x512xf32>
    %620 = arith.addf %618, %619 : vector<8x512xf32>
    %621 = vector.extract_strided_slice %620 {offsets = [0, 0], sizes = [8, 128], strides = [1, 1]} : vector<8x512xf32> to vector<8x128xf32>
    %622 = arith.negf %621 : vector<8x128xf32>
    %623 = math.exp %622 : vector<8x128xf32>
    %cst_133 = arith.constant 1.000000e+00 : f32
    %624 = vector.broadcast %cst_133 : f32 to vector<8x128xf32>
    %625 = arith.addf %624, %623 : vector<8x128xf32>
    %626 = arith.divf %624, %625 : vector<8x128xf32>
    %627 = vector.extract_strided_slice %620 {offsets = [0, 128], sizes = [8, 128], strides = [1, 1]} : vector<8x512xf32> to vector<8x128xf32>
    %628 = arith.negf %627 : vector<8x128xf32>
    %629 = math.exp %628 : vector<8x128xf32>
    %cst_134 = arith.constant 1.000000e+00 : f32
    %630 = vector.broadcast %cst_134 : f32 to vector<8x128xf32>
    %631 = arith.addf %630, %629 : vector<8x128xf32>
    %632 = arith.divf %630, %631 : vector<8x128xf32>
    %633 = vector.extract_strided_slice %620 {offsets = [0, 256], sizes = [8, 128], strides = [1, 1]} : vector<8x512xf32> to vector<8x128xf32>
    %634 = math.tanh %633 : vector<8x128xf32>
    %635 = vector.extract_strided_slice %620 {offsets = [0, 384], sizes = [8, 128], strides = [1, 1]} : vector<8x512xf32> to vector<8x128xf32>
    %636 = arith.negf %635 : vector<8x128xf32>
    %637 = math.exp %636 : vector<8x128xf32>
    %cst_135 = arith.constant 1.000000e+00 : f32
    %638 = vector.broadcast %cst_135 : f32 to vector<8x128xf32>
    %639 = arith.addf %638, %637 : vector<8x128xf32>
    %640 = arith.divf %638, %639 : vector<8x128xf32>
    %641 = arith.mulf %632, %611 : vector<8x128xf32>
    %642 = arith.mulf %626, %634 : vector<8x128xf32>
    %643 = arith.addf %641, %642 : vector<8x128xf32>
    %644 = math.tanh %643 : vector<8x128xf32>
    %645 = arith.mulf %640, %644 : vector<8x128xf32>
    %c14_i32 = arith.constant 14 : i32
    %646 = arith.addi %4, %c14_i32 : i32
    %647 = vector.broadcast %646 : i32 to vector<8x1xi32>
    %648 = arith.cmpi sgt, %3, %647 : vector<8x1xi32>
    %649 = vector.shape_cast %648 : vector<8x1xi1> to vector<8x1xi1>
    %650 = vector.broadcast %649 : vector<8x1xi1> to vector<8x128xi1>
    %651 = arith.select %650, %645, %608 : vector<8x128xi1>, vector<8x128xf32>
    %652 = vector.shape_cast %648 : vector<8x1xi1> to vector<8x1xi1>
    %653 = vector.broadcast %652 : vector<8x1xi1> to vector<8x128xi1>
    %654 = arith.select %653, %643, %611 : vector<8x128xi1>, vector<8x128xf32>
    %cst_136 = arith.constant 0.000000e+00 : f32
    %655 = vector.shape_cast %648 : vector<8x1xi1> to vector<8x1xi1>
    %656 = vector.broadcast %655 : vector<8x1xi1> to vector<8x128xi1>
    %657 = vector.broadcast %cst_136 : f32 to vector<8x128xf32>
    %658 = arith.select %656, %645, %657 : vector<8x128xi1>, vector<8x128xf32>
    %659 = arith.truncf %658 : vector<8x128xf32> to vector<8x128xbf16>
    %c112_137 = arith.constant 112 : index
    %c0_138 = arith.constant 0 : index
    %660 = vector.load %arg11[%c112_137, %c0_138] : memref<128x128xbf16, #tpu.memory_space<vmem>>, vector<8x128xbf16>
    tpu.vector_store %arg11[%c112_137, %c0_138], %659 {strides = array<i32>} : memref<128x128xbf16, #tpu.memory_space<vmem>>, vector<8x128xbf16>,
    %c120 = arith.constant 120 : index
    %c0_139 = arith.constant 0 : index
    %661 = vector.load %arg10[%c120, %c0_139] : memref<128x512xf32, #tpu.memory_space<vmem>>, vector<8x512xf32>
    %cst_140 = arith.constant dense<0.000000e+00> : vector<8x512xf32>
    %662 = tpu.matmul %651, %13, %cst_140 {dimension_numbers = #tpu.dot_dimension_numbers<[1], [0], [0], [1], [0, 0, 1, 1], [], []>} : vector<8x128xf32>, vector<128x512xf32>, vector<8x512xf32> -> vector<8x512xf32>
    %663 = arith.addf %661, %662 : vector<8x512xf32>
    %664 = vector.extract_strided_slice %663 {offsets = [0, 0], sizes = [8, 128], strides = [1, 1]} : vector<8x512xf32> to vector<8x128xf32>
    %665 = arith.negf %664 : vector<8x128xf32>
    %666 = math.exp %665 : vector<8x128xf32>
    %cst_141 = arith.constant 1.000000e+00 : f32
    %667 = vector.broadcast %cst_141 : f32 to vector<8x128xf32>
    %668 = arith.addf %667, %666 : vector<8x128xf32>
    %669 = arith.divf %667, %668 : vector<8x128xf32>
    %670 = vector.extract_strided_slice %663 {offsets = [0, 128], sizes = [8, 128], strides = [1, 1]} : vector<8x512xf32> to vector<8x128xf32>
    %671 = arith.negf %670 : vector<8x128xf32>
    %672 = math.exp %671 : vector<8x128xf32>
    %cst_142 = arith.constant 1.000000e+00 : f32
    %673 = vector.broadcast %cst_142 : f32 to vector<8x128xf32>
    %674 = arith.addf %673, %672 : vector<8x128xf32>
    %675 = arith.divf %673, %674 : vector<8x128xf32>
    %676 = vector.extract_strided_slice %663 {offsets = [0, 256], sizes = [8, 128], strides = [1, 1]} : vector<8x512xf32> to vector<8x128xf32>
    %677 = math.tanh %676 : vector<8x128xf32>
    %678 = vector.extract_strided_slice %663 {offsets = [0, 384], sizes = [8, 128], strides = [1, 1]} : vector<8x512xf32> to vector<8x128xf32>
    %679 = arith.negf %678 : vector<8x128xf32>
    %680 = math.exp %679 : vector<8x128xf32>
    %cst_143 = arith.constant 1.000000e+00 : f32
    %681 = vector.broadcast %cst_143 : f32 to vector<8x128xf32>
    %682 = arith.addf %681, %680 : vector<8x128xf32>
    %683 = arith.divf %681, %682 : vector<8x128xf32>
    %684 = arith.mulf %675, %654 : vector<8x128xf32>
    %685 = arith.mulf %669, %677 : vector<8x128xf32>
    %686 = arith.addf %684, %685 : vector<8x128xf32>
    %687 = math.tanh %686 : vector<8x128xf32>
    %688 = arith.mulf %683, %687 : vector<8x128xf32>
    %c15_i32 = arith.constant 15 : i32
    %689 = arith.addi %4, %c15_i32 : i32
    %690 = vector.broadcast %689 : i32 to vector<8x1xi32>
    %691 = arith.cmpi sgt, %3, %690 : vector<8x1xi32>
    %692 = vector.shape_cast %691 : vector<8x1xi1> to vector<8x1xi1>
    %693 = vector.broadcast %692 : vector<8x1xi1> to vector<8x128xi1>
    %694 = arith.select %693, %688, %651 : vector<8x128xi1>, vector<8x128xf32>
    %695 = vector.shape_cast %691 : vector<8x1xi1> to vector<8x1xi1>
    %696 = vector.broadcast %695 : vector<8x1xi1> to vector<8x128xi1>
    %697 = arith.select %696, %686, %654 : vector<8x128xi1>, vector<8x128xf32>
    %cst_144 = arith.constant 0.000000e+00 : f32
    %698 = vector.shape_cast %691 : vector<8x1xi1> to vector<8x1xi1>
    %699 = vector.broadcast %698 : vector<8x1xi1> to vector<8x128xi1>
    %700 = vector.broadcast %cst_144 : f32 to vector<8x128xf32>
    %701 = arith.select %699, %688, %700 : vector<8x128xi1>, vector<8x128xf32>
    %702 = arith.truncf %701 : vector<8x128xf32> to vector<8x128xbf16>
    %c120_145 = arith.constant 120 : index
    %c0_146 = arith.constant 0 : index
    %703 = vector.load %arg11[%c120_145, %c0_146] : memref<128x128xbf16, #tpu.memory_space<vmem>>, vector<8x128xbf16>
    tpu.vector_store %arg11[%c120_145, %c0_146], %702 {strides = array<i32>} : memref<128x128xbf16, #tpu.memory_space<vmem>>, vector<8x128xbf16>,
    %c0_147 = arith.constant 0 : index
    %c0_148 = arith.constant 0 : index
    %704 = vector.load %arg12[%c0_147, %c0_148] : memref<8x128xf32, #tpu.memory_space<vmem>>, vector<8x128xf32>
    tpu.vector_store %arg12[%c0_147, %c0_148], %694 {strides = array<i32>} : memref<8x128xf32, #tpu.memory_space<vmem>>, vector<8x128xf32>,
    %c0_149 = arith.constant 0 : index
    %c0_150 = arith.constant 0 : index
    %705 = vector.load %arg13[%c0_149, %c0_150] : memref<8x128xf32, #tpu.memory_space<vmem>>, vector<8x128xf32>
    tpu.vector_store %arg13[%c0_149, %c0_150], %697 {strides = array<i32>} : memref<8x128xf32, #tpu.memory_space<vmem>>, vector<8x128xf32>,
    %c0_151 = arith.constant 0 : index
    %c0_152 = arith.constant 0 : index
    %706 = vector.load %arg11[%c0_151, %c0_152] : memref<128x128xbf16, #tpu.memory_space<vmem>>, vector<128x128xbf16>
    %c0_153 = arith.constant 0 : index
    %c0_154 = arith.constant 0 : index
    %707 = vector.load %arg7[%c0_153, %c0_154] : memref<128x32xbf16, #tpu.memory_space<vmem>>, vector<128x32xbf16>
    %cst_155 = arith.constant dense<0.000000e+00> : vector<128x32xf32>
    %708 = tpu.matmul %706, %707, %cst_155 {dimension_numbers = #tpu.dot_dimension_numbers<[1], [0], [0], [1], [0, 0, 1, 1], [], []>} : vector<128x128xbf16>, vector<128x32xbf16>, vector<128x32xf32> -> vector<128x32xf32>
    %c0_156 = arith.constant 0 : index
    %c0_157 = arith.constant 0 : index
    %709 = vector.load %arg8[%c0_156, %c0_157] : memref<1x32xf32, #tpu.memory_space<vmem>>, vector<1x32xf32>
    %710 = vector.broadcast %709 : vector<1x32xf32> to vector<128x32xf32>
    %711 = arith.addf %708, %710 : vector<128x32xf32>
    %712 = vector.shape_cast %711 : vector<128x32xf32> to vector<16x8x32xf32>
    %c0_158 = arith.constant 0 : index
    %c0_159 = arith.constant 0 : index
    %c0_160 = arith.constant 0 : index
    %713 = vector.load %arg9[%c0_158, %c0_159, %c0_160] : memref<16x8x32xf32, #tpu.memory_space<vmem>>, vector<16x8x32xf32>
    tpu.vector_store %arg9[%c0_158, %c0_159, %c0_160], %712 {strides = array<i32>} : memref<16x8x32xf32, #tpu.memory_space<vmem>>, vector<16x8x32xf32>,
    return
  }
  func.func @transform_0(%arg0: i32, %arg1: i32) -> (i32, i32) {
    %c0_i32 = arith.constant 0 : i32
    %c0_i32_0 = arith.constant 0 : i32
    return %arg0, %c0_i32 : i32, i32
  }
  func.func @transform_1(%arg0: i32, %arg1: i32) -> (i32, i32, i32) {
    %c0_i32 = arith.constant 0 : i32
    %c0_i32_0 = arith.constant 0 : i32
    return %arg1, %arg0, %c0_i32 : i32, i32, i32
  }
  func.func @transform_2(%arg0: i32, %arg1: i32) -> (i32, i32) {
    %c0_i32 = arith.constant 0 : i32
    %c0_i32_0 = arith.constant 0 : i32
    %c0_i32_1 = arith.constant 0 : i32
    return %c0_i32, %c0_i32_0 : i32, i32
  }
  func.func @transform_3(%arg0: i32, %arg1: i32) -> (i32, i32) {
    %c0_i32 = arith.constant 0 : i32
    %c0_i32_0 = arith.constant 0 : i32
    %c0_i32_1 = arith.constant 0 : i32
    return %c0_i32, %c0_i32_0 : i32, i32
  }
  func.func @transform_4(%arg0: i32, %arg1: i32) -> (i32, i32) {
    %c0_i32 = arith.constant 0 : i32
    %c0_i32_0 = arith.constant 0 : i32
    %c0_i32_1 = arith.constant 0 : i32
    return %c0_i32, %c0_i32_0 : i32, i32
  }
  func.func @transform_5(%arg0: i32, %arg1: i32) -> (i32, i32) {
    %c0_i32 = arith.constant 0 : i32
    %c0_i32_0 = arith.constant 0 : i32
    %c0_i32_1 = arith.constant 0 : i32
    return %c0_i32, %c0_i32_0 : i32, i32
  }
  func.func @transform_6(%arg0: i32, %arg1: i32) -> (i32, i32) {
    %c0_i32 = arith.constant 0 : i32
    %c0_i32_0 = arith.constant 0 : i32
    %c0_i32_1 = arith.constant 0 : i32
    return %c0_i32, %c0_i32_0 : i32, i32
  }
  func.func @transform_7(%arg0: i32, %arg1: i32) -> (i32, i32, i32) {
    %c0_i32 = arith.constant 0 : i32
    %c0_i32_0 = arith.constant 0 : i32
    return %arg1, %arg0, %c0_i32 : i32, i32, i32
  }
}

</mosaic_0001>

<bundles_post_ra>
// kernel: rnn_layers_forward.1
= control target key start
LH: loop header
LB: loop body
LE: loop exit
PB: predicated region body
PF: predicated region fallthrough
CT: control target
= control target key end

     0   :  { %12 = vsyncpa [#allocation7], 0  ;;  %s4075_s27 = smov [#allocation6]   ;;  %s4076_s29 = smov 512   ;;  %s6433_s0 = inlined_call_operand.vmem [shape: s32[8,1], index: 0, kind: input, shape index: {}]   ;;  %s6434_s1 = inlined_call_operand.vmem [shape: bf16[16,8,32], index: 1, kind: input, shape index: {}]   ;;  %s6435_s2 = inlined_call_operand.vmem [shape: bf16[32,512], index: 2, kind: input, shape index: {}]   ;;  %s6436_s3 = inlined_call_operand.hbm [shape: f32[128,512], index: 3, kind: input, shape index: {}]   ;;  %s6437_s4 = inlined_call_operand.vmem [shape: f32[1,512], index: 4, kind: input, shape index: {}]   ;;  %s6438_s5 = inlined_call_operand.vmem [shape: bf16[128,32], index: 5, kind: input, shape index: {}]   ;;  %s6439_s6 = inlined_call_operand.vmem [shape: f32[1,32], index: 6, kind: input, shape index: {}]   ;;  %s6440_s7 = inlined_call_operand.vmem [shape: f32[16,8,32], index: 7, kind: output, shape index: {}]  }
   0x1   :  { %s23_s26 = sshll.u32 %s6436_s3, 4  ;;  %s25_s28 = sshll.u32 %s4075_s27, 4  ;;  %s24_s26 = int_to_ptr.hbm [resolvable:$true] %s23_s26  ;;  %s26_s28 = int_to_ptr.vmem [resolvable:$true] %s25_s28 }
   0x2   :  { %s4077_s30 = smov 32  }
   0x3   :  { %31 = dma.hbm_to_vmem [thread:$0]  %s24_s26, 8192, %s26_s28, [#allocation7], %s4076_s29, %s4076_s29, %s4077_s30  }
   0x4   :  { %4073 = dma.done.wait [#allocation7], 8192  }
   0x5   :  { %4074 = vsyncadd [#allocation7], 4294959104  ;;  %v3393_v0 = vld [vmem:[%s6435_s2 + $0x20] sm:$0xf]  ;;  %v3565_v1 = vld [vmem:[%s6435_s2 + $0x2c] sm:$0xf0] }
   0x6   :  { %v3564_v2 = vld [vmem:[%s6435_s2 + $0x2c] sm:$0xf]  ;;  %v3394_v3 = vor.u32 %v3565_v1, %v3393_v0  ;;  %v3403_v4 = vld [vmem:[%s6435_s2 + $0x38] sm:$0xf0]  ;;  %v3377_v5 = vld [vmem:[%s6435_s2] sm:$0xf] }
   0x7   :  { %v3561_v6 = vld [vmem:[%s6435_s2 + $0xc] sm:$0xf0]  ;;  %v3406_v7 = vor.u32 %v3564_v2, %v3403_v4  ;;  %v3560_v8 = vld [vmem:[%s6435_s2 + $0xc] sm:$0xf]  ;;  %v3387_v9 = vld [vmem:[%s6435_s2 + $0x18] sm:$0xf0] }
   0x8   :  { %3587 = vmatpush.bf16.msra.mxu1 %v3394_v3  ;;  %3588 = vmatpush.bf16.msra.mxu2 %v3394_v3  ;;  %v3378_v10 = vor.u32 %v3561_v6, %v3377_v5  ;;  %v3563_v11 = vld [vmem:[%s6435_s2 + $0x24] sm:$0xf]  ;;  %v3395_v12 = vld [vmem:[%s6435_s2 + $0x30] sm:$0xf0]  ;;  %v3390_v13 = vor.u32 %v3560_v8, %v3387_v9  ;;  %v3401_v15 = vld [vmem:[%s6435_s2 + $0x28] sm:$0xf] }
   0x9   :  { %343 = vmatpush.bf16.msra.mxu3 %v3406_v7  ;;  %v3398_v14 = vor.u32 %v3563_v11, %v3395_v12  ;;  %v3566_v16 = vld [vmem:[%s6435_s2 + $0x34] sm:$0xf0]  ;;  %196 = vmatpush.bf16.msra.mxu0 %v3394_v3  ;;  %v4162_v17 = vld [vmem:[%s6434_s1 + $0x10] sm:$0xff]  ;;  %v4167_v19 = vld [vmem:[%s6434_s1 + $0x28] sm:$0xff]  ;;  %vm165_vm0 = vcmask 261120  }
   0xa   :  { %v3402_v18 = vor.u32 %v3566_v16, %v3401_v15  ;;  %v3559_v20 = vld [vmem:[%s6435_s2 + $0x4] sm:$0xf]  ;;  %v3379_v21 = vld [vmem:[%s6435_s2 + $0x10] sm:$0xf0]  ;;  %v3385_v24 = vld [vmem:[%s6435_s2 + $0x8] sm:$0xf] }
   0xb   :  { %v3551_v22 = vld [vmem:[%s6434_s1] sm:$0xff]  ;;  %v3382_v23 = vor.u32 %v3559_v20, %v3379_v21  ;;  %v3562_v25 = vld [vmem:[%s6435_s2 + $0x14] sm:$0xf0]  ;;  %v4202_v29 = vld [vmem:[%s6434_s1 + $0x30] sm:$0xff] }
   0xc   :  { %3589 = vmatpush.bf16.msra.mxu1 %v3378_v10  ;;  %3590 = vmatpush.bf16.msra.mxu2 %v3378_v10  ;;  %v4189_v26 = vld [vmem:[#allocation6 + $0x1e0] sm:$0xff]  ;;  %v3386_v27 = vor.u32 %v3562_v25, %v3385_v24  ;;  %v4197_v28 = vld [vmem:[%s6434_s1 + $0x18] sm:$0xff]  ;;  %v4207_v30 = vld [vmem:[%s6434_s1 + $0x8] sm:$0xff] }
   0xd   :  { %344 = vmatpush.bf16.msra.mxu3 %v3390_v13  ;;  %197 = vmatpush.bf16.msra.mxu0 %v3378_v10  ;;  %v4215_v31 = vld [vmem:[#allocation6 + $0x1e8] sm:$0xff]  ;;  %v4217_v32 = vld [vmem:[#allocation6 + $0x1c0] sm:$0xff]  ;;  %v4225_v35 = vld [vmem:[#allocation6 + $0x1f0] sm:$0xff] }
   0xe   :  { %v4219_v33 = vld [vmem:[#allocation6 + $0x1c8] sm:$0xff]  ;;  %v4223_v34 = vld [vmem:[#allocation6 + $0x1a0] sm:$0xff]  ;;  %v4242_v37 = vld [vmem:[%s6434_s1 + $0x38] sm:$0xff] }
   0xf   :  { %3409 = vmatmul.msk.bf16.vlgmr.msra.gmra.mxu1 %vm165_vm0, %v4162_v17  ;;  %3412 = vmatmul.msk.bf16.vlgmr.msra.gmra.mxu2 %vm165_vm0, %v4167_v19  ;;  %v4237_v36 = vld [vmem:[%s6434_s1 + $0x20] sm:$0xff]  ;;  %v4250_v38 = vld [vmem:[#allocation6 + $0x1a8] sm:$0xff]  ;;  %v4254_v40 = vld [vmem:[#allocation6 + $0x1d0] sm:$0xff] }
  0x10   :  { %245 = vmatpush.bf16.msrb.mxu1 %v3398_v14  ;;  %294 = vmatpush.bf16.msrb.mxu2 %v3402_v18  ;;  %v4252_v39 = vld [vmem:[#allocation6 + $0x180] sm:$0xff]  ;;  %v4258_v41 = vld [vmem:[#allocation6 + $0x188] sm:$0xff]  ;;  %v4262_v43 = vld [vmem:[#allocation6 + $0x1b0] sm:$0xff] }
  0x11   :  { %3431 = vmatmul.msk.bf16.vlgmr.msra.gmra.mxu3 %vm165_vm0, %v3551_v22  ;;  %3407 = vmatmul.msk.bf16.vlgmr.msra.gmra.mxu0 %vm165_vm0, %v3551_v22  ;;  %v4260_v42 = vld [vmem:[#allocation6 + $0x160] sm:$0xff]  ;;  %v4274_v44 = vld [vmem:[#allocation6 + $0x168] sm:$0xff]  ;;  %v4282_v47 = vld [vmem:[#allocation6 + $0x190] sm:$0xff] }
  0x12   :  { %520 = vmatpush.msrb.mxu3 %v4189_v26  ;;  %683 = vmatpush.msrb.mxu0 %v4189_v26  ;;  %v4276_v45 = vld [vmem:[#allocation6 + $0x140] sm:$0xff]  ;;  %v4284_v48 = vld [vmem:[#allocation6 + $0x148] sm:$0xff]  ;;  %v4292_v50 = vld [vmem:[#allocation6 + $0x170] sm:$0xff] }
  0x13   :  { %v4278_v46 = vld [vmem:[#allocation6 + $0x120] sm:$0xff]  ;;  %v4318_v55 = vld [vmem:[#allocation6 + $0x128] sm:$0xff]  ;;  %v4325_v57 = vld [vmem:[#allocation6 + $0x150] sm:$0xff] }
  0x14   :  { %246 = vmatpush.bf16.msrb.mxu1 %v3382_v23  ;;  %295 = vmatpush.bf16.msrb.mxu2 %v3386_v27  ;;  %v4287_v49 = vld [vmem:[#allocation6 + $0x100] sm:$0xff]  ;;  %v4330_v59 = vld [vmem:[#allocation6 + $0x108] sm:$0xff]  ;;  %v4335_v60 = vld [vmem:[#allocation6 + $0x130] sm:$0xff] }
  0x15   :  { %521 = vmatpush.msrb.mxu3 %v4217_v32  ;;  %684 = vmatpush.msrb.mxu0 %v4217_v32  ;;  %v4294_v51 = vld [vmem:[#allocation6 + $0xe0] sm:$0xff]  ;;  %v4346_v63 = vld [vmem:[#allocation6 + $0x1f8] sm:$0xff]  ;;  %v4368_v3 = vld [vmem:[#allocation6 + $0xe8] sm:$0xff] }
  0x16   :  { %6664 = vst [vmem:[#allocation9_spill] sm:$0xff] %v4294_v51  ;;  %v4299_v52 = vld [vmem:[#allocation6 + $0xc0] sm:$0xff]  ;;  %v4350_v0 = vld [vmem:[#allocation6 + $0x1d8] sm:$0xff]  ;;  %v4375_v5 = vld [vmem:[#allocation6 + $0x110] sm:$0xff] }
  0x17   :  { %522 = vmatpush.msrb.mxu3 %v4223_v34  ;;  %685 = vmatpush.msrb.mxu0 %v4223_v34  ;;  %6665 = vst [vmem:[#allocation10_spill] sm:$0xff] %v4299_v52  ;;  %v4303_v53 = vld [vmem:[#allocation6 + $0xa0] sm:$0xff]  ;;  %v4354_v1 = vld [vmem:[#allocation6 + $0x1b8] sm:$0xff]  ;;  %v4380_v7 = vld [vmem:[#allocation6 + $0xc8] sm:$0xff] }
  0x18   :  { %540 = vmatpush.msra.mxu1 %v4215_v31  ;;  %560 = vmatpush.msra.mxu2 %v4225_v35  ;;  %6666 = vst [vmem:[#allocation11_spill] sm:$0xff] %v4303_v53  ;;  %v4314_v54 = vld [vmem:[#allocation6 + $0x80] sm:$0xff]  ;;  %v4360_v2 = vld [vmem:[#allocation6 + $0x198] sm:$0xff]  ;;  %v4403_v12 = vld [vmem:[#allocation6 + $0xf0] sm:$0xff] }
  0x19   :  { %523 = vmatpush.msrb.mxu3 %v4252_v39  ;;  %686 = vmatpush.msrb.mxu0 %v4252_v39  ;;  %6667 = vst [vmem:[#allocation12_spill] sm:$0xff] %v4314_v54  ;;  %v4320_v56 = vld [vmem:[#allocation6 + $0x60] sm:$0xff]  ;;  %v4370_v4 = vld [vmem:[#allocation6 + $0x178] sm:$0xff]  ;;  %v4417_v15 = vld [vmem:[#allocation6 + $0xa8] sm:$0xff] }
  0x1a   :  { %541 = vmatpush.msra.mxu1 %v4219_v33  ;;  %561 = vmatpush.msra.mxu2 %v4254_v40  ;;  %6668 = vst [vmem:[#allocation13_spill] sm:$0xff] %v4320_v56  ;;  %v4327_v58 = vld [vmem:[#allocation6 + $0x40] sm:$0xff]  ;;  %v4377_v6 = vld [vmem:[#allocation6 + $0x158] sm:$0xff]  ;;  %v4430_v18 = vld [vmem:[#allocation6 + $0xd0] sm:$0xff] }
  0x1b   :  { %524 = vmatpush.msrb.mxu3 %v4260_v42  ;;  %687 = vmatpush.msrb.mxu0 %v4260_v42  ;;  %6669 = vst [vmem:[#allocation14_spill] sm:$0xff] %v4327_v58  ;;  %v4337_v61 = vld [vmem:[#allocation6 + $0x20] sm:$0xff]  ;;  %v4385_v8 = vld [vmem:[#allocation6 + $0x138] sm:$0xff]  ;;  %v4432_v20 = vld [vmem:[#allocation6 + $0x88] sm:$0xff] }
  0x1c   :  { %542 = vmatpush.msra.mxu1 %v4250_v38  ;;  %562 = vmatpush.msra.mxu2 %v4262_v43  ;;  %6670 = vst [vmem:[#allocation15_spill] sm:$0xff] %v4337_v61  ;;  %v4342_v62 = vld [vmem:[#allocation6] sm:$0xff]  ;;  %v4389_v9 = vld [vmem:[#allocation6 + $0x118] sm:$0xff]  ;;  %v4445_v23 = vld [vmem:[#allocation6 + $0xb0] sm:$0xff] }
  0x1d   :  { %525 = vmatpush.msrb.mxu3 %v4276_v45  ;;  %688 = vmatpush.msrb.mxu0 %v4276_v45  ;;  %6671 = vst [vmem:[#allocation16_spill] sm:$0xff] %v4342_v62  ;;  %v4393_v10 = vld [vmem:[#allocation6 + $0xf8] sm:$0xff]  ;;  %v4452_v24 = vld [vmem:[#allocation6 + $0x68] sm:$0xff]  ;;  %v4457_v25 = vld [vmem:[#allocation6 + $0x90] sm:$0xff] }
  0x1e   :  { %543 = vmatpush.msra.mxu1 %v4258_v41  ;;  %563 = vmatpush.msra.mxu2 %v4282_v47  ;;  %6672 = vst [vmem:[#allocation17_spill] sm:$0xff] %v4389_v9  ;;  %v4397_v11 = vld [vmem:[#allocation6 + $0xd8] sm:$0xff]  ;;  %v4459_v27 = vld [vmem:[#allocation6 + $0x48] sm:$0xff] }
  0x1f   :  { %3410 = vmatmul.msk.bf16.gmra.mxu1 %vm165_vm0, %v4197_v28  ;;  %3413 = vmatmul.msk.bf16.gmra.mxu2 %vm165_vm0, %v4202_v29  ;;  %v4405_v13 = vld [vmem:[#allocation6 + $0xb8] sm:$0xff]  ;;  %6677 = vst [vmem:[#allocation22_spill] sm:$0xff] %v4432_v20 }
  0x20   :  { %544 = vmatpush.msra.mxu1 %v4274_v44  ;;  %526 = vmatpush.msrb.mxu3 %v4278_v46  ;;  %6673 = vst [vmem:[#allocation18_spill] sm:$0xff] %v4405_v13  ;;  %v4415_v14 = vld [vmem:[#allocation6 + $0x98] sm:$0xff] }
  0x21   :  { %3432 = vmatmul.msk.bf16.gmra.mxu3 %vm165_vm0, %v4207_v30  ;;  %3408 = vmatmul.msk.bf16.gmra.mxu0 %vm165_vm0, %v4207_v30  ;;  %6674 = vst [vmem:[#allocation19_spill] sm:$0xff] %v4415_v14  ;;  %v4422_v16 = vld [vmem:[#allocation6 + $0x78] sm:$0xff] }
  0x22   :  { %545 = vmatpush.msra.mxu1 %v4284_v48  ;;  %564 = vmatpush.msra.mxu2 %v4292_v50  ;;  %6675 = vst [vmem:[#allocation20_spill] sm:$0xff] %v4422_v16  ;;  %v4434_v21 = vld [vmem:[#allocation6 + $0x38] sm:$0xff] }
  0x23   :  { %689 = vmatpush.msrb.mxu0 %v4278_v46  ;;  %527 = vmatpush.msrb.mxu3 %v4287_v49  ;;  %6678 = vst [vmem:[#allocation23_spill] sm:$0xff] %v4434_v21 }
  0x24   :  { %546 = vmatpush.msra.mxu1 %v4318_v55  ;;  %565 = vmatpush.msra.mxu2 %v4325_v57  ;;  %6680 = vst [vmem:[#allocation25_spill] sm:$0xff] %v4452_v24 }
  0x25   :  { %690 = vmatpush.msrb.mxu0 %v4287_v49  ;;  %528 = vmatpush.msrb.mxu3 %v4294_v51  ;;  %6681 = vst [vmem:[#allocation26_spill] sm:$0xff] %v4457_v25 }
  0x26   :  { %547 = vmatpush.msra.mxu1 %v4330_v59  ;;  %566 = vmatpush.msra.mxu2 %v4335_v60  ;;  %6682 = vst [vmem:[#allocation27_spill] sm:$0xff] %v4459_v27 }
  0x27   :  { %691 = vmatpush.msrb.mxu0 %v4294_v51  ;;  %529 = vmatpush.msrb.mxu3 %v4299_v52 }
  0x28   :  { %548 = vmatpush.msra.mxu1 %v4368_v3  ;;  %567 = vmatpush.msra.mxu2 %v4375_v5 }
  0x29   :  { %692 = vmatpush.msrb.mxu0 %v4299_v52  ;;  %530 = vmatpush.msrb.mxu3 %v4303_v53 }
  0x2a   :  { %549 = vmatpush.msra.mxu1 %v4380_v7  ;;  %568 = vmatpush.msra.mxu2 %v4403_v12 }
  0x2b   :  { %693 = vmatpush.msrb.mxu0 %v4303_v53  ;;  %531 = vmatpush.msrb.mxu3 %v4314_v54 }
  0x2c   :  { %550 = vmatpush.msra.mxu1 %v4417_v15  ;;  %569 = vmatpush.msra.mxu2 %v4430_v18 }
  0x2d   :  { %694 = vmatpush.msrb.mxu0 %v4314_v54  ;;  %532 = vmatpush.msrb.mxu3 %v4320_v56 }
  0x2e   :  { %551 = vmatpush.msra.mxu1 %v4432_v20  ;;  %570 = vmatpush.msra.mxu2 %v4445_v23 }
  0x2f   :  { %3411 = vmatmul.msk.bf16.gmra.mxu1 %vm165_vm0, %v4237_v36  ;;  %3414 = vmatmul.msk.bf16.gmra.mxu2 %vm165_vm0, %v4242_v37 }
  0x30   :  { %695 = vmatpush.msrb.mxu0 %v4320_v56  ;;  %533 = vmatpush.msrb.mxu3 %v4327_v58 }
  0x31   :  { %3433 = vmatmul.msk.bf16.gmra.mxu3 %vm165_vm0, %v4162_v17  ;;  %552 = vmatpush.msra.mxu1 %v4452_v24 }
  0x32   :  { %696 = vmatpush.msrb.mxu0 %v4327_v58  ;;  %534 = vmatpush.msrb.mxu3 %v4337_v61 }
  0x33   :  { %571 = vmatpush.msra.mxu2 %v4457_v25  ;;  %553 = vmatpush.msra.mxu1 %v4459_v27 }
  0x34   :  { %697 = vmatpush.msrb.mxu0 %v4337_v61  ;;  %535 = vmatpush.msrb.mxu3 %v4342_v62 }
  0x36   :  { %698 = vmatpush.msrb.mxu0 %v4342_v62  ;;  %580 = vmatpush.msra.mxu3 %v4346_v63 }
  0x38   :  { %847 = vmatpush.msra.mxu0 %v4189_v26  ;;  %581 = vmatpush.msra.mxu3 %v4350_v0 }
  0x3a   :  { %848 = vmatpush.msra.mxu0 %v4217_v32  ;;  %582 = vmatpush.msra.mxu3 %v4354_v1 }
  0x3c   :  { %849 = vmatpush.msra.mxu0 %v4223_v34  ;;  %583 = vmatpush.msra.mxu3 %v4360_v2 }
  0x3e   :  { %850 = vmatpush.msra.mxu0 %v4252_v39  ;;  %584 = vmatpush.msra.mxu3 %v4370_v4 }
  0x3f   :  { %3415 = vmatmul.msk.bf16.vlgmr.msrb.gmra.mxu1 %vm165_vm0, %v3551_v22  ;;  %3423 = vmatmul.msk.bf16.vlgmr.msrb.gmra.mxu2 %vm165_vm0, %v3551_v22  ;;  %v4440_v22 = vld [vmem:[#allocation6 + $0x18] sm:$0xff] }
  0x40   :  { %851 = vmatpush.msra.mxu0 %v4260_v42  ;;  %585 = vmatpush.msra.mxu3 %v4377_v6  ;;  %6679 = vst [vmem:[#allocation24_spill] sm:$0xff] %v4440_v22 }
  0x41   :  { %3434 = vmatmul.msk.bf16.gmra.mxu3 %vm165_vm0, %v4197_v28 }
  0x42   :  { %852 = vmatpush.msra.mxu0 %v4276_v45  ;;  %586 = vmatpush.msra.mxu3 %v4385_v8 }
  0x44   :  { %853 = vmatpush.msra.mxu0 %v4278_v46  ;;  %587 = vmatpush.msra.mxu3 %v4389_v9 }
  0x46   :  { %854 = vmatpush.msra.mxu0 %v4287_v49  ;;  %588 = vmatpush.msra.mxu3 %v4393_v10 }
  0x48   :  { %855 = vmatpush.msra.mxu0 %v4294_v51  ;;  %589 = vmatpush.msra.mxu3 %v4397_v11 }
  0x4a   :  { %856 = vmatpush.msra.mxu0 %v4299_v52  ;;  %590 = vmatpush.msra.mxu3 %v4405_v13  ;;  %v4507_v52 = vld [vmem:[#allocation6 + $0x10] sm:$0xff] }
  0x4b   :  { %6694 = vst [vmem:[#allocation39_spill] sm:$0xff] %v4507_v52 }
  0x4c   :  { %857 = vmatpush.msra.mxu0 %v4303_v53  ;;  %591 = vmatpush.msra.mxu3 %v4415_v14  ;;  %v4504_v53 = vld [vmem:[#allocation6 + $0x30] sm:$0xff] }
  0x4d   :  { %6693 = vst [vmem:[#allocation38_spill] sm:$0xff] %v4504_v53 }
  0x4e   :  { %858 = vmatpush.msra.mxu0 %v4314_v54  ;;  %592 = vmatpush.msra.mxu3 %v4422_v16 }
  0x4f   :  { %3416 = vmatmul.msk.bf16.gmra.mxu1 %vm165_vm0, %v4207_v30  ;;  %3424 = vmatmul.msk.bf16.gmra.mxu2 %vm165_vm0, %v4207_v30  ;;  %v4465_v30 = vld [vmem:[#allocation6 + $0x70] sm:$0xff] }
  0x50   :  { %859 = vmatpush.msra.mxu0 %v4320_v56  ;;  %6684 = vst [vmem:[#allocation29_spill] sm:$0xff] %v4465_v30  ;;  %572 = vmatpush.msra.mxu2 %v4465_v30  ;;  %v4484_v56 = vld [vmem:[#allocation6 + $0x50] sm:$0xff] }
  0x51   :  { %3435 = vmatmul.msk.bf16.gmra.mxu3 %vm165_vm0, %v4237_v36  ;;  %6688 = vst [vmem:[#allocation33_spill] sm:$0xff] %v4484_v56 }
  0x52   :  { %860 = vmatpush.msra.mxu0 %v4327_v58  ;;  %573 = vmatpush.msra.mxu2 %v4484_v56 }
  0x54   :  { %861 = vmatpush.msra.mxu0 %v4337_v61  ;;  %574 = vmatpush.msra.mxu2 %v4504_v53 }
  0x56   :  { %862 = vmatpush.msra.mxu0 %v4342_v62  ;;  %v6448_v62 = vmov 0.0   ;;  %575 = vmatpush.msra.mxu2 %v4507_v52 }
  0x58   :  { %723 = vmatpush.msrb.mxu2 %v4225_v35 }
  0x5a   :  { %724 = vmatpush.msrb.mxu2 %v4254_v40 }
  0x5c   :  { %725 = vmatpush.msrb.mxu2 %v4262_v43 }
  0x5e   :  { %726 = vmatpush.msrb.mxu2 %v4282_v47 }
  0x5f   :  { %3417 = vmatmul.msk.bf16.gmra.mxu1 %vm165_vm0, %v4162_v17  ;;  %3425 = vmatmul.msk.bf16.gmra.mxu2 %vm165_vm0, %v4162_v17  ;;  %v4426_v17 = vld [vmem:[#allocation6 + $0x58] sm:$0xff] }
  0x60   :  { %6676 = vst [vmem:[#allocation21_spill] sm:$0xff] %v4426_v17  ;;  %593 = vmatpush.msra.mxu3 %v4426_v17  ;;  %727 = vmatpush.msrb.mxu2 %v4292_v50 }
  0x61   :  { %3436 = vmatmul.msk.bf16.gmra.mxu3 %vm165_vm0, %v4167_v19 }
  0x62   :  { %594 = vmatpush.msra.mxu3 %v4434_v21  ;;  %728 = vmatpush.msrb.mxu2 %v4325_v57 }
  0x64   :  { %595 = vmatpush.msra.mxu3 %v4440_v22  ;;  %729 = vmatpush.msrb.mxu2 %v4335_v60 }
  0x66   :  { %730 = vmatpush.msrb.mxu2 %v4375_v5 }
  0x68   :  { %731 = vmatpush.msrb.mxu2 %v4403_v12 }
  0x6a   :  { %732 = vmatpush.msrb.mxu2 %v4430_v18 }
  0x6c   :  { %733 = vmatpush.msrb.mxu2 %v4445_v23 }
  0x6e   :  { %734 = vmatpush.msrb.mxu2 %v4457_v25 }
  0x6f   :  { %3418 = vmatmul.msk.bf16.gmra.mxu1 %vm165_vm0, %v4197_v28  ;;  %3426 = vmatmul.msk.bf16.gmra.mxu2 %vm165_vm0, %v4197_v28 }
  0x70   :  { %735 = vmatpush.msrb.mxu2 %v4465_v30 }
  0x71   :  { %3437 = vmatmul.msk.bf16.gmra.mxu3 %vm165_vm0, %v4202_v29 }
  0x72   :  { %736 = vmatpush.msrb.mxu2 %v4484_v56 }
  0x74   :  { %737 = vmatpush.msrb.mxu2 %v4504_v53 }
  0x76   :  { %738 = vmatpush.msrb.mxu2 %v4507_v52 }
  0x7f   :  { %3419 = vmatmul.msk.bf16.gmra.mxu1 %vm165_vm0, %v4237_v36  ;;  %3427 = vmatmul.msk.bf16.gmra.mxu2 %vm165_vm0, %v4237_v36  ;;  %v4472_v36 = vld [vmem:[#allocation6 + $0x28] sm:$0xff] }
  0x80   :  { %6685 = vst [vmem:[#allocation30_spill] sm:$0xff] %v4472_v36  ;;  %554 = vmatpush.msra.mxu1 %v4472_v36 }
  0x81   :  { %3438 = vmatmul.msk.bf16.gmra.mxu3 %vm165_vm0, %v4242_v37 }
  0x8c   :  { %v4463_v28 = vpop.f32.mrf.mxu1 }
  0x8d   :  { %6683 = vst [vmem:[#allocation28_spill] sm:$0xff] %v4463_v28 }
  0x8f   :  { %3420 = vmatmul.msk.bf16.gmra.mxu1 %vm165_vm0, %v4167_v19  ;;  %3428 = vmatmul.msk.bf16.gmra.mxu2 %vm165_vm0, %v4167_v19  ;;  %v4486_v19 = vld [vmem:[#allocation6 + $0x8] sm:$0xff] }
  0x90   :  { %6689 = vst [vmem:[#allocation34_spill] sm:$0xff] %v4486_v19  ;;  %555 = vmatpush.msra.mxu1 %v4486_v19 }
  0x91   :  { %536 = vmatmul.f32.vlgmr.msrb.gmra.mxu3 %v6448_v62 }
  0x92   :  { %743 = vmatpush.msrb.mxu3 %v4346_v63  ;;  %v4477_v28 = vpop.f32.mrf.mxu2  ;;  %703 = vmatpush.msrb.mxu1 %v4215_v31 }
  0x93   :  { %6686 = vst [vmem:[#allocation31_spill] sm:$0xff] %v4477_v28 }
  0x94   :  { %v4479_v61 = vpop.f32.mrf.mxu3  ;;  %744 = vmatpush.msrb.mxu3 %v4350_v0  ;;  %v4482_v58 = vpop.f32.mrf.mxu1  ;;  %704 = vmatpush.msrb.mxu1 %v4219_v33 }
  0x95   :  { %6687 = vst [vmem:[#allocation32_spill] sm:$0xff] %v4482_v58 }
  0x96   :  { %745 = vmatpush.msrb.mxu3 %v4354_v1  ;;  %705 = vmatpush.msrb.mxu1 %v4250_v38 }
  0x98   :  { %746 = vmatpush.msrb.mxu3 %v4360_v2  ;;  %706 = vmatpush.msrb.mxu1 %v4258_v41 }
  0x99   :  { %596 = vmatmul.f32.vlgmr.msra.gmra.mxu3 %v6448_v62 }
  0x9a   :  { %747 = vmatpush.msrb.mxu3 %v4370_v4  ;;  %v4496_v28 = vpop.f32.mrf.mxu2  ;;  %707 = vmatpush.msrb.mxu1 %v4274_v44 }
  0x9b   :  { %6690 = vst [vmem:[#allocation35_spill] sm:$0xff] %v4496_v28 }
  0x9c   :  { %v4498_v58 = vpop.f32.mrf.mxu3  ;;  %748 = vmatpush.msrb.mxu3 %v4377_v6  ;;  %v4502_v54 = vpop.f32.mrf.mxu1  ;;  %708 = vmatpush.msrb.mxu1 %v4284_v48 }
  0x9d   :  { %6691 = vst [vmem:[#allocation36_spill] sm:$0xff] %v4498_v58  ;;  %v6450_v58 = vmov 0  }
  0x9e   :  { %6692 = vst [vmem:[#allocation37_spill] sm:$0xff] %v4502_v54  ;;  %749 = vmatpush.msrb.mxu3 %v4385_v8  ;;  %709 = vmatpush.msrb.mxu1 %v4318_v55 }
  0x9f   :  { %3421 = vmatmul.msk.bf16.gmra.mxu1 %vm165_vm0, %v4202_v29  ;;  %3429 = vmatmul.msk.bf16.gmra.mxu2 %vm165_vm0, %v4202_v29 }
  0xa0   :  { %750 = vmatpush.msrb.mxu3 %v4389_v9  ;;  %710 = vmatpush.msrb.mxu1 %v4330_v59 }
  0xa1   :  { %3596 = vset.pattern.permute.xlu0 %v6450_v58  ;;  %3597 = vset.pattern.permute.xlu1 %v6450_v58 }
  0xa2   :  { %v4519_v62 = vpop.f32.mrf.mxu2  ;;  %751 = vmatpush.msrb.mxu3 %v4393_v10  ;;  %711 = vmatpush.msrb.mxu1 %v4368_v3 }
  0xa3   :  { %6695 = vst [vmem:[#allocation40_spill] sm:$0xff] %v4519_v62  ;;  %v4542_v62 = vld [vmem:[%s6433_s0] sm:$0xff]  ;;  %3598 = vset.pattern.permute.xlu2 %v6450_v58 }
  0xa4   :  { %v4522_v28 = vpop.f32.mrf.mxu3  ;;  %v4526_v54 = vpop.f32.mrf.mxu1  ;;  %752 = vmatpush.msrb.mxu3 %v4397_v11  ;;  %6699 = vst [vmem:[#allocation44_spill] sm:$0xff] %v4542_v62  ;;  %712 = vmatpush.msrb.mxu1 %v4380_v7  ;;  %vm668_vm1 = vcmp.gt.s32.totalorder %v4542_v62, 0  ;;  %vm832_vm2 = vcmp.gt.s32.totalorder %v4542_v62, 1  ;;  %vm1652_vm3 = vcmp.gt.s32.totalorder %v4542_v62, 6  ;;  %vm2144_vm4 = vcmp.gt.s32.totalorder %v4542_v62, 9 }
  0xa5   :  { %6696 = vst [vmem:[#allocation41_spill] sm:$0xff] %v4522_v28  ;;  %vm2636_vm5 = vcmp.gt.s32.totalorder %v4542_v62, 12  ;;  %vm3128_vm6 = vcmp.gt.s32.totalorder %v4542_v62, 15 }
  0xa6   :  { %6697 = vst [vmem:[#allocation42_spill] sm:$0xff] %v4526_v54  ;;  %753 = vmatpush.msrb.mxu3 %v4405_v13  ;;  %713 = vmatpush.msrb.mxu1 %v4417_v15 }
  0xa8   :  { %754 = vmatpush.msrb.mxu3 %v4415_v14  ;;  %714 = vmatpush.msrb.mxu1 %v4432_v20 }
  0xaa   :  { %v4537_v29 = vpop.f32.mrf.mxu2  ;;  %755 = vmatpush.msrb.mxu3 %v4422_v16  ;;  %715 = vmatpush.msrb.mxu1 %v4452_v24 }
  0xab   :  { %6698 = vst [vmem:[#allocation43_spill] sm:$0xff] %v4537_v29  ;;  %v669_v29 = vsel %vm668_vm1, 1, %v6450_v58 }
  0xac   :  { %v4545_v54 = vpop.f32.mrf.mxu3  ;;  %v4550_v28 = vpop.f32.mrf.mxu1  ;;  %671 = vperm.xlu0 %3596, %v669_v29   ;;  %756 = vmatpush.msrb.mxu3 %v4426_v17 }
  0xad   :  { %6700 = vst [vmem:[#allocation45_spill] sm:$0xff] %v4545_v54  ;;  %716 = vmatpush.msrb.mxu1 %v4459_v27  ;;  %v833_v54 = vsel %vm832_vm2, 1, %v6450_v58 }
  0xae   :  { %6701 = vst [vmem:[#allocation46_spill] sm:$0xff] %v4550_v28  ;;  %757 = vmatpush.msrb.mxu3 %v4434_v21 }
  0xaf   :  { %3422 = vmatmul.msk.bf16.gmra.mxu1 %vm165_vm0, %v4242_v37  ;;  %3430 = vmatmul.msk.bf16.gmra.mxu2 %vm165_vm0, %v4242_v37 }
  0xb0   :  { %758 = vmatpush.msrb.mxu3 %v4440_v22  ;;  %717 = vmatpush.msrb.mxu1 %v4472_v36 }
  0xb2   :  { %v4566_v29 = vpop.f32.mrf.mxu2  ;;  %907 = vmatpush.msra.mxu3 %v4346_v63  ;;  %718 = vmatpush.msrb.mxu1 %v4486_v19 }
  0xb3   :  { %6702 = vst [vmem:[#allocation47_spill] sm:$0xff] %v4566_v29 }
  0xb4   :  { %v4570_v28 = vpop.f32.mrf.mxu3  ;;  %v4575_v37 = vpop.f32.mrf.mxu1  ;;  %835 = vperm.xlu0 %3596, %v833_v54   ;;  %908 = vmatpush.msra.mxu3 %v4350_v0 }
  0xb5   :  { %6703 = vst [vmem:[#allocation48_spill] sm:$0xff] %v4570_v28 }
  0xb6   :  { %6704 = vst [vmem:[#allocation49_spill] sm:$0xff] %v4575_v37  ;;  %909 = vmatpush.msra.mxu3 %v4354_v1  ;;  %v6707_v37 = vmov 0  }
  0xb7   :  { %v1653_v28 = vsel %vm1652_vm3, 1, %v6707_v37  ;;  %v2145_v51 = vsel %vm2144_vm4, 1, %v6707_v37 }
  0xb8   :  { %910 = vmatpush.msra.mxu3 %v4360_v2 }
  0xba   :  { %v4586_v29 = vpop.f32.mrf.mxu2  ;;  %911 = vmatpush.msra.mxu3 %v4370_v4 }
  0xbb   :  { %6705 = vst [vmem:[#allocation50_spill] sm:$0xff] %v4586_v29  ;;  %v6708_v29 = vmov 0.0  }
  0xbc   :  { %v4589_v58 = vpop.f32.mrf.mxu3  ;;  %v4593_v54 = vpop.f32.mrf.mxu1  ;;  %1655 = vperm.xlu0 %3596, %v1653_v28   ;;  %912 = vmatpush.msra.mxu3 %v4377_v6 }
  0xbd   :  { %6706 = vst [vmem:[#allocation51_spill] sm:$0xff] %v4589_v58 }
  0xbe   :  { %913 = vmatpush.msra.mxu3 %v4385_v8 }
  0xbf   :  { %556 = vmatmul.f32.vlgmr.msra.gmra.mxu1 %v6708_v29  ;;  %576 = vmatmul.f32.vlgmr.msra.gmra.mxu2 %v6708_v29 }
  0xc0   :  { %867 = vmatpush.msra.mxu1 %v4215_v31  ;;  %887 = vmatpush.msra.mxu2 %v4225_v35 }
  0xc1   :  { %914 = vmatpush.msra.mxu3 %v4389_v9  ;;  %v2637_v9 = vsel %vm2636_vm5, 1, %v6707_v37 }
  0xc2   :  { %v4605_v58 = vpop.f32.mrf.mxu2  ;;  %868 = vmatpush.msra.mxu1 %v4219_v33  ;;  %888 = vmatpush.msra.mxu2 %v4254_v40 }
  0xc3   :  { %915 = vmatpush.msra.mxu3 %v4393_v10 }
  0xc4   :  { %v4608_v28 = vpop.f32.mrf.mxu3  ;;  %v4613_v29 = vpop.f32.mrf.mxu1  ;;  %869 = vmatpush.msra.mxu1 %v4250_v38  ;;  %2147 = vperm.xlu0 %3596, %v2145_v51  }
  0xc5   :  { %6709 = vst [vmem:[#allocation52_spill] sm:$0xff] %v4608_v28  ;;  %889 = vmatpush.msra.mxu2 %v4262_v43  ;;  %916 = vmatpush.msra.mxu3 %v4397_v11 }
  0xc6   :  { %6710 = vst [vmem:[#allocation53_spill] sm:$0xff] %v4613_v29  ;;  %870 = vmatpush.msra.mxu1 %v4258_v41 }
  0xc7   :  { %890 = vmatpush.msra.mxu2 %v4282_v47  ;;  %917 = vmatpush.msra.mxu3 %v4405_v13 }
  0xc8   :  { %871 = vmatpush.msra.mxu1 %v4274_v44 }
  0xc9   :  { %891 = vmatpush.msra.mxu2 %v4292_v50  ;;  %918 = vmatpush.msra.mxu3 %v4415_v14 }
  0xca   :  { %v4624_v28 = vpop.f32.mrf.mxu2  ;;  %872 = vmatpush.msra.mxu1 %v4284_v48 }
  0xcb   :  { %6711 = vst [vmem:[#allocation54_spill] sm:$0xff] %v4624_v28  ;;  %892 = vmatpush.msra.mxu2 %v4325_v57  ;;  %919 = vmatpush.msra.mxu3 %v4422_v16 }
  0xcc   :  { %v4630_v51 = vpop.f32.mrf.mxu3  ;;  %v4632_v29 = vpop.f32.mrf.mxu1  ;;  %873 = vmatpush.msra.mxu1 %v4318_v55  ;;  %2639 = vperm.xlu0 %3596, %v2637_v9  }
  0xcd   :  { %6712 = vst [vmem:[#allocation55_spill] sm:$0xff] %v4630_v51  ;;  %893 = vmatpush.msra.mxu2 %v4335_v60  ;;  %920 = vmatpush.msra.mxu3 %v4426_v17 }
  0xce   :  { %6713 = vst [vmem:[#allocation56_spill] sm:$0xff] %v4632_v29  ;;  %874 = vmatpush.msra.mxu1 %v4330_v59  ;;  %v3129_v29 = vsel %vm3128_vm6, 1, %v6707_v37 }
  0xcf   :  { %894 = vmatpush.msra.mxu2 %v4375_v5  ;;  %921 = vmatpush.msra.mxu3 %v4434_v21 }
  0xd0   :  { %875 = vmatpush.msra.mxu1 %v4368_v3 }
  0xd1   :  { %895 = vmatpush.msra.mxu2 %v4403_v12  ;;  %922 = vmatpush.msra.mxu3 %v4440_v22 }
  0xd2   :  { %v4644_v51 = vpop.f32.mrf.mxu2  ;;  %876 = vmatpush.msra.mxu1 %v4380_v7 }
  0xd3   :  { %6714 = vst [vmem:[#allocation57_spill] sm:$0xff] %v4644_v51  ;;  %896 = vmatpush.msra.mxu2 %v4430_v18 }
  0xd4   :  { %v4650_v9 = vpop.f32.mrf.mxu1  ;;  %877 = vmatpush.msra.mxu1 %v4417_v15  ;;  %3131 = vperm.xlu0 %3596, %v3129_v29   ;;  %v4656_v51 = vpop.f32.mrf.mxu3 }
  0xd5   :  { %6715 = vst [vmem:[#allocation58_spill] sm:$0xff] %v4650_v9  ;;  %897 = vmatpush.msra.mxu2 %v4445_v23 }
  0xd6   :  { %6716 = vst [vmem:[#allocation59_spill] sm:$0xff] %v4656_v51  ;;  %878 = vmatpush.msra.mxu1 %v4432_v20 }
  0xd7   :  { %898 = vmatpush.msra.mxu2 %v4457_v25 }
  0xd8   :  { %879 = vmatpush.msra.mxu1 %v4452_v24 }
  0xd9   :  { %899 = vmatpush.msra.mxu2 %v4465_v30 }
  0xda   :  { %v4663_v9 = vpop.f32.mrf.mxu2  ;;  %880 = vmatpush.msra.mxu1 %v4459_v27 }
  0xdb   :  { %6717 = vst [vmem:[#allocation60_spill] sm:$0xff] %v4663_v9  ;;  %900 = vmatpush.msra.mxu2 %v4484_v56 }
  0xdc   :  { %v4667_v29 = vpop.f32.mrf.mxu1  ;;  %881 = vmatpush.msra.mxu1 %v4472_v36  ;;  %v4673_v51 = vpop.f32.mrf.mxu3 }
  0xdd   :  { %6718 = vst [vmem:[#allocation61_spill] sm:$0xff] %v4667_v29  ;;  %901 = vmatpush.msra.mxu2 %v4504_v53 }
  0xde   :  { %882 = vmatpush.msra.mxu1 %v4486_v19  ;;  %6719 = vst [vmem:[#allocation62_spill] sm:$0xff] %v4673_v51 }
  0xdf   :  { %902 = vmatpush.msra.mxu2 %v4507_v52 }
  0xe2   :  { %v4675_v28 = vpop.f32.mrf.mxu2 }
  0xe3   :  { %6720 = vst [vmem:[#allocation63_spill] sm:$0xff] %v4675_v28 }
  0xe4   :  { %v4677_v37 = vpop.f32.mrf.mxu1  ;;  %v4679_v9 = vpop.f32.mrf.mxu3 }
  0xe5   :  { %6721 = vst [vmem:[#allocation64_spill] sm:$0xff] %v4677_v37 }
  0xe6   :  { %6722 = vst [vmem:[#allocation65_spill] sm:$0xff] %v4679_v9 }
  0xea   :  { %v4681_v62 = vpop.f32.mrf.mxu2 }
  0xeb   :  { %6723 = vst [vmem:[#allocation66_spill] sm:$0xff] %v4681_v62 }
  0xec   :  { %v4683_v22 = vpop.f32.mrf.mxu1  ;;  %v4687_v21 = vpop.f32.mrf.mxu3 }
  0xed   :  { %6724 = vst [vmem:[#allocation67_spill] sm:$0xff] %v4683_v22 }
  0xee   :  { %6726 = vst [vmem:[#allocation69_spill] sm:$0xff] %v4687_v21 }
  0xf2   :  { %v4685_v29 = vpop.f32.mrf.mxu2 }
  0xf3   :  { %6725 = vst [vmem:[#allocation68_spill] sm:$0xff] %v4685_v29 }
  0xf4   :  { %v4689_v53 = vpop.f32.mrf.mxu1  ;;  %v4695_v51 = vpop.f32.mrf.mxu3 }
  0xf5   :  { %6727 = vst [vmem:[#allocation70_spill] sm:$0xff] %v4689_v53 }
  0xf6   :  { %6730 = vst [vmem:[#allocation73_spill] sm:$0xff] %v4695_v51 }
  0xfa   :  { %v4691_v19 = vpop.f32.mrf.mxu2 }
  0xfb   :  { %6728 = vst [vmem:[#allocation71_spill] sm:$0xff] %v4691_v19 }
  0xfc   :  { %v4693_v52 = vpop.f32.mrf.mxu1  ;;  %v4701_v9 = vpop.f32.mrf.mxu3 }
  0xfd   :  { %6729 = vst [vmem:[#allocation72_spill] sm:$0xff] %v4693_v52 }
  0xfe   :  { %6733 = vst [vmem:[#allocation76_spill] sm:$0xff] %v4701_v9  ;;  %v75_v9 = vld [vmem:[%s6437_s4] sm:$0xf] }
 0x102   :  { %v4697_v28 = vpop.f32.mrf.mxu2 }
 0x103   :  { %6731 = vst [vmem:[#allocation74_spill] sm:$0xff] %v4697_v28 }
 0x104   :  { %v4699_v37 = vpop.f32.mrf.mxu1  ;;  %v4707_v29 = vpop.f32.mrf.mxu3 }
 0x105   :  { %6732 = vst [vmem:[#allocation75_spill] sm:$0xff] %v4699_v37  ;;  %v199_v37 = vpop.f32.mrf.mxu0 }
 0x106   :  { %6736 = vst [vmem:[#allocation79_spill] sm:$0xff] %v4707_v29 }
 0x10a   :  { %v4703_v62 = vpop.f32.mrf.mxu2 }
 0x10b   :  { %6734 = vst [vmem:[#allocation77_spill] sm:$0xff] %v4703_v62  ;;  %v4722_v62 = vperm.slane %v75_v9, 0 }
 0x10c   :  { %v4705_v22 = vpop.f32.mrf.mxu1  ;;  %v4715_v52 = vpop.f32.mrf.mxu3 }
 0x10d   :  { %6735 = vst [vmem:[#allocation78_spill] sm:$0xff] %v4705_v22  ;;  %v200_v29 = vadd.f32 %v199_v37, %v4722_v62 }
 0x10e   :  { %6740 = vst [vmem:[#allocation83_spill] sm:$0xff] %v4715_v52  ;;  %v4731_v52 = vperm.slane %v75_v9, 3 }
 0x10f   :  { %6742 = vst [vmem:[#allocation85_spill] sm:$0xff] %v4722_v62  ;;  %v4739_v62 = vperm.slane %v75_v9, 1 }
 0x110   :  { %6746 = vst [vmem:[#allocation89_spill] sm:$0xff] %v4731_v52  ;;  %v347_v56 = vadd.f32 %v4479_v61, %v4731_v52 }
 0x111   :  { %6749 = vst [vmem:[#allocation92_spill] sm:$0xff] %v4739_v62 }
 0x112   :  { %v4709_v21 = vpop.f32.mrf.mxu2 }
 0x113   :  { %6737 = vst [vmem:[#allocation80_spill] sm:$0xff] %v4709_v21 }
 0x114   :  { %v4711_v53 = vpop.f32.mrf.mxu1 }
 0x115   :  { %6738 = vst [vmem:[#allocation81_spill] sm:$0xff] %v4711_v53  ;;  %v537_v53 = vpop.f32.mrf.mxu3 }
 0x116   :  { %v600_v28 = vadd.f32 %v537_v53, %v200_v29  ;;  %v249_v29 = vadd.f32 %v4593_v54, %v4739_v62 }
 0x11a   :  { %v4713_v19 = vpop.f32.mrf.mxu2 }
 0x11b   :  { %6739 = vst [vmem:[#allocation82_spill] sm:$0xff] %v4713_v19  ;;  %v3439_v19 = vmul.f32 -1.442695, %v600_v28 }
 0x11c   :  { %v4717_v51 = vpop.f32.mrf.mxu1 }
 0x11d   :  { %6741 = vst [vmem:[#allocation84_spill] sm:$0xff] %v4717_v51  ;;  %3600 = vpow2.f32 %v3439_v19  ;;  %v597_v17 = vpop.f32.mrf.mxu3 }
 0x11e   :  { %v603_v27 = vadd.f32 %v597_v17, %v347_v56  ;;  %v672_v13 = vpop.permute.xlu0 %671 }
 0x11f   :  { %vm673_vm15 = vcmp.eq.s32.totalorder %v672_v13, 1 }
 0x122   :  { %v4724_v22 = vpop.f32.mrf.mxu2 }
 0x123   :  { %6743 = vst [vmem:[#allocation86_spill] sm:$0xff] %v4724_v22  ;;  %v3601_v37 = vpop.eup %3600 }
 0x124   :  { %v4727_v21 = vpop.f32.mrf.mxu1  ;;  %v607_v28 = vadd.f32 1.0, %v3601_v37 }
 0x125   :  { %6744 = vst [vmem:[#allocation87_spill] sm:$0xff] %v4727_v21  ;;  %v3441_v21 = vmul.f32 -1.442695, %v603_v27  ;;  %v4747_v27 = vperm.slane %v75_v9, 2 }
 0x126   :  { %vm613_vm7 = vweird.f32 %v607_v28 }
 0x127   :  { %3602 = vpow2.f32 %v3441_v21  ;;  %6752 = vst [vmem:[#allocation95_spill] sm:$0xff] %v4747_v27  ;;  %v298_v21 = vadd.f32 %v4605_v58, %v4747_v27 }
 0x128   :  { %3604 = vrcp.f32 %v607_v28 }
 0x12a   :  { %v4733_v51 = vpop.f32.mrf.mxu2 }
 0x12b   :  { %6747 = vst [vmem:[#allocation90_spill] sm:$0xff] %v4733_v51 }
 0x12c   :  { %v4729_v36 = vpop.f32.mrf.mxu1 }
 0x12d   :  { %6745 = vst [vmem:[#allocation88_spill] sm:$0xff] %v4729_v36  ;;  %v3603_v16 = vpop.eup %3602 }
 0x12e   :  { %v3605_v56 = vpop.eup %3604  ;;  %v646_v17 = vadd.f32 1.0, %v3603_v16  ;;  %v619_v16 = vand.u32 2147483648, %v607_v28 }
 0x12f   :  { %vm614_vm8 = vweird.f32 %v3605_v56 }
 0x130   :  { %vm4751_vm9 = vmor %vm613_vm7, %vm614_vm8  ;;  %v620_v58 = vor.u32 1.1754944e-38, %v619_v16  ;;  %vm652_vm2 = vweird.f32 %v646_v17 }
 0x132   :  { %v4741_v53 = vpop.f32.mrf.mxu2 }
 0x133   :  { %6750 = vst [vmem:[#allocation93_spill] sm:$0xff] %v4741_v53 }
 0x134   :  { %v4737_v22 = vpop.f32.mrf.mxu1 }
 0x135   :  { %6748 = vst [vmem:[#allocation91_spill] sm:$0xff] %v4737_v22  ;;  %v609_v22 = vmul.f32 %v3605_v56, %v607_v28 }
 0x137   :  { %v610_v37 = vsub.f32 1.0, %v609_v22 }
 0x13a   :  { %v4745_v61 = vpop.f32.mrf.mxu2 }
 0x13b   :  { %6751 = vst [vmem:[#allocation94_spill] sm:$0xff] %v4745_v61  ;;  %v617_v61 = vand.u32 2147483647, %v607_v28 }
 0x13c   :  { %v557_v19 = vpop.f32.mrf.mxu1 }
 0x13d   :  { %v601_v36 = vadd.f32 %v557_v19, %v249_v29  ;;  %v611_v29 = vmul.f32 %v3605_v56, %v610_v37  ;;  %vm618_vm10 = vcmp.eq.f32.partialorder %v617_v61, 8.507059e+37 }
 0x13f   :  { %v3440_v51 = vmul.f32 -1.442695, %v601_v36  ;;  %v612_v30 = vadd.f32 %v3605_v56, %v611_v29 }
 0x141   :  { %3606 = vpow2.f32 %v3440_v51 }
 0x142   :  { %3608 = vrcp.f32 %v646_v17  ;;  %v577_v54 = vpop.f32.mrf.mxu2 }
 0x143   :  { %v602_v36 = vadd.f32 %v577_v54, %v298_v21  ;;  %v616_v54 = vsel %vm4751_vm9, %v3605_v56, %v612_v30  ;;  %v658_v56 = vand.u32 2147483648, %v646_v17 }
 0x144   :  { %v621_v25 = vsel %vm618_vm10, %v620_v58, %v616_v54 }
 0x147   :  { %v3607_v52 = vpop.eup %3606 }
 0x148   :  { %v626_v53 = vadd.f32 1.0, %v3607_v52  ;;  %v3609_v19 = vpop.eup %3608 }
 0x149   :  { %v648_v9 = vmul.f32 %v3609_v19, %v646_v17  ;;  %vm653_vm1 = vweird.f32 %v3609_v19 }
 0x14a   :  { %3610 = vrcp.f32 %v626_v53  ;;  %v638_v24 = vand.u32 2147483648, %v626_v53  ;;  %v636_v21 = vand.u32 2147483647, %v626_v53  ;;  %vm632_vm12 = vweird.f32 %v626_v53  ;;  %vm654_vm3 = vmor %vm652_vm2, %vm653_vm1 }
 0x14b   :  { %3612 = vtanh.f32 %v602_v36  ;;  %v649_v27 = vsub.f32 1.0, %v648_v9 }
 0x14c   :  { %v639_v14 = vor.u32 1.1754944e-38, %v638_v24  ;;  %vm637_vm14 = vcmp.eq.f32.partialorder %v636_v21, 8.507059e+37  ;;  %v656_v24 = vand.u32 2147483647, %v646_v17 }
 0x14d   :  { %v650_v36 = vmul.f32 %v3609_v19, %v649_v27 }
 0x14e   :  { %vm657_vm4 = vcmp.eq.f32.partialorder %v656_v24, 8.507059e+37  ;;  %v6789_v24 = vld [vmem:[#allocation54_spill] sm:$0xff] }
 0x14f   :  { %v651_v30 = vadd.f32 %v3609_v19, %v650_v36 }
 0x150   :  { %v3611_v51 = vpop.eup %3610 }
 0x151   :  { %v628_v62 = vmul.f32 %v3611_v51, %v626_v53  ;;  %vm633_vm11 = vweird.f32 %v3611_v51  ;;  %v3613_v29 = vpop.eup %3612  ;;  %v655_v9 = vsel %vm654_vm3, %v3609_v19, %v651_v30  ;;  %v6785_v19 = vld [vmem:[#allocation36_spill] sm:$0xff] }
 0x152   :  { %vm634_vm13 = vmor %vm632_vm12, %vm633_vm11  ;;  %v663_v16 = vmul.f32 %v3613_v29, %v621_v25 }
 0x153   :  { %v629_v22 = vsub.f32 1.0, %v628_v62 }
 0x155   :  { %v630_v37 = vmul.f32 %v3611_v51, %v629_v22 }
 0x157   :  { %v631_v28 = vadd.f32 %v3611_v51, %v630_v37 }
 0x159   :  { %v635_v20 = vsel %vm634_vm13, %v3611_v51, %v631_v28  ;;  %v659_v51 = vor.u32 1.1754944e-38, %v658_v56  ;;  %v6788_v56 = vld [vmem:[#allocation95_spill] sm:$0xff] }
 0x15a   :  { %v640_v62 = vsel %vm637_vm14, %v639_v14, %v635_v20 }
 0x15b   :  { %v662_v61 = vmul.f32 0.0, %v640_v62  ;;  %v660_v14 = vsel %vm657_vm4, %v659_v51, %v655_v9  ;;  %v6786_v62 = vld [vmem:[#allocation44_spill] sm:$0xff]  ;;  %v300_v9 = vadd.f32 %v6789_v24, %v6788_v56  ;;  %v4880_v24 = vld [vmem:[#allocation6 + $0x1c0] sm:$0xff] }
 0x15c   :  { %vm996_vm5 = vcmp.gt.s32.totalorder %v6786_v62, 2  ;;  %vm1160_vm6 = vcmp.gt.s32.totalorder %v6786_v62, 3  ;;  %vm1816_vm12 = vcmp.gt.s32.totalorder %v6786_v62, 7  ;;  %vm2308_vm3 = vcmp.gt.s32.totalorder %v6786_v62, 10 }
 0x15d   :  { %v664_v22 = vadd.f32 %v663_v16, %v662_v61  ;;  %v6787_v16 = vmov 0  }
 0x15f   :  { %3614 = vtanh.f32 %v664_v22  ;;  %v4758_v53 = vsel %vm673_vm15, %v664_v22, 0.0  ;;  %v997_v22 = vsel %vm996_vm5, 1, %v6787_v16 }
 0x160   :  { %999 = vperm.xlu1 %3597, %v997_v22   ;;  %v4868_v22 = vld [vmem:[#allocation6 + $0x1e0] sm:$0xff] }
 0x165   :  { %v3615_v27 = vpop.eup %3614 }
 0x166   :  { %v666_v20 = vmul.f32 %v3615_v27, %v660_v14 }
 0x168   :  { %3583 = vmatmul.msk.f32.vlgmr.msrb.gmra.mxu0 %vm673_vm15, %v666_v20  ;;  %3584 = vmatmul.msk.f32.vlgmr.msrb.gmra.mxu1 %vm673_vm15, %v666_v20  ;;  %v4763_v25 = vsel %vm673_vm15, %v666_v20, 0.0 }
 0x169   :  { %3585 = vmatmul.msk.f32.vlgmr.msrb.gmra.mxu2 %vm673_vm15, %v666_v20  ;;  %3586 = vmatmul.msk.f32.vlgmr.msrb.gmra.mxu3 %vm673_vm15, %v666_v20  ;;  %v677_v17 = vpack.c.bf16 %v4763_v25, %v4763_v25 }
 0x16a   :  { %1011 = vmatpush.msrb.mxu0 %v4189_v26  ;;  %1031 = vmatpush.msrb.mxu1 %v4215_v31  ;;  %v6755_v26 = vld [vmem:[#allocation17_spill] sm:$0xff] }
 0x16b   :  { %678 = vst [vmem:[#allocation3] sm:$0xf] %v677_v17  ;;  %1051 = vmatpush.msrb.mxu2 %v4225_v35  ;;  %1071 = vmatpush.msrb.mxu3 %v4346_v63  ;;  %v6756_v31 = vld [vmem:[#allocation9_spill] sm:$0xff]  ;;  %v6760_v35 = vld [vmem:[#allocation12_spill] sm:$0xff]  ;;  %v6778_v63 = vld [vmem:[#allocation39_spill] sm:$0xff] }
 0x16c   :  { %1012 = vmatpush.msrb.mxu0 %v4217_v32  ;;  %1032 = vmatpush.msrb.mxu1 %v4219_v33  ;;  %v6757_v32 = vld [vmem:[#allocation10_spill] sm:$0xff]  ;;  %v6758_v33 = vld [vmem:[#allocation11_spill] sm:$0xff] }
 0x16d   :  { %1052 = vmatpush.msrb.mxu2 %v4254_v40  ;;  %1072 = vmatpush.msrb.mxu3 %v4350_v0  ;;  %v6763_v40 = vld [vmem:[#allocation19_spill] sm:$0xff]  ;;  %v6779_v0 = vld [vmem:[#allocation24_spill] sm:$0xff] }
 0x16e   :  { %1013 = vmatpush.msrb.mxu0 %v4223_v34  ;;  %1033 = vmatpush.msrb.mxu1 %v4250_v38  ;;  %v6759_v34 = vld [vmem:[#allocation18_spill] sm:$0xff] }
 0x16f   :  { %1053 = vmatpush.msrb.mxu2 %v4262_v43  ;;  %1073 = vmatpush.msrb.mxu3 %v4354_v1  ;;  %v6761_v38 = vld [vmem:[#allocation22_spill] sm:$0xff]  ;;  %v6766_v43 = vld [vmem:[#allocation29_spill] sm:$0xff]  ;;  %v201_v1 = vpop.f32.mrf.mxu0 }
 0x170   :  { %1014 = vmatpush.msrb.mxu0 %v4252_v39  ;;  %1034 = vmatpush.msrb.mxu1 %v4258_v41  ;;  %v6762_v39 = vld [vmem:[#allocation26_spill] sm:$0xff]  ;;  %v6764_v41 = vld [vmem:[#allocation13_spill] sm:$0xff] }
 0x171   :  { %1054 = vmatpush.msrb.mxu2 %v4282_v47  ;;  %1074 = vmatpush.msrb.mxu3 %v4360_v2  ;;  %v6770_v47 = vld [vmem:[#allocation33_spill] sm:$0xff] }
 0x172   :  { %1015 = vmatpush.msrb.mxu0 %v4260_v42  ;;  %1035 = vmatpush.msrb.mxu1 %v4274_v44  ;;  %v6765_v42 = vld [vmem:[#allocation25_spill] sm:$0xff]  ;;  %v6767_v44 = vld [vmem:[#allocation20_spill] sm:$0xff] }
 0x173   :  { %1055 = vmatpush.msrb.mxu2 %v4292_v50  ;;  %1075 = vmatpush.msrb.mxu3 %v4370_v4  ;;  %v6773_v50 = vld [vmem:[#allocation30_spill] sm:$0xff]  ;;  %v6781_v4 = vld [vmem:[#allocation92_spill] sm:$0xff] }
 0x174   :  { %1016 = vmatpush.msrb.mxu0 %v4276_v45  ;;  %1036 = vmatpush.msrb.mxu1 %v4284_v48  ;;  %v6768_v45 = vld [vmem:[#allocation14_spill] sm:$0xff]  ;;  %v6771_v48 = vld [vmem:[#allocation21_spill] sm:$0xff] }
 0x175   :  { %1056 = vmatpush.msrb.mxu2 %v4325_v57  ;;  %1076 = vmatpush.msrb.mxu3 %v4377_v6  ;;  %v6775_v57 = vld [vmem:[#allocation23_spill] sm:$0xff] }
 0x176   :  { %1017 = vmatpush.msrb.mxu0 %v4278_v46  ;;  %1037 = vmatpush.msrb.mxu1 %v4318_v55  ;;  %v6769_v46 = vld [vmem:[#allocation27_spill] sm:$0xff]  ;;  %v6774_v55 = vld [vmem:[#allocation38_spill] sm:$0xff] }
 0x177   :  { %1057 = vmatpush.msrb.mxu2 %v4335_v60  ;;  %1077 = vmatpush.msrb.mxu3 %v4385_v8  ;;  %v6777_v60 = vld [vmem:[#allocation34_spill] sm:$0xff]  ;;  %v4833_v2 = vpop.f32.mrf.mxu0 }
 0x178   :  { %1018 = vmatpush.msrb.mxu0 %v4287_v49  ;;  %1038 = vmatpush.msrb.mxu1 %v4330_v59  ;;  %v6772_v49 = vld [vmem:[#allocation15_spill] sm:$0xff]  ;;  %v6776_v59 = vld [vmem:[#allocation16_spill] sm:$0xff] }
 0x179   :  { %1058 = vmatpush.msrb.mxu2 %v4375_v5  ;;  %1078 = vmatpush.msrb.mxu3 %v6755_v26  ;;  %v6782_v5 = vld [vmem:[#allocation53_spill] sm:$0xff] }
 0x17a   :  { %1019 = vmatpush.msrb.mxu0 %v6756_v31  ;;  %1039 = vmatpush.msrb.mxu1 %v4368_v3  ;;  %v251_v6 = vadd.f32 %v6782_v5, %v6781_v4 }
 0x17b   :  { %1059 = vmatpush.msrb.mxu2 %v4403_v12  ;;  %1079 = vmatpush.msrb.mxu3 %v4393_v10 }
 0x17c   :  { %1020 = vmatpush.msrb.mxu0 %v6757_v32  ;;  %1040 = vmatpush.msrb.mxu1 %v4380_v7  ;;  %v6783_v7 = vld [vmem:[#allocation85_spill] sm:$0xff]  ;;  %v1161_v32 = vsel %vm1160_vm6, 1, %v6787_v16 }
 0x17d   :  { %1060 = vmatpush.msrb.mxu2 %v4430_v18  ;;  %1080 = vmatpush.msrb.mxu3 %v4397_v11  ;;  %v202_v8 = vadd.f32 %v201_v1, %v6783_v7 }
 0x17e   :  { %1021 = vmatpush.msrb.mxu0 %v6758_v33  ;;  %1041 = vmatpush.msrb.mxu1 %v4417_v15 }
 0x17f   :  { %1061 = vmatpush.msrb.mxu2 %v4445_v23  ;;  %1081 = vmatpush.msrb.mxu3 %v6759_v34  ;;  %v4835_v3 = vpop.f32.mrf.mxu0  ;;  %v6784_v23 = vld [vmem:[#allocation89_spill] sm:$0xff] }
 0x180   :  { %1022 = vmatpush.msrb.mxu0 %v6760_v35  ;;  %1042 = vmatpush.msrb.mxu1 %v6761_v38  ;;  %6780 = vst [vmem:[#allocation17_spill] sm:$0xff] %v4835_v3  ;;  %v349_v52 = vadd.f32 %v6785_v19, %v6784_v23  ;;  %v5024_v3 = vld [vmem:[#allocation6 + $0x40] sm:$0xff] }
 0x181   :  { %1062 = vmatpush.msrb.mxu2 %v6762_v39  ;;  %1082 = vmatpush.msrb.mxu3 %v6763_v40  ;;  %6807 = vst [vmem:[#allocation30_spill] sm:$0xff] %v5024_v3 }
 0x182   :  { %1023 = vmatpush.msrb.mxu0 %v6764_v41  ;;  %1043 = vmatpush.msrb.mxu1 %v6765_v42 }
 0x183   :  { %1063 = vmatpush.msrb.mxu2 %v6766_v43  ;;  %1083 = vmatpush.msrb.mxu3 %v6767_v44 }
 0x184   :  { %1024 = vmatpush.msrb.mxu0 %v6768_v45  ;;  %1044 = vmatpush.msrb.mxu1 %v6769_v46 }
 0x185   :  { %1064 = vmatpush.msrb.mxu2 %v6770_v47  ;;  %1084 = vmatpush.msrb.mxu3 %v6771_v48 }
 0x186   :  { %1025 = vmatpush.msrb.mxu0 %v6772_v49  ;;  %1045 = vmatpush.msrb.mxu1 %v6773_v50 }
 0x187   :  { %1065 = vmatpush.msrb.mxu2 %v6774_v55  ;;  %1085 = vmatpush.msrb.mxu3 %v6775_v57 }
 0x188   :  { %1026 = vmatpush.msrb.mxu0 %v6776_v59  ;;  %1046 = vmatpush.msrb.mxu1 %v6777_v60 }
 0x189   :  { %1066 = vmatpush.msrb.mxu2 %v6778_v63  ;;  %1086 = vmatpush.msrb.mxu3 %v6779_v0 }
 0x18a   :  { %1163 = vperm.xlu1 %3597, %v1161_v32   ;;  %v4907_v32 = vld [vmem:[#allocation6 + $0x188] sm:$0xff] }
 0x1e5   :  { %v700_v10 = vpop.f32.mrf.mxu0  ;;  %v720_v11 = vpop.f32.mrf.mxu1 }
 0x1e6   :  { %v763_v12 = vadd.f32 %v700_v10, %v202_v8  ;;  %v764_v13 = vadd.f32 %v720_v11, %v251_v6  ;;  %v1817_v6 = vsel %vm1816_vm12, 1, %v6787_v16  ;;  %v836_v11 = vpop.permute.xlu0 %835 }
 0x1e7   :  { %1819 = vperm.xlu1 %3597, %v1817_v6   ;;  %vm837_vm1 = vcmp.eq.s32.totalorder %v836_v11, 1  ;;  %v4970_v6 = vld [vmem:[#allocation6 + $0xf0] sm:$0xff]  ;;  %v4979_v11 = vld [vmem:[#allocation6 + $0xc8] sm:$0xff] }
 0x1e8   :  { %v3442_v15 = vmul.f32 -1.442695, %v763_v12  ;;  %v3443_v18 = vmul.f32 -1.442695, %v764_v13  ;;  %6792 = vst [vmem:[#allocation11_spill] sm:$0xff] %v4979_v11 }
 0x1ea   :  { %3616 = vpow2.f32 %v3442_v15 }
 0x1eb   :  { %3618 = vpow2.f32 %v3443_v18 }
 0x1ec   :  { %v760_v58 = vpop.f32.mrf.mxu3  ;;  %v740_v61 = vpop.f32.mrf.mxu2 }
 0x1ed   :  { %v766_v37 = vadd.f32 %v760_v58, %v349_v52  ;;  %v765_v14 = vadd.f32 %v740_v61, %v300_v9  ;;  %v2309_v58 = vsel %vm2308_vm3, 1, %v6787_v16  ;;  %v4883_v9 = vld [vmem:[#allocation6 + $0x1c8] sm:$0xff] }
 0x1ef   :  { %v3444_v54 = vmul.f32 -1.442695, %v766_v37  ;;  %2311 = vperm.xlu1 %3597, %v2309_v58   ;;  %v4997_v58 = vld [vmem:[#allocation6 + $0xb8] sm:$0xff] }
 0x1f0   :  { %v3617_v21 = vpop.eup %3616  ;;  %6798 = vst [vmem:[#allocation13_spill] sm:$0xff] %v4997_v58 }
 0x1f1   :  { %v3619_v28 = vpop.eup %3618  ;;  %v770_v29 = vadd.f32 1.0, %v3617_v21  ;;  %3620 = vpow2.f32 %v3444_v54 }
 0x1f2   :  { %v789_v36 = vadd.f32 1.0, %v3619_v28 }
 0x1f3   :  { %3622 = vrcp.f32 %v770_v29  ;;  %v782_v34 = vand.u32 2147483648, %v770_v29  ;;  %v780_v39 = vand.u32 2147483647, %v770_v29  ;;  %vm776_vm10 = vweird.f32 %v770_v29 }
 0x1f4   :  { %3624 = vrcp.f32 %v789_v36  ;;  %v801_v35 = vand.u32 2147483648, %v789_v36  ;;  %v799_v41 = vand.u32 2147483647, %v789_v36  ;;  %vm795_vm9 = vweird.f32 %v789_v36 }
 0x1f5   :  { %v783_v44 = vor.u32 1.1754944e-38, %v782_v34  ;;  %vm781_vm14 = vcmp.eq.f32.partialorder %v780_v39, 8.507059e+37  ;;  %v4913_v34 = vld [vmem:[#allocation6 + $0x198] sm:$0xff]  ;;  %v4922_v39 = vld [vmem:[#allocation6 + $0x170] sm:$0xff] }
 0x1f6   :  { %v802_v48 = vor.u32 1.1754944e-38, %v801_v35  ;;  %vm800_vm15 = vcmp.eq.f32.partialorder %v799_v41, 8.507059e+37  ;;  %v4916_v35 = vld [vmem:[#allocation6 + $0x160] sm:$0xff] }
 0x1f7   :  { %v3621_v30 = vpop.eup %3620  ;;  %v4928_v41 = vld [vmem:[#allocation6 + $0x140] sm:$0xff] }
 0x1f8   :  { %v809_v51 = vadd.f32 1.0, %v3621_v30  ;;  %v4877_v30 = vld [vmem:[#allocation6 + $0x1f8] sm:$0xff] }
 0x1f9   :  { %v3623_v27 = vpop.eup %3622 }
 0x1fa   :  { %v3625_v20 = vpop.eup %3624  ;;  %v772_v17 = vmul.f32 %v3623_v27, %v770_v29  ;;  %3626 = vrcp.f32 %v809_v51  ;;  %vm777_vm7 = vweird.f32 %v3623_v27  ;;  %v821_v15 = vand.u32 2147483648, %v809_v51 }
 0x1fb   :  { %v791_v26 = vmul.f32 %v3625_v20, %v789_v36  ;;  %3628 = vtanh.f32 %v765_v14  ;;  %vm796_vm8 = vweird.f32 %v3625_v20  ;;  %vm778_vm11 = vmor %vm776_vm10, %vm777_vm7  ;;  %vm815_vm4 = vweird.f32 %v809_v51  ;;  %v4892_v14 = vld [vmem:[#allocation6 + $0x1a0] sm:$0xff] }
 0x1fc   :  { %v773_v31 = vsub.f32 1.0, %v772_v17  ;;  %vm797_vm13 = vmor %vm795_vm9, %vm796_vm8  ;;  %v819_v19 = vand.u32 2147483647, %v809_v51  ;;  %v822_v37 = vor.u32 1.1754944e-38, %v821_v15  ;;  %vm2800_vm7 = vcmp.gt.s32.totalorder %v6786_v62, 13  ;;  %v4874_v62 = vld [vmem:[#allocation6 + $0x1f0] sm:$0xff] }
 0x1fd   :  { %v792_v33 = vsub.f32 1.0, %v791_v26  ;;  %v2801_v61 = vsel %vm2800_vm7, 1, %v6787_v16  ;;  %v4898_v17 = vld [vmem:[#allocation6 + $0x1b0] sm:$0xff]  ;;  %v4901_v26 = vld [vmem:[#allocation6 + $0x1b8] sm:$0xff]  ;;  %v4988_v15 = vld [vmem:[#allocation6 + $0xa0] sm:$0xff] }
 0x1fe   :  { %v774_v38 = vmul.f32 %v3623_v27, %v773_v31  ;;  %vm820_vm6 = vcmp.eq.f32.partialorder %v819_v19, 8.507059e+37  ;;  %2803 = vperm.xlu1 %3597, %v2801_v61   ;;  %v4904_v31 = vld [vmem:[#allocation6 + $0x180] sm:$0xff]  ;;  %6795 = vst [vmem:[#allocation22_spill] sm:$0xff] %v4988_v15  ;;  %v4991_v19 = vld [vmem:[#allocation6 + $0xa8] sm:$0xff]  ;;  %v5018_v61 = vld [vmem:[#allocation6 + $0x70] sm:$0xff] }
 0x1ff   :  { %v793_v40 = vmul.f32 %v3625_v20, %v792_v33  ;;  %v4910_v33 = vld [vmem:[#allocation6 + $0x190] sm:$0xff]  ;;  %6796 = vst [vmem:[#allocation26_spill] sm:$0xff] %v4991_v19  ;;  %v5021_v16 = vld [vmem:[#allocation6 + $0x78] sm:$0xff] }
 0x200   :  { %v3627_v42 = vpop.eup %3626  ;;  %v775_v43 = vadd.f32 %v3623_v27, %v774_v38  ;;  %v4919_v38 = vld [vmem:[#allocation6 + $0x168] sm:$0xff]  ;;  %6805 = vst [vmem:[#allocation21_spill] sm:$0xff] %v5018_v61 }
 0x201   :  { %v794_v45 = vadd.f32 %v3625_v20, %v793_v40  ;;  %v811_v46 = vmul.f32 %v3627_v42, %v809_v51  ;;  %v3629_v50 = vpop.eup %3628  ;;  %vm816_vm2 = vweird.f32 %v3627_v42  ;;  %v4886_v51 = vld [vmem:[#allocation6 + $0x1d0] sm:$0xff]  ;;  %v4925_v40 = vld [vmem:[#allocation6 + $0x178] sm:$0xff]  ;;  %6806 = vst [vmem:[#allocation15_spill] sm:$0xff] %v5021_v16 }
 0x202   :  { %v779_v49 = vsel %vm778_vm11, %v3623_v27, %v775_v43  ;;  %vm817_vm5 = vmor %vm815_vm4, %vm816_vm2  ;;  %v4889_v27 = vld [vmem:[#allocation6 + $0x1d8] sm:$0xff]  ;;  %v4934_v43 = vld [vmem:[#allocation6 + $0x150] sm:$0xff] }
 0x203   :  { %v784_v57 = vsel %vm781_vm14, %v783_v44, %v779_v49  ;;  %v798_v59 = vsel %vm797_vm13, %v3625_v20, %v794_v45  ;;  %v812_v0 = vsub.f32 1.0, %v811_v46  ;;  %v4895_v20 = vld [vmem:[#allocation6 + $0x1a8] sm:$0xff]  ;;  %v4937_v44 = vld [vmem:[#allocation6 + $0x158] sm:$0xff]  ;;  %v4940_v45 = vld [vmem:[#allocation6 + $0x120] sm:$0xff] }
 0x204   :  { %v803_v1 = vsel %vm800_vm15, %v802_v48, %v798_v59  ;;  %v826_v5 = vmul.f32 %v3629_v50, %v784_v57  ;;  %v4943_v46 = vld [vmem:[#allocation6 + $0x128] sm:$0xff]  ;;  %v4946_v48 = vld [vmem:[#allocation6 + $0x130] sm:$0xff]  ;;  %v4949_v49 = vld [vmem:[#allocation6 + $0x138] sm:$0xff] }
 0x205   :  { %v825_v8 = vmul.f32 %v803_v1, %v4758_v53  ;;  %v813_v10 = vmul.f32 %v3627_v42, %v812_v0  ;;  %v4952_v50 = vld [vmem:[#allocation6 + $0x100] sm:$0xff]  ;;  %v4955_v57 = vld [vmem:[#allocation6 + $0x108] sm:$0xff]  ;;  %v4958_v59 = vld [vmem:[#allocation6 + $0x110] sm:$0xff] }
 0x206   :  { %v4961_v0 = vld [vmem:[#allocation6 + $0x118] sm:$0xff]  ;;  %v4964_v1 = vld [vmem:[#allocation6 + $0xe0] sm:$0xff] }
 0x207   :  { %v827_v12 = vadd.f32 %v826_v5, %v825_v8  ;;  %v814_v13 = vadd.f32 %v3627_v42, %v813_v10  ;;  %v4967_v5 = vld [vmem:[#allocation6 + $0xe8] sm:$0xff]  ;;  %v4973_v8 = vld [vmem:[#allocation6 + $0xf8] sm:$0xff]  ;;  %v4976_v10 = vld [vmem:[#allocation6 + $0xc0] sm:$0xff] }
 0x208   :  { %6790 = vst [vmem:[#allocation9_spill] sm:$0xff] %v4973_v8 }
 0x209   :  { %3630 = vtanh.f32 %v827_v12  ;;  %v4854_v18 = vsel %vm837_vm1, %v827_v12, %v4758_v53  ;;  %v818_v52 = vsel %vm817_vm5, %v3627_v42, %v814_v13  ;;  %v4931_v42 = vld [vmem:[#allocation6 + $0x148] sm:$0xff]  ;;  %6791 = vst [vmem:[#allocation10_spill] sm:$0xff] %v4976_v10  ;;  %v4982_v12 = vld [vmem:[#allocation6 + $0xd0] sm:$0xff]  ;;  %v4985_v13 = vld [vmem:[#allocation6 + $0xd8] sm:$0xff] }
 0x20a   :  { %v823_v21 = vsel %vm820_vm6, %v822_v37, %v818_v52  ;;  %6793 = vst [vmem:[#allocation18_spill] sm:$0xff] %v4982_v12  ;;  %v4994_v52 = vld [vmem:[#allocation6 + $0xb0] sm:$0xff]  ;;  %v5000_v37 = vld [vmem:[#allocation6 + $0x80] sm:$0xff] }
 0x20b   :  { %6794 = vst [vmem:[#allocation12_spill] sm:$0xff] %v4985_v13 }
 0x20c   :  { %6797 = vst [vmem:[#allocation19_spill] sm:$0xff] %v4994_v52 }
 0x20d   :  { %6799 = vst [vmem:[#allocation25_spill] sm:$0xff] %v5000_v37 }
 0x20f   :  { %v3631_v54 = vpop.eup %3630 }
 0x210   :  { %v829_v28 = vmul.f32 %v3631_v54, %v823_v21  ;;  %v5003_v54 = vld [vmem:[#allocation6 + $0x88] sm:$0xff]  ;;  %v5006_v21 = vld [vmem:[#allocation6 + $0x90] sm:$0xff] }
 0x211   :  { %6800 = vst [vmem:[#allocation29_spill] sm:$0xff] %v5003_v54 }
 0x212   :  { %v4860_v29 = vsel %vm837_vm1, %v829_v28, %v4763_v25  ;;  %v840_v53 = vsel %vm837_vm1, %v829_v28, 0.0  ;;  %v4871_v25 = vld [vmem:[#allocation6 + $0x1e8] sm:$0xff]  ;;  %6801 = vst [vmem:[#allocation20_spill] sm:$0xff] %v5006_v21  ;;  %v5009_v28 = vld [vmem:[#allocation6 + $0x98] sm:$0xff] }
 0x213   :  { %v841_v36 = vpack.c.bf16 %v840_v53, %v840_v53  ;;  %863 = vmatmul.f32.vlgmr.msra.gmra.mxu0 %v4860_v29  ;;  %883 = vmatmul.f32.vlgmr.msra.gmra.mxu1 %v4860_v29  ;;  %6802 = vst [vmem:[#allocation14_spill] sm:$0xff] %v5009_v28  ;;  %v5012_v53 = vld [vmem:[#allocation6 + $0x60] sm:$0xff] }
 0x214   :  { %903 = vmatmul.f32.vlgmr.msra.gmra.mxu2 %v4860_v29  ;;  %923 = vmatmul.f32.vlgmr.msra.gmra.mxu3 %v4860_v29  ;;  %6803 = vst [vmem:[#allocation27_spill] sm:$0xff] %v5012_v53 }
 0x215   :  { %842 = vst [vmem:[#allocation3 + $0x4] sm:$0xf] %v841_v36  ;;  %1175 = vmatpush.msra.mxu0 %v4868_v22  ;;  %1195 = vmatpush.msra.mxu1 %v4871_v25  ;;  %v5015_v36 = vld [vmem:[#allocation6 + $0x68] sm:$0xff] }
 0x216   :  { %1215 = vmatpush.msra.mxu2 %v4874_v62  ;;  %1235 = vmatpush.msra.mxu3 %v4877_v30  ;;  %6804 = vst [vmem:[#allocation33_spill] sm:$0xff] %v5015_v36 }
 0x217   :  { %1176 = vmatpush.msra.mxu0 %v4880_v24  ;;  %1196 = vmatpush.msra.mxu1 %v4883_v9 }
 0x218   :  { %1216 = vmatpush.msra.mxu2 %v4886_v51  ;;  %1236 = vmatpush.msra.mxu3 %v4889_v27 }
 0x219   :  { %1177 = vmatpush.msra.mxu0 %v4892_v14  ;;  %1197 = vmatpush.msra.mxu1 %v4895_v20 }
 0x21a   :  { %1217 = vmatpush.msra.mxu2 %v4898_v17  ;;  %1237 = vmatpush.msra.mxu3 %v4901_v26 }
 0x21b   :  { %1178 = vmatpush.msra.mxu0 %v4904_v31  ;;  %1198 = vmatpush.msra.mxu1 %v4907_v32 }
 0x21c   :  { %1218 = vmatpush.msra.mxu2 %v4910_v33  ;;  %1238 = vmatpush.msra.mxu3 %v4913_v34 }
 0x21d   :  { %1179 = vmatpush.msra.mxu0 %v4916_v35  ;;  %1199 = vmatpush.msra.mxu1 %v4919_v38 }
 0x21e   :  { %1219 = vmatpush.msra.mxu2 %v4922_v39  ;;  %1239 = vmatpush.msra.mxu3 %v4925_v40 }
 0x21f   :  { %1180 = vmatpush.msra.mxu0 %v4928_v41  ;;  %1200 = vmatpush.msra.mxu1 %v4931_v42 }
 0x220   :  { %1220 = vmatpush.msra.mxu2 %v4934_v43  ;;  %1240 = vmatpush.msra.mxu3 %v4937_v44 }
 0x221   :  { %1181 = vmatpush.msra.mxu0 %v4940_v45  ;;  %1201 = vmatpush.msra.mxu1 %v4943_v46 }
 0x222   :  { %1221 = vmatpush.msra.mxu2 %v4946_v48  ;;  %1241 = vmatpush.msra.mxu3 %v4949_v49 }
 0x223   :  { %1182 = vmatpush.msra.mxu0 %v4952_v50  ;;  %1202 = vmatpush.msra.mxu1 %v4955_v57 }
 0x224   :  { %1222 = vmatpush.msra.mxu2 %v4958_v59  ;;  %1242 = vmatpush.msra.mxu3 %v4961_v0 }
 0x225   :  { %1183 = vmatpush.msra.mxu0 %v4964_v1  ;;  %1203 = vmatpush.msra.mxu1 %v4967_v5 }
 0x226   :  { %1223 = vmatpush.msra.mxu2 %v4970_v6  ;;  %1243 = vmatpush.msra.mxu3 %v4973_v8 }
 0x227   :  { %1184 = vmatpush.msra.mxu0 %v4976_v10  ;;  %1204 = vmatpush.msra.mxu1 %v4979_v11  ;;  %v1000_v11 = vpop.permute.xlu1 %999 }
 0x228   :  { %1224 = vmatpush.msra.mxu2 %v4982_v12  ;;  %1244 = vmatpush.msra.mxu3 %v4985_v13  ;;  %vm1001_vm1 = vcmp.eq.s32.totalorder %v1000_v11, 1  ;;  %v6820_v11 = vld [vmem:[#allocation18_spill] sm:$0xff] }
 0x229   :  { %1185 = vmatpush.msra.mxu0 %v4988_v15  ;;  %1205 = vmatpush.msra.mxu1 %v4991_v19 }
 0x22a   :  { %1225 = vmatpush.msra.mxu2 %v4994_v52  ;;  %1245 = vmatpush.msra.mxu3 %v4997_v58 }
 0x22b   :  { %1186 = vmatpush.msra.mxu0 %v5000_v37  ;;  %1206 = vmatpush.msra.mxu1 %v5003_v54 }
 0x22c   :  { %1226 = vmatpush.msra.mxu2 %v5006_v21  ;;  %1246 = vmatpush.msra.mxu3 %v5009_v28  ;;  %v5027_v28 = vld [vmem:[#allocation6 + $0x48] sm:$0xff] }
 0x22d   :  { %1187 = vmatpush.msra.mxu0 %v5012_v53  ;;  %1207 = vmatpush.msra.mxu1 %v5015_v36  ;;  %6808 = vst [vmem:[#allocation38_spill] sm:$0xff] %v5027_v28  ;;  %v5031_v53 = vld [vmem:[#allocation6 + $0x58] sm:$0xff]  ;;  %v5034_v36 = vld [vmem:[#allocation6 + $0x20] sm:$0xff] }
 0x22e   :  { %1227 = vmatpush.msra.mxu2 %v5018_v61  ;;  %1247 = vmatpush.msra.mxu3 %v5021_v16  ;;  %6809 = vst [vmem:[#allocation23_spill] sm:$0xff] %v5031_v53  ;;  %v5037_v61 = vld [vmem:[#allocation6 + $0x28] sm:$0xff] }
 0x22f   :  { %1188 = vmatpush.msra.mxu0 %v5024_v3  ;;  %1208 = vmatpush.msra.mxu1 %v5027_v28  ;;  %6810 = vst [vmem:[#allocation16_spill] sm:$0xff] %v5034_v36  ;;  %v5041_v3 = vld [vmem:[#allocation6 + $0x38] sm:$0xff]  ;;  %v5044_v28 = vld [vmem:[#allocation6] sm:$0xff] }
 0x230   :  { %1228 = vmatpush.msra.mxu2 %v6770_v47  ;;  %1248 = vmatpush.msra.mxu3 %v5031_v53  ;;  %6811 = vst [vmem:[#allocation34_spill] sm:$0xff] %v5037_v61  ;;  %v5049_v47 = vld [vmem:[#allocation6 + $0x18] sm:$0xff] }
 0x231   :  { %1189 = vmatpush.msra.mxu0 %v5034_v36  ;;  %1209 = vmatpush.msra.mxu1 %v5037_v61  ;;  %6812 = vst [vmem:[#allocation39_spill] sm:$0xff] %v5041_v3  ;;  %v6815_v61 = vld [vmem:[#allocation56_spill] sm:$0xff] }
 0x232   :  { %1229 = vmatpush.msra.mxu2 %v6774_v55  ;;  %1249 = vmatpush.msra.mxu3 %v5041_v3  ;;  %6813 = vst [vmem:[#allocation24_spill] sm:$0xff] %v5044_v28  ;;  %v254_v36 = vadd.f32 %v6815_v61, %v6781_v4  ;;  %v205_v55 = vadd.f32 %v4833_v2, %v6783_v7 }
 0x233   :  { %1190 = vmatpush.msra.mxu0 %v5044_v28  ;;  %1210 = vmatpush.msra.mxu1 %v6777_v60  ;;  %6814 = vst [vmem:[#allocation53_spill] sm:$0xff] %v5049_v47  ;;  %v6816_v60 = vld [vmem:[#allocation41_spill] sm:$0xff] }
 0x234   :  { %1230 = vmatpush.msra.mxu2 %v6778_v63  ;;  %1250 = vmatpush.msra.mxu3 %v5049_v47  ;;  %v352_v63 = vadd.f32 %v6816_v60, %v6784_v23 }
 0x290   :  { %v864_v53 = vpop.f32.mrf.mxu0  ;;  %v884_v3 = vpop.f32.mrf.mxu1 }
 0x291   :  { %v927_v16 = vadd.f32 %v864_v53, %v205_v55  ;;  %v928_v21 = vadd.f32 %v884_v3, %v254_v36  ;;  %v6817_v3 = vld [vmem:[#allocation57_spill] sm:$0xff] }
 0x293   :  { %v3445_v54 = vmul.f32 -1.442695, %v927_v16  ;;  %v3446_v28 = vmul.f32 -1.442695, %v928_v21  ;;  %v303_v16 = vadd.f32 %v6817_v3, %v6788_v56 }
 0x295   :  { %3632 = vpow2.f32 %v3445_v54 }
 0x296   :  { %3634 = vpow2.f32 %v3446_v28 }
 0x297   :  { %v924_v37 = vpop.f32.mrf.mxu3  ;;  %v904_v2 = vpop.f32.mrf.mxu2 }
 0x298   :  { %v930_v58 = vadd.f32 %v924_v37, %v352_v63  ;;  %v929_v36 = vadd.f32 %v904_v2, %v303_v16 }
 0x29a   :  { %v3447_v47 = vmul.f32 -1.442695, %v930_v58 }
 0x29b   :  { %v3633_v52 = vpop.eup %3632 }
 0x29c   :  { %v3635_v19 = vpop.eup %3634  ;;  %v934_v61 = vadd.f32 1.0, %v3633_v52  ;;  %3636 = vpow2.f32 %v3447_v47 }
 0x29d   :  { %v953_v4 = vadd.f32 1.0, %v3635_v19 }
 0x29e   :  { %3638 = vrcp.f32 %v934_v61  ;;  %v946_v63 = vand.u32 2147483648, %v934_v61  ;;  %v944_v19 = vand.u32 2147483647, %v934_v61  ;;  %vm940_vm10 = vweird.f32 %v934_v61 }
 0x29f   :  { %3640 = vrcp.f32 %v953_v4  ;;  %v965_v47 = vand.u32 2147483648, %v953_v4  ;;  %v963_v7 = vand.u32 2147483647, %v953_v4  ;;  %vm959_vm12 = vweird.f32 %v953_v4 }
 0x2a0   :  { %v947_v2 = vor.u32 1.1754944e-38, %v946_v63  ;;  %vm945_vm13 = vcmp.eq.f32.partialorder %v944_v19, 8.507059e+37 }
 0x2a1   :  { %vm964_vm15 = vcmp.eq.f32.partialorder %v963_v7, 8.507059e+37 }
 0x2a2   :  { %v3637_v53 = vpop.eup %3636 }
 0x2a3   :  { %v973_v54 = vadd.f32 1.0, %v3637_v53 }
 0x2a4   :  { %v3639_v21 = vpop.eup %3638 }
 0x2a5   :  { %v3641_v55 = vpop.eup %3640  ;;  %v936_v28 = vmul.f32 %v3639_v21, %v934_v61  ;;  %3642 = vrcp.f32 %v973_v54  ;;  %vm941_vm8 = vweird.f32 %v3639_v21  ;;  %vm979_vm3 = vweird.f32 %v973_v54 }
 0x2a6   :  { %v955_v37 = vmul.f32 %v3641_v55, %v953_v4  ;;  %3644 = vtanh.f32 %v929_v36  ;;  %vm960_vm9 = vweird.f32 %v3641_v55  ;;  %vm942_vm11 = vmor %vm940_vm10, %vm941_vm8  ;;  %v985_v4 = vand.u32 2147483648, %v973_v54 }
 0x2a7   :  { %v937_v58 = vsub.f32 1.0, %v936_v28  ;;  %vm961_vm14 = vmor %vm959_vm12, %vm960_vm9  ;;  %v966_v28 = vor.u32 1.1754944e-38, %v965_v47 }
 0x2a8   :  { %v956_v60 = vsub.f32 1.0, %v955_v37 }
 0x2a9   :  { %v938_v52 = vmul.f32 %v3639_v21, %v937_v58 }
 0x2aa   :  { %v957_v23 = vmul.f32 %v3641_v55, %v956_v60 }
 0x2ab   :  { %v3643_v15 = vpop.eup %3642  ;;  %v939_v3 = vadd.f32 %v3639_v21, %v938_v52 }
 0x2ac   :  { %v975_v53 = vmul.f32 %v3643_v15, %v973_v54  ;;  %v958_v16 = vadd.f32 %v3641_v55, %v957_v23  ;;  %v3645_v36 = vpop.eup %3644  ;;  %vm980_vm2 = vweird.f32 %v3643_v15 }
 0x2ad   :  { %v943_v56 = vsel %vm942_vm11, %v3639_v21, %v939_v3  ;;  %vm981_vm4 = vmor %vm979_vm3, %vm980_vm2  ;;  %v986_v21 = vor.u32 1.1754944e-38, %v985_v4  ;;  %v6823_v3 = vld [vmem:[#allocation26_spill] sm:$0xff] }
 0x2ae   :  { %v948_v37 = vsel %vm945_vm13, %v947_v2, %v943_v56  ;;  %v976_v58 = vsub.f32 1.0, %v975_v53  ;;  %v962_v13 = vsel %vm961_vm14, %v3641_v55, %v958_v16  ;;  %v983_v56 = vand.u32 2147483647, %v973_v54  ;;  %v6822_v54 = vld [vmem:[#allocation22_spill] sm:$0xff]  ;;  %v6824_v2 = vld [vmem:[#allocation19_spill] sm:$0xff]  ;;  %v6825_v53 = vld [vmem:[#allocation13_spill] sm:$0xff] }
 0x2af   :  { %v990_v60 = vmul.f32 %v3645_v36, %v948_v37  ;;  %v967_v12 = vsel %vm964_vm15, %v966_v28, %v962_v13  ;;  %v6826_v16 = vld [vmem:[#allocation25_spill] sm:$0xff]  ;;  %v6828_v36 = vld [vmem:[#allocation20_spill] sm:$0xff]  ;;  %v6829_v37 = vld [vmem:[#allocation14_spill] sm:$0xff] }
 0x2b0   :  { %v977_v10 = vmul.f32 %v3643_v15, %v976_v58  ;;  %v989_v61 = vmul.f32 %v967_v12, %v4854_v18  ;;  %vm984_vm5 = vcmp.eq.f32.partialorder %v983_v56, 8.507059e+37  ;;  %v6827_v28 = vld [vmem:[#allocation29_spill] sm:$0xff]  ;;  %v6830_v58 = vld [vmem:[#allocation27_spill] sm:$0xff]  ;;  %v6835_v4 = vld [vmem:[#allocation38_spill] sm:$0xff] }
 0x2b1   :  { %v5128_v56 = vld [vmem:[#allocation6 + $0x50] sm:$0xff] }
 0x2b2   :  { %v991_v63 = vadd.f32 %v990_v60, %v989_v61  ;;  %v978_v52 = vadd.f32 %v3643_v15, %v977_v10  ;;  %v6831_v60 = vld [vmem:[#allocation33_spill] sm:$0xff]  ;;  %6836 = vst [vmem:[#allocation36_spill] sm:$0xff] %v5128_v56 }
 0x2b3   :  { %v6832_v61 = vld [vmem:[#allocation21_spill] sm:$0xff] }
 0x2b4   :  { %3646 = vtanh.f32 %v991_v63  ;;  %v5063_v23 = vsel %vm1001_vm1, %v991_v63, %v4854_v18  ;;  %v982_v7 = vsel %vm981_vm4, %v3643_v15, %v978_v52  ;;  %v6818_v18 = vld [vmem:[#allocation10_spill] sm:$0xff]  ;;  %v6821_v15 = vld [vmem:[#allocation12_spill] sm:$0xff]  ;;  %v6833_v63 = vld [vmem:[#allocation15_spill] sm:$0xff] }
 0x2b5   :  { %v987_v55 = vsel %vm984_vm5, %v986_v21, %v982_v7  ;;  %v6834_v52 = vld [vmem:[#allocation30_spill] sm:$0xff]  ;;  %v6837_v7 = vld [vmem:[#allocation23_spill] sm:$0xff]  ;;  %v6838_v21 = vld [vmem:[#allocation16_spill] sm:$0xff] }
 0x2ba   :  { %v3647_v13 = vpop.eup %3646 }
 0x2bb   :  { %v993_v19 = vmul.f32 %v3647_v13, %v987_v55  ;;  %v6839_v13 = vld [vmem:[#allocation34_spill] sm:$0xff]  ;;  %v5134_v55 = vld [vmem:[#allocation6 + $0x30] sm:$0xff] }
 0x2bc   :  { %6840 = vst [vmem:[#allocation44_spill] sm:$0xff] %v5134_v55 }
 0x2bd   :  { %v5067_v12 = vsel %vm1001_vm1, %v993_v19, %v4860_v29  ;;  %v1004_v10 = vsel %vm1001_vm1, %v993_v19, 0.0  ;;  %v6819_v29 = vld [vmem:[#allocation11_spill] sm:$0xff] }
 0x2be   :  { %v1005_v47 = vpack.c.bf16 %v1004_v10, %v1004_v10  ;;  %1027 = vmatmul.f32.vlgmr.msrb.gmra.mxu0 %v5067_v12  ;;  %1047 = vmatmul.f32.vlgmr.msrb.gmra.mxu1 %v5067_v12  ;;  %v6841_v19 = vld [vmem:[#allocation39_spill] sm:$0xff]  ;;  %v6842_v10 = vld [vmem:[#allocation24_spill] sm:$0xff] }
 0x2bf   :  { %1067 = vmatmul.f32.vlgmr.msrb.gmra.mxu2 %v5067_v12  ;;  %1087 = vmatmul.f32.vlgmr.msrb.gmra.mxu3 %v5067_v12 }
 0x2c0   :  { %1006 = vst [vmem:[#allocation3 + $0x8] sm:$0xf] %v1005_v47  ;;  %1339 = vmatpush.msrb.mxu0 %v4868_v22  ;;  %1359 = vmatpush.msrb.mxu1 %v4871_v25  ;;  %v5139_v47 = vld [vmem:[#allocation6 + $0x8] sm:$0xff] }
 0x2c1   :  { %1379 = vmatpush.msrb.mxu2 %v4874_v62  ;;  %1399 = vmatpush.msrb.mxu3 %v4877_v30  ;;  %6843 = vst [vmem:[#allocation54_spill] sm:$0xff] %v5139_v47 }
 0x2c2   :  { %1340 = vmatpush.msrb.mxu0 %v4880_v24  ;;  %1360 = vmatpush.msrb.mxu1 %v4883_v9 }
 0x2c3   :  { %1380 = vmatpush.msrb.mxu2 %v4886_v51  ;;  %1400 = vmatpush.msrb.mxu3 %v4889_v27 }
 0x2c4   :  { %1341 = vmatpush.msrb.mxu0 %v4892_v14  ;;  %1361 = vmatpush.msrb.mxu1 %v4895_v20 }
 0x2c5   :  { %1381 = vmatpush.msrb.mxu2 %v4898_v17  ;;  %1401 = vmatpush.msrb.mxu3 %v4901_v26 }
 0x2c6   :  { %1342 = vmatpush.msrb.mxu0 %v4904_v31  ;;  %1362 = vmatpush.msrb.mxu1 %v4907_v32 }
 0x2c7   :  { %1382 = vmatpush.msrb.mxu2 %v4910_v33  ;;  %1402 = vmatpush.msrb.mxu3 %v4913_v34 }
 0x2c8   :  { %1343 = vmatpush.msrb.mxu0 %v4916_v35  ;;  %1363 = vmatpush.msrb.mxu1 %v4919_v38 }
 0x2c9   :  { %1383 = vmatpush.msrb.mxu2 %v4922_v39  ;;  %1403 = vmatpush.msrb.mxu3 %v4925_v40 }
 0x2ca   :  { %1344 = vmatpush.msrb.mxu0 %v4928_v41  ;;  %1364 = vmatpush.msrb.mxu1 %v4931_v42 }
 0x2cb   :  { %1384 = vmatpush.msrb.mxu2 %v4934_v43  ;;  %1404 = vmatpush.msrb.mxu3 %v4937_v44 }
 0x2cc   :  { %1345 = vmatpush.msrb.mxu0 %v4940_v45  ;;  %1365 = vmatpush.msrb.mxu1 %v4943_v46 }
 0x2cd   :  { %1385 = vmatpush.msrb.mxu2 %v4946_v48  ;;  %1405 = vmatpush.msrb.mxu3 %v4949_v49 }
 0x2ce   :  { %1346 = vmatpush.msrb.mxu0 %v4952_v50  ;;  %1366 = vmatpush.msrb.mxu1 %v4955_v57 }
 0x2cf   :  { %1386 = vmatpush.msrb.mxu2 %v4958_v59  ;;  %1406 = vmatpush.msrb.mxu3 %v4961_v0 }
 0x2d0   :  { %1347 = vmatpush.msrb.mxu0 %v4964_v1  ;;  %1367 = vmatpush.msrb.mxu1 %v4967_v5 }
 0x2d1   :  { %1387 = vmatpush.msrb.mxu2 %v4970_v6  ;;  %1407 = vmatpush.msrb.mxu3 %v4973_v8 }
 0x2d2   :  { %1348 = vmatpush.msrb.mxu0 %v6818_v18  ;;  %1368 = vmatpush.msrb.mxu1 %v6819_v29 }
 0x2d3   :  { %1388 = vmatpush.msrb.mxu2 %v6820_v11  ;;  %1408 = vmatpush.msrb.mxu3 %v6821_v15 }
 0x2d4   :  { %1349 = vmatpush.msrb.mxu0 %v6822_v54  ;;  %1369 = vmatpush.msrb.mxu1 %v6823_v3 }
 0x2d5   :  { %1389 = vmatpush.msrb.mxu2 %v6824_v2  ;;  %1409 = vmatpush.msrb.mxu3 %v6825_v53 }
 0x2d6   :  { %1350 = vmatpush.msrb.mxu0 %v6826_v16  ;;  %1370 = vmatpush.msrb.mxu1 %v6827_v28 }
 0x2d7   :  { %1390 = vmatpush.msrb.mxu2 %v6828_v36  ;;  %1410 = vmatpush.msrb.mxu3 %v6829_v37  ;;  %v6851_v36 = vld [vmem:[#allocation45_spill] sm:$0xff] }
 0x2d8   :  { %1351 = vmatpush.msrb.mxu0 %v6830_v58  ;;  %1371 = vmatpush.msrb.mxu1 %v6831_v60 }
 0x2d9   :  { %1391 = vmatpush.msrb.mxu2 %v6832_v61  ;;  %1411 = vmatpush.msrb.mxu3 %v6833_v63  ;;  %v6849_v63 = vld [vmem:[#allocation17_spill] sm:$0xff] }
 0x2da   :  { %1352 = vmatpush.msrb.mxu0 %v6834_v52  ;;  %1372 = vmatpush.msrb.mxu1 %v6835_v4  ;;  %v5142_v4 = vld [vmem:[#allocation6 + $0x10] sm:$0xff]  ;;  %v6848_v52 = vld [vmem:[#allocation85_spill] sm:$0xff] }
 0x2db   :  { %1392 = vmatpush.msrb.mxu2 %v5128_v56  ;;  %1412 = vmatpush.msrb.mxu3 %v6837_v7  ;;  %6844 = vst [vmem:[#allocation56_spill] sm:$0xff] %v5142_v4  ;;  %v6845_v7 = vld [vmem:[#allocation53_spill] sm:$0xff] }
 0x2dc   :  { %1353 = vmatpush.msrb.mxu0 %v6838_v21  ;;  %1373 = vmatpush.msrb.mxu1 %v6839_v13  ;;  %v6846_v21 = vld [vmem:[#allocation92_spill] sm:$0xff]  ;;  %v6847_v13 = vld [vmem:[#allocation58_spill] sm:$0xff] }
 0x2dd   :  { %1393 = vmatpush.msrb.mxu2 %v5134_v55  ;;  %1413 = vmatpush.msrb.mxu3 %v6841_v19  ;;  %v256_v56 = vadd.f32 %v6847_v13, %v6846_v21  ;;  %v207_v55 = vadd.f32 %v6849_v63, %v6848_v52 }
 0x2de   :  { %1354 = vmatpush.msrb.mxu0 %v6842_v10  ;;  %1374 = vmatpush.msrb.mxu1 %v5139_v47  ;;  %v6850_v47 = vld [vmem:[#allocation89_spill] sm:$0xff] }
 0x2df   :  { %1394 = vmatpush.msrb.mxu2 %v5142_v4  ;;  %1414 = vmatpush.msrb.mxu3 %v6845_v7  ;;  %v354_v28 = vadd.f32 %v6851_v36, %v6850_v47  ;;  %v6852_v36 = vmov 0  }
 0x33b   :  { %v1028_v61 = vpop.f32.mrf.mxu0  ;;  %v1048_v19 = vpop.f32.mrf.mxu1 }
 0x33c   :  { %v1091_v60 = vadd.f32 %v1028_v61, %v207_v55  ;;  %v1092_v10 = vadd.f32 %v1048_v19, %v256_v56 }
 0x33e   :  { %v3448_v58 = vmul.f32 -1.442695, %v1091_v60  ;;  %v3449_v37 = vmul.f32 -1.442695, %v1092_v10  ;;  %v5155_v60 = vld [vmem:[%s6433_s0] sm:$0xff] }
 0x33f   :  { %vm1324_vm6 = vcmp.gt.s32.totalorder %v5155_v60, 4  ;;  %vm1488_vm7 = vcmp.gt.s32.totalorder %v5155_v60, 5  ;;  %vm1980_vm13 = vcmp.gt.s32.totalorder %v5155_v60, 8  ;;  %vm2472_vm4 = vcmp.gt.s32.totalorder %v5155_v60, 11 }
 0x340   :  { %3648 = vpow2.f32 %v3448_v58  ;;  %v1489_v10 = vsel %vm1488_vm7, 1, %v6852_v36 }
 0x341   :  { %3650 = vpow2.f32 %v3449_v37  ;;  %v1325_v37 = vsel %vm1324_vm6, 1, %v6852_v36 }
 0x342   :  { %v1088_v4 = vpop.f32.mrf.mxu3  ;;  %v1068_v58 = vpop.f32.mrf.mxu2  ;;  %1327 = vperm.xlu2 %3598, %v1325_v37  }
 0x343   :  { %v1094_v16 = vadd.f32 %v1088_v4, %v354_v28  ;;  %v6853_v28 = vld [vmem:[#allocation95_spill] sm:$0xff] }
 0x345   :  { %v3450_v7 = vmul.f32 -1.442695, %v1094_v16  ;;  %v6854_v16 = vld [vmem:[#allocation60_spill] sm:$0xff] }
 0x346   :  { %v3649_v53 = vpop.eup %3648  ;;  %v305_v63 = vadd.f32 %v6854_v16, %v6853_v28 }
 0x347   :  { %v3651_v2 = vpop.eup %3650  ;;  %v1098_v13 = vadd.f32 1.0, %v3649_v53  ;;  %3652 = vpow2.f32 %v3450_v7 }
 0x348   :  { %v1117_v21 = vadd.f32 1.0, %v3651_v2  ;;  %v1093_v2 = vadd.f32 %v1068_v58, %v305_v63 }
 0x349   :  { %3654 = vrcp.f32 %v1098_v13  ;;  %v1110_v52 = vand.u32 2147483648, %v1098_v13  ;;  %v1108_v16 = vand.u32 2147483647, %v1098_v13  ;;  %vm1104_vm11 = vweird.f32 %v1098_v13 }
 0x34a   :  { %3656 = vrcp.f32 %v1117_v21  ;;  %v1129_v3 = vand.u32 2147483648, %v1117_v21  ;;  %1491 = vperm.xlu2 %3598, %v1489_v10   ;;  %vm1123_vm10 = vweird.f32 %v1117_v21 }
 0x34b   :  { %v1111_v28 = vor.u32 1.1754944e-38, %v1110_v52  ;;  %vm1109_vm15 = vcmp.eq.f32.partialorder %v1108_v16, 8.507059e+37 }
 0x34d   :  { %v3653_v61 = vpop.eup %3652 }
 0x34e   :  { %v1137_v53 = vadd.f32 1.0, %v3653_v61  ;;  %v1127_v61 = vand.u32 2147483647, %v1117_v21 }
 0x34f   :  { %v3655_v4 = vpop.eup %3654 }
 0x350   :  { %v3657_v56 = vpop.eup %3656  ;;  %v1100_v7 = vmul.f32 %v3655_v4, %v1098_v13  ;;  %3658 = vrcp.f32 %v1137_v53  ;;  %vm1105_vm8 = vweird.f32 %v3655_v4  ;;  %vm1128_vm1 = vcmp.eq.f32.partialorder %v1127_v61, 8.507059e+37  ;;  %v1164_v13 = vpop.permute.xlu1 %1163 }
 0x351   :  { %v1119_v55 = vmul.f32 %v3657_v56, %v1117_v21  ;;  %3660 = vtanh.f32 %v1093_v2  ;;  %vm1124_vm9 = vweird.f32 %v3657_v56  ;;  %vm1106_vm12 = vmor %vm1104_vm11, %vm1105_vm8  ;;  %v1130_v2 = vor.u32 1.1754944e-38, %v1129_v3 }
 0x352   :  { %v1101_v19 = vsub.f32 1.0, %v1100_v7  ;;  %vm1125_vm14 = vmor %vm1123_vm10, %vm1124_vm9  ;;  %vm1165_vm2 = vcmp.eq.s32.totalorder %v1164_v13, 1  ;;  %v1149_v3 = vand.u32 2147483648, %v1137_v53  ;;  %vm1143_vm5 = vweird.f32 %v1137_v53  ;;  %v6869_v13 = vld [vmem:[#allocation33_spill] sm:$0xff] }
 0x353   :  { %v1120_v47 = vsub.f32 1.0, %v1119_v55  ;;  %vm2964_vm8 = vcmp.gt.s32.totalorder %v5155_v60, 14  ;;  %v6856_v60 = vld [vmem:[#allocation10_spill] sm:$0xff] }
 0x354   :  { %v1102_v54 = vmul.f32 %v3655_v4, %v1101_v19 }
 0x355   :  { %v1121_v37 = vmul.f32 %v3657_v56, %v1120_v47 }
 0x356   :  { %v3659_v58 = vpop.eup %3658  ;;  %v1103_v63 = vadd.f32 %v3655_v4, %v1102_v54  ;;  %v1981_v54 = vsel %vm1980_vm13, 1, %v6852_v36 }
 0x357   :  { %v1122_v7 = vadd.f32 %v3657_v56, %v1121_v37  ;;  %v1139_v15 = vmul.f32 %v3659_v58, %v1137_v53  ;;  %v3661_v19 = vpop.eup %3660  ;;  %1983 = vperm.xlu2 %3598, %v1981_v54   ;;  %vm1144_vm3 = vweird.f32 %v3659_v58  ;;  %v6866_v54 = vld [vmem:[#allocation20_spill] sm:$0xff] }
 0x358   :  { %v1107_v55 = vsel %vm1106_vm12, %v3655_v4, %v1103_v63  ;;  %vm1145_vm6 = vmor %vm1143_vm5, %vm1144_vm3  ;;  %v1150_v4 = vor.u32 1.1754944e-38, %v1149_v3  ;;  %v6871_v3 = vld [vmem:[#allocation15_spill] sm:$0xff] }
 0x359   :  { %v1112_v11 = vsel %vm1109_vm15, %v1111_v28, %v1107_v55  ;;  %v1126_v47 = vsel %vm1125_vm14, %v3657_v56, %v1122_v7  ;;  %v1140_v29 = vsub.f32 1.0, %v1139_v15  ;;  %v6860_v7 = vld [vmem:[#allocation22_spill] sm:$0xff]  ;;  %v6862_v55 = vld [vmem:[#allocation19_spill] sm:$0xff] }
 0x35a   :  { %v1131_v10 = vsel %vm1128_vm1, %v1130_v2, %v1126_v47  ;;  %v1154_v18 = vmul.f32 %v3661_v19, %v1112_v11  ;;  %v1147_v11 = vand.u32 2147483647, %v1137_v53  ;;  %v6858_v53 = vld [vmem:[#allocation18_spill] sm:$0xff]  ;;  %v6863_v19 = vld [vmem:[#allocation13_spill] sm:$0xff] }
 0x35b   :  { %v1153_v21 = vmul.f32 %v1131_v10, %v5063_v23  ;;  %v1141_v52 = vmul.f32 %v3659_v58, %v1140_v29  ;;  %v2473_v29 = vsel %vm2472_vm4, 1, %v6852_v36  ;;  %v6861_v2 = vld [vmem:[#allocation26_spill] sm:$0xff]  ;;  %v6864_v47 = vld [vmem:[#allocation25_spill] sm:$0xff] }
 0x35c   :  { %vm1148_vm7 = vcmp.eq.f32.partialorder %v1147_v11, 8.507059e+37  ;;  %v6865_v10 = vld [vmem:[#allocation29_spill] sm:$0xff]  ;;  %v6872_v11 = vld [vmem:[#allocation30_spill] sm:$0xff] }
 0x35d   :  { %v1155_v37 = vadd.f32 %v1154_v18, %v1153_v21  ;;  %v1142_v8 = vadd.f32 %v3659_v58, %v1141_v52  ;;  %v6867_v21 = vld [vmem:[#allocation14_spill] sm:$0xff]  ;;  %v6868_v52 = vld [vmem:[#allocation27_spill] sm:$0xff] }
 0x35f   :  { %3662 = vtanh.f32 %v1155_v37  ;;  %v5169_v15 = vsel %vm1165_vm2, %v1155_v37, %v5063_v23  ;;  %v1146_v28 = vsel %vm1145_vm6, %v3659_v58, %v1142_v8  ;;  %2475 = vperm.xlu2 %3598, %v2473_v29   ;;  %v2965_v8 = vsel %vm2964_vm8, 1, %v6852_v36  ;;  %v6857_v36 = vld [vmem:[#allocation11_spill] sm:$0xff]  ;;  %v6859_v58 = vld [vmem:[#allocation12_spill] sm:$0xff]  ;;  %v6870_v37 = vld [vmem:[#allocation21_spill] sm:$0xff] }
 0x360   :  { %v1151_v56 = vsel %vm1148_vm7, %v1150_v4, %v1146_v28  ;;  %v6873_v28 = vld [vmem:[#allocation38_spill] sm:$0xff]  ;;  %v6874_v29 = vld [vmem:[#allocation36_spill] sm:$0xff]  ;;  %v6875_v4 = vld [vmem:[#allocation23_spill] sm:$0xff] }
 0x365   :  { %v3663_v18 = vpop.eup %3662 }
 0x366   :  { %v1157_v16 = vmul.f32 %v3663_v18, %v1151_v56  ;;  %v6876_v18 = vld [vmem:[#allocation16_spill] sm:$0xff]  ;;  %v6877_v56 = vld [vmem:[#allocation34_spill] sm:$0xff] }
 0x367   :  { %2967 = vperm.xlu2 %3598, %v2965_v8   ;;  %v6881_v8 = vld [vmem:[#allocation54_spill] sm:$0xff] }
 0x368   :  { %v5175_v61 = vsel %vm1165_vm2, %v1157_v16, %v5067_v12  ;;  %v1168_v23 = vsel %vm1165_vm2, %v1157_v16, 0.0  ;;  %v6855_v12 = vld [vmem:[#allocation9_spill] sm:$0xff]  ;;  %v6878_v16 = vld [vmem:[#allocation44_spill] sm:$0xff] }
 0x369   :  { %v1169_v63 = vpack.c.bf16 %v1168_v23, %v1168_v23  ;;  %1191 = vmatmul.f32.vlgmr.msra.gmra.mxu0 %v5175_v61  ;;  %1211 = vmatmul.f32.vlgmr.msra.gmra.mxu1 %v5175_v61  ;;  %v6879_v23 = vld [vmem:[#allocation39_spill] sm:$0xff] }
 0x36a   :  { %1231 = vmatmul.f32.vlgmr.msra.gmra.mxu2 %v5175_v61  ;;  %1251 = vmatmul.f32.vlgmr.msra.gmra.mxu3 %v5175_v61 }
 0x36b   :  { %1170 = vst [vmem:[#allocation3 + $0xc] sm:$0xf] %v1169_v63  ;;  %1503 = vmatpush.msra.mxu0 %v4868_v22  ;;  %1523 = vmatpush.msra.mxu1 %v4871_v25  ;;  %v6880_v63 = vld [vmem:[#allocation24_spill] sm:$0xff] }
 0x36c   :  { %1543 = vmatpush.msra.mxu2 %v4874_v62  ;;  %1563 = vmatpush.msra.mxu3 %v4877_v30 }
 0x36d   :  { %1504 = vmatpush.msra.mxu0 %v4880_v24  ;;  %1524 = vmatpush.msra.mxu1 %v4883_v9 }
 0x36e   :  { %1544 = vmatpush.msra.mxu2 %v4886_v51  ;;  %1564 = vmatpush.msra.mxu3 %v4889_v27 }
 0x36f   :  { %1505 = vmatpush.msra.mxu0 %v4892_v14  ;;  %1525 = vmatpush.msra.mxu1 %v4895_v20 }
 0x370   :  { %1545 = vmatpush.msra.mxu2 %v4898_v17  ;;  %1565 = vmatpush.msra.mxu3 %v4901_v26 }
 0x371   :  { %1506 = vmatpush.msra.mxu0 %v4904_v31  ;;  %1526 = vmatpush.msra.mxu1 %v4907_v32 }
 0x372   :  { %1546 = vmatpush.msra.mxu2 %v4910_v33  ;;  %1566 = vmatpush.msra.mxu3 %v4913_v34 }
 0x373   :  { %1507 = vmatpush.msra.mxu0 %v4916_v35  ;;  %1527 = vmatpush.msra.mxu1 %v4919_v38 }
 0x374   :  { %1547 = vmatpush.msra.mxu2 %v4922_v39  ;;  %1567 = vmatpush.msra.mxu3 %v4925_v40 }
 0x375   :  { %1508 = vmatpush.msra.mxu0 %v4928_v41  ;;  %1528 = vmatpush.msra.mxu1 %v4931_v42 }
 0x376   :  { %1548 = vmatpush.msra.mxu2 %v4934_v43  ;;  %1568 = vmatpush.msra.mxu3 %v4937_v44 }
 0x377   :  { %1509 = vmatpush.msra.mxu0 %v4940_v45  ;;  %1529 = vmatpush.msra.mxu1 %v4943_v46 }
 0x378   :  { %1549 = vmatpush.msra.mxu2 %v4946_v48  ;;  %1569 = vmatpush.msra.mxu3 %v4949_v49 }
 0x379   :  { %1510 = vmatpush.msra.mxu0 %v4952_v50  ;;  %1530 = vmatpush.msra.mxu1 %v4955_v57 }
 0x37a   :  { %1550 = vmatpush.msra.mxu2 %v4958_v59  ;;  %1570 = vmatpush.msra.mxu3 %v4961_v0 }
 0x37b   :  { %1511 = vmatpush.msra.mxu0 %v4964_v1  ;;  %1531 = vmatpush.msra.mxu1 %v4967_v5 }
 0x37c   :  { %1551 = vmatpush.msra.mxu2 %v4970_v6  ;;  %1571 = vmatpush.msra.mxu3 %v6855_v12 }
 0x37d   :  { %1512 = vmatpush.msra.mxu0 %v6856_v60  ;;  %1532 = vmatpush.msra.mxu1 %v6857_v36 }
 0x37e   :  { %1552 = vmatpush.msra.mxu2 %v6858_v53  ;;  %1572 = vmatpush.msra.mxu3 %v6859_v58 }
 0x37f   :  { %1513 = vmatpush.msra.mxu0 %v6860_v7  ;;  %1533 = vmatpush.msra.mxu1 %v6861_v2 }
 0x380   :  { %1553 = vmatpush.msra.mxu2 %v6862_v55  ;;  %1573 = vmatpush.msra.mxu3 %v6863_v19 }
 0x381   :  { %1514 = vmatpush.msra.mxu0 %v6864_v47  ;;  %1534 = vmatpush.msra.mxu1 %v6865_v10  ;;  %v6889_v10 = vld [vmem:[#allocation48_spill] sm:$0xff] }
 0x382   :  { %1554 = vmatpush.msra.mxu2 %v6866_v54  ;;  %1574 = vmatpush.msra.mxu3 %v6867_v21 }
 0x383   :  { %1515 = vmatpush.msra.mxu0 %v6868_v52  ;;  %1535 = vmatpush.msra.mxu1 %v6869_v13  ;;  %v6887_v13 = vld [vmem:[#allocation61_spill] sm:$0xff] }
 0x384   :  { %1555 = vmatpush.msra.mxu2 %v6870_v37  ;;  %1575 = vmatpush.msra.mxu3 %v6871_v3  ;;  %v6882_v3 = vld [vmem:[#allocation56_spill] sm:$0xff] }
 0x385   :  { %1516 = vmatpush.msra.mxu0 %v6872_v11  ;;  %1536 = vmatpush.msra.mxu1 %v6873_v28  ;;  %v6883_v11 = vld [vmem:[#allocation53_spill] sm:$0xff] }
 0x386   :  { %1556 = vmatpush.msra.mxu2 %v6874_v29  ;;  %1576 = vmatpush.msra.mxu3 %v6875_v4  ;;  %v6884_v28 = vld [vmem:[#allocation85_spill] sm:$0xff]  ;;  %v6885_v29 = vld [vmem:[#allocation28_spill] sm:$0xff] }
 0x387   :  { %1517 = vmatpush.msra.mxu0 %v6876_v18  ;;  %1537 = vmatpush.msra.mxu1 %v6877_v56  ;;  %v210_v37 = vadd.f32 %v6885_v29, %v6884_v28  ;;  %v6886_v4 = vld [vmem:[#allocation92_spill] sm:$0xff] }
 0x388   :  { %1557 = vmatpush.msra.mxu2 %v6878_v16  ;;  %1577 = vmatpush.msra.mxu3 %v6879_v23  ;;  %v259_v18 = vadd.f32 %v6887_v13, %v6886_v4 }
 0x389   :  { %1518 = vmatpush.msra.mxu0 %v6880_v63  ;;  %1538 = vmatpush.msra.mxu1 %v6881_v8  ;;  %v6888_v63 = vld [vmem:[#allocation89_spill] sm:$0xff] }
 0x38a   :  { %1558 = vmatpush.msra.mxu2 %v6882_v3  ;;  %1578 = vmatpush.msra.mxu3 %v6883_v11  ;;  %v357_v8 = vadd.f32 %v6889_v10, %v6888_v63 }
 0x39c   :  { %v1328_v36 = vpop.permute.xlu2 %1327 }
 0x39d   :  { %vm1329_vm2 = vcmp.eq.s32.totalorder %v1328_v36, 1 }
 0x3e6   :  { %v1192_v52 = vpop.f32.mrf.mxu0  ;;  %v1212_v56 = vpop.f32.mrf.mxu1 }
 0x3e7   :  { %v1255_v21 = vadd.f32 %v1192_v52, %v210_v37  ;;  %v1256_v16 = vadd.f32 %v1212_v56, %v259_v18  ;;  %v6890_v37 = vld [vmem:[#allocation95_spill] sm:$0xff] }
 0x3e9   :  { %v3451_v54 = vmul.f32 -1.442695, %v1255_v21  ;;  %v3452_v23 = vmul.f32 -1.442695, %v1256_v16  ;;  %v6891_v21 = vld [vmem:[#allocation63_spill] sm:$0xff] }
 0x3ea   :  { %v308_v18 = vadd.f32 %v6891_v21, %v6890_v37 }
 0x3eb   :  { %3664 = vpow2.f32 %v3451_v54 }
 0x3ec   :  { %3666 = vpow2.f32 %v3452_v23 }
 0x3ed   :  { %v1252_v3 = vpop.f32.mrf.mxu3  ;;  %v1232_v13 = vpop.f32.mrf.mxu2 }
 0x3ee   :  { %v1258_v47 = vadd.f32 %v1252_v3, %v357_v8  ;;  %v1257_v16 = vadd.f32 %v1232_v13, %v308_v18 }
 0x3f0   :  { %v3453_v11 = vmul.f32 -1.442695, %v1258_v47 }
 0x3f1   :  { %v3665_v19 = vpop.eup %3664 }
 0x3f2   :  { %v3667_v55 = vpop.eup %3666  ;;  %v1262_v29 = vadd.f32 1.0, %v3665_v19  ;;  %3668 = vpow2.f32 %v3453_v11 }
 0x3f3   :  { %v1281_v28 = vadd.f32 1.0, %v3667_v55 }
 0x3f4   :  { %3670 = vrcp.f32 %v1262_v29  ;;  %v1274_v63 = vand.u32 2147483648, %v1262_v29  ;;  %v1272_v55 = vand.u32 2147483647, %v1262_v29  ;;  %vm1268_vm11 = vweird.f32 %v1262_v29 }
 0x3f5   :  { %3672 = vrcp.f32 %v1281_v28  ;;  %v1293_v11 = vand.u32 2147483648, %v1281_v28  ;;  %v1291_v2 = vand.u32 2147483647, %v1281_v28  ;;  %vm1287_vm13 = vweird.f32 %v1281_v28 }
 0x3f6   :  { %v1275_v13 = vor.u32 1.1754944e-38, %v1274_v63  ;;  %vm1273_vm14 = vcmp.eq.f32.partialorder %v1272_v55, 8.507059e+37 }
 0x3f7   :  { %vm1292_vm1 = vcmp.eq.f32.partialorder %v1291_v2, 8.507059e+37 }
 0x3f8   :  { %v3669_v52 = vpop.eup %3668 }
 0x3f9   :  { %v1301_v54 = vadd.f32 1.0, %v3669_v52 }
 0x3fa   :  { %v3671_v56 = vpop.eup %3670 }
 0x3fb   :  { %v3673_v10 = vpop.eup %3672  ;;  %v1264_v23 = vmul.f32 %v3671_v56, %v1262_v29  ;;  %3674 = vrcp.f32 %v1301_v54  ;;  %vm1269_vm9 = vweird.f32 %v3671_v56  ;;  %vm1307_vm4 = vweird.f32 %v1301_v54 }
 0x3fc   :  { %v1283_v3 = vmul.f32 %v3673_v10, %v1281_v28  ;;  %3676 = vtanh.f32 %v1257_v16  ;;  %vm1288_vm10 = vweird.f32 %v3673_v10  ;;  %vm1270_vm12 = vmor %vm1268_vm11, %vm1269_vm9  ;;  %v1313_v28 = vand.u32 2147483648, %v1301_v54 }
 0x3fd   :  { %v1265_v47 = vsub.f32 1.0, %v1264_v23  ;;  %vm1289_vm15 = vmor %vm1287_vm13, %vm1288_vm10  ;;  %v1294_v23 = vor.u32 1.1754944e-38, %v1293_v11 }
 0x3fe   :  { %v1284_v8 = vsub.f32 1.0, %v1283_v3 }
 0x3ff   :  { %v1266_v19 = vmul.f32 %v3671_v56, %v1265_v47 }
 0x400   :  { %v1285_v4 = vmul.f32 %v3673_v10, %v1284_v8 }
 0x401   :  { %v3675_v7 = vpop.eup %3674  ;;  %v1267_v21 = vadd.f32 %v3671_v56, %v1266_v19 }
 0x402   :  { %v1303_v52 = vmul.f32 %v3675_v7, %v1301_v54  ;;  %v1286_v18 = vadd.f32 %v3673_v10, %v1285_v4  ;;  %v3677_v16 = vpop.eup %3676  ;;  %vm1308_vm3 = vweird.f32 %v3675_v7 }
 0x403   :  { %v1271_v37 = vsel %vm1270_vm12, %v3671_v56, %v1267_v21  ;;  %vm1309_vm5 = vmor %vm1307_vm4, %vm1308_vm3  ;;  %v1314_v56 = vor.u32 1.1754944e-38, %v1313_v28  ;;  %v6925_v21 = vld [vmem:[#allocation51_spill] sm:$0xff]  ;;  %v6927_v28 = vld [vmem:[#allocation66_spill] sm:$0xff] }
 0x404   :  { %v1276_v3 = vsel %vm1273_vm14, %v1275_v13, %v1271_v37  ;;  %v1304_v47 = vsub.f32 1.0, %v1303_v52  ;;  %v1290_v58 = vsel %vm1289_vm15, %v3673_v10, %v1286_v18  ;;  %v1311_v37 = vand.u32 2147483647, %v1301_v54  ;;  %v6924_v54 = vld [vmem:[#allocation89_spill] sm:$0xff] }
 0x405   :  { %v1318_v8 = vmul.f32 %v3677_v16, %v1276_v3  ;;  %v1295_v53 = vsel %vm1292_vm1, %v1294_v23, %v1290_v58  ;;  %v359_v13 = vadd.f32 %v6925_v21, %v6924_v54 }
 0x406   :  { %v1305_v60 = vmul.f32 %v3675_v7, %v1304_v47  ;;  %v1317_v29 = vmul.f32 %v1295_v53, %v5169_v15  ;;  %vm1312_vm6 = vcmp.eq.f32.partialorder %v1311_v37, 8.507059e+37 }
 0x408   :  { %v1319_v63 = vadd.f32 %v1318_v8, %v1317_v29  ;;  %v1306_v19 = vadd.f32 %v3675_v7, %v1305_v60 }
 0x40a   :  { %3678 = vtanh.f32 %v1319_v63  ;;  %v5258_v4 = vsel %vm1329_vm2, %v1319_v63, %v5169_v15  ;;  %v1310_v2 = vsel %vm1309_vm5, %v3675_v7, %v1306_v19  ;;  %v6926_v19 = vld [vmem:[#allocation95_spill] sm:$0xff] }
 0x40b   :  { %v1315_v10 = vsel %vm1312_vm6, %v1314_v56, %v1310_v2  ;;  %v310_v37 = vadd.f32 %v6927_v28, %v6926_v19  ;;  %v5388_v28 = vld [vmem:[#allocation6 + $0x1b8] sm:$0xff] }
 0x410   :  { %v3679_v58 = vpop.eup %3678 }
 0x411   :  { %v1321_v55 = vmul.f32 %v3679_v58, %v1315_v10 }
 0x413   :  { %v5262_v53 = vsel %vm1329_vm2, %v1321_v55, %v5175_v61  ;;  %v1332_v60 = vsel %vm1329_vm2, %v1321_v55, 0.0 }
 0x414   :  { %v1333_v11 = vpack.c.bf16 %v1332_v60, %v1332_v60  ;;  %1355 = vmatmul.f32.vlgmr.msrb.gmra.mxu0 %v5262_v53  ;;  %1375 = vmatmul.f32.vlgmr.msrb.gmra.mxu1 %v5262_v53 }
 0x415   :  { %1395 = vmatmul.f32.vlgmr.msrb.gmra.mxu2 %v5262_v53  ;;  %1415 = vmatmul.f32.vlgmr.msrb.gmra.mxu3 %v5262_v53 }
 0x416   :  { %1334 = vst [vmem:[#allocation3 + $0x10] sm:$0xf] %v1333_v11  ;;  %1667 = vmatpush.msrb.mxu0 %v4868_v22  ;;  %1687 = vmatpush.msrb.mxu1 %v4871_v25  ;;  %v6892_v22 = vld [vmem:[#allocation10_spill] sm:$0xff]  ;;  %v6893_v25 = vld [vmem:[#allocation11_spill] sm:$0xff] }
 0x417   :  { %1707 = vmatpush.msrb.mxu2 %v4874_v62  ;;  %1727 = vmatpush.msrb.mxu3 %v4877_v30  ;;  %v6894_v62 = vld [vmem:[#allocation18_spill] sm:$0xff]  ;;  %v6895_v30 = vld [vmem:[#allocation12_spill] sm:$0xff] }
 0x418   :  { %1668 = vmatpush.msrb.mxu0 %v4880_v24  ;;  %1688 = vmatpush.msrb.mxu1 %v4883_v9  ;;  %v6896_v24 = vld [vmem:[#allocation22_spill] sm:$0xff] }
 0x419   :  { %1708 = vmatpush.msrb.mxu2 %v4886_v51  ;;  %1728 = vmatpush.msrb.mxu3 %v4889_v27  ;;  %v6897_v9 = vld [vmem:[#allocation26_spill] sm:$0xff]  ;;  %v6898_v51 = vld [vmem:[#allocation19_spill] sm:$0xff]  ;;  %v6899_v27 = vld [vmem:[#allocation13_spill] sm:$0xff] }
 0x41a   :  { %1669 = vmatpush.msrb.mxu0 %v4892_v14  ;;  %1689 = vmatpush.msrb.mxu1 %v4895_v20  ;;  %v6900_v14 = vld [vmem:[#allocation25_spill] sm:$0xff] }
 0x41b   :  { %1709 = vmatpush.msrb.mxu2 %v4898_v17  ;;  %1729 = vmatpush.msrb.mxu3 %v4901_v26  ;;  %v6901_v20 = vld [vmem:[#allocation29_spill] sm:$0xff]  ;;  %v6902_v17 = vld [vmem:[#allocation20_spill] sm:$0xff]  ;;  %v6903_v26 = vld [vmem:[#allocation14_spill] sm:$0xff] }
 0x41c   :  { %1670 = vmatpush.msrb.mxu0 %v4904_v31  ;;  %1690 = vmatpush.msrb.mxu1 %v4907_v32  ;;  %v6904_v31 = vld [vmem:[#allocation27_spill] sm:$0xff]  ;;  %v6905_v32 = vld [vmem:[#allocation33_spill] sm:$0xff] }
 0x41d   :  { %1710 = vmatpush.msrb.mxu2 %v4910_v33  ;;  %1730 = vmatpush.msrb.mxu3 %v4913_v34  ;;  %v6906_v33 = vld [vmem:[#allocation21_spill] sm:$0xff]  ;;  %v6907_v34 = vld [vmem:[#allocation15_spill] sm:$0xff] }
 0x41e   :  { %1671 = vmatpush.msrb.mxu0 %v4916_v35  ;;  %1691 = vmatpush.msrb.mxu1 %v4919_v38  ;;  %v6908_v35 = vld [vmem:[#allocation30_spill] sm:$0xff] }
 0x41f   :  { %1711 = vmatpush.msrb.mxu2 %v4922_v39  ;;  %1731 = vmatpush.msrb.mxu3 %v4925_v40  ;;  %v6909_v38 = vld [vmem:[#allocation38_spill] sm:$0xff]  ;;  %v6910_v39 = vld [vmem:[#allocation36_spill] sm:$0xff]  ;;  %v6911_v40 = vld [vmem:[#allocation23_spill] sm:$0xff] }
 0x420   :  { %1672 = vmatpush.msrb.mxu0 %v4928_v41  ;;  %1692 = vmatpush.msrb.mxu1 %v4931_v42  ;;  %v6912_v41 = vld [vmem:[#allocation16_spill] sm:$0xff]  ;;  %v6913_v42 = vld [vmem:[#allocation34_spill] sm:$0xff] }
 0x421   :  { %1712 = vmatpush.msrb.mxu2 %v4934_v43  ;;  %1732 = vmatpush.msrb.mxu3 %v4937_v44  ;;  %v6914_v43 = vld [vmem:[#allocation44_spill] sm:$0xff]  ;;  %v6915_v44 = vld [vmem:[#allocation39_spill] sm:$0xff] }
 0x422   :  { %1673 = vmatpush.msrb.mxu0 %v4940_v45  ;;  %1693 = vmatpush.msrb.mxu1 %v4943_v46  ;;  %v6916_v45 = vld [vmem:[#allocation24_spill] sm:$0xff]  ;;  %v6917_v46 = vld [vmem:[#allocation54_spill] sm:$0xff] }
 0x423   :  { %1713 = vmatpush.msrb.mxu2 %v4946_v48  ;;  %1733 = vmatpush.msrb.mxu3 %v4949_v49  ;;  %v6918_v48 = vld [vmem:[#allocation56_spill] sm:$0xff]  ;;  %v6919_v49 = vld [vmem:[#allocation53_spill] sm:$0xff] }
 0x424   :  { %1674 = vmatpush.msrb.mxu0 %v4952_v50  ;;  %1694 = vmatpush.msrb.mxu1 %v4955_v57  ;;  %v6920_v50 = vld [vmem:[#allocation85_spill] sm:$0xff]  ;;  %v6921_v57 = vld [vmem:[#allocation32_spill] sm:$0xff] }
 0x425   :  { %1714 = vmatpush.msrb.mxu2 %v4958_v59  ;;  %1734 = vmatpush.msrb.mxu3 %v4961_v0  ;;  %v212_v59 = vadd.f32 %v6921_v57, %v6920_v50  ;;  %v6922_v0 = vld [vmem:[#allocation92_spill] sm:$0xff] }
 0x426   :  { %1675 = vmatpush.msrb.mxu0 %v4964_v1  ;;  %1695 = vmatpush.msrb.mxu1 %v4967_v5  ;;  %v6923_v1 = vld [vmem:[#allocation64_spill] sm:$0xff] }
 0x427   :  { %1715 = vmatpush.msrb.mxu2 %v4970_v6  ;;  %1735 = vmatpush.msrb.mxu3 %v6855_v12  ;;  %v261_v5 = vadd.f32 %v6923_v1, %v6922_v0 }
 0x428   :  { %1676 = vmatpush.msrb.mxu0 %v6892_v22  ;;  %1696 = vmatpush.msrb.mxu1 %v6893_v25 }
 0x429   :  { %1716 = vmatpush.msrb.mxu2 %v6894_v62  ;;  %1736 = vmatpush.msrb.mxu3 %v6895_v30 }
 0x42a   :  { %1677 = vmatpush.msrb.mxu0 %v6896_v24  ;;  %1697 = vmatpush.msrb.mxu1 %v6897_v9 }
 0x42b   :  { %1717 = vmatpush.msrb.mxu2 %v6898_v51  ;;  %1737 = vmatpush.msrb.mxu3 %v6899_v27 }
 0x42c   :  { %1678 = vmatpush.msrb.mxu0 %v6900_v14  ;;  %1698 = vmatpush.msrb.mxu1 %v6901_v20 }
 0x42d   :  { %1718 = vmatpush.msrb.mxu2 %v6902_v17  ;;  %1738 = vmatpush.msrb.mxu3 %v6903_v26 }
 0x42e   :  { %1679 = vmatpush.msrb.mxu0 %v6904_v31  ;;  %1699 = vmatpush.msrb.mxu1 %v6905_v32 }
 0x42f   :  { %1719 = vmatpush.msrb.mxu2 %v6906_v33  ;;  %1739 = vmatpush.msrb.mxu3 %v6907_v34 }
 0x430   :  { %1680 = vmatpush.msrb.mxu0 %v6908_v35  ;;  %1700 = vmatpush.msrb.mxu1 %v6909_v38 }
 0x431   :  { %1720 = vmatpush.msrb.mxu2 %v6910_v39  ;;  %1740 = vmatpush.msrb.mxu3 %v6911_v40 }
 0x432   :  { %1681 = vmatpush.msrb.mxu0 %v6912_v41  ;;  %1701 = vmatpush.msrb.mxu1 %v6913_v42 }
 0x433   :  { %1721 = vmatpush.msrb.mxu2 %v6914_v43  ;;  %1741 = vmatpush.msrb.mxu3 %v6915_v44 }
 0x434   :  { %1682 = vmatpush.msrb.mxu0 %v6916_v45  ;;  %1702 = vmatpush.msrb.mxu1 %v6917_v46  ;;  %v1492_v45 = vpop.permute.xlu2 %1491 }
 0x435   :  { %1722 = vmatpush.msrb.mxu2 %v6918_v48  ;;  %1742 = vmatpush.msrb.mxu3 %v6919_v49  ;;  %vm1493_vm15 = vcmp.eq.s32.totalorder %v1492_v45, 1  ;;  %v5481_v45 = vld [vmem:[#allocation6 + $0xb0] sm:$0xff] }
 0x436   :  { %6933 = vst [vmem:[#allocation60_spill] sm:$0xff] %v5481_v45 }
 0x491   :  { %v1356_v6 = vpop.f32.mrf.mxu0  ;;  %v1376_v15 = vpop.f32.mrf.mxu1 }
 0x492   :  { %v1419_v61 = vadd.f32 %v1356_v6, %v212_v59  ;;  %v1420_v12 = vadd.f32 %v1376_v15, %v261_v5 }
 0x494   :  { %v3454_v36 = vmul.f32 -1.442695, %v1419_v61  ;;  %v3455_v7 = vmul.f32 -1.442695, %v1420_v12 }
 0x496   :  { %3680 = vpow2.f32 %v3454_v36 }
 0x497   :  { %3682 = vpow2.f32 %v3455_v7 }
 0x498   :  { %v1416_v52 = vpop.f32.mrf.mxu3  ;;  %v1396_v29 = vpop.f32.mrf.mxu2 }
 0x499   :  { %v1422_v18 = vadd.f32 %v1416_v52, %v359_v13  ;;  %v1421_v58 = vadd.f32 %v1396_v29, %v310_v37  ;;  %v5358_v52 = vld [vmem:[#allocation6 + $0x1e8] sm:$0xff]  ;;  %v5391_v37 = vld [vmem:[#allocation6 + $0x180] sm:$0xff] }
 0x49a   :  { %v5382_v29 = vld [vmem:[#allocation6 + $0x1a8] sm:$0xff] }
 0x49b   :  { %v3456_v23 = vmul.f32 -1.442695, %v1422_v18  ;;  %v5364_v18 = vld [vmem:[#allocation6 + $0x1f8] sm:$0xff] }
 0x49c   :  { %v3681_v16 = vpop.eup %3680 }
 0x49d   :  { %v3683_v3 = vpop.eup %3682  ;;  %v1426_v47 = vadd.f32 1.0, %v3681_v16  ;;  %3684 = vpow2.f32 %v3456_v23  ;;  %v5367_v23 = vld [vmem:[#allocation6 + $0x1c0] sm:$0xff]  ;;  %v5370_v16 = vld [vmem:[#allocation6 + $0x1c8] sm:$0xff] }
 0x49e   :  { %v1445_v8 = vadd.f32 1.0, %v3683_v3  ;;  %v5373_v3 = vld [vmem:[#allocation6 + $0x1d0] sm:$0xff] }
 0x49f   :  { %3686 = vrcp.f32 %v1426_v47  ;;  %v1438_v25 = vand.u32 2147483648, %v1426_v47  ;;  %v1436_v24 = vand.u32 2147483647, %v1426_v47  ;;  %vm1432_vm9 = vweird.f32 %v1426_v47 }
 0x4a0   :  { %3688 = vrcp.f32 %v1445_v8  ;;  %v1457_v62 = vand.u32 2147483648, %v1445_v8  ;;  %v1455_v51 = vand.u32 2147483647, %v1445_v8  ;;  %vm1451_vm10 = vweird.f32 %v1445_v8 }
 0x4a1   :  { %v1439_v20 = vor.u32 1.1754944e-38, %v1438_v25  ;;  %vm1437_vm13 = vcmp.eq.f32.partialorder %v1436_v24, 8.507059e+37  ;;  %v5418_v25 = vld [vmem:[#allocation6 + $0x148] sm:$0xff]  ;;  %v5427_v24 = vld [vmem:[#allocation6 + $0x120] sm:$0xff] }
 0x4a2   :  { %v1458_v31 = vor.u32 1.1754944e-38, %v1457_v62  ;;  %vm1456_vm14 = vcmp.eq.f32.partialorder %v1455_v51, 8.507059e+37  ;;  %v5421_v62 = vld [vmem:[#allocation6 + $0x150] sm:$0xff] }
 0x4a3   :  { %v3685_v63 = vpop.eup %3684  ;;  %v5433_v51 = vld [vmem:[#allocation6 + $0x130] sm:$0xff] }
 0x4a4   :  { %v1465_v2 = vadd.f32 1.0, %v3685_v63  ;;  %v5385_v63 = vld [vmem:[#allocation6 + $0x1b0] sm:$0xff] }
 0x4a5   :  { %v3687_v56 = vpop.eup %3686 }
 0x4a6   :  { %v3689_v10 = vpop.eup %3688  ;;  %v1428_v55 = vmul.f32 %v3687_v56, %v1426_v47  ;;  %3690 = vrcp.f32 %v1465_v2  ;;  %vm1433_vm7 = vweird.f32 %v3687_v56  ;;  %v1477_v59 = vand.u32 2147483648, %v1465_v2  ;;  %v5376_v47 = vld [vmem:[#allocation6 + $0x1d8] sm:$0xff] }
 0x4a7   :  { %v1447_v60 = vmul.f32 %v3689_v10, %v1445_v8  ;;  %3692 = vtanh.f32 %v1421_v58  ;;  %vm1452_vm8 = vweird.f32 %v3689_v10  ;;  %vm1434_vm11 = vmor %vm1432_vm9, %vm1433_vm7  ;;  %vm1471_vm2 = vweird.f32 %v1465_v2  ;;  %v5379_v8 = vld [vmem:[#allocation6 + $0x1a0] sm:$0xff]  ;;  %v5400_v58 = vld [vmem:[#allocation6 + $0x198] sm:$0xff] }
 0x4a8   :  { %v1429_v11 = vsub.f32 1.0, %v1428_v55  ;;  %vm1453_vm12 = vmor %vm1451_vm10, %vm1452_vm8  ;;  %v1475_v5 = vand.u32 2147483647, %v1465_v2  ;;  %v1478_v15 = vor.u32 1.1754944e-38, %v1477_v59  ;;  %v5406_v55 = vld [vmem:[#allocation6 + $0x168] sm:$0xff] }
 0x4a9   :  { %v1448_v22 = vsub.f32 1.0, %v1447_v60  ;;  %v5409_v60 = vld [vmem:[#allocation6 + $0x170] sm:$0xff]  ;;  %v5490_v59 = vld [vmem:[#allocation6 + $0x88] sm:$0xff] }
 0x4aa   :  { %v1430_v30 = vmul.f32 %v3687_v56, %v1429_v11  ;;  %vm1476_vm4 = vcmp.eq.f32.partialorder %v1475_v5, 8.507059e+37  ;;  %v5412_v11 = vld [vmem:[#allocation6 + $0x178] sm:$0xff]  ;;  %6936 = vst [vmem:[#allocation61_spill] sm:$0xff] %v5490_v59  ;;  %v5493_v5 = vld [vmem:[#allocation6 + $0x90] sm:$0xff] }
 0x4ab   :  { %v1449_v9 = vmul.f32 %v3689_v10, %v1448_v22  ;;  %v5415_v22 = vld [vmem:[#allocation6 + $0x140] sm:$0xff]  ;;  %6937 = vst [vmem:[#allocation48_spill] sm:$0xff] %v5493_v5 }
 0x4ac   :  { %v3691_v27 = vpop.eup %3690  ;;  %v1431_v14 = vadd.f32 %v3687_v56, %v1430_v30  ;;  %v5424_v30 = vld [vmem:[#allocation6 + $0x158] sm:$0xff] }
 0x4ad   :  { %v1450_v17 = vadd.f32 %v3689_v10, %v1449_v9  ;;  %v1467_v26 = vmul.f32 %v3691_v27, %v1465_v2  ;;  %v3693_v33 = vpop.eup %3692  ;;  %vm1472_vm1 = vweird.f32 %v3691_v27  ;;  %v5394_v2 = vld [vmem:[#allocation6 + $0x188] sm:$0xff] }
 0x4ae   :  { %v1435_v32 = vsel %vm1434_vm11, %v3687_v56, %v1431_v14  ;;  %vm1473_vm3 = vmor %vm1471_vm2, %vm1472_vm1  ;;  %v5397_v56 = vld [vmem:[#allocation6 + $0x190] sm:$0xff]  ;;  %v5430_v9 = vld [vmem:[#allocation6 + $0x128] sm:$0xff] }
 0x4af   :  { %v1440_v34 = vsel %vm1437_vm13, %v1439_v20, %v1435_v32  ;;  %v1454_v35 = vsel %vm1453_vm12, %v3689_v10, %v1450_v17  ;;  %v1468_v38 = vsub.f32 1.0, %v1467_v26  ;;  %v5403_v10 = vld [vmem:[#allocation6 + $0x160] sm:$0xff]  ;;  %v5442_v20 = vld [vmem:[#allocation6 + $0x108] sm:$0xff]  ;;  %v5445_v17 = vld [vmem:[#allocation6 + $0x110] sm:$0xff] }
 0x4b0   :  { %v1459_v40 = vsel %vm1456_vm14, %v1458_v31, %v1454_v35  ;;  %v1482_v41 = vmul.f32 %v3693_v33, %v1440_v34  ;;  %v5439_v14 = vld [vmem:[#allocation6 + $0x100] sm:$0xff]  ;;  %v5448_v26 = vld [vmem:[#allocation6 + $0x118] sm:$0xff]  ;;  %v5454_v32 = vld [vmem:[#allocation6 + $0xe8] sm:$0xff] }
 0x4b1   :  { %v1481_v42 = vmul.f32 %v1459_v40, %v5258_v4  ;;  %v1469_v44 = vmul.f32 %v3691_v27, %v1468_v38  ;;  %v5451_v31 = vld [vmem:[#allocation6 + $0xe0] sm:$0xff]  ;;  %v5457_v33 = vld [vmem:[#allocation6 + $0xf0] sm:$0xff]  ;;  %v5460_v34 = vld [vmem:[#allocation6 + $0xf8] sm:$0xff] }
 0x4b2   :  { %v5463_v35 = vld [vmem:[#allocation6 + $0xc0] sm:$0xff]  ;;  %v5466_v38 = vld [vmem:[#allocation6 + $0xc8] sm:$0xff]  ;;  %v5469_v40 = vld [vmem:[#allocation6 + $0xd0] sm:$0xff] }
 0x4b3   :  { %v1483_v49 = vadd.f32 %v1482_v41, %v1481_v42  ;;  %v1470_v57 = vadd.f32 %v3691_v27, %v1469_v44  ;;  %6928 = vst [vmem:[#allocation41_spill] sm:$0xff] %v5466_v38  ;;  %v5472_v41 = vld [vmem:[#allocation6 + $0xd8] sm:$0xff]  ;;  %v5475_v42 = vld [vmem:[#allocation6 + $0xa0] sm:$0xff]  ;;  %v5478_v44 = vld [vmem:[#allocation6 + $0xa8] sm:$0xff] }
 0x4b4   :  { %6929 = vst [vmem:[#allocation57_spill] sm:$0xff] %v5469_v40 }
 0x4b5   :  { %3694 = vtanh.f32 %v1483_v49  ;;  %v5344_v1 = vsel %vm1493_vm15, %v1483_v49, %v5258_v4  ;;  %v1474_v6 = vsel %vm1473_vm3, %v3691_v27, %v1470_v57  ;;  %v5355_v4 = vld [vmem:[#allocation6 + $0x1e0] sm:$0xff]  ;;  %v5436_v27 = vld [vmem:[#allocation6 + $0x138] sm:$0xff]  ;;  %6930 = vst [vmem:[#allocation58_spill] sm:$0xff] %v5472_v41 }
 0x4b6   :  { %v1479_v12 = vsel %vm1476_vm4, %v1478_v15, %v1474_v6  ;;  %6931 = vst [vmem:[#allocation17_spill] sm:$0xff] %v5475_v42  ;;  %v5484_v49 = vld [vmem:[#allocation6 + $0xb8] sm:$0xff]  ;;  %v5487_v57 = vld [vmem:[#allocation6 + $0x80] sm:$0xff] }
 0x4b7   :  { %6932 = vst [vmem:[#allocation45_spill] sm:$0xff] %v5478_v44  ;;  %v5496_v6 = vld [vmem:[#allocation6 + $0x98] sm:$0xff]  ;;  %v5499_v15 = vld [vmem:[#allocation6 + $0x60] sm:$0xff] }
 0x4b8   :  { %6934 = vst [vmem:[#allocation9_spill] sm:$0xff] %v5484_v49 }
 0x4b9   :  { %6935 = vst [vmem:[#allocation28_spill] sm:$0xff] %v5487_v57 }
 0x4ba   :  { %6938 = vst [vmem:[#allocation63_spill] sm:$0xff] %v5496_v6 }
 0x4bb   :  { %v3695_v61 = vpop.eup %3694  ;;  %6939 = vst [vmem:[#allocation10_spill] sm:$0xff] %v5499_v15 }
 0x4bc   :  { %v1485_v36 = vmul.f32 %v3695_v61, %v1479_v12  ;;  %v5502_v61 = vld [vmem:[#allocation6 + $0x68] sm:$0xff]  ;;  %v5505_v12 = vld [vmem:[#allocation6 + $0x70] sm:$0xff] }
 0x4bd   :  { %6940 = vst [vmem:[#allocation11_spill] sm:$0xff] %v5502_v61 }
 0x4be   :  { %v5348_v7 = vsel %vm1493_vm15, %v1485_v36, %v5262_v53  ;;  %v1496_v21 = vsel %vm1493_vm15, %v1485_v36, 0.0  ;;  %v5361_v53 = vld [vmem:[#allocation6 + $0x1f0] sm:$0xff]  ;;  %6941 = vst [vmem:[#allocation18_spill] sm:$0xff] %v5505_v12  ;;  %v5508_v36 = vld [vmem:[#allocation6 + $0x78] sm:$0xff] }
 0x4bf   :  { %v1497_v13 = vpack.c.bf16 %v1496_v21, %v1496_v21  ;;  %1519 = vmatmul.f32.vlgmr.msra.gmra.mxu0 %v5348_v7  ;;  %1539 = vmatmul.f32.vlgmr.msra.gmra.mxu1 %v5348_v7  ;;  %6942 = vst [vmem:[#allocation12_spill] sm:$0xff] %v5508_v36  ;;  %v5511_v21 = vld [vmem:[#allocation6 + $0x40] sm:$0xff] }
 0x4c0   :  { %1559 = vmatmul.f32.vlgmr.msra.gmra.mxu2 %v5348_v7  ;;  %1579 = vmatmul.f32.vlgmr.msra.gmra.mxu3 %v5348_v7  ;;  %6943 = vst [vmem:[#allocation22_spill] sm:$0xff] %v5511_v21 }
 0x4c1   :  { %1498 = vst [vmem:[#allocation3 + $0x14] sm:$0xf] %v1497_v13  ;;  %1831 = vmatpush.msra.mxu0 %v5355_v4  ;;  %1851 = vmatpush.msra.mxu1 %v5358_v52  ;;  %v5514_v13 = vld [vmem:[#allocation6 + $0x48] sm:$0xff] }
 0x4c2   :  { %1871 = vmatpush.msra.mxu2 %v5361_v53  ;;  %1891 = vmatpush.msra.mxu3 %v5364_v18  ;;  %6944 = vst [vmem:[#allocation26_spill] sm:$0xff] %v5514_v13 }
 0x4c3   :  { %1832 = vmatpush.msra.mxu0 %v5367_v23  ;;  %1852 = vmatpush.msra.mxu1 %v5370_v16 }
 0x4c4   :  { %1872 = vmatpush.msra.mxu2 %v5373_v3  ;;  %1892 = vmatpush.msra.mxu3 %v5376_v47 }
 0x4c5   :  { %1833 = vmatpush.msra.mxu0 %v5379_v8  ;;  %1853 = vmatpush.msra.mxu1 %v5382_v29 }
 0x4c6   :  { %1873 = vmatpush.msra.mxu2 %v5385_v63  ;;  %1893 = vmatpush.msra.mxu3 %v5388_v28 }
 0x4c7   :  { %1834 = vmatpush.msra.mxu0 %v5391_v37  ;;  %1854 = vmatpush.msra.mxu1 %v5394_v2 }
 0x4c8   :  { %1874 = vmatpush.msra.mxu2 %v5397_v56  ;;  %1894 = vmatpush.msra.mxu3 %v5400_v58 }
 0x4c9   :  { %1835 = vmatpush.msra.mxu0 %v5403_v10  ;;  %1855 = vmatpush.msra.mxu1 %v5406_v55 }
 0x4ca   :  { %1875 = vmatpush.msra.mxu2 %v5409_v60  ;;  %1895 = vmatpush.msra.mxu3 %v5412_v11 }
 0x4cb   :  { %1836 = vmatpush.msra.mxu0 %v5415_v22  ;;  %1856 = vmatpush.msra.mxu1 %v5418_v25 }
 0x4cc   :  { %1876 = vmatpush.msra.mxu2 %v5421_v62  ;;  %1896 = vmatpush.msra.mxu3 %v5424_v30 }
 0x4cd   :  { %1837 = vmatpush.msra.mxu0 %v5427_v24  ;;  %1857 = vmatpush.msra.mxu1 %v5430_v9 }
 0x4ce   :  { %1877 = vmatpush.msra.mxu2 %v5433_v51  ;;  %1897 = vmatpush.msra.mxu3 %v5436_v27 }
 0x4cf   :  { %1838 = vmatpush.msra.mxu0 %v5439_v14  ;;  %1858 = vmatpush.msra.mxu1 %v5442_v20 }
 0x4d0   :  { %1878 = vmatpush.msra.mxu2 %v5445_v17  ;;  %1898 = vmatpush.msra.mxu3 %v5448_v26 }
 0x4d1   :  { %1839 = vmatpush.msra.mxu0 %v5451_v31  ;;  %1859 = vmatpush.msra.mxu1 %v5454_v32 }
 0x4d2   :  { %1879 = vmatpush.msra.mxu2 %v5457_v33  ;;  %1899 = vmatpush.msra.mxu3 %v5460_v34 }
 0x4d3   :  { %1840 = vmatpush.msra.mxu0 %v5463_v35  ;;  %1860 = vmatpush.msra.mxu1 %v5466_v38 }
 0x4d4   :  { %1880 = vmatpush.msra.mxu2 %v5469_v40  ;;  %1900 = vmatpush.msra.mxu3 %v5472_v41 }
 0x4d5   :  { %1841 = vmatpush.msra.mxu0 %v5475_v42  ;;  %1861 = vmatpush.msra.mxu1 %v5478_v44 }
 0x4d6   :  { %1881 = vmatpush.msra.mxu2 %v5481_v45  ;;  %1901 = vmatpush.msra.mxu3 %v5484_v49 }
 0x4d7   :  { %1842 = vmatpush.msra.mxu0 %v5487_v57  ;;  %1862 = vmatpush.msra.mxu1 %v5490_v59 }
 0x4d8   :  { %1882 = vmatpush.msra.mxu2 %v5493_v5  ;;  %1902 = vmatpush.msra.mxu3 %v5496_v6 }
 0x4d9   :  { %1843 = vmatpush.msra.mxu0 %v5499_v15  ;;  %1863 = vmatpush.msra.mxu1 %v5502_v61  ;;  %v5518_v15 = vld [vmem:[#allocation6 + $0x58] sm:$0xff]  ;;  %v5521_v61 = vld [vmem:[#allocation6 + $0x20] sm:$0xff] }
 0x4da   :  { %1883 = vmatpush.msra.mxu2 %v5505_v12  ;;  %1903 = vmatpush.msra.mxu3 %v5508_v36  ;;  %6945 = vst [vmem:[#allocation19_spill] sm:$0xff] %v5518_v15  ;;  %v5524_v12 = vld [vmem:[#allocation6 + $0x28] sm:$0xff] }
 0x4db   :  { %1844 = vmatpush.msra.mxu0 %v5511_v21  ;;  %1864 = vmatpush.msra.mxu1 %v5514_v13  ;;  %6946 = vst [vmem:[#allocation13_spill] sm:$0xff] %v5521_v61  ;;  %v5528_v21 = vld [vmem:[#allocation6 + $0x38] sm:$0xff]  ;;  %v5531_v13 = vld [vmem:[#allocation6] sm:$0xff] }
 0x4dc   :  { %1884 = vmatpush.msra.mxu2 %v6910_v39  ;;  %1904 = vmatpush.msra.mxu3 %v5518_v15  ;;  %6947 = vst [vmem:[#allocation25_spill] sm:$0xff] %v5524_v12  ;;  %v5536_v39 = vld [vmem:[#allocation6 + $0x18] sm:$0xff] }
 0x4dd   :  { %1845 = vmatpush.msra.mxu0 %v5521_v61  ;;  %1865 = vmatpush.msra.mxu1 %v5524_v12  ;;  %6948 = vst [vmem:[#allocation29_spill] sm:$0xff] %v5528_v21  ;;  %v6951_v12 = vld [vmem:[#allocation37_spill] sm:$0xff] }
 0x4de   :  { %1885 = vmatpush.msra.mxu2 %v6914_v43  ;;  %1905 = vmatpush.msra.mxu3 %v5528_v21  ;;  %6949 = vst [vmem:[#allocation20_spill] sm:$0xff] %v5531_v13  ;;  %v215_v61 = vadd.f32 %v6951_v12, %v6920_v50  ;;  %v6952_v43 = vld [vmem:[#allocation67_spill] sm:$0xff] }
 0x4df   :  { %1846 = vmatpush.msra.mxu0 %v5531_v13  ;;  %1866 = vmatpush.msra.mxu1 %v6917_v46  ;;  %6950 = vst [vmem:[#allocation14_spill] sm:$0xff] %v5536_v39  ;;  %v264_v15 = vadd.f32 %v6952_v43, %v6922_v0  ;;  %v6953_v46 = vld [vmem:[#allocation52_spill] sm:$0xff] }
 0x4e0   :  { %1886 = vmatpush.msra.mxu2 %v6918_v48  ;;  %1906 = vmatpush.msra.mxu3 %v5536_v39  ;;  %v362_v48 = vadd.f32 %v6953_v46, %v6924_v54 }
 0x53c   :  { %v1520_v36 = vpop.f32.mrf.mxu0  ;;  %v1540_v21 = vpop.f32.mrf.mxu1 }
 0x53d   :  { %v1583_v6 = vadd.f32 %v1520_v36, %v215_v61  ;;  %v1584_v5 = vadd.f32 %v1540_v21, %v264_v15 }
 0x53f   :  { %v3457_v59 = vmul.f32 -1.442695, %v1583_v6  ;;  %v3458_v13 = vmul.f32 -1.442695, %v1584_v5  ;;  %v6954_v6 = vld [vmem:[#allocation68_spill] sm:$0xff] }
 0x540   :  { %v313_v5 = vadd.f32 %v6954_v6, %v6926_v19 }
 0x541   :  { %3696 = vpow2.f32 %v3457_v59 }
 0x542   :  { %3698 = vpow2.f32 %v3458_v13 }
 0x543   :  { %v1580_v57 = vpop.f32.mrf.mxu3  ;;  %v1560_v43 = vpop.f32.mrf.mxu2 }
 0x544   :  { %v1586_v49 = vadd.f32 %v1580_v57, %v362_v48  ;;  %v1585_v36 = vadd.f32 %v1560_v43, %v313_v5 }
 0x546   :  { %v3459_v39 = vmul.f32 -1.442695, %v1586_v49 }
 0x547   :  { %v3697_v45 = vpop.eup %3696 }
 0x548   :  { %v3699_v44 = vpop.eup %3698  ;;  %v1590_v12 = vadd.f32 1.0, %v3697_v45  ;;  %3700 = vpow2.f32 %v3459_v39 }
 0x549   :  { %v1609_v50 = vadd.f32 1.0, %v3699_v44 }
 0x54a   :  { %3702 = vrcp.f32 %v1590_v12  ;;  %v1602_v48 = vand.u32 2147483648, %v1590_v12  ;;  %v1600_v39 = vand.u32 2147483647, %v1590_v12  ;;  %vm1596_vm7 = vweird.f32 %v1590_v12 }
 0x54b   :  { %3704 = vrcp.f32 %v1609_v50  ;;  %v1621_v45 = vand.u32 2147483648, %v1609_v50  ;;  %v1619_v0 = vand.u32 2147483647, %v1609_v50  ;;  %vm1615_vm8 = vweird.f32 %v1609_v50 }
 0x54c   :  { %v1603_v43 = vor.u32 1.1754944e-38, %v1602_v48  ;;  %vm1601_vm11 = vcmp.eq.f32.partialorder %v1600_v39, 8.507059e+37 }
 0x54d   :  { %vm1620_vm12 = vcmp.eq.f32.partialorder %v1619_v0, 8.507059e+37 }
 0x54e   :  { %v3701_v61 = vpop.eup %3700 }
 0x54f   :  { %v1629_v59 = vadd.f32 1.0, %v3701_v61 }
 0x550   :  { %v3703_v15 = vpop.eup %3702 }
 0x551   :  { %v3705_v21 = vpop.eup %3704  ;;  %v1592_v13 = vmul.f32 %v3703_v15, %v1590_v12  ;;  %3706 = vrcp.f32 %v1629_v59  ;;  %vm1597_vm5 = vweird.f32 %v3703_v15  ;;  %v1656_v12 = vpop.permute.xlu0 %1655  ;;  %vm1635_vm15 = vweird.f32 %v1629_v59 }
 0x552   :  { %v1611_v57 = vmul.f32 %v3705_v21, %v1609_v50  ;;  %3708 = vtanh.f32 %v1585_v36  ;;  %vm1616_vm6 = vweird.f32 %v3705_v21  ;;  %vm1598_vm9 = vmor %vm1596_vm7, %vm1597_vm5  ;;  %vm1657_vm13 = vcmp.eq.s32.totalorder %v1656_v12, 1  ;;  %v6968_v12 = vld [vmem:[#allocation18_spill] sm:$0xff] }
 0x553   :  { %v1593_v49 = vsub.f32 1.0, %v1592_v13  ;;  %vm1617_vm10 = vmor %vm1615_vm8, %vm1616_vm6  ;;  %v1622_v13 = vor.u32 1.1754944e-38, %v1621_v45 }
 0x554   :  { %v1612_v46 = vsub.f32 1.0, %v1611_v57 }
 0x555   :  { %v1594_v44 = vmul.f32 %v3703_v15, %v1593_v49 }
 0x556   :  { %v1613_v54 = vmul.f32 %v3705_v21, %v1612_v46 }
 0x557   :  { %v3707_v42 = vpop.eup %3706  ;;  %v1595_v6 = vadd.f32 %v3703_v15, %v1594_v44 }
 0x558   :  { %v1614_v61 = vadd.f32 %v3705_v21, %v1613_v54  ;;  %v1631_v5 = vmul.f32 %v3707_v42, %v1629_v59  ;;  %v3709_v36 = vpop.eup %3708  ;;  %vm1636_vm14 = vweird.f32 %v3707_v42  ;;  %v1641_v54 = vand.u32 2147483648, %v1629_v59 }
 0x559   :  { %v1599_v57 = vsel %vm1598_vm9, %v3703_v15, %v1595_v6  ;;  %vm1637_vm1 = vmor %vm1635_vm15, %vm1636_vm14 }
 0x55a   :  { %v1604_v19 = vsel %vm1601_vm11, %v1603_v43, %v1599_v57  ;;  %v1618_v49 = vsel %vm1617_vm10, %v3705_v21, %v1614_v61  ;;  %v1632_v41 = vsub.f32 1.0, %v1631_v5  ;;  %v1639_v21 = vand.u32 2147483647, %v1629_v59  ;;  %v6958_v59 = vld [vmem:[#allocation17_spill] sm:$0xff]  ;;  %v6960_v61 = vld [vmem:[#allocation60_spill] sm:$0xff] }
 0x55b   :  { %v1623_v46 = vsel %vm1620_vm12, %v1622_v13, %v1618_v49  ;;  %v1646_v40 = vmul.f32 %v3709_v36, %v1604_v19  ;;  %v1642_v45 = vor.u32 1.1754944e-38, %v1641_v54  ;;  %v6959_v43 = vld [vmem:[#allocation45_spill] sm:$0xff]  ;;  %v6962_v13 = vld [vmem:[#allocation28_spill] sm:$0xff]  ;;  %v6965_v49 = vld [vmem:[#allocation63_spill] sm:$0xff] }
 0x55c   :  { %v1645_v38 = vmul.f32 %v1623_v46, %v5344_v1  ;;  %v1633_v44 = vmul.f32 %v3707_v42, %v1632_v41  ;;  %vm1640_vm2 = vcmp.eq.f32.partialorder %v1639_v21, 8.507059e+37  ;;  %v6961_v5 = vld [vmem:[#allocation9_spill] sm:$0xff]  ;;  %v6964_v36 = vld [vmem:[#allocation48_spill] sm:$0xff]  ;;  %v6966_v46 = vld [vmem:[#allocation10_spill] sm:$0xff] }
 0x55d   :  { %v6963_v57 = vld [vmem:[#allocation61_spill] sm:$0xff]  ;;  %v6971_v54 = vld [vmem:[#allocation26_spill] sm:$0xff]  ;;  %v5615_v21 = vld [vmem:[#allocation6 + $0x50] sm:$0xff] }
 0x55e   :  { %v1647_v50 = vadd.f32 %v1646_v40, %v1645_v38  ;;  %v1634_v48 = vadd.f32 %v3707_v42, %v1633_v44  ;;  %v6967_v44 = vld [vmem:[#allocation11_spill] sm:$0xff]  ;;  %6972 = vst [vmem:[#allocation27_spill] sm:$0xff] %v5615_v21 }
 0x560   :  { %3710 = vtanh.f32 %v1647_v50  ;;  %v5550_v15 = vsel %vm1657_vm13, %v1647_v50, %v5344_v1  ;;  %v1638_v0 = vsel %vm1637_vm1, %v3707_v42, %v1634_v48  ;;  %v6955_v1 = vld [vmem:[#allocation41_spill] sm:$0xff]  ;;  %v6957_v42 = vld [vmem:[#allocation58_spill] sm:$0xff]  ;;  %v6969_v50 = vld [vmem:[#allocation12_spill] sm:$0xff] }
 0x561   :  { %v1643_v39 = vsel %vm1640_vm2, %v1642_v45, %v1638_v0  ;;  %v6970_v48 = vld [vmem:[#allocation22_spill] sm:$0xff]  ;;  %v6973_v0 = vld [vmem:[#allocation19_spill] sm:$0xff]  ;;  %v6974_v45 = vld [vmem:[#allocation13_spill] sm:$0xff] }
 0x566   :  { %v3711_v19 = vpop.eup %3710 }
 0x567   :  { %v1649_v41 = vmul.f32 %v3711_v19, %v1643_v39  ;;  %v6975_v19 = vld [vmem:[#allocation25_spill] sm:$0xff]  ;;  %v5621_v39 = vld [vmem:[#allocation6 + $0x30] sm:$0xff] }
 0x568   :  { %6976 = vst [vmem:[#allocation33_spill] sm:$0xff] %v5621_v39 }
 0x569   :  { %v5554_v38 = vsel %vm1657_vm13, %v1649_v41, %v5348_v7  ;;  %v1660_v40 = vsel %vm1657_vm13, %v1649_v41, 0.0  ;;  %v6956_v7 = vld [vmem:[#allocation57_spill] sm:$0xff] }
 0x56a   :  { %v1661_v6 = vpack.c.bf16 %v1660_v40, %v1660_v40  ;;  %1683 = vmatmul.f32.vlgmr.msrb.gmra.mxu0 %v5554_v38  ;;  %1703 = vmatmul.f32.vlgmr.msrb.gmra.mxu1 %v5554_v38  ;;  %v6977_v41 = vld [vmem:[#allocation29_spill] sm:$0xff]  ;;  %v6978_v40 = vld [vmem:[#allocation20_spill] sm:$0xff] }
 0x56b   :  { %1723 = vmatmul.f32.vlgmr.msrb.gmra.mxu2 %v5554_v38  ;;  %1743 = vmatmul.f32.vlgmr.msrb.gmra.mxu3 %v5554_v38 }
 0x56c   :  { %1662 = vst [vmem:[#allocation3 + $0x18] sm:$0xf] %v1661_v6  ;;  %1995 = vmatpush.msrb.mxu0 %v5355_v4  ;;  %2015 = vmatpush.msrb.mxu1 %v5358_v52  ;;  %v5626_v6 = vld [vmem:[#allocation6 + $0x8] sm:$0xff] }
 0x56d   :  { %2035 = vmatpush.msrb.mxu2 %v5361_v53  ;;  %2055 = vmatpush.msrb.mxu3 %v5364_v18  ;;  %6979 = vst [vmem:[#allocation21_spill] sm:$0xff] %v5626_v6 }
 0x56e   :  { %1996 = vmatpush.msrb.mxu0 %v5367_v23  ;;  %2016 = vmatpush.msrb.mxu1 %v5370_v16 }
 0x56f   :  { %2036 = vmatpush.msrb.mxu2 %v5373_v3  ;;  %2056 = vmatpush.msrb.mxu3 %v5376_v47 }
 0x570   :  { %1997 = vmatpush.msrb.mxu0 %v5379_v8  ;;  %2017 = vmatpush.msrb.mxu1 %v5382_v29 }
 0x571   :  { %2037 = vmatpush.msrb.mxu2 %v5385_v63  ;;  %2057 = vmatpush.msrb.mxu3 %v5388_v28 }
 0x572   :  { %1998 = vmatpush.msrb.mxu0 %v5391_v37  ;;  %2018 = vmatpush.msrb.mxu1 %v5394_v2 }
 0x573   :  { %2038 = vmatpush.msrb.mxu2 %v5397_v56  ;;  %2058 = vmatpush.msrb.mxu3 %v5400_v58 }
 0x574   :  { %1999 = vmatpush.msrb.mxu0 %v5403_v10  ;;  %2019 = vmatpush.msrb.mxu1 %v5406_v55 }
 0x575   :  { %2039 = vmatpush.msrb.mxu2 %v5409_v60  ;;  %2059 = vmatpush.msrb.mxu3 %v5412_v11 }
 0x576   :  { %2000 = vmatpush.msrb.mxu0 %v5415_v22  ;;  %2020 = vmatpush.msrb.mxu1 %v5418_v25 }
 0x577   :  { %2040 = vmatpush.msrb.mxu2 %v5421_v62  ;;  %2060 = vmatpush.msrb.mxu3 %v5424_v30 }
 0x578   :  { %2001 = vmatpush.msrb.mxu0 %v5427_v24  ;;  %2021 = vmatpush.msrb.mxu1 %v5430_v9 }
 0x579   :  { %2041 = vmatpush.msrb.mxu2 %v5433_v51  ;;  %2061 = vmatpush.msrb.mxu3 %v5436_v27 }
 0x57a   :  { %2002 = vmatpush.msrb.mxu0 %v5439_v14  ;;  %2022 = vmatpush.msrb.mxu1 %v5442_v20 }
 0x57b   :  { %2042 = vmatpush.msrb.mxu2 %v5445_v17  ;;  %2062 = vmatpush.msrb.mxu3 %v5448_v26 }
 0x57c   :  { %2003 = vmatpush.msrb.mxu0 %v5451_v31  ;;  %2023 = vmatpush.msrb.mxu1 %v5454_v32 }
 0x57d   :  { %2043 = vmatpush.msrb.mxu2 %v5457_v33  ;;  %2063 = vmatpush.msrb.mxu3 %v5460_v34 }
 0x57e   :  { %2004 = vmatpush.msrb.mxu0 %v5463_v35  ;;  %2024 = vmatpush.msrb.mxu1 %v6955_v1 }
 0x57f   :  { %2044 = vmatpush.msrb.mxu2 %v6956_v7  ;;  %2064 = vmatpush.msrb.mxu3 %v6957_v42 }
 0x580   :  { %2005 = vmatpush.msrb.mxu0 %v6958_v59  ;;  %2025 = vmatpush.msrb.mxu1 %v6959_v43 }
 0x581   :  { %2045 = vmatpush.msrb.mxu2 %v6960_v61  ;;  %2065 = vmatpush.msrb.mxu3 %v6961_v5 }
 0x582   :  { %2006 = vmatpush.msrb.mxu0 %v6962_v13  ;;  %2026 = vmatpush.msrb.mxu1 %v6963_v57 }
 0x583   :  { %2046 = vmatpush.msrb.mxu2 %v6964_v36  ;;  %2066 = vmatpush.msrb.mxu3 %v6965_v49  ;;  %v6987_v36 = vld [vmem:[#allocation55_spill] sm:$0xff] }
 0x584   :  { %2007 = vmatpush.msrb.mxu0 %v6966_v46  ;;  %2027 = vmatpush.msrb.mxu1 %v6967_v44 }
 0x585   :  { %2047 = vmatpush.msrb.mxu2 %v6968_v12  ;;  %2067 = vmatpush.msrb.mxu3 %v6969_v50  ;;  %v6985_v50 = vld [vmem:[#allocation70_spill] sm:$0xff] }
 0x586   :  { %2008 = vmatpush.msrb.mxu0 %v6970_v48  ;;  %2028 = vmatpush.msrb.mxu1 %v6971_v54  ;;  %v5629_v54 = vld [vmem:[#allocation6 + $0x10] sm:$0xff]  ;;  %v6984_v48 = vld [vmem:[#allocation92_spill] sm:$0xff] }
 0x587   :  { %2048 = vmatpush.msrb.mxu2 %v5615_v21  ;;  %2068 = vmatpush.msrb.mxu3 %v6973_v0  ;;  %6980 = vst [vmem:[#allocation15_spill] sm:$0xff] %v5629_v54  ;;  %v6981_v0 = vld [vmem:[#allocation14_spill] sm:$0xff] }
 0x588   :  { %2009 = vmatpush.msrb.mxu0 %v6974_v45  ;;  %2029 = vmatpush.msrb.mxu1 %v6975_v19  ;;  %v6982_v45 = vld [vmem:[#allocation85_spill] sm:$0xff]  ;;  %v6983_v19 = vld [vmem:[#allocation42_spill] sm:$0xff] }
 0x589   :  { %2049 = vmatpush.msrb.mxu2 %v5621_v39  ;;  %2069 = vmatpush.msrb.mxu3 %v6977_v41  ;;  %v217_v21 = vadd.f32 %v6983_v19, %v6982_v45  ;;  %v266_v39 = vadd.f32 %v6985_v50, %v6984_v48 }
 0x58a   :  { %2010 = vmatpush.msrb.mxu0 %v6978_v40  ;;  %2030 = vmatpush.msrb.mxu1 %v5626_v6  ;;  %v6986_v6 = vld [vmem:[#allocation89_spill] sm:$0xff] }
 0x58b   :  { %2050 = vmatpush.msrb.mxu2 %v5629_v54  ;;  %2070 = vmatpush.msrb.mxu3 %v6981_v0  ;;  %v364_v57 = vadd.f32 %v6987_v36, %v6986_v6 }
 0x5e7   :  { %v1684_v12 = vpop.f32.mrf.mxu0  ;;  %v1704_v41 = vpop.f32.mrf.mxu1 }
 0x5e8   :  { %v1747_v44 = vadd.f32 %v1684_v12, %v217_v21  ;;  %v1748_v40 = vadd.f32 %v1704_v41, %v266_v39  ;;  %v6988_v21 = vld [vmem:[#allocation95_spill] sm:$0xff] }
 0x5ea   :  { %v3460_v46 = vmul.f32 -1.442695, %v1747_v44  ;;  %v3461_v49 = vmul.f32 -1.442695, %v1748_v40  ;;  %v6989_v44 = vld [vmem:[#allocation71_spill] sm:$0xff] }
 0x5eb   :  { %v315_v39 = vadd.f32 %v6989_v44, %v6988_v21 }
 0x5ec   :  { %3712 = vpow2.f32 %v3460_v46 }
 0x5ed   :  { %3714 = vpow2.f32 %v3461_v49 }
 0x5ee   :  { %v1744_v54 = vpop.f32.mrf.mxu3  ;;  %v1724_v50 = vpop.f32.mrf.mxu2 }
 0x5ef   :  { %v1750_v13 = vadd.f32 %v1744_v54, %v364_v57  ;;  %v1749_v40 = vadd.f32 %v1724_v50, %v315_v39 }
 0x5f1   :  { %v3462_v0 = vmul.f32 -1.442695, %v1750_v13 }
 0x5f2   :  { %v3713_v5 = vpop.eup %3712 }
 0x5f3   :  { %v3715_v61 = vpop.eup %3714  ;;  %v1754_v19 = vadd.f32 1.0, %v3713_v5  ;;  %3716 = vpow2.f32 %v3462_v0 }
 0x5f4   :  { %v1773_v45 = vadd.f32 1.0, %v3715_v61 }
 0x5f5   :  { %3718 = vrcp.f32 %v1754_v19  ;;  %v1766_v6 = vand.u32 2147483648, %v1754_v19  ;;  %v1764_v0 = vand.u32 2147483647, %v1754_v19  ;;  %vm1760_vm5 = vweird.f32 %v1754_v19 }
 0x5f6   :  { %3720 = vrcp.f32 %v1773_v45  ;;  %v1785_v5 = vand.u32 2147483648, %v1773_v45  ;;  %v1783_v43 = vand.u32 2147483647, %v1773_v45  ;;  %vm1779_vm6 = vweird.f32 %v1773_v45 }
 0x5f7   :  { %v1767_v50 = vor.u32 1.1754944e-38, %v1766_v6  ;;  %vm1765_vm9 = vcmp.eq.f32.partialorder %v1764_v0, 8.507059e+37 }
 0x5f8   :  { %vm1784_vm10 = vcmp.eq.f32.partialorder %v1783_v43, 8.507059e+37 }
 0x5f9   :  { %v3717_v12 = vpop.eup %3716 }
 0x5fa   :  { %v1793_v46 = vadd.f32 1.0, %v3717_v12 }
 0x5fb   :  { %v3719_v41 = vpop.eup %3718 }
 0x5fc   :  { %v3721_v36 = vpop.eup %3720  ;;  %v1756_v49 = vmul.f32 %v3719_v41, %v1754_v19  ;;  %3722 = vrcp.f32 %v1793_v46  ;;  %vm1761_vm3 = vweird.f32 %v3719_v41  ;;  %v1820_v19 = vpop.permute.xlu1 %1819  ;;  %vm1799_vm13 = vweird.f32 %v1793_v46 }
 0x5fd   :  { %v1775_v57 = vmul.f32 %v3721_v36, %v1773_v45  ;;  %3724 = vtanh.f32 %v1749_v40  ;;  %vm1780_vm4 = vweird.f32 %v3721_v36  ;;  %vm1762_vm7 = vmor %vm1760_vm5, %vm1761_vm3  ;;  %vm1821_vm11 = vcmp.eq.s32.totalorder %v1820_v19, 1  ;;  %v7003_v19 = vld [vmem:[#allocation18_spill] sm:$0xff] }
 0x5fe   :  { %v1757_v13 = vsub.f32 1.0, %v1756_v49  ;;  %vm1781_vm8 = vmor %vm1779_vm6, %vm1780_vm4  ;;  %v1786_v49 = vor.u32 1.1754944e-38, %v1785_v5 }
 0x5ff   :  { %v1776_v54 = vsub.f32 1.0, %v1775_v57 }
 0x600   :  { %v1758_v61 = vmul.f32 %v3719_v41, %v1757_v13 }
 0x601   :  { %v1777_v48 = vmul.f32 %v3721_v36, %v1776_v54 }
 0x602   :  { %v3723_v59 = vpop.eup %3722  ;;  %v1759_v44 = vadd.f32 %v3719_v41, %v1758_v61 }
 0x603   :  { %v1778_v12 = vadd.f32 %v3721_v36, %v1777_v48  ;;  %v1795_v39 = vmul.f32 %v3723_v59, %v1793_v46  ;;  %v3725_v40 = vpop.eup %3724  ;;  %vm1800_vm12 = vweird.f32 %v3723_v59  ;;  %v1805_v48 = vand.u32 2147483648, %v1793_v46 }
 0x604   :  { %v1763_v57 = vsel %vm1762_vm7, %v3719_v41, %v1759_v44  ;;  %vm1801_vm14 = vmor %vm1799_vm13, %vm1800_vm12 }
 0x605   :  { %v1768_v21 = vsel %vm1765_vm9, %v1767_v50, %v1763_v57  ;;  %v1782_v13 = vsel %vm1781_vm8, %v3721_v36, %v1778_v12  ;;  %v1796_v42 = vsub.f32 1.0, %v1795_v39  ;;  %v1803_v36 = vand.u32 2147483647, %v1793_v46  ;;  %v6993_v46 = vld [vmem:[#allocation17_spill] sm:$0xff]  ;;  %v6995_v12 = vld [vmem:[#allocation60_spill] sm:$0xff] }
 0x606   :  { %v1787_v54 = vsel %vm1784_vm10, %v1786_v49, %v1782_v13  ;;  %v1810_v7 = vmul.f32 %v3725_v40, %v1768_v21  ;;  %v1806_v5 = vor.u32 1.1754944e-38, %v1805_v48  ;;  %v6994_v50 = vld [vmem:[#allocation45_spill] sm:$0xff]  ;;  %v6997_v49 = vld [vmem:[#allocation28_spill] sm:$0xff]  ;;  %v7000_v13 = vld [vmem:[#allocation63_spill] sm:$0xff] }
 0x607   :  { %v1809_v1 = vmul.f32 %v1787_v54, %v5550_v15  ;;  %v1797_v61 = vmul.f32 %v3723_v59, %v1796_v42  ;;  %vm1804_vm15 = vcmp.eq.f32.partialorder %v1803_v36, 8.507059e+37  ;;  %v6996_v39 = vld [vmem:[#allocation9_spill] sm:$0xff]  ;;  %v6999_v40 = vld [vmem:[#allocation48_spill] sm:$0xff]  ;;  %v7001_v54 = vld [vmem:[#allocation10_spill] sm:$0xff] }
 0x608   :  { %v6998_v57 = vld [vmem:[#allocation61_spill] sm:$0xff]  ;;  %v7006_v48 = vld [vmem:[#allocation26_spill] sm:$0xff]  ;;  %v7007_v36 = vld [vmem:[#allocation27_spill] sm:$0xff] }
 0x609   :  { %v1811_v45 = vadd.f32 %v1810_v7, %v1809_v1  ;;  %v1798_v6 = vadd.f32 %v3723_v59, %v1797_v61  ;;  %v7002_v61 = vld [vmem:[#allocation11_spill] sm:$0xff] }
 0x60b   :  { %3726 = vtanh.f32 %v1811_v45  ;;  %v5644_v41 = vsel %vm1821_vm11, %v1811_v45, %v5550_v15  ;;  %v1802_v43 = vsel %vm1801_vm14, %v3723_v59, %v1798_v6  ;;  %v6990_v15 = vld [vmem:[#allocation41_spill] sm:$0xff]  ;;  %v6992_v59 = vld [vmem:[#allocation58_spill] sm:$0xff]  ;;  %v7004_v45 = vld [vmem:[#allocation12_spill] sm:$0xff] }
 0x60c   :  { %v1807_v0 = vsel %vm1804_vm15, %v1806_v5, %v1802_v43  ;;  %v7005_v6 = vld [vmem:[#allocation22_spill] sm:$0xff]  ;;  %v7008_v43 = vld [vmem:[#allocation19_spill] sm:$0xff]  ;;  %v7009_v5 = vld [vmem:[#allocation13_spill] sm:$0xff] }
 0x611   :  { %v3727_v21 = vpop.eup %3726 }
 0x612   :  { %v1813_v42 = vmul.f32 %v3727_v21, %v1807_v0  ;;  %v7010_v21 = vld [vmem:[#allocation25_spill] sm:$0xff] }
 0x613   :  { %v7011_v0 = vld [vmem:[#allocation33_spill] sm:$0xff] }
 0x614   :  { %v5648_v1 = vsel %vm1821_vm11, %v1813_v42, %v5554_v38  ;;  %v1824_v7 = vsel %vm1821_vm11, %v1813_v42, 0.0  ;;  %v6991_v38 = vld [vmem:[#allocation57_spill] sm:$0xff] }
 0x615   :  { %v1825_v44 = vpack.c.bf16 %v1824_v7, %v1824_v7  ;;  %1847 = vmatmul.f32.vlgmr.msra.gmra.mxu0 %v5648_v1  ;;  %1867 = vmatmul.f32.vlgmr.msra.gmra.mxu1 %v5648_v1  ;;  %v7012_v42 = vld [vmem:[#allocation29_spill] sm:$0xff]  ;;  %v7013_v7 = vld [vmem:[#allocation20_spill] sm:$0xff] }
 0x616   :  { %1887 = vmatmul.f32.vlgmr.msra.gmra.mxu2 %v5648_v1  ;;  %1907 = vmatmul.f32.vlgmr.msra.gmra.mxu3 %v5648_v1 }
 0x617   :  { %1826 = vst [vmem:[#allocation3 + $0x1c] sm:$0xf] %v1825_v44  ;;  %2159 = vmatpush.msra.mxu0 %v5355_v4  ;;  %2179 = vmatpush.msra.mxu1 %v5358_v52  ;;  %v7014_v44 = vld [vmem:[#allocation21_spill] sm:$0xff] }
 0x618   :  { %2199 = vmatpush.msra.mxu2 %v5361_v53  ;;  %2219 = vmatpush.msra.mxu3 %v5364_v18 }
 0x619   :  { %2160 = vmatpush.msra.mxu0 %v5367_v23  ;;  %2180 = vmatpush.msra.mxu1 %v5370_v16 }
 0x61a   :  { %2200 = vmatpush.msra.mxu2 %v5373_v3  ;;  %2220 = vmatpush.msra.mxu3 %v5376_v47 }
 0x61b   :  { %2161 = vmatpush.msra.mxu0 %v5379_v8  ;;  %2181 = vmatpush.msra.mxu1 %v5382_v29 }
 0x61c   :  { %2201 = vmatpush.msra.mxu2 %v5385_v63  ;;  %2221 = vmatpush.msra.mxu3 %v5388_v28 }
 0x61d   :  { %2162 = vmatpush.msra.mxu0 %v5391_v37  ;;  %2182 = vmatpush.msra.mxu1 %v5394_v2 }
 0x61e   :  { %2202 = vmatpush.msra.mxu2 %v5397_v56  ;;  %2222 = vmatpush.msra.mxu3 %v5400_v58 }
 0x61f   :  { %2163 = vmatpush.msra.mxu0 %v5403_v10  ;;  %2183 = vmatpush.msra.mxu1 %v5406_v55 }
 0x620   :  { %2203 = vmatpush.msra.mxu2 %v5409_v60  ;;  %2223 = vmatpush.msra.mxu3 %v5412_v11 }
 0x621   :  { %2164 = vmatpush.msra.mxu0 %v5415_v22  ;;  %2184 = vmatpush.msra.mxu1 %v5418_v25 }
 0x622   :  { %2204 = vmatpush.msra.mxu2 %v5421_v62  ;;  %2224 = vmatpush.msra.mxu3 %v5424_v30 }
 0x623   :  { %2165 = vmatpush.msra.mxu0 %v5427_v24  ;;  %2185 = vmatpush.msra.mxu1 %v5430_v9 }
 0x624   :  { %2205 = vmatpush.msra.mxu2 %v5433_v51  ;;  %2225 = vmatpush.msra.mxu3 %v5436_v27 }
 0x625   :  { %2166 = vmatpush.msra.mxu0 %v5439_v14  ;;  %2186 = vmatpush.msra.mxu1 %v5442_v20 }
 0x626   :  { %2206 = vmatpush.msra.mxu2 %v5445_v17  ;;  %2226 = vmatpush.msra.mxu3 %v5448_v26 }
 0x627   :  { %2167 = vmatpush.msra.mxu0 %v5451_v31  ;;  %2187 = vmatpush.msra.mxu1 %v5454_v32 }
 0x628   :  { %2207 = vmatpush.msra.mxu2 %v5457_v33  ;;  %2227 = vmatpush.msra.mxu3 %v5460_v34 }
 0x629   :  { %2168 = vmatpush.msra.mxu0 %v5463_v35  ;;  %2188 = vmatpush.msra.mxu1 %v6990_v15 }
 0x62a   :  { %2208 = vmatpush.msra.mxu2 %v6991_v38  ;;  %2228 = vmatpush.msra.mxu3 %v6992_v59 }
 0x62b   :  { %2169 = vmatpush.msra.mxu0 %v6993_v46  ;;  %2189 = vmatpush.msra.mxu1 %v6994_v50 }
 0x62c   :  { %2209 = vmatpush.msra.mxu2 %v6995_v12  ;;  %2229 = vmatpush.msra.mxu3 %v6996_v39 }
 0x62d   :  { %2170 = vmatpush.msra.mxu0 %v6997_v49  ;;  %2190 = vmatpush.msra.mxu1 %v6998_v57  ;;  %v7022_v57 = vld [vmem:[#allocation59_spill] sm:$0xff] }
 0x62e   :  { %2210 = vmatpush.msra.mxu2 %v6999_v40  ;;  %2230 = vmatpush.msra.mxu3 %v7000_v13 }
 0x62f   :  { %2171 = vmatpush.msra.mxu0 %v7001_v54  ;;  %2191 = vmatpush.msra.mxu1 %v7002_v61  ;;  %v7020_v61 = vld [vmem:[#allocation72_spill] sm:$0xff] }
 0x630   :  { %2211 = vmatpush.msra.mxu2 %v7003_v19  ;;  %2231 = vmatpush.msra.mxu3 %v7004_v45  ;;  %v7015_v45 = vld [vmem:[#allocation15_spill] sm:$0xff] }
 0x631   :  { %2172 = vmatpush.msra.mxu0 %v7005_v6  ;;  %2192 = vmatpush.msra.mxu1 %v7006_v48  ;;  %v7016_v6 = vld [vmem:[#allocation14_spill] sm:$0xff]  ;;  %v7017_v48 = vld [vmem:[#allocation85_spill] sm:$0xff] }
 0x632   :  { %2212 = vmatpush.msra.mxu2 %v7007_v36  ;;  %2232 = vmatpush.msra.mxu3 %v7008_v43  ;;  %v7018_v36 = vld [vmem:[#allocation46_spill] sm:$0xff]  ;;  %v7019_v43 = vld [vmem:[#allocation92_spill] sm:$0xff] }
 0x633   :  { %2173 = vmatpush.msra.mxu0 %v7009_v5  ;;  %2193 = vmatpush.msra.mxu1 %v7010_v21  ;;  %v220_v19 = vadd.f32 %v7018_v36, %v7017_v48  ;;  %v269_v5 = vadd.f32 %v7020_v61, %v7019_v43 }
 0x634   :  { %2213 = vmatpush.msra.mxu2 %v7011_v0  ;;  %2233 = vmatpush.msra.mxu3 %v7012_v42 }
 0x635   :  { %2174 = vmatpush.msra.mxu0 %v7013_v7  ;;  %2194 = vmatpush.msra.mxu1 %v7014_v44  ;;  %v7021_v7 = vld [vmem:[#allocation89_spill] sm:$0xff] }
 0x636   :  { %2214 = vmatpush.msra.mxu2 %v7015_v45  ;;  %2234 = vmatpush.msra.mxu3 %v7016_v6  ;;  %v367_v44 = vadd.f32 %v7022_v57, %v7021_v7 }
 0x692   :  { %v1848_v54 = vpop.f32.mrf.mxu0  ;;  %v1868_v21 = vpop.f32.mrf.mxu1 }
 0x693   :  { %v1911_v13 = vadd.f32 %v1848_v54, %v220_v19  ;;  %v1912_v0 = vadd.f32 %v1868_v21, %v269_v5  ;;  %v7023_v19 = vld [vmem:[#allocation95_spill] sm:$0xff] }
 0x695   :  { %v3463_v40 = vmul.f32 -1.442695, %v1911_v13  ;;  %v3464_v42 = vmul.f32 -1.442695, %v1912_v0  ;;  %v7024_v13 = vld [vmem:[#allocation74_spill] sm:$0xff] }
 0x696   :  { %v318_v5 = vadd.f32 %v7024_v13, %v7023_v19 }
 0x697   :  { %3728 = vpow2.f32 %v3463_v40 }
 0x698   :  { %3730 = vpow2.f32 %v3464_v42 }
 0x699   :  { %v1908_v45 = vpop.f32.mrf.mxu3  ;;  %v1888_v61 = vpop.f32.mrf.mxu2 }
 0x69a   :  { %v1914_v49 = vadd.f32 %v1908_v45, %v367_v44  ;;  %v1913_v0 = vadd.f32 %v1888_v61, %v318_v5 }
 0x69c   :  { %v3465_v6 = vmul.f32 -1.442695, %v1914_v49 }
 0x69d   :  { %v3729_v39 = vpop.eup %3728 }
 0x69e   :  { %v3731_v12 = vpop.eup %3730  ;;  %v1918_v36 = vadd.f32 1.0, %v3729_v39  ;;  %3732 = vpow2.f32 %v3465_v6 }
 0x69f   :  { %v1937_v48 = vadd.f32 1.0, %v3731_v12 }
 0x6a0   :  { %3734 = vrcp.f32 %v1918_v36  ;;  %v1930_v7 = vand.u32 2147483648, %v1918_v36  ;;  %v1928_v6 = vand.u32 2147483647, %v1918_v36  ;;  %vm1924_vm3 = vweird.f32 %v1918_v36 }
 0x6a1   :  { %3736 = vrcp.f32 %v1937_v48  ;;  %v1949_v39 = vand.u32 2147483648, %v1937_v48  ;;  %v1947_v50 = vand.u32 2147483647, %v1937_v48  ;;  %vm1943_vm4 = vweird.f32 %v1937_v48 }
 0x6a2   :  { %v1931_v61 = vor.u32 1.1754944e-38, %v1930_v7  ;;  %vm1929_vm7 = vcmp.eq.f32.partialorder %v1928_v6, 8.507059e+37 }
 0x6a3   :  { %vm1948_vm8 = vcmp.eq.f32.partialorder %v1947_v50, 8.507059e+37 }
 0x6a4   :  { %v3733_v54 = vpop.eup %3732 }
 0x6a5   :  { %v1957_v40 = vadd.f32 1.0, %v3733_v54 }
 0x6a6   :  { %v3735_v21 = vpop.eup %3734 }
 0x6a7   :  { %v3737_v57 = vpop.eup %3736  ;;  %v1920_v42 = vmul.f32 %v3735_v21, %v1918_v36  ;;  %3738 = vrcp.f32 %v1957_v40  ;;  %vm1925_vm1 = vweird.f32 %v3735_v21  ;;  %v1984_v36 = vpop.permute.xlu2 %1983  ;;  %vm1963_vm11 = vweird.f32 %v1957_v40 }
 0x6a8   :  { %v1939_v45 = vmul.f32 %v3737_v57, %v1937_v48  ;;  %3740 = vtanh.f32 %v1913_v0  ;;  %vm1944_vm2 = vweird.f32 %v3737_v57  ;;  %vm1926_vm5 = vmor %vm1924_vm3, %vm1925_vm1  ;;  %vm1985_vm9 = vcmp.eq.s32.totalorder %v1984_v36, 1 }
 0x6a9   :  { %v1921_v49 = vsub.f32 1.0, %v1920_v42  ;;  %vm1945_vm6 = vmor %vm1943_vm4, %vm1944_vm2  ;;  %v1950_v42 = vor.u32 1.1754944e-38, %v1949_v39 }
 0x6aa   :  { %v1940_v44 = vsub.f32 1.0, %v1939_v45 }
 0x6ab   :  { %v1922_v12 = vmul.f32 %v3735_v21, %v1921_v49 }
 0x6ac   :  { %v1941_v43 = vmul.f32 %v3737_v57, %v1940_v44 }
 0x6ad   :  { %v3739_v46 = vpop.eup %3738  ;;  %v1923_v13 = vadd.f32 %v3735_v21, %v1922_v12 }
 0x6ae   :  { %v1942_v54 = vadd.f32 %v3737_v57, %v1941_v43  ;;  %v1959_v5 = vmul.f32 %v3739_v46, %v1957_v40  ;;  %v3741_v0 = vpop.eup %3740  ;;  %vm1964_vm10 = vweird.f32 %v3739_v46  ;;  %v1969_v43 = vand.u32 2147483648, %v1957_v40 }
 0x6af   :  { %v1927_v45 = vsel %vm1926_vm5, %v3735_v21, %v1923_v13  ;;  %vm1965_vm12 = vmor %vm1963_vm11, %vm1964_vm10 }
 0x6b0   :  { %v1932_v19 = vsel %vm1929_vm7, %v1931_v61, %v1927_v45  ;;  %v1946_v49 = vsel %vm1945_vm6, %v3737_v57, %v1942_v54  ;;  %v1960_v59 = vsub.f32 1.0, %v1959_v5  ;;  %v1967_v57 = vand.u32 2147483647, %v1957_v40  ;;  %v7057_v40 = vld [vmem:[#allocation62_spill] sm:$0xff] }
 0x6b1   :  { %v1951_v44 = vsel %vm1948_vm8, %v1950_v42, %v1946_v49  ;;  %v1974_v38 = vmul.f32 %v3741_v0, %v1932_v19  ;;  %v1970_v39 = vor.u32 1.1754944e-38, %v1969_v43 }
 0x6b2   :  { %v1973_v15 = vmul.f32 %v1951_v44, %v5644_v41  ;;  %v1961_v12 = vmul.f32 %v3739_v46, %v1960_v59  ;;  %vm1968_vm13 = vcmp.eq.f32.partialorder %v1967_v57, 8.507059e+37 }
 0x6b4   :  { %v1975_v48 = vadd.f32 %v1974_v38, %v1973_v15  ;;  %v1962_v7 = vadd.f32 %v3739_v46, %v1961_v12 }
 0x6b6   :  { %3742 = vtanh.f32 %v1975_v48  ;;  %v5730_v21 = vsel %vm1985_vm9, %v1975_v48, %v5644_v41  ;;  %v1966_v50 = vsel %vm1965_vm12, %v3739_v46, %v1962_v7  ;;  %v7056_v46 = vld [vmem:[#allocation89_spill] sm:$0xff]  ;;  %v7058_v48 = vld [vmem:[#allocation95_spill] sm:$0xff] }
 0x6b7   :  { %v1971_v6 = vsel %vm1968_vm13, %v1970_v39, %v1966_v50  ;;  %v369_v61 = vadd.f32 %v7057_v40, %v7056_v46  ;;  %v7059_v7 = vld [vmem:[#allocation77_spill] sm:$0xff] }
 0x6b8   :  { %v320_v43 = vadd.f32 %v7059_v7, %v7058_v48  ;;  %v5860_v7 = vld [vmem:[#allocation6 + $0x1b8] sm:$0xff] }
 0x6bc   :  { %v3743_v19 = vpop.eup %3742 }
 0x6bd   :  { %v1977_v59 = vmul.f32 %v3743_v19, %v1971_v6 }
 0x6bf   :  { %v5734_v15 = vsel %vm1985_vm9, %v1977_v59, %v5648_v1  ;;  %v1988_v38 = vsel %vm1985_vm9, %v1977_v59, 0.0 }
 0x6c0   :  { %v1989_v13 = vpack.c.bf16 %v1988_v38, %v1988_v38  ;;  %2011 = vmatmul.f32.vlgmr.msrb.gmra.mxu0 %v5734_v15  ;;  %2031 = vmatmul.f32.vlgmr.msrb.gmra.mxu1 %v5734_v15 }
 0x6c1   :  { %2051 = vmatmul.f32.vlgmr.msrb.gmra.mxu2 %v5734_v15  ;;  %2071 = vmatmul.f32.vlgmr.msrb.gmra.mxu3 %v5734_v15 }
 0x6c2   :  { %1990 = vst [vmem:[#allocation3 + $0x20] sm:$0xf] %v1989_v13  ;;  %2323 = vmatpush.msrb.mxu0 %v5355_v4  ;;  %2343 = vmatpush.msrb.mxu1 %v5358_v52  ;;  %v7025_v4 = vld [vmem:[#allocation41_spill] sm:$0xff] }
 0x6c3   :  { %2363 = vmatpush.msrb.mxu2 %v5361_v53  ;;  %2383 = vmatpush.msrb.mxu3 %v5364_v18  ;;  %v7026_v52 = vld [vmem:[#allocation57_spill] sm:$0xff]  ;;  %v7027_v53 = vld [vmem:[#allocation58_spill] sm:$0xff] }
 0x6c4   :  { %2324 = vmatpush.msrb.mxu0 %v5367_v23  ;;  %2344 = vmatpush.msrb.mxu1 %v5370_v16  ;;  %v7028_v18 = vld [vmem:[#allocation17_spill] sm:$0xff]  ;;  %v7030_v16 = vld [vmem:[#allocation60_spill] sm:$0xff] }
 0x6c5   :  { %2364 = vmatpush.msrb.mxu2 %v5373_v3  ;;  %2384 = vmatpush.msrb.mxu3 %v5376_v47  ;;  %v7029_v23 = vld [vmem:[#allocation45_spill] sm:$0xff]  ;;  %v7032_v47 = vld [vmem:[#allocation28_spill] sm:$0xff] }
 0x6c6   :  { %2325 = vmatpush.msrb.mxu0 %v5379_v8  ;;  %2345 = vmatpush.msrb.mxu1 %v5382_v29  ;;  %v7031_v3 = vld [vmem:[#allocation9_spill] sm:$0xff]  ;;  %v7034_v29 = vld [vmem:[#allocation48_spill] sm:$0xff] }
 0x6c7   :  { %2365 = vmatpush.msrb.mxu2 %v5385_v63  ;;  %2385 = vmatpush.msrb.mxu3 %v5388_v28  ;;  %v7033_v8 = vld [vmem:[#allocation61_spill] sm:$0xff]  ;;  %v7035_v63 = vld [vmem:[#allocation63_spill] sm:$0xff]  ;;  %v7036_v28 = vld [vmem:[#allocation10_spill] sm:$0xff] }
 0x6c8   :  { %2326 = vmatpush.msrb.mxu0 %v5391_v37  ;;  %2346 = vmatpush.msrb.mxu1 %v5394_v2  ;;  %v7037_v37 = vld [vmem:[#allocation11_spill] sm:$0xff]  ;;  %v7038_v2 = vld [vmem:[#allocation18_spill] sm:$0xff] }
 0x6c9   :  { %2366 = vmatpush.msrb.mxu2 %v5397_v56  ;;  %2386 = vmatpush.msrb.mxu3 %v5400_v58  ;;  %v7039_v56 = vld [vmem:[#allocation12_spill] sm:$0xff]  ;;  %v7040_v58 = vld [vmem:[#allocation22_spill] sm:$0xff] }
 0x6ca   :  { %2327 = vmatpush.msrb.mxu0 %v5403_v10  ;;  %2347 = vmatpush.msrb.mxu1 %v5406_v55  ;;  %v7041_v10 = vld [vmem:[#allocation26_spill] sm:$0xff]  ;;  %v7042_v55 = vld [vmem:[#allocation27_spill] sm:$0xff] }
 0x6cb   :  { %2367 = vmatpush.msrb.mxu2 %v5409_v60  ;;  %2387 = vmatpush.msrb.mxu3 %v5412_v11  ;;  %v7043_v60 = vld [vmem:[#allocation19_spill] sm:$0xff]  ;;  %v7044_v11 = vld [vmem:[#allocation13_spill] sm:$0xff] }
 0x6cc   :  { %2328 = vmatpush.msrb.mxu0 %v5415_v22  ;;  %2348 = vmatpush.msrb.mxu1 %v5418_v25  ;;  %v7045_v22 = vld [vmem:[#allocation25_spill] sm:$0xff] }
 0x6cd   :  { %2368 = vmatpush.msrb.mxu2 %v5421_v62  ;;  %2388 = vmatpush.msrb.mxu3 %v5424_v30  ;;  %v7046_v25 = vld [vmem:[#allocation33_spill] sm:$0xff]  ;;  %v7048_v30 = vld [vmem:[#allocation20_spill] sm:$0xff] }
 0x6ce   :  { %2329 = vmatpush.msrb.mxu0 %v5427_v24  ;;  %2349 = vmatpush.msrb.mxu1 %v5430_v9  ;;  %v7047_v62 = vld [vmem:[#allocation29_spill] sm:$0xff]  ;;  %v7050_v9 = vld [vmem:[#allocation15_spill] sm:$0xff] }
 0x6cf   :  { %2369 = vmatpush.msrb.mxu2 %v5433_v51  ;;  %2389 = vmatpush.msrb.mxu3 %v5436_v27  ;;  %v7049_v24 = vld [vmem:[#allocation21_spill] sm:$0xff]  ;;  %v7051_v51 = vld [vmem:[#allocation14_spill] sm:$0xff] }
 0x6d0   :  { %2330 = vmatpush.msrb.mxu0 %v5439_v14  ;;  %2350 = vmatpush.msrb.mxu1 %v5442_v20  ;;  %v7052_v27 = vld [vmem:[#allocation85_spill] sm:$0xff] }
 0x6d1   :  { %2370 = vmatpush.msrb.mxu2 %v5445_v17  ;;  %2390 = vmatpush.msrb.mxu3 %v5448_v26  ;;  %v7053_v14 = vld [vmem:[#allocation49_spill] sm:$0xff]  ;;  %v7054_v17 = vld [vmem:[#allocation92_spill] sm:$0xff]  ;;  %v7055_v26 = vld [vmem:[#allocation75_spill] sm:$0xff] }
 0x6d2   :  { %2331 = vmatpush.msrb.mxu0 %v5451_v31  ;;  %2351 = vmatpush.msrb.mxu1 %v5454_v32  ;;  %v222_v20 = vadd.f32 %v7053_v14, %v7052_v27  ;;  %v271_v31 = vadd.f32 %v7055_v26, %v7054_v17 }
 0x6d3   :  { %2371 = vmatpush.msrb.mxu2 %v5457_v33  ;;  %2391 = vmatpush.msrb.mxu3 %v5460_v34 }
 0x6d4   :  { %2332 = vmatpush.msrb.mxu0 %v5463_v35  ;;  %2352 = vmatpush.msrb.mxu1 %v7025_v4 }
 0x6d5   :  { %2372 = vmatpush.msrb.mxu2 %v7026_v52  ;;  %2392 = vmatpush.msrb.mxu3 %v7027_v53 }
 0x6d6   :  { %2333 = vmatpush.msrb.mxu0 %v7028_v18  ;;  %2353 = vmatpush.msrb.mxu1 %v7029_v23 }
 0x6d7   :  { %2373 = vmatpush.msrb.mxu2 %v7030_v16  ;;  %2393 = vmatpush.msrb.mxu3 %v7031_v3 }
 0x6d8   :  { %2334 = vmatpush.msrb.mxu0 %v7032_v47  ;;  %2354 = vmatpush.msrb.mxu1 %v7033_v8 }
 0x6d9   :  { %2374 = vmatpush.msrb.mxu2 %v7034_v29  ;;  %2394 = vmatpush.msrb.mxu3 %v7035_v63 }
 0x6da   :  { %2335 = vmatpush.msrb.mxu0 %v7036_v28  ;;  %2355 = vmatpush.msrb.mxu1 %v7037_v37 }
 0x6db   :  { %2375 = vmatpush.msrb.mxu2 %v7038_v2  ;;  %2395 = vmatpush.msrb.mxu3 %v7039_v56 }
 0x6dc   :  { %2336 = vmatpush.msrb.mxu0 %v7040_v58  ;;  %2356 = vmatpush.msrb.mxu1 %v7041_v10 }
 0x6dd   :  { %2376 = vmatpush.msrb.mxu2 %v7042_v55  ;;  %2396 = vmatpush.msrb.mxu3 %v7043_v60 }
 0x6de   :  { %2337 = vmatpush.msrb.mxu0 %v7044_v11  ;;  %2357 = vmatpush.msrb.mxu1 %v7045_v22 }
 0x6df   :  { %2377 = vmatpush.msrb.mxu2 %v7046_v25  ;;  %2397 = vmatpush.msrb.mxu3 %v7047_v62 }
 0x6e0   :  { %2338 = vmatpush.msrb.mxu0 %v7048_v30  ;;  %2358 = vmatpush.msrb.mxu1 %v7049_v24  ;;  %v2148_v30 = vpop.permute.xlu0 %2147 }
 0x6e1   :  { %2378 = vmatpush.msrb.mxu2 %v7050_v9  ;;  %2398 = vmatpush.msrb.mxu3 %v7051_v51  ;;  %vm2149_vm7 = vcmp.eq.s32.totalorder %v2148_v30, 1  ;;  %v5953_v30 = vld [vmem:[#allocation6 + $0xb0] sm:$0xff] }
 0x6e2   :  { %7065 = vst [vmem:[#allocation34_spill] sm:$0xff] %v5953_v30 }
 0x73d   :  { %v2012_v32 = vpop.f32.mrf.mxu0  ;;  %v2032_v33 = vpop.f32.mrf.mxu1 }
 0x73e   :  { %v2075_v34 = vadd.f32 %v2012_v32, %v222_v20  ;;  %v2076_v35 = vadd.f32 %v2032_v33, %v271_v31 }
 0x740   :  { %v3466_v41 = vmul.f32 -1.442695, %v2075_v34  ;;  %v3467_v1 = vmul.f32 -1.442695, %v2076_v35 }
 0x742   :  { %3744 = vpow2.f32 %v3466_v41 }
 0x743   :  { %3746 = vpow2.f32 %v3467_v1 }
 0x744   :  { %v2072_v54 = vpop.f32.mrf.mxu3  ;;  %v2052_v12 = vpop.f32.mrf.mxu2 }
 0x745   :  { %v2078_v5 = vadd.f32 %v2072_v54, %v369_v61  ;;  %v2077_v39 = vadd.f32 %v2052_v12, %v320_v43  ;;  %v5830_v54 = vld [vmem:[#allocation6 + $0x1e8] sm:$0xff]  ;;  %v5863_v43 = vld [vmem:[#allocation6 + $0x180] sm:$0xff] }
 0x746   :  { %v5854_v12 = vld [vmem:[#allocation6 + $0x1a8] sm:$0xff] }
 0x747   :  { %v3468_v42 = vmul.f32 -1.442695, %v2078_v5  ;;  %v5836_v5 = vld [vmem:[#allocation6 + $0x1f8] sm:$0xff] }
 0x748   :  { %v3745_v45 = vpop.eup %3744 }
 0x749   :  { %v3747_v0 = vpop.eup %3746  ;;  %v2082_v49 = vadd.f32 1.0, %v3745_v45  ;;  %3748 = vpow2.f32 %v3468_v42  ;;  %v5839_v42 = vld [vmem:[#allocation6 + $0x1c0] sm:$0xff]  ;;  %v5842_v45 = vld [vmem:[#allocation6 + $0x1c8] sm:$0xff] }
 0x74a   :  { %v2101_v44 = vadd.f32 1.0, %v3747_v0  ;;  %v5845_v0 = vld [vmem:[#allocation6 + $0x1d0] sm:$0xff] }
 0x74b   :  { %3750 = vrcp.f32 %v2082_v49  ;;  %v2094_v4 = vand.u32 2147483648, %v2082_v49  ;;  %v2092_v18 = vand.u32 2147483647, %v2082_v49  ;;  %vm2088_vm1 = vweird.f32 %v2082_v49 }
 0x74c   :  { %3752 = vrcp.f32 %v2101_v44  ;;  %v2113_v52 = vand.u32 2147483648, %v2101_v44  ;;  %v2111_v16 = vand.u32 2147483647, %v2101_v44  ;;  %vm2107_vm2 = vweird.f32 %v2101_v44 }
 0x74d   :  { %v2095_v8 = vor.u32 1.1754944e-38, %v2094_v4  ;;  %vm2093_vm5 = vcmp.eq.f32.partialorder %v2092_v18, 8.507059e+37  ;;  %v5890_v4 = vld [vmem:[#allocation6 + $0x148] sm:$0xff]  ;;  %v5899_v18 = vld [vmem:[#allocation6 + $0x120] sm:$0xff] }
 0x74e   :  { %v2114_v28 = vor.u32 1.1754944e-38, %v2113_v52  ;;  %vm2112_vm6 = vcmp.eq.f32.partialorder %v2111_v16, 8.507059e+37  ;;  %v5893_v52 = vld [vmem:[#allocation6 + $0x150] sm:$0xff] }
 0x74f   :  { %v3749_v36 = vpop.eup %3748  ;;  %v5905_v16 = vld [vmem:[#allocation6 + $0x130] sm:$0xff] }
 0x750   :  { %v2121_v57 = vadd.f32 1.0, %v3749_v36  ;;  %v5857_v36 = vld [vmem:[#allocation6 + $0x1b0] sm:$0xff] }
 0x751   :  { %v3751_v50 = vpop.eup %3750 }
 0x752   :  { %v3753_v19 = vpop.eup %3752  ;;  %v2084_v6 = vmul.f32 %v3751_v50, %v2082_v49  ;;  %3754 = vrcp.f32 %v2121_v57  ;;  %vm2089_vm14 = vweird.f32 %v3751_v50  ;;  %v2133_v20 = vand.u32 2147483648, %v2121_v57  ;;  %v5848_v49 = vld [vmem:[#allocation6 + $0x1d8] sm:$0xff] }
 0x753   :  { %v2103_v59 = vmul.f32 %v3753_v19, %v2101_v44  ;;  %3756 = vtanh.f32 %v2077_v39  ;;  %vm2108_vm15 = vweird.f32 %v3753_v19  ;;  %vm2090_vm3 = vmor %vm2088_vm1, %vm2089_vm14  ;;  %vm2127_vm9 = vweird.f32 %v2121_v57  ;;  %v5851_v44 = vld [vmem:[#allocation6 + $0x1a0] sm:$0xff]  ;;  %v5872_v39 = vld [vmem:[#allocation6 + $0x198] sm:$0xff] }
 0x754   :  { %v2085_v38 = vsub.f32 1.0, %v2084_v6  ;;  %vm2109_vm4 = vmor %vm2107_vm2, %vm2108_vm15  ;;  %v2131_v31 = vand.u32 2147483647, %v2121_v57  ;;  %v2134_v33 = vor.u32 1.1754944e-38, %v2133_v20  ;;  %v5878_v6 = vld [vmem:[#allocation6 + $0x168] sm:$0xff] }
 0x755   :  { %v2104_v13 = vsub.f32 1.0, %v2103_v59  ;;  %v5881_v59 = vld [vmem:[#allocation6 + $0x170] sm:$0xff]  ;;  %v5962_v20 = vld [vmem:[#allocation6 + $0x88] sm:$0xff] }
 0x756   :  { %v2086_v53 = vmul.f32 %v3751_v50, %v2085_v38  ;;  %vm2132_vm11 = vcmp.eq.f32.partialorder %v2131_v31, 8.507059e+37  ;;  %v5884_v38 = vld [vmem:[#allocation6 + $0x178] sm:$0xff]  ;;  %7068 = vst [vmem:[#allocation24_spill] sm:$0xff] %v5962_v20  ;;  %v5965_v31 = vld [vmem:[#allocation6 + $0x90] sm:$0xff] }
 0x757   :  { %v2105_v23 = vmul.f32 %v3753_v19, %v2104_v13  ;;  %v5887_v13 = vld [vmem:[#allocation6 + $0x140] sm:$0xff]  ;;  %7069 = vst [vmem:[#allocation54_spill] sm:$0xff] %v5965_v31 }
 0x758   :  { %v3755_v3 = vpop.eup %3754  ;;  %v2087_v47 = vadd.f32 %v3751_v50, %v2086_v53  ;;  %v5896_v53 = vld [vmem:[#allocation6 + $0x158] sm:$0xff] }
 0x759   :  { %v2106_v29 = vadd.f32 %v3753_v19, %v2105_v23  ;;  %v2123_v63 = vmul.f32 %v3755_v3, %v2121_v57  ;;  %v3757_v2 = vpop.eup %3756  ;;  %vm2128_vm8 = vweird.f32 %v3755_v3  ;;  %v5866_v57 = vld [vmem:[#allocation6 + $0x188] sm:$0xff] }
 0x75a   :  { %v2091_v37 = vsel %vm2090_vm3, %v3751_v50, %v2087_v47  ;;  %vm2129_vm10 = vmor %vm2127_vm9, %vm2128_vm8  ;;  %v5869_v50 = vld [vmem:[#allocation6 + $0x190] sm:$0xff]  ;;  %v5902_v23 = vld [vmem:[#allocation6 + $0x128] sm:$0xff] }
 0x75b   :  { %v2096_v56 = vsel %vm2093_vm5, %v2095_v8, %v2091_v37  ;;  %v2110_v58 = vsel %vm2109_vm4, %v3753_v19, %v2106_v29  ;;  %v2124_v10 = vsub.f32 1.0, %v2123_v63  ;;  %v5875_v19 = vld [vmem:[#allocation6 + $0x160] sm:$0xff]  ;;  %v5914_v8 = vld [vmem:[#allocation6 + $0x108] sm:$0xff]  ;;  %v5917_v29 = vld [vmem:[#allocation6 + $0x110] sm:$0xff] }
 0x75c   :  { %v2115_v60 = vsel %vm2112_vm6, %v2114_v28, %v2110_v58  ;;  %v2138_v11 = vmul.f32 %v3757_v2, %v2096_v56  ;;  %v5911_v47 = vld [vmem:[#allocation6 + $0x100] sm:$0xff]  ;;  %v5920_v63 = vld [vmem:[#allocation6 + $0x118] sm:$0xff]  ;;  %v5926_v37 = vld [vmem:[#allocation6 + $0xe8] sm:$0xff] }
 0x75d   :  { %v2137_v22 = vmul.f32 %v2115_v60, %v5730_v21  ;;  %v2125_v62 = vmul.f32 %v3755_v3, %v2124_v10  ;;  %v5923_v28 = vld [vmem:[#allocation6 + $0xe0] sm:$0xff]  ;;  %v5929_v2 = vld [vmem:[#allocation6 + $0xf0] sm:$0xff]  ;;  %v5932_v56 = vld [vmem:[#allocation6 + $0xf8] sm:$0xff] }
 0x75e   :  { %v5935_v58 = vld [vmem:[#allocation6 + $0xc0] sm:$0xff]  ;;  %v5938_v10 = vld [vmem:[#allocation6 + $0xc8] sm:$0xff]  ;;  %v5941_v60 = vld [vmem:[#allocation6 + $0xd0] sm:$0xff] }
 0x75f   :  { %v2139_v51 = vadd.f32 %v2138_v11, %v2137_v22  ;;  %v2126_v14 = vadd.f32 %v3755_v3, %v2125_v62  ;;  %7060 = vst [vmem:[#allocation30_spill] sm:$0xff] %v5938_v10  ;;  %v5944_v11 = vld [vmem:[#allocation6 + $0xd8] sm:$0xff]  ;;  %v5947_v22 = vld [vmem:[#allocation6 + $0xa0] sm:$0xff]  ;;  %v5950_v62 = vld [vmem:[#allocation6 + $0xa8] sm:$0xff] }
 0x760   :  { %7061 = vst [vmem:[#allocation38_spill] sm:$0xff] %v5941_v60 }
 0x761   :  { %3758 = vtanh.f32 %v2139_v51  ;;  %v5816_v26 = vsel %vm2149_vm7, %v2139_v51, %v5730_v21  ;;  %v2130_v32 = vsel %vm2129_vm10, %v3755_v3, %v2126_v14  ;;  %v5827_v21 = vld [vmem:[#allocation6 + $0x1e0] sm:$0xff]  ;;  %v5908_v3 = vld [vmem:[#allocation6 + $0x138] sm:$0xff]  ;;  %7062 = vst [vmem:[#allocation36_spill] sm:$0xff] %v5944_v11 }
 0x762   :  { %v2135_v35 = vsel %vm2132_vm11, %v2134_v33, %v2130_v32  ;;  %7063 = vst [vmem:[#allocation23_spill] sm:$0xff] %v5947_v22  ;;  %v5956_v51 = vld [vmem:[#allocation6 + $0xb8] sm:$0xff]  ;;  %v5959_v14 = vld [vmem:[#allocation6 + $0x80] sm:$0xff] }
 0x763   :  { %7064 = vst [vmem:[#allocation16_spill] sm:$0xff] %v5950_v62  ;;  %v5968_v32 = vld [vmem:[#allocation6 + $0x98] sm:$0xff]  ;;  %v5971_v33 = vld [vmem:[#allocation6 + $0x60] sm:$0xff] }
 0x764   :  { %7066 = vst [vmem:[#allocation44_spill] sm:$0xff] %v5956_v51 }
 0x765   :  { %7067 = vst [vmem:[#allocation39_spill] sm:$0xff] %v5959_v14 }
 0x766   :  { %7070 = vst [vmem:[#allocation56_spill] sm:$0xff] %v5968_v32 }
 0x767   :  { %v3759_v34 = vpop.eup %3758  ;;  %7071 = vst [vmem:[#allocation53_spill] sm:$0xff] %v5971_v33 }
 0x768   :  { %v2141_v41 = vmul.f32 %v3759_v34, %v2135_v35  ;;  %v5974_v34 = vld [vmem:[#allocation6 + $0x68] sm:$0xff]  ;;  %v5977_v35 = vld [vmem:[#allocation6 + $0x70] sm:$0xff] }
 0x769   :  { %7072 = vst [vmem:[#allocation32_spill] sm:$0xff] %v5974_v34 }
 0x76a   :  { %v5820_v1 = vsel %vm2149_vm7, %v2141_v41, %v5734_v15  ;;  %v2152_v40 = vsel %vm2149_vm7, %v2141_v41, 0.0  ;;  %v5833_v15 = vld [vmem:[#allocation6 + $0x1f0] sm:$0xff]  ;;  %7073 = vst [vmem:[#allocation64_spill] sm:$0xff] %v5977_v35  ;;  %v5980_v41 = vld [vmem:[#allocation6 + $0x78] sm:$0xff] }
 0x76b   :  { %v2153_v61 = vpack.c.bf16 %v2152_v40, %v2152_v40  ;;  %2175 = vmatmul.f32.vlgmr.msra.gmra.mxu0 %v5820_v1  ;;  %2195 = vmatmul.f32.vlgmr.msra.gmra.mxu1 %v5820_v1  ;;  %7074 = vst [vmem:[#allocation51_spill] sm:$0xff] %v5980_v41  ;;  %v5983_v40 = vld [vmem:[#allocation6 + $0x40] sm:$0xff] }
 0x76c   :  { %2215 = vmatmul.f32.vlgmr.msra.gmra.mxu2 %v5820_v1  ;;  %2235 = vmatmul.f32.vlgmr.msra.gmra.mxu3 %v5820_v1  ;;  %7075 = vst [vmem:[#allocation66_spill] sm:$0xff] %v5983_v40 }
 0x76d   :  { %2154 = vst [vmem:[#allocation3 + $0x24] sm:$0xf] %v2153_v61  ;;  %2487 = vmatpush.msra.mxu0 %v5827_v21  ;;  %2507 = vmatpush.msra.mxu1 %v5830_v54  ;;  %v5986_v61 = vld [vmem:[#allocation6 + $0x48] sm:$0xff] }
 0x76e   :  { %2527 = vmatpush.msra.mxu2 %v5833_v15  ;;  %2547 = vmatpush.msra.mxu3 %v5836_v5  ;;  %7076 = vst [vmem:[#allocation37_spill] sm:$0xff] %v5986_v61 }
 0x76f   :  { %2488 = vmatpush.msra.mxu0 %v5839_v42  ;;  %2508 = vmatpush.msra.mxu1 %v5842_v45 }
 0x770   :  { %2528 = vmatpush.msra.mxu2 %v5845_v0  ;;  %2548 = vmatpush.msra.mxu3 %v5848_v49 }
 0x771   :  { %2489 = vmatpush.msra.mxu0 %v5851_v44  ;;  %2509 = vmatpush.msra.mxu1 %v5854_v12 }
 0x772   :  { %2529 = vmatpush.msra.mxu2 %v5857_v36  ;;  %2549 = vmatpush.msra.mxu3 %v5860_v7 }
 0x773   :  { %2490 = vmatpush.msra.mxu0 %v5863_v43  ;;  %2510 = vmatpush.msra.mxu1 %v5866_v57 }
 0x774   :  { %2530 = vmatpush.msra.mxu2 %v5869_v50  ;;  %2550 = vmatpush.msra.mxu3 %v5872_v39 }
 0x775   :  { %2491 = vmatpush.msra.mxu0 %v5875_v19  ;;  %2511 = vmatpush.msra.mxu1 %v5878_v6 }
 0x776   :  { %2531 = vmatpush.msra.mxu2 %v5881_v59  ;;  %2551 = vmatpush.msra.mxu3 %v5884_v38 }
 0x777   :  { %2492 = vmatpush.msra.mxu0 %v5887_v13  ;;  %2512 = vmatpush.msra.mxu1 %v5890_v4 }
 0x778   :  { %2532 = vmatpush.msra.mxu2 %v5893_v52  ;;  %2552 = vmatpush.msra.mxu3 %v5896_v53 }
 0x779   :  { %2493 = vmatpush.msra.mxu0 %v5899_v18  ;;  %2513 = vmatpush.msra.mxu1 %v5902_v23 }
 0x77a   :  { %2533 = vmatpush.msra.mxu2 %v5905_v16  ;;  %2553 = vmatpush.msra.mxu3 %v5908_v3 }
 0x77b   :  { %2494 = vmatpush.msra.mxu0 %v5911_v47  ;;  %2514 = vmatpush.msra.mxu1 %v5914_v8 }
 0x77c   :  { %2534 = vmatpush.msra.mxu2 %v5917_v29  ;;  %2554 = vmatpush.msra.mxu3 %v5920_v63 }
 0x77d   :  { %2495 = vmatpush.msra.mxu0 %v5923_v28  ;;  %2515 = vmatpush.msra.mxu1 %v5926_v37 }
 0x77e   :  { %2535 = vmatpush.msra.mxu2 %v5929_v2  ;;  %2555 = vmatpush.msra.mxu3 %v5932_v56 }
 0x77f   :  { %2496 = vmatpush.msra.mxu0 %v5935_v58  ;;  %2516 = vmatpush.msra.mxu1 %v5938_v10 }
 0x780   :  { %2536 = vmatpush.msra.mxu2 %v5941_v60  ;;  %2556 = vmatpush.msra.mxu3 %v5944_v11 }
 0x781   :  { %2497 = vmatpush.msra.mxu0 %v5947_v22  ;;  %2517 = vmatpush.msra.mxu1 %v5950_v62 }
 0x782   :  { %2537 = vmatpush.msra.mxu2 %v5953_v30  ;;  %2557 = vmatpush.msra.mxu3 %v5956_v51 }
 0x783   :  { %2498 = vmatpush.msra.mxu0 %v5959_v14  ;;  %2518 = vmatpush.msra.mxu1 %v5962_v20 }
 0x784   :  { %2538 = vmatpush.msra.mxu2 %v5965_v31  ;;  %2558 = vmatpush.msra.mxu3 %v5968_v32 }
 0x785   :  { %2499 = vmatpush.msra.mxu0 %v5971_v33  ;;  %2519 = vmatpush.msra.mxu1 %v5974_v34  ;;  %v5990_v33 = vld [vmem:[#allocation6 + $0x58] sm:$0xff]  ;;  %v5993_v34 = vld [vmem:[#allocation6 + $0x20] sm:$0xff] }
 0x786   :  { %2539 = vmatpush.msra.mxu2 %v5977_v35  ;;  %2559 = vmatpush.msra.mxu3 %v5980_v41  ;;  %7077 = vst [vmem:[#allocation67_spill] sm:$0xff] %v5990_v33  ;;  %v5996_v35 = vld [vmem:[#allocation6 + $0x28] sm:$0xff] }
 0x787   :  { %2500 = vmatpush.msra.mxu0 %v5983_v40  ;;  %2520 = vmatpush.msra.mxu1 %v5986_v61  ;;  %7078 = vst [vmem:[#allocation52_spill] sm:$0xff] %v5993_v34  ;;  %v6000_v40 = vld [vmem:[#allocation6 + $0x38] sm:$0xff]  ;;  %v6003_v61 = vld [vmem:[#allocation6] sm:$0xff] }
 0x788   :  { %2540 = vmatpush.msra.mxu2 %v7042_v55  ;;  %2560 = vmatpush.msra.mxu3 %v5990_v33  ;;  %7079 = vst [vmem:[#allocation68_spill] sm:$0xff] %v5996_v35  ;;  %v6008_v55 = vld [vmem:[#allocation6 + $0x18] sm:$0xff] }
 0x789   :  { %2501 = vmatpush.msra.mxu0 %v5993_v34  ;;  %2521 = vmatpush.msra.mxu1 %v5996_v35  ;;  %7080 = vst [vmem:[#allocation42_spill] sm:$0xff] %v6000_v40  ;;  %v7083_v35 = vld [vmem:[#allocation31_spill] sm:$0xff] }
 0x78a   :  { %2541 = vmatpush.msra.mxu2 %v7046_v25  ;;  %2561 = vmatpush.msra.mxu3 %v6000_v40  ;;  %7081 = vst [vmem:[#allocation70_spill] sm:$0xff] %v6003_v61  ;;  %v225_v34 = vadd.f32 %v7083_v35, %v7052_v27  ;;  %v7084_v25 = vld [vmem:[#allocation78_spill] sm:$0xff] }
 0x78b   :  { %2502 = vmatpush.msra.mxu0 %v6003_v61  ;;  %2522 = vmatpush.msra.mxu1 %v7049_v24  ;;  %7082 = vst [vmem:[#allocation55_spill] sm:$0xff] %v6008_v55  ;;  %v274_v33 = vadd.f32 %v7084_v25, %v7054_v17  ;;  %v7085_v24 = vld [vmem:[#allocation65_spill] sm:$0xff] }
 0x78c   :  { %2542 = vmatpush.msra.mxu2 %v7050_v9  ;;  %2562 = vmatpush.msra.mxu3 %v6008_v55  ;;  %v372_v9 = vadd.f32 %v7085_v24, %v7056_v46 }
 0x7e8   :  { %v2176_v41 = vpop.f32.mrf.mxu0  ;;  %v2196_v40 = vpop.f32.mrf.mxu1 }
 0x7e9   :  { %v2239_v32 = vadd.f32 %v2176_v41, %v225_v34  ;;  %v2240_v31 = vadd.f32 %v2196_v40, %v274_v33 }
 0x7eb   :  { %v3469_v20 = vmul.f32 -1.442695, %v2239_v32  ;;  %v3470_v61 = vmul.f32 -1.442695, %v2240_v31  ;;  %v7086_v32 = vld [vmem:[#allocation80_spill] sm:$0xff] }
 0x7ec   :  { %v323_v31 = vadd.f32 %v7086_v32, %v7058_v48 }
 0x7ed   :  { %3760 = vpow2.f32 %v3469_v20 }
 0x7ee   :  { %3762 = vpow2.f32 %v3470_v61 }
 0x7ef   :  { %v2236_v14 = vpop.f32.mrf.mxu3  ;;  %v2216_v25 = vpop.f32.mrf.mxu2 }
 0x7f0   :  { %v2242_v51 = vadd.f32 %v2236_v14, %v372_v9  ;;  %v2241_v41 = vadd.f32 %v2216_v25, %v323_v31 }
 0x7f2   :  { %v3471_v55 = vmul.f32 -1.442695, %v2242_v51 }
 0x7f3   :  { %v3761_v30 = vpop.eup %3760 }
 0x7f4   :  { %v3763_v62 = vpop.eup %3762  ;;  %v2246_v35 = vadd.f32 1.0, %v3761_v30  ;;  %3764 = vpow2.f32 %v3471_v55 }
 0x7f5   :  { %v2265_v27 = vadd.f32 1.0, %v3763_v62 }
 0x7f6   :  { %3766 = vrcp.f32 %v2246_v35  ;;  %v2258_v9 = vand.u32 2147483648, %v2246_v35  ;;  %v2256_v55 = vand.u32 2147483647, %v2246_v35  ;;  %vm2252_vm14 = vweird.f32 %v2246_v35 }
 0x7f7   :  { %3768 = vrcp.f32 %v2265_v27  ;;  %v2277_v30 = vand.u32 2147483648, %v2265_v27  ;;  %v2275_v17 = vand.u32 2147483647, %v2265_v27  ;;  %vm2271_vm15 = vweird.f32 %v2265_v27 }
 0x7f8   :  { %v2259_v25 = vor.u32 1.1754944e-38, %v2258_v9  ;;  %vm2257_vm3 = vcmp.eq.f32.partialorder %v2256_v55, 8.507059e+37 }
 0x7f9   :  { %vm2276_vm4 = vcmp.eq.f32.partialorder %v2275_v17, 8.507059e+37 }
 0x7fa   :  { %v3765_v34 = vpop.eup %3764 }
 0x7fb   :  { %v2285_v20 = vadd.f32 1.0, %v3765_v34 }
 0x7fc   :  { %v3767_v33 = vpop.eup %3766 }
 0x7fd   :  { %v3769_v40 = vpop.eup %3768  ;;  %v2248_v61 = vmul.f32 %v3767_v33, %v2246_v35  ;;  %3770 = vrcp.f32 %v2285_v20  ;;  %vm2253_vm12 = vweird.f32 %v3767_v33  ;;  %v2312_v35 = vpop.permute.xlu1 %2311  ;;  %vm2291_vm7 = vweird.f32 %v2285_v20 }
 0x7fe   :  { %v2267_v14 = vmul.f32 %v3769_v40, %v2265_v27  ;;  %3772 = vtanh.f32 %v2241_v41  ;;  %vm2272_vm13 = vweird.f32 %v3769_v40  ;;  %vm2254_vm1 = vmor %vm2252_vm14, %vm2253_vm12  ;;  %vm2313_vm5 = vcmp.eq.s32.totalorder %v2312_v35, 1  ;;  %v7100_v35 = vld [vmem:[#allocation64_spill] sm:$0xff] }
 0x7ff   :  { %v2249_v51 = vsub.f32 1.0, %v2248_v61  ;;  %vm2273_vm2 = vmor %vm2271_vm15, %vm2272_vm13  ;;  %v2278_v61 = vor.u32 1.1754944e-38, %v2277_v30 }
 0x800   :  { %v2268_v24 = vsub.f32 1.0, %v2267_v14 }
 0x801   :  { %v2250_v62 = vmul.f32 %v3767_v33, %v2249_v51 }
 0x802   :  { %v2269_v46 = vmul.f32 %v3769_v40, %v2268_v24 }
 0x803   :  { %v3771_v22 = vpop.eup %3770  ;;  %v2251_v32 = vadd.f32 %v3767_v33, %v2250_v62 }
 0x804   :  { %v2270_v34 = vadd.f32 %v3769_v40, %v2269_v46  ;;  %v2287_v31 = vmul.f32 %v3771_v22, %v2285_v20  ;;  %v3773_v41 = vpop.eup %3772  ;;  %vm2292_vm6 = vweird.f32 %v3771_v22  ;;  %v2297_v46 = vand.u32 2147483648, %v2285_v20 }
 0x805   :  { %v2255_v14 = vsel %vm2254_vm1, %v3767_v33, %v2251_v32  ;;  %vm2293_vm8 = vmor %vm2291_vm7, %vm2292_vm6 }
 0x806   :  { %v2260_v48 = vsel %vm2257_vm3, %v2259_v25, %v2255_v14  ;;  %v2274_v51 = vsel %vm2273_vm2, %v3769_v40, %v2270_v34  ;;  %v2288_v11 = vsub.f32 1.0, %v2287_v31  ;;  %v2295_v40 = vand.u32 2147483647, %v2285_v20  ;;  %v7090_v20 = vld [vmem:[#allocation23_spill] sm:$0xff]  ;;  %v7091_v25 = vld [vmem:[#allocation16_spill] sm:$0xff]  ;;  %v7092_v34 = vld [vmem:[#allocation34_spill] sm:$0xff] }
 0x807   :  { %v2279_v24 = vsel %vm2276_vm4, %v2278_v61, %v2274_v51  ;;  %v2302_v60 = vmul.f32 %v3773_v41, %v2260_v48  ;;  %v2298_v30 = vor.u32 1.1754944e-38, %v2297_v46  ;;  %v7093_v31 = vld [vmem:[#allocation44_spill] sm:$0xff]  ;;  %v7094_v61 = vld [vmem:[#allocation39_spill] sm:$0xff]  ;;  %v7096_v41 = vld [vmem:[#allocation54_spill] sm:$0xff] }
 0x808   :  { %v2301_v10 = vmul.f32 %v2279_v24, %v5816_v26  ;;  %v2289_v62 = vmul.f32 %v3771_v22, %v2288_v11  ;;  %vm2296_vm9 = vcmp.eq.f32.partialorder %v2295_v40, 8.507059e+37  ;;  %v7095_v14 = vld [vmem:[#allocation24_spill] sm:$0xff]  ;;  %v7098_v24 = vld [vmem:[#allocation53_spill] sm:$0xff]  ;;  %v6087_v40 = vld [vmem:[#allocation6 + $0x50] sm:$0xff] }
 0x809   :  { %v7097_v51 = vld [vmem:[#allocation56_spill] sm:$0xff]  ;;  %v7103_v46 = vld [vmem:[#allocation37_spill] sm:$0xff]  ;;  %7104 = vst [vmem:[#allocation71_spill] sm:$0xff] %v6087_v40 }
 0x80a   :  { %v2303_v27 = vadd.f32 %v2302_v60, %v2301_v10  ;;  %v2290_v9 = vadd.f32 %v3771_v22, %v2289_v62  ;;  %v7099_v62 = vld [vmem:[#allocation32_spill] sm:$0xff] }
 0x80c   :  { %3774 = vtanh.f32 %v2303_v27  ;;  %v6022_v33 = vsel %vm2313_vm5, %v2303_v27, %v5816_v26  ;;  %v2294_v17 = vsel %vm2293_vm8, %v3771_v22, %v2290_v9  ;;  %v7087_v26 = vld [vmem:[#allocation30_spill] sm:$0xff]  ;;  %v7089_v22 = vld [vmem:[#allocation36_spill] sm:$0xff]  ;;  %v7101_v27 = vld [vmem:[#allocation51_spill] sm:$0xff] }
 0x80d   :  { %v2299_v55 = vsel %vm2296_vm9, %v2298_v30, %v2294_v17  ;;  %v7102_v9 = vld [vmem:[#allocation66_spill] sm:$0xff]  ;;  %v7105_v17 = vld [vmem:[#allocation67_spill] sm:$0xff]  ;;  %v7106_v30 = vld [vmem:[#allocation52_spill] sm:$0xff] }
 0x812   :  { %v3775_v48 = vpop.eup %3774 }
 0x813   :  { %v2305_v11 = vmul.f32 %v3775_v48, %v2299_v55  ;;  %v7107_v48 = vld [vmem:[#allocation68_spill] sm:$0xff]  ;;  %v6093_v55 = vld [vmem:[#allocation6 + $0x30] sm:$0xff] }
 0x814   :  { %7108 = vst [vmem:[#allocation46_spill] sm:$0xff] %v6093_v55 }
 0x815   :  { %v6026_v10 = vsel %vm2313_vm5, %v2305_v11, %v5820_v1  ;;  %v2316_v60 = vsel %vm2313_vm5, %v2305_v11, 0.0  ;;  %v7088_v1 = vld [vmem:[#allocation38_spill] sm:$0xff] }
 0x816   :  { %v2317_v32 = vpack.c.bf16 %v2316_v60, %v2316_v60  ;;  %2339 = vmatmul.f32.vlgmr.msrb.gmra.mxu0 %v6026_v10  ;;  %2359 = vmatmul.f32.vlgmr.msrb.gmra.mxu1 %v6026_v10  ;;  %v7109_v11 = vld [vmem:[#allocation42_spill] sm:$0xff] }
 0x817   :  { %2379 = vmatmul.f32.vlgmr.msrb.gmra.mxu2 %v6026_v10  ;;  %2399 = vmatmul.f32.vlgmr.msrb.gmra.mxu3 %v6026_v10  ;;  %v7110_v60 = vld [vmem:[#allocation70_spill] sm:$0xff] }
 0x818   :  { %2318 = vst [vmem:[#allocation3 + $0x28] sm:$0xf] %v2317_v32  ;;  %2651 = vmatpush.msrb.mxu0 %v5827_v21  ;;  %2671 = vmatpush.msrb.mxu1 %v5830_v54  ;;  %v6098_v32 = vld [vmem:[#allocation6 + $0x8] sm:$0xff] }
 0x819   :  { %2691 = vmatpush.msrb.mxu2 %v5833_v15  ;;  %2711 = vmatpush.msrb.mxu3 %v5836_v5  ;;  %7111 = vst [vmem:[#allocation72_spill] sm:$0xff] %v6098_v32 }
 0x81a   :  { %2652 = vmatpush.msrb.mxu0 %v5839_v42  ;;  %2672 = vmatpush.msrb.mxu1 %v5842_v45 }
 0x81b   :  { %2692 = vmatpush.msrb.mxu2 %v5845_v0  ;;  %2712 = vmatpush.msrb.mxu3 %v5848_v49 }
 0x81c   :  { %2653 = vmatpush.msrb.mxu0 %v5851_v44  ;;  %2673 = vmatpush.msrb.mxu1 %v5854_v12 }
 0x81d   :  { %2693 = vmatpush.msrb.mxu2 %v5857_v36  ;;  %2713 = vmatpush.msrb.mxu3 %v5860_v7 }
 0x81e   :  { %2654 = vmatpush.msrb.mxu0 %v5863_v43  ;;  %2674 = vmatpush.msrb.mxu1 %v5866_v57 }
 0x81f   :  { %2694 = vmatpush.msrb.mxu2 %v5869_v50  ;;  %2714 = vmatpush.msrb.mxu3 %v5872_v39 }
 0x820   :  { %2655 = vmatpush.msrb.mxu0 %v5875_v19  ;;  %2675 = vmatpush.msrb.mxu1 %v5878_v6 }
 0x821   :  { %2695 = vmatpush.msrb.mxu2 %v5881_v59  ;;  %2715 = vmatpush.msrb.mxu3 %v5884_v38 }
 0x822   :  { %2656 = vmatpush.msrb.mxu0 %v5887_v13  ;;  %2676 = vmatpush.msrb.mxu1 %v5890_v4 }
 0x823   :  { %2696 = vmatpush.msrb.mxu2 %v5893_v52  ;;  %2716 = vmatpush.msrb.mxu3 %v5896_v53 }
 0x824   :  { %2657 = vmatpush.msrb.mxu0 %v5899_v18  ;;  %2677 = vmatpush.msrb.mxu1 %v5902_v23 }
 0x825   :  { %2697 = vmatpush.msrb.mxu2 %v5905_v16  ;;  %2717 = vmatpush.msrb.mxu3 %v5908_v3 }
 0x826   :  { %2658 = vmatpush.msrb.mxu0 %v5911_v47  ;;  %2678 = vmatpush.msrb.mxu1 %v5914_v8 }
 0x827   :  { %2698 = vmatpush.msrb.mxu2 %v5917_v29  ;;  %2718 = vmatpush.msrb.mxu3 %v5920_v63 }
 0x828   :  { %2659 = vmatpush.msrb.mxu0 %v5923_v28  ;;  %2679 = vmatpush.msrb.mxu1 %v5926_v37 }
 0x829   :  { %2699 = vmatpush.msrb.mxu2 %v5929_v2  ;;  %2719 = vmatpush.msrb.mxu3 %v5932_v56 }
 0x82a   :  { %2660 = vmatpush.msrb.mxu0 %v5935_v58  ;;  %2680 = vmatpush.msrb.mxu1 %v7087_v26 }
 0x82b   :  { %2700 = vmatpush.msrb.mxu2 %v7088_v1  ;;  %2720 = vmatpush.msrb.mxu3 %v7089_v22 }
 0x82c   :  { %2661 = vmatpush.msrb.mxu0 %v7090_v20  ;;  %2681 = vmatpush.msrb.mxu1 %v7091_v25 }
 0x82d   :  { %2701 = vmatpush.msrb.mxu2 %v7092_v34  ;;  %2721 = vmatpush.msrb.mxu3 %v7093_v31 }
 0x82e   :  { %2662 = vmatpush.msrb.mxu0 %v7094_v61  ;;  %2682 = vmatpush.msrb.mxu1 %v7095_v14 }
 0x82f   :  { %2702 = vmatpush.msrb.mxu2 %v7096_v41  ;;  %2722 = vmatpush.msrb.mxu3 %v7097_v51  ;;  %v7119_v41 = vld [vmem:[#allocation69_spill] sm:$0xff] }
 0x830   :  { %2663 = vmatpush.msrb.mxu0 %v7098_v24  ;;  %2683 = vmatpush.msrb.mxu1 %v7099_v62 }
 0x831   :  { %2703 = vmatpush.msrb.mxu2 %v7100_v35  ;;  %2723 = vmatpush.msrb.mxu3 %v7101_v27  ;;  %v7117_v27 = vld [vmem:[#allocation81_spill] sm:$0xff] }
 0x832   :  { %2664 = vmatpush.msrb.mxu0 %v7102_v9  ;;  %2684 = vmatpush.msrb.mxu1 %v7103_v46  ;;  %v6101_v46 = vld [vmem:[#allocation6 + $0x10] sm:$0xff]  ;;  %v7116_v9 = vld [vmem:[#allocation92_spill] sm:$0xff] }
 0x833   :  { %2704 = vmatpush.msrb.mxu2 %v6087_v40  ;;  %2724 = vmatpush.msrb.mxu3 %v7105_v17  ;;  %7112 = vst [vmem:[#allocation59_spill] sm:$0xff] %v6101_v46  ;;  %v7113_v17 = vld [vmem:[#allocation55_spill] sm:$0xff] }
 0x834   :  { %2665 = vmatpush.msrb.mxu0 %v7106_v30  ;;  %2685 = vmatpush.msrb.mxu1 %v7107_v48  ;;  %v7114_v30 = vld [vmem:[#allocation85_spill] sm:$0xff]  ;;  %v7115_v48 = vld [vmem:[#allocation35_spill] sm:$0xff] }
 0x835   :  { %2705 = vmatpush.msrb.mxu2 %v6093_v55  ;;  %2725 = vmatpush.msrb.mxu3 %v7109_v11  ;;  %v227_v40 = vadd.f32 %v7115_v48, %v7114_v30  ;;  %v276_v55 = vadd.f32 %v7117_v27, %v7116_v9 }
 0x836   :  { %2666 = vmatpush.msrb.mxu0 %v7110_v60  ;;  %2686 = vmatpush.msrb.mxu1 %v6098_v32  ;;  %v7118_v32 = vld [vmem:[#allocation89_spill] sm:$0xff] }
 0x837   :  { %2706 = vmatpush.msrb.mxu2 %v6101_v46  ;;  %2726 = vmatpush.msrb.mxu3 %v7113_v17  ;;  %v374_v14 = vadd.f32 %v7119_v41, %v7118_v32 }
 0x893   :  { %v2340_v35 = vpop.f32.mrf.mxu0  ;;  %v2360_v11 = vpop.f32.mrf.mxu1 }
 0x894   :  { %v2403_v62 = vadd.f32 %v2340_v35, %v227_v40  ;;  %v2404_v60 = vadd.f32 %v2360_v11, %v276_v55  ;;  %v7120_v40 = vld [vmem:[#allocation95_spill] sm:$0xff] }
 0x896   :  { %v3472_v24 = vmul.f32 -1.442695, %v2403_v62  ;;  %v3473_v51 = vmul.f32 -1.442695, %v2404_v60  ;;  %v7121_v62 = vld [vmem:[#allocation82_spill] sm:$0xff] }
 0x897   :  { %v325_v55 = vadd.f32 %v7121_v62, %v7120_v40 }
 0x898   :  { %3776 = vpow2.f32 %v3472_v24 }
 0x899   :  { %3778 = vpow2.f32 %v3473_v51 }
 0x89a   :  { %v2400_v46 = vpop.f32.mrf.mxu3  ;;  %v2380_v27 = vpop.f32.mrf.mxu2 }
 0x89b   :  { %v2406_v61 = vadd.f32 %v2400_v46, %v374_v14  ;;  %v2405_v60 = vadd.f32 %v2380_v27, %v325_v55 }
 0x89d   :  { %v3474_v17 = vmul.f32 -1.442695, %v2406_v61 }
 0x89e   :  { %v3777_v31 = vpop.eup %3776 }
 0x89f   :  { %v3779_v34 = vpop.eup %3778  ;;  %v2410_v48 = vadd.f32 1.0, %v3777_v31  ;;  %3780 = vpow2.f32 %v3474_v17 }
 0x8a0   :  { %v2429_v30 = vadd.f32 1.0, %v3779_v34 }
 0x8a1   :  { %3782 = vrcp.f32 %v2410_v48  ;;  %v2422_v32 = vand.u32 2147483648, %v2410_v48  ;;  %v2420_v17 = vand.u32 2147483647, %v2410_v48  ;;  %vm2416_vm12 = vweird.f32 %v2410_v48 }
 0x8a2   :  { %3784 = vrcp.f32 %v2429_v30  ;;  %v2441_v31 = vand.u32 2147483648, %v2429_v30  ;;  %v2439_v25 = vand.u32 2147483647, %v2429_v30  ;;  %vm2435_vm13 = vweird.f32 %v2429_v30 }
 0x8a3   :  { %v2423_v27 = vor.u32 1.1754944e-38, %v2422_v32  ;;  %vm2421_vm1 = vcmp.eq.f32.partialorder %v2420_v17, 8.507059e+37 }
 0x8a4   :  { %vm2440_vm2 = vcmp.eq.f32.partialorder %v2439_v25, 8.507059e+37 }
 0x8a5   :  { %v3781_v35 = vpop.eup %3780 }
 0x8a6   :  { %v2449_v24 = vadd.f32 1.0, %v3781_v35 }
 0x8a7   :  { %v3783_v11 = vpop.eup %3782 }
 0x8a8   :  { %v3785_v41 = vpop.eup %3784  ;;  %v2412_v51 = vmul.f32 %v3783_v11, %v2410_v48  ;;  %3786 = vrcp.f32 %v2449_v24  ;;  %vm2417_vm10 = vweird.f32 %v3783_v11  ;;  %v2476_v48 = vpop.permute.xlu2 %2475  ;;  %vm2455_vm5 = vweird.f32 %v2449_v24 }
 0x8a9   :  { %v2431_v14 = vmul.f32 %v3785_v41, %v2429_v30  ;;  %3788 = vtanh.f32 %v2405_v60  ;;  %vm2436_vm11 = vweird.f32 %v3785_v41  ;;  %vm2418_vm14 = vmor %vm2416_vm12, %vm2417_vm10  ;;  %vm2477_vm3 = vcmp.eq.s32.totalorder %v2476_v48, 1  ;;  %v7135_v48 = vld [vmem:[#allocation64_spill] sm:$0xff] }
 0x8aa   :  { %v2413_v61 = vsub.f32 1.0, %v2412_v51  ;;  %vm2437_vm15 = vmor %vm2435_vm13, %vm2436_vm11  ;;  %v2442_v51 = vor.u32 1.1754944e-38, %v2441_v31 }
 0x8ab   :  { %v2432_v46 = vsub.f32 1.0, %v2431_v14 }
 0x8ac   :  { %v2414_v34 = vmul.f32 %v3783_v11, %v2413_v61 }
 0x8ad   :  { %v2433_v9 = vmul.f32 %v3785_v41, %v2432_v46 }
 0x8ae   :  { %v3787_v20 = vpop.eup %3786  ;;  %v2415_v62 = vadd.f32 %v3783_v11, %v2414_v34 }
 0x8af   :  { %v2434_v35 = vadd.f32 %v3785_v41, %v2433_v9  ;;  %v2451_v55 = vmul.f32 %v3787_v20, %v2449_v24  ;;  %v3789_v60 = vpop.eup %3788  ;;  %vm2456_vm4 = vweird.f32 %v3787_v20  ;;  %v2461_v9 = vand.u32 2147483648, %v2449_v24 }
 0x8b0   :  { %v2419_v14 = vsel %vm2418_vm14, %v3783_v11, %v2415_v62  ;;  %vm2457_vm6 = vmor %vm2455_vm5, %vm2456_vm4 }
 0x8b1   :  { %v2424_v40 = vsel %vm2421_vm1, %v2423_v27, %v2419_v14  ;;  %v2438_v61 = vsel %vm2437_vm15, %v3785_v41, %v2434_v35  ;;  %v2452_v22 = vsub.f32 1.0, %v2451_v55  ;;  %v2459_v41 = vand.u32 2147483647, %v2449_v24  ;;  %v7125_v24 = vld [vmem:[#allocation23_spill] sm:$0xff]  ;;  %v7126_v27 = vld [vmem:[#allocation16_spill] sm:$0xff]  ;;  %v7127_v35 = vld [vmem:[#allocation34_spill] sm:$0xff] }
 0x8b2   :  { %v2443_v46 = vsel %vm2440_vm2, %v2442_v51, %v2438_v61  ;;  %v2466_v1 = vmul.f32 %v3789_v60, %v2424_v40  ;;  %v2462_v31 = vor.u32 1.1754944e-38, %v2461_v9  ;;  %v7128_v55 = vld [vmem:[#allocation44_spill] sm:$0xff]  ;;  %v7129_v51 = vld [vmem:[#allocation39_spill] sm:$0xff]  ;;  %v7131_v60 = vld [vmem:[#allocation54_spill] sm:$0xff] }
 0x8b3   :  { %v2465_v26 = vmul.f32 %v2443_v46, %v6022_v33  ;;  %v2453_v34 = vmul.f32 %v3787_v20, %v2452_v22  ;;  %vm2460_vm7 = vcmp.eq.f32.partialorder %v2459_v41, 8.507059e+37  ;;  %v7130_v14 = vld [vmem:[#allocation24_spill] sm:$0xff]  ;;  %v7133_v46 = vld [vmem:[#allocation53_spill] sm:$0xff]  ;;  %v7139_v41 = vld [vmem:[#allocation71_spill] sm:$0xff] }
 0x8b4   :  { %v7132_v61 = vld [vmem:[#allocation56_spill] sm:$0xff]  ;;  %v7138_v9 = vld [vmem:[#allocation37_spill] sm:$0xff] }
 0x8b5   :  { %v2467_v30 = vadd.f32 %v2466_v1, %v2465_v26  ;;  %v2454_v32 = vadd.f32 %v3787_v20, %v2453_v34  ;;  %v7134_v34 = vld [vmem:[#allocation32_spill] sm:$0xff] }
 0x8b7   :  { %3790 = vtanh.f32 %v2467_v30  ;;  %v6116_v11 = vsel %vm2477_vm3, %v2467_v30, %v6022_v33  ;;  %v2458_v25 = vsel %vm2457_vm6, %v3787_v20, %v2454_v32  ;;  %v7122_v33 = vld [vmem:[#allocation30_spill] sm:$0xff]  ;;  %v7124_v20 = vld [vmem:[#allocation36_spill] sm:$0xff]  ;;  %v7136_v30 = vld [vmem:[#allocation51_spill] sm:$0xff] }
 0x8b8   :  { %v2463_v17 = vsel %vm2460_vm7, %v2462_v31, %v2458_v25  ;;  %v7137_v32 = vld [vmem:[#allocation66_spill] sm:$0xff]  ;;  %v7140_v25 = vld [vmem:[#allocation67_spill] sm:$0xff]  ;;  %v7141_v31 = vld [vmem:[#allocation52_spill] sm:$0xff] }
 0x8bd   :  { %v3791_v40 = vpop.eup %3790 }
 0x8be   :  { %v2469_v22 = vmul.f32 %v3791_v40, %v2463_v17  ;;  %v7142_v40 = vld [vmem:[#allocation68_spill] sm:$0xff]  ;;  %v7143_v17 = vld [vmem:[#allocation46_spill] sm:$0xff] }
 0x8c0   :  { %v6120_v26 = vsel %vm2477_vm3, %v2469_v22, %v6026_v10  ;;  %v2480_v1 = vsel %vm2477_vm3, %v2469_v22, 0.0  ;;  %v7123_v10 = vld [vmem:[#allocation38_spill] sm:$0xff] }
 0x8c1   :  { %v2481_v62 = vpack.c.bf16 %v2480_v1, %v2480_v1  ;;  %2503 = vmatmul.f32.vlgmr.msra.gmra.mxu0 %v6120_v26  ;;  %2523 = vmatmul.f32.vlgmr.msra.gmra.mxu1 %v6120_v26  ;;  %v7144_v22 = vld [vmem:[#allocation42_spill] sm:$0xff] }
 0x8c2   :  { %2543 = vmatmul.f32.vlgmr.msra.gmra.mxu2 %v6120_v26  ;;  %2563 = vmatmul.f32.vlgmr.msra.gmra.mxu3 %v6120_v26  ;;  %v7145_v1 = vld [vmem:[#allocation70_spill] sm:$0xff] }
 0x8c3   :  { %2482 = vst [vmem:[#allocation3 + $0x2c] sm:$0xf] %v2481_v62  ;;  %2815 = vmatpush.msra.mxu0 %v5827_v21  ;;  %2835 = vmatpush.msra.mxu1 %v5830_v54  ;;  %v7146_v62 = vld [vmem:[#allocation72_spill] sm:$0xff] }
 0x8c4   :  { %2855 = vmatpush.msra.mxu2 %v5833_v15  ;;  %2875 = vmatpush.msra.mxu3 %v5836_v5 }
 0x8c5   :  { %2816 = vmatpush.msra.mxu0 %v5839_v42  ;;  %2836 = vmatpush.msra.mxu1 %v5842_v45 }
 0x8c6   :  { %2856 = vmatpush.msra.mxu2 %v5845_v0  ;;  %2876 = vmatpush.msra.mxu3 %v5848_v49 }
 0x8c7   :  { %2817 = vmatpush.msra.mxu0 %v5851_v44  ;;  %2837 = vmatpush.msra.mxu1 %v5854_v12 }
 0x8c8   :  { %2857 = vmatpush.msra.mxu2 %v5857_v36  ;;  %2877 = vmatpush.msra.mxu3 %v5860_v7 }
 0x8c9   :  { %2818 = vmatpush.msra.mxu0 %v5863_v43  ;;  %2838 = vmatpush.msra.mxu1 %v5866_v57 }
 0x8ca   :  { %2858 = vmatpush.msra.mxu2 %v5869_v50  ;;  %2878 = vmatpush.msra.mxu3 %v5872_v39 }
 0x8cb   :  { %2819 = vmatpush.msra.mxu0 %v5875_v19  ;;  %2839 = vmatpush.msra.mxu1 %v5878_v6 }
 0x8cc   :  { %2859 = vmatpush.msra.mxu2 %v5881_v59  ;;  %2879 = vmatpush.msra.mxu3 %v5884_v38 }
 0x8cd   :  { %2820 = vmatpush.msra.mxu0 %v5887_v13  ;;  %2840 = vmatpush.msra.mxu1 %v5890_v4 }
 0x8ce   :  { %2860 = vmatpush.msra.mxu2 %v5893_v52  ;;  %2880 = vmatpush.msra.mxu3 %v5896_v53 }
 0x8cf   :  { %2821 = vmatpush.msra.mxu0 %v5899_v18  ;;  %2841 = vmatpush.msra.mxu1 %v5902_v23 }
 0x8d0   :  { %2861 = vmatpush.msra.mxu2 %v5905_v16  ;;  %2881 = vmatpush.msra.mxu3 %v5908_v3 }
 0x8d1   :  { %2822 = vmatpush.msra.mxu0 %v5911_v47  ;;  %2842 = vmatpush.msra.mxu1 %v5914_v8 }
 0x8d2   :  { %2862 = vmatpush.msra.mxu2 %v5917_v29  ;;  %2882 = vmatpush.msra.mxu3 %v5920_v63 }
 0x8d3   :  { %2823 = vmatpush.msra.mxu0 %v5923_v28  ;;  %2843 = vmatpush.msra.mxu1 %v5926_v37 }
 0x8d4   :  { %2863 = vmatpush.msra.mxu2 %v5929_v2  ;;  %2883 = vmatpush.msra.mxu3 %v5932_v56 }
 0x8d5   :  { %2824 = vmatpush.msra.mxu0 %v5935_v58  ;;  %2844 = vmatpush.msra.mxu1 %v7122_v33 }
 0x8d6   :  { %2864 = vmatpush.msra.mxu2 %v7123_v10  ;;  %2884 = vmatpush.msra.mxu3 %v7124_v20 }
 0x8d7   :  { %2825 = vmatpush.msra.mxu0 %v7125_v24  ;;  %2845 = vmatpush.msra.mxu1 %v7126_v27 }
 0x8d8   :  { %2865 = vmatpush.msra.mxu2 %v7127_v35  ;;  %2885 = vmatpush.msra.mxu3 %v7128_v55 }
 0x8d9   :  { %2826 = vmatpush.msra.mxu0 %v7129_v51  ;;  %2846 = vmatpush.msra.mxu1 %v7130_v14  ;;  %v7154_v14 = vld [vmem:[#allocation73_spill] sm:$0xff] }
 0x8da   :  { %2866 = vmatpush.msra.mxu2 %v7131_v60  ;;  %2886 = vmatpush.msra.mxu3 %v7132_v61 }
 0x8db   :  { %2827 = vmatpush.msra.mxu0 %v7133_v46  ;;  %2847 = vmatpush.msra.mxu1 %v7134_v34  ;;  %v7152_v34 = vld [vmem:[#allocation84_spill] sm:$0xff] }
 0x8dc   :  { %2867 = vmatpush.msra.mxu2 %v7135_v48  ;;  %2887 = vmatpush.msra.mxu3 %v7136_v30  ;;  %v7147_v30 = vld [vmem:[#allocation59_spill] sm:$0xff] }
 0x8dd   :  { %2828 = vmatpush.msra.mxu0 %v7137_v32  ;;  %2848 = vmatpush.msra.mxu1 %v7138_v9  ;;  %v7148_v32 = vld [vmem:[#allocation55_spill] sm:$0xff]  ;;  %v7149_v9 = vld [vmem:[#allocation85_spill] sm:$0xff] }
 0x8de   :  { %2868 = vmatpush.msra.mxu2 %v7139_v41  ;;  %2888 = vmatpush.msra.mxu3 %v7140_v25  ;;  %v7150_v41 = vld [vmem:[#allocation40_spill] sm:$0xff] }
 0x8df   :  { %2829 = vmatpush.msra.mxu0 %v7141_v31  ;;  %2849 = vmatpush.msra.mxu1 %v7142_v40  ;;  %v230_v48 = vadd.f32 %v7150_v41, %v7149_v9  ;;  %v7151_v25 = vld [vmem:[#allocation92_spill] sm:$0xff] }
 0x8e0   :  { %2869 = vmatpush.msra.mxu2 %v7143_v17  ;;  %2889 = vmatpush.msra.mxu3 %v7144_v22  ;;  %v279_v31 = vadd.f32 %v7152_v34, %v7151_v25 }
 0x8e1   :  { %2830 = vmatpush.msra.mxu0 %v7145_v1  ;;  %2850 = vmatpush.msra.mxu1 %v7146_v62  ;;  %v7153_v1 = vld [vmem:[#allocation89_spill] sm:$0xff] }
 0x8e2   :  { %2870 = vmatpush.msra.mxu2 %v7147_v30  ;;  %2890 = vmatpush.msra.mxu3 %v7148_v32  ;;  %v377_v62 = vadd.f32 %v7154_v14, %v7153_v1 }
 0x93e   :  { %v2504_v46 = vpop.f32.mrf.mxu0  ;;  %v2524_v40 = vpop.f32.mrf.mxu1 }
 0x93f   :  { %v2567_v61 = vadd.f32 %v2504_v46, %v230_v48  ;;  %v2568_v17 = vadd.f32 %v2524_v40, %v279_v31  ;;  %v7155_v48 = vld [vmem:[#allocation95_spill] sm:$0xff] }
 0x941   :  { %v3475_v60 = vmul.f32 -1.442695, %v2567_v61  ;;  %v3476_v22 = vmul.f32 -1.442695, %v2568_v17  ;;  %v7156_v61 = vld [vmem:[#allocation86_spill] sm:$0xff] }
 0x942   :  { %v328_v31 = vadd.f32 %v7156_v61, %v7155_v48 }
 0x943   :  { %3792 = vpow2.f32 %v3475_v60 }
 0x944   :  { %3794 = vpow2.f32 %v3476_v22 }
 0x945   :  { %v2564_v30 = vpop.f32.mrf.mxu3  ;;  %v2544_v34 = vpop.f32.mrf.mxu2 }
 0x946   :  { %v2570_v51 = vadd.f32 %v2564_v30, %v377_v62  ;;  %v2569_v17 = vadd.f32 %v2544_v34, %v328_v31 }
 0x948   :  { %v3477_v32 = vmul.f32 -1.442695, %v2570_v51 }
 0x949   :  { %v3793_v55 = vpop.eup %3792 }
 0x94a   :  { %v3795_v35 = vpop.eup %3794  ;;  %v2574_v41 = vadd.f32 1.0, %v3793_v55  ;;  %3796 = vpow2.f32 %v3477_v32 }
 0x94b   :  { %v2593_v9 = vadd.f32 1.0, %v3795_v35 }
 0x94c   :  { %3798 = vrcp.f32 %v2574_v41  ;;  %v2586_v1 = vand.u32 2147483648, %v2574_v41  ;;  %v2584_v32 = vand.u32 2147483647, %v2574_v41  ;;  %vm2580_vm10 = vweird.f32 %v2574_v41 }
 0x94d   :  { %3800 = vrcp.f32 %v2593_v9  ;;  %v2605_v55 = vand.u32 2147483648, %v2593_v9  ;;  %v2603_v27 = vand.u32 2147483647, %v2593_v9  ;;  %vm2599_vm11 = vweird.f32 %v2593_v9 }
 0x94e   :  { %v2587_v34 = vor.u32 1.1754944e-38, %v2586_v1  ;;  %vm2585_vm14 = vcmp.eq.f32.partialorder %v2584_v32, 8.507059e+37 }
 0x94f   :  { %vm2604_vm15 = vcmp.eq.f32.partialorder %v2603_v27, 8.507059e+37 }
 0x950   :  { %v3797_v46 = vpop.eup %3796 }
 0x951   :  { %v2613_v60 = vadd.f32 1.0, %v3797_v46 }
 0x952   :  { %v3799_v40 = vpop.eup %3798 }
 0x953   :  { %v3801_v14 = vpop.eup %3800  ;;  %v2576_v22 = vmul.f32 %v3799_v40, %v2574_v41  ;;  %3802 = vrcp.f32 %v2613_v60  ;;  %vm2581_vm8 = vweird.f32 %v3799_v40  ;;  %v2640_v41 = vpop.permute.xlu0 %2639  ;;  %vm2619_vm3 = vweird.f32 %v2613_v60 }
 0x954   :  { %v2595_v30 = vmul.f32 %v3801_v14, %v2593_v9  ;;  %3804 = vtanh.f32 %v2569_v17  ;;  %vm2600_vm9 = vweird.f32 %v3801_v14  ;;  %vm2582_vm12 = vmor %vm2580_vm10, %vm2581_vm8  ;;  %vm2641_vm1 = vcmp.eq.s32.totalorder %v2640_v41, 1 }
 0x955   :  { %v2577_v51 = vsub.f32 1.0, %v2576_v22  ;;  %vm2601_vm13 = vmor %vm2599_vm11, %vm2600_vm9  ;;  %v2606_v22 = vor.u32 1.1754944e-38, %v2605_v55 }
 0x956   :  { %v2596_v62 = vsub.f32 1.0, %v2595_v30 }
 0x957   :  { %v2578_v35 = vmul.f32 %v3799_v40, %v2577_v51 }
 0x958   :  { %v2597_v25 = vmul.f32 %v3801_v14, %v2596_v62 }
 0x959   :  { %v3803_v24 = vpop.eup %3802  ;;  %v2579_v61 = vadd.f32 %v3799_v40, %v2578_v35 }
 0x95a   :  { %v2598_v46 = vadd.f32 %v3801_v14, %v2597_v25  ;;  %v2615_v31 = vmul.f32 %v3803_v24, %v2613_v60  ;;  %v3805_v17 = vpop.eup %3804  ;;  %vm2620_vm2 = vweird.f32 %v3803_v24  ;;  %v2625_v25 = vand.u32 2147483648, %v2613_v60 }
 0x95b   :  { %v2583_v30 = vsel %vm2582_vm12, %v3799_v40, %v2579_v61  ;;  %vm2621_vm4 = vmor %vm2619_vm3, %vm2620_vm2 }
 0x95c   :  { %v2588_v48 = vsel %vm2585_vm14, %v2587_v34, %v2583_v30  ;;  %v2602_v51 = vsel %vm2601_vm13, %v3801_v14, %v2598_v46  ;;  %v2616_v20 = vsub.f32 1.0, %v2615_v31  ;;  %v2623_v14 = vand.u32 2147483647, %v2613_v60  ;;  %v7189_v60 = vld [vmem:[#allocation76_spill] sm:$0xff] }
 0x95d   :  { %v2607_v62 = vsel %vm2604_vm15, %v2606_v22, %v2602_v51  ;;  %v2630_v10 = vmul.f32 %v3805_v17, %v2588_v48  ;;  %v2626_v55 = vor.u32 1.1754944e-38, %v2625_v25 }
 0x95e   :  { %v2629_v33 = vmul.f32 %v2607_v62, %v6116_v11  ;;  %v2617_v35 = vmul.f32 %v3803_v24, %v2616_v20  ;;  %vm2624_vm5 = vcmp.eq.f32.partialorder %v2623_v14, 8.507059e+37 }
 0x960   :  { %v2631_v9 = vadd.f32 %v2630_v10, %v2629_v33  ;;  %v2618_v1 = vadd.f32 %v3803_v24, %v2617_v35 }
 0x962   :  { %3806 = vtanh.f32 %v2631_v9  ;;  %v6202_v40 = vsel %vm2641_vm1, %v2631_v9, %v6116_v11  ;;  %v2622_v27 = vsel %vm2621_vm4, %v3803_v24, %v2618_v1  ;;  %v7188_v24 = vld [vmem:[#allocation89_spill] sm:$0xff]  ;;  %v7190_v9 = vld [vmem:[#allocation95_spill] sm:$0xff]  ;;  %v7191_v1 = vld [vmem:[#allocation90_spill] sm:$0xff] }
 0x963   :  { %v2627_v32 = vsel %vm2624_vm5, %v2626_v55, %v2622_v27  ;;  %v379_v34 = vadd.f32 %v7189_v60, %v7188_v24  ;;  %v330_v25 = vadd.f32 %v7191_v1, %v7190_v9  ;;  %v7194_v1 = vld [vmem:[#allocation79_spill] sm:$0xff] }
 0x968   :  { %v3807_v48 = vpop.eup %3806 }
 0x969   :  { %v2633_v20 = vmul.f32 %v3807_v48, %v2627_v32 }
 0x96b   :  { %v6206_v33 = vsel %vm2641_vm1, %v2633_v20, %v6120_v26  ;;  %v2644_v10 = vsel %vm2641_vm1, %v2633_v20, 0.0 }
 0x96c   :  { %v2645_v61 = vpack.c.bf16 %v2644_v10, %v2644_v10  ;;  %2667 = vmatmul.f32.vlgmr.msrb.gmra.mxu0 %v6206_v33  ;;  %2687 = vmatmul.f32.vlgmr.msrb.gmra.mxu1 %v6206_v33 }
 0x96d   :  { %2707 = vmatmul.f32.vlgmr.msrb.gmra.mxu2 %v6206_v33  ;;  %2727 = vmatmul.f32.vlgmr.msrb.gmra.mxu3 %v6206_v33 }
 0x96e   :  { %2646 = vst [vmem:[#allocation3 + $0x30] sm:$0xf] %v2645_v61  ;;  %2979 = vmatpush.msrb.mxu0 %v5827_v21  ;;  %2999 = vmatpush.msrb.mxu1 %v5830_v54  ;;  %v7157_v21 = vld [vmem:[#allocation30_spill] sm:$0xff] }
 0x96f   :  { %3019 = vmatpush.msrb.mxu2 %v5833_v15  ;;  %3039 = vmatpush.msrb.mxu3 %v5836_v5  ;;  %v7158_v54 = vld [vmem:[#allocation38_spill] sm:$0xff]  ;;  %v7159_v15 = vld [vmem:[#allocation36_spill] sm:$0xff]  ;;  %v7160_v5 = vld [vmem:[#allocation23_spill] sm:$0xff] }
 0x970   :  { %2980 = vmatpush.msrb.mxu0 %v5839_v42  ;;  %3000 = vmatpush.msrb.mxu1 %v5842_v45  ;;  %v7161_v42 = vld [vmem:[#allocation16_spill] sm:$0xff]  ;;  %v7162_v45 = vld [vmem:[#allocation34_spill] sm:$0xff] }
 0x971   :  { %3020 = vmatpush.msrb.mxu2 %v5845_v0  ;;  %3040 = vmatpush.msrb.mxu3 %v5848_v49  ;;  %v7163_v0 = vld [vmem:[#allocation44_spill] sm:$0xff]  ;;  %v7164_v49 = vld [vmem:[#allocation39_spill] sm:$0xff] }
 0x972   :  { %2981 = vmatpush.msrb.mxu0 %v5851_v44  ;;  %3001 = vmatpush.msrb.mxu1 %v5854_v12  ;;  %v7165_v44 = vld [vmem:[#allocation24_spill] sm:$0xff]  ;;  %v7166_v12 = vld [vmem:[#allocation54_spill] sm:$0xff] }
 0x973   :  { %3021 = vmatpush.msrb.mxu2 %v5857_v36  ;;  %3041 = vmatpush.msrb.mxu3 %v5860_v7  ;;  %v7167_v36 = vld [vmem:[#allocation56_spill] sm:$0xff]  ;;  %v7168_v7 = vld [vmem:[#allocation53_spill] sm:$0xff] }
 0x974   :  { %2982 = vmatpush.msrb.mxu0 %v5863_v43  ;;  %3002 = vmatpush.msrb.mxu1 %v5866_v57  ;;  %v7169_v43 = vld [vmem:[#allocation32_spill] sm:$0xff] }
 0x975   :  { %3022 = vmatpush.msrb.mxu2 %v5869_v50  ;;  %3042 = vmatpush.msrb.mxu3 %v5872_v39  ;;  %v7170_v57 = vld [vmem:[#allocation64_spill] sm:$0xff]  ;;  %v7171_v50 = vld [vmem:[#allocation51_spill] sm:$0xff]  ;;  %v7172_v39 = vld [vmem:[#allocation66_spill] sm:$0xff] }
 0x976   :  { %2983 = vmatpush.msrb.mxu0 %v5875_v19  ;;  %3003 = vmatpush.msrb.mxu1 %v5878_v6  ;;  %v7173_v19 = vld [vmem:[#allocation37_spill] sm:$0xff]  ;;  %v7174_v6 = vld [vmem:[#allocation71_spill] sm:$0xff] }
 0x977   :  { %3023 = vmatpush.msrb.mxu2 %v5881_v59  ;;  %3043 = vmatpush.msrb.mxu3 %v5884_v38  ;;  %v7175_v59 = vld [vmem:[#allocation67_spill] sm:$0xff]  ;;  %v7176_v38 = vld [vmem:[#allocation52_spill] sm:$0xff] }
 0x978   :  { %2984 = vmatpush.msrb.mxu0 %v5887_v13  ;;  %3004 = vmatpush.msrb.mxu1 %v5890_v4  ;;  %v7177_v13 = vld [vmem:[#allocation68_spill] sm:$0xff]  ;;  %v7178_v4 = vld [vmem:[#allocation46_spill] sm:$0xff] }
 0x979   :  { %3024 = vmatpush.msrb.mxu2 %v5893_v52  ;;  %3044 = vmatpush.msrb.mxu3 %v5896_v53  ;;  %v7179_v52 = vld [vmem:[#allocation42_spill] sm:$0xff] }
 0x97a   :  { %2985 = vmatpush.msrb.mxu0 %v5899_v18  ;;  %3005 = vmatpush.msrb.mxu1 %v5902_v23  ;;  %v7180_v53 = vld [vmem:[#allocation70_spill] sm:$0xff]  ;;  %v7181_v18 = vld [vmem:[#allocation72_spill] sm:$0xff]  ;;  %v7182_v23 = vld [vmem:[#allocation59_spill] sm:$0xff] }
 0x97b   :  { %3025 = vmatpush.msrb.mxu2 %v5905_v16  ;;  %3045 = vmatpush.msrb.mxu3 %v5908_v3  ;;  %v7183_v16 = vld [vmem:[#allocation55_spill] sm:$0xff]  ;;  %v7184_v3 = vld [vmem:[#allocation85_spill] sm:$0xff] }
 0x97c   :  { %2986 = vmatpush.msrb.mxu0 %v5911_v47  ;;  %3006 = vmatpush.msrb.mxu1 %v5914_v8  ;;  %v7185_v47 = vld [vmem:[#allocation43_spill] sm:$0xff] }
 0x97d   :  { %3026 = vmatpush.msrb.mxu2 %v5917_v29  ;;  %3046 = vmatpush.msrb.mxu3 %v5920_v63  ;;  %v232_v8 = vadd.f32 %v7185_v47, %v7184_v3  ;;  %v7186_v29 = vld [vmem:[#allocation92_spill] sm:$0xff]  ;;  %v7187_v63 = vld [vmem:[#allocation87_spill] sm:$0xff] }
 0x97e   :  { %2987 = vmatpush.msrb.mxu0 %v5923_v28  ;;  %3007 = vmatpush.msrb.mxu1 %v5926_v37  ;;  %v281_v28 = vadd.f32 %v7187_v63, %v7186_v29 }
 0x97f   :  { %3027 = vmatpush.msrb.mxu2 %v5929_v2  ;;  %3047 = vmatpush.msrb.mxu3 %v5932_v56 }
 0x980   :  { %2988 = vmatpush.msrb.mxu0 %v5935_v58  ;;  %3008 = vmatpush.msrb.mxu1 %v7157_v21 }
 0x981   :  { %3028 = vmatpush.msrb.mxu2 %v7158_v54  ;;  %3048 = vmatpush.msrb.mxu3 %v7159_v15 }
 0x982   :  { %2989 = vmatpush.msrb.mxu0 %v7160_v5  ;;  %3009 = vmatpush.msrb.mxu1 %v7161_v42 }
 0x983   :  { %3029 = vmatpush.msrb.mxu2 %v7162_v45  ;;  %3049 = vmatpush.msrb.mxu3 %v7163_v0 }
 0x984   :  { %2990 = vmatpush.msrb.mxu0 %v7164_v49  ;;  %3010 = vmatpush.msrb.mxu1 %v7165_v44 }
 0x985   :  { %3030 = vmatpush.msrb.mxu2 %v7166_v12  ;;  %3050 = vmatpush.msrb.mxu3 %v7167_v36 }
 0x986   :  { %2991 = vmatpush.msrb.mxu0 %v7168_v7  ;;  %3011 = vmatpush.msrb.mxu1 %v7169_v43 }
 0x987   :  { %3031 = vmatpush.msrb.mxu2 %v7170_v57  ;;  %3051 = vmatpush.msrb.mxu3 %v7171_v50 }
 0x988   :  { %2992 = vmatpush.msrb.mxu0 %v7172_v39  ;;  %3012 = vmatpush.msrb.mxu1 %v7173_v19 }
 0x989   :  { %3032 = vmatpush.msrb.mxu2 %v7174_v6  ;;  %3052 = vmatpush.msrb.mxu3 %v7175_v59 }
 0x98a   :  { %2993 = vmatpush.msrb.mxu0 %v7176_v38  ;;  %3013 = vmatpush.msrb.mxu1 %v7177_v13  ;;  %v2804_v38 = vpop.permute.xlu1 %2803 }
 0x98b   :  { %3033 = vmatpush.msrb.mxu2 %v7178_v4  ;;  %3053 = vmatpush.msrb.mxu3 %v7179_v52  ;;  %vm2805_vm14 = vcmp.eq.s32.totalorder %v2804_v38, 1 }
 0x98c   :  { %2994 = vmatpush.msrb.mxu0 %v7180_v53  ;;  %3014 = vmatpush.msrb.mxu1 %v7181_v18 }
 0x98d   :  { %3034 = vmatpush.msrb.mxu2 %v7182_v23  ;;  %3054 = vmatpush.msrb.mxu3 %v7183_v16 }
 0x9e9   :  { %v2668_v37 = vpop.f32.mrf.mxu0  ;;  %v2688_v2 = vpop.f32.mrf.mxu1 }
 0x9ea   :  { %v2731_v56 = vadd.f32 %v2668_v37, %v232_v8  ;;  %v2732_v58 = vadd.f32 %v2688_v2, %v281_v28 }
 0x9ec   :  { %v3478_v11 = vmul.f32 -1.442695, %v2731_v56  ;;  %v3479_v26 = vmul.f32 -1.442695, %v2732_v58 }
 0x9ee   :  { %3808 = vpow2.f32 %v3478_v11  ;;  %v3580_v11 = vld [vmem:[%s6438_s5 + $0x28] sm:$0xff] }
 0x9ef   :  { %3810 = vpow2.f32 %v3479_v26  ;;  %v7192_v26 = vld [vmem:[#allocation47_spill] sm:$0xff] }
 0x9f0   :  { %v2728_v46 = vpop.f32.mrf.mxu3  ;;  %v2708_v35 = vpop.f32.mrf.mxu2  ;;  %v235_v60 = vadd.f32 %v7192_v26, %v7184_v3 }
 0x9f1   :  { %v2734_v31 = vadd.f32 %v2728_v46, %v379_v34  ;;  %v2733_v55 = vadd.f32 %v2708_v35, %v330_v25  ;;  %v7193_v34 = vld [vmem:[#allocation88_spill] sm:$0xff]  ;;  %v382_v25 = vadd.f32 %v7194_v1, %v7188_v24 }
 0x9f2   :  { %v284_v46 = vadd.f32 %v7193_v34, %v7186_v29 }
 0x9f3   :  { %v3480_v22 = vmul.f32 -1.442695, %v2734_v31 }
 0x9f4   :  { %v3809_v30 = vpop.eup %3808 }
 0x9f5   :  { %v3811_v17 = vpop.eup %3810  ;;  %v2738_v51 = vadd.f32 1.0, %v3809_v30  ;;  %3812 = vpow2.f32 %v3480_v22 }
 0x9f6   :  { %v2757_v62 = vadd.f32 1.0, %v3811_v17 }
 0x9f7   :  { %3814 = vrcp.f32 %v2738_v51  ;;  %v2750_v21 = vand.u32 2147483648, %v2738_v51  ;;  %v2748_v5 = vand.u32 2147483647, %v2738_v51  ;;  %vm2744_vm8 = vweird.f32 %v2738_v51 }
 0x9f8   :  { %3816 = vrcp.f32 %v2757_v62  ;;  %v2769_v54 = vand.u32 2147483648, %v2757_v62  ;;  %v2767_v45 = vand.u32 2147483647, %v2757_v62  ;;  %vm2763_vm9 = vweird.f32 %v2757_v62 }
 0x9f9   :  { %v2751_v44 = vor.u32 1.1754944e-38, %v2750_v21  ;;  %vm2749_vm12 = vcmp.eq.f32.partialorder %v2748_v5, 8.507059e+37  ;;  %v3576_v21 = vld [vmem:[%s6438_s5 + $0x8] sm:$0xff] }
 0x9fa   :  { %v2770_v7 = vor.u32 1.1754944e-38, %v2769_v54  ;;  %vm2768_vm13 = vcmp.eq.f32.partialorder %v2767_v45, 8.507059e+37  ;;  %v3575_v54 = vld [vmem:[%s6438_s5] sm:$0xff] }
 0x9fb   :  { %v3813_v41 = vpop.eup %3812 }
 0x9fc   :  { %v2777_v14 = vadd.f32 1.0, %v3813_v41  ;;  %v3578_v41 = vld [vmem:[%s6438_s5 + $0x18] sm:$0xff] }
 0x9fd   :  { %v3815_v27 = vpop.eup %3814 }
 0x9fe   :  { %v3817_v48 = vpop.eup %3816  ;;  %v2740_v32 = vmul.f32 %v3815_v27, %v2738_v51  ;;  %3818 = vrcp.f32 %v2777_v14  ;;  %vm2745_vm6 = vweird.f32 %v3815_v27  ;;  %v2789_v18 = vand.u32 2147483648, %v2777_v14  ;;  %v3579_v51 = vld [vmem:[%s6438_s5 + $0x20] sm:$0xff] }
 0x9ff   :  { %v2759_v20 = vmul.f32 %v3817_v48, %v2757_v62  ;;  %3820 = vtanh.f32 %v2733_v55  ;;  %vm2764_vm7 = vweird.f32 %v3817_v48  ;;  %vm2746_vm10 = vmor %vm2744_vm8, %vm2745_vm6  ;;  %vm2783_vm1 = vweird.f32 %v2777_v14 }
 0xa00   :  { %v2741_v10 = vsub.f32 1.0, %v2740_v32  ;;  %vm2765_vm11 = vmor %vm2763_vm9, %vm2764_vm7  ;;  %v2787_v16 = vand.u32 2147483647, %v2777_v14  ;;  %v2790_v8 = vor.u32 1.1754944e-38, %v2789_v18 }
 0xa01   :  { %v2760_v61 = vsub.f32 1.0, %v2759_v20 }
 0xa02   :  { %v2742_v15 = vmul.f32 %v3815_v27, %v2741_v10  ;;  %vm2788_vm3 = vcmp.eq.f32.partialorder %v2787_v16, 8.507059e+37 }
 0xa03   :  { %v2761_v42 = vmul.f32 %v3817_v48, %v2760_v61 }
 0xa04   :  { %v3819_v0 = vpop.eup %3818  ;;  %v2743_v49 = vadd.f32 %v3815_v27, %v2742_v15 }
 0xa05   :  { %v2762_v12 = vadd.f32 %v3817_v48, %v2761_v42  ;;  %v2779_v36 = vmul.f32 %v3819_v0, %v2777_v14  ;;  %v3821_v57 = vpop.eup %3820  ;;  %vm2784_vm15 = vweird.f32 %v3819_v0  ;;  %v7195_v42 = vld [vmem:[#allocation93_spill] sm:$0xff] }
 0xa06   :  { %v2747_v43 = vsel %vm2746_vm10, %v3815_v27, %v2743_v49  ;;  %vm2785_vm2 = vmor %vm2783_vm1, %vm2784_vm15  ;;  %v3577_v27 = vld [vmem:[%s6438_s5 + $0x10] sm:$0xff]  ;;  %v333_v45 = vadd.f32 %v7195_v42, %v7190_v9 }
 0xa07   :  { %v2752_v50 = vsel %vm2749_vm12, %v2751_v44, %v2747_v43  ;;  %v2766_v39 = vsel %vm2765_vm11, %v3817_v48, %v2762_v12  ;;  %v2780_v19 = vsub.f32 1.0, %v2779_v36 }
 0xa08   :  { %v2771_v6 = vsel %vm2768_vm13, %v2770_v7, %v2766_v39  ;;  %v2794_v59 = vmul.f32 %v3821_v57, %v2752_v50 }
 0xa09   :  { %v2793_v13 = vmul.f32 %v2771_v6, %v6202_v40  ;;  %v2781_v4 = vmul.f32 %v3819_v0, %v2780_v19 }
 0xa0b   :  { %v2795_v52 = vadd.f32 %v2794_v59, %v2793_v13  ;;  %v2782_v53 = vadd.f32 %v3819_v0, %v2781_v4 }
 0xa0d   :  { %3822 = vtanh.f32 %v2795_v52  ;;  %v6288_v23 = vsel %vm2805_vm14, %v2795_v52, %v6202_v40  ;;  %v2786_v47 = vsel %vm2785_vm2, %v3819_v0, %v2782_v53  ;;  %v3582_v40 = vld [vmem:[%s6438_s5 + $0x38] sm:$0xff] }
 0xa0e   :  { %v2791_v28 = vsel %vm2788_vm3, %v2790_v8, %v2786_v47 }
 0xa13   :  { %v3823_v63 = vpop.eup %3822 }
 0xa14   :  { %v2797_v37 = vmul.f32 %v3823_v63, %v2791_v28 }
 0xa16   :  { %v6292_v2 = vsel %vm2805_vm14, %v2797_v37, %v6206_v33  ;;  %v2808_v56 = vsel %vm2805_vm14, %v2797_v37, 0.0  ;;  %v3581_v33 = vld [vmem:[%s6438_s5 + $0x30] sm:$0xff] }
 0xa17   :  { %v2809_v58 = vpack.c.bf16 %v2808_v56, %v2808_v56  ;;  %2831 = vmatmul.f32.vlgmr.msra.gmra.mxu0 %v6292_v2  ;;  %2851 = vmatmul.f32.vlgmr.msra.gmra.mxu1 %v6292_v2 }
 0xa18   :  { %2871 = vmatmul.f32.vlgmr.msra.gmra.mxu2 %v6292_v2  ;;  %2891 = vmatmul.f32.vlgmr.msra.gmra.mxu3 %v6292_v2 }
 0xa19   :  { %2810 = vst [vmem:[#allocation3 + $0x34] sm:$0xf] %v2809_v58  ;;  %3273 = vmatpush.bf16.msra.mxu0 %v3582_v40  ;;  %v2968_v40 = vpop.permute.xlu2 %2967 }
 0xa1a   :  { %vm2969_vm12 = vcmp.eq.s32.totalorder %v2968_v40, 1 }
 0xa1d   :  { %3274 = vmatpush.bf16.msra.mxu0 %v3581_v33 }
 0xa21   :  { %3275 = vmatpush.bf16.msra.mxu0 %v3580_v11 }
 0xa25   :  { %3276 = vmatpush.bf16.msra.mxu0 %v3579_v51 }
 0xa29   :  { %3277 = vmatpush.bf16.msra.mxu0 %v3578_v41 }
 0xa2d   :  { %3278 = vmatpush.bf16.msra.mxu0 %v3577_v27  ;;  %v3570_v27 = vld [vmem:[#allocation3 + $0x18] sm:$0xff] }
 0xa31   :  { %3279 = vmatpush.bf16.msra.mxu0 %v3576_v21 }
 0xa35   :  { %3280 = vmatpush.bf16.msra.mxu0 %v3575_v54 }
 0xa94   :  { %v2832_v31 = vpop.f32.mrf.mxu0  ;;  %v2852_v22 = vpop.f32.mrf.mxu1 }
 0xa95   :  { %v2895_v30 = vadd.f32 %v2832_v31, %v235_v60  ;;  %v2896_v17 = vadd.f32 %v2852_v22, %v284_v46 }
 0xa97   :  { %v3481_v62 = vmul.f32 -1.442695, %v2895_v30  ;;  %v3482_v35 = vmul.f32 -1.442695, %v2896_v17 }
 0xa99   :  { %3824 = vpow2.f32 %v3481_v62 }
 0xa9a   :  { %3826 = vpow2.f32 %v3482_v35 }
 0xa9b   :  { %v2892_v14 = vpop.f32.mrf.mxu3  ;;  %v2872_v15 = vpop.f32.mrf.mxu2 }
 0xa9c   :  { %v2898_v55 = vadd.f32 %v2892_v14, %v382_v25  ;;  %v2897_v44 = vadd.f32 %v2872_v15, %v333_v45  ;;  %v3568_v25 = vld [vmem:[#allocation3 + $0x8] sm:$0xff]  ;;  %v3569_v14 = vld [vmem:[#allocation3 + $0x10] sm:$0xff] }
 0xa9e   :  { %v3483_v48 = vmul.f32 -1.442695, %v2898_v55  ;;  %v3571_v55 = vld [vmem:[#allocation3 + $0x20] sm:$0xff] }
 0xa9f   :  { %v3825_v32 = vpop.eup %3824 }
 0xaa0   :  { %v3827_v20 = vpop.eup %3826  ;;  %v2902_v10 = vadd.f32 1.0, %v3825_v32  ;;  %3828 = vpow2.f32 %v3483_v48  ;;  %v3572_v48 = vld [vmem:[#allocation3 + $0x28] sm:$0xff] }
 0xaa1   :  { %v2921_v61 = vadd.f32 1.0, %v3827_v20  ;;  %v7196_v32 = vld [vmem:[#allocation50_spill] sm:$0xff] }
 0xaa2   :  { %3830 = vrcp.f32 %v2902_v10  ;;  %v2914_v50 = vand.u32 2147483648, %v2902_v10  ;;  %v2912_v6 = vand.u32 2147483647, %v2902_v10  ;;  %vm2908_vm6 = vweird.f32 %v2902_v10 }
 0xaa3   :  { %3832 = vrcp.f32 %v2921_v61  ;;  %v2933_v39 = vand.u32 2147483648, %v2921_v61  ;;  %v2931_v38 = vand.u32 2147483647, %v2921_v61  ;;  %vm2927_vm7 = vweird.f32 %v2921_v61 }
 0xaa4   :  { %v2915_v52 = vor.u32 1.1754944e-38, %v2914_v50  ;;  %vm2913_vm10 = vcmp.eq.f32.partialorder %v2912_v6, 8.507059e+37  ;;  %v237_v20 = vadd.f32 %v7196_v32, %v7184_v3 }
 0xaa5   :  { %v2934_v16 = vor.u32 1.1754944e-38, %v2933_v39  ;;  %vm2932_vm11 = vcmp.eq.f32.partialorder %v2931_v38, 8.507059e+37  ;;  %v7199_v38 = vld [vmem:[#allocation94_spill] sm:$0xff] }
 0xaa6   :  { %v3829_v5 = vpop.eup %3828 }
 0xaa7   :  { %v2941_v0 = vadd.f32 1.0, %v3829_v5 }
 0xaa8   :  { %v3831_v49 = vpop.eup %3830 }
 0xaa9   :  { %v3833_v12 = vpop.eup %3832  ;;  %v2904_v36 = vmul.f32 %v3831_v49, %v2902_v10  ;;  %3834 = vrcp.f32 %v2941_v0  ;;  %vm2909_vm4 = vweird.f32 %v3831_v49  ;;  %v2953_v34 = vand.u32 2147483648, %v2941_v0  ;;  %v7197_v10 = vld [vmem:[#allocation91_spill] sm:$0xff] }
 0xaaa   :  { %v2923_v7 = vmul.f32 %v3833_v12, %v2921_v61  ;;  %3836 = vtanh.f32 %v2897_v44  ;;  %vm2928_vm5 = vweird.f32 %v3833_v12  ;;  %vm2910_vm8 = vmor %vm2908_vm6, %vm2909_vm4  ;;  %vm2947_vm14 = vweird.f32 %v2941_v0 }
 0xaab   :  { %v2905_v43 = vsub.f32 1.0, %v2904_v36  ;;  %vm2929_vm9 = vmor %vm2927_vm7, %vm2928_vm5  ;;  %v2951_v31 = vand.u32 2147483647, %v2941_v0  ;;  %v2954_v30 = vor.u32 1.1754944e-38, %v2953_v34  ;;  %v286_v61 = vadd.f32 %v7197_v10, %v7186_v29 }
 0xaac   :  { %v2924_v57 = vsub.f32 1.0, %v2923_v7 }
 0xaad   :  { %v2906_v19 = vmul.f32 %v3831_v49, %v2905_v43  ;;  %vm2952_vm1 = vcmp.eq.f32.partialorder %v2951_v31, 8.507059e+37 }
 0xaae   :  { %v2925_v59 = vmul.f32 %v3833_v12, %v2924_v57 }
 0xaaf   :  { %v3835_v13 = vpop.eup %3834  ;;  %v2907_v4 = vadd.f32 %v3831_v49, %v2906_v19 }
 0xab0   :  { %v2926_v53 = vadd.f32 %v3833_v12, %v2925_v59  ;;  %v2943_v18 = vmul.f32 %v3835_v13, %v2941_v0  ;;  %v3837_v8 = vpop.eup %3836  ;;  %vm2948_vm13 = vweird.f32 %v3835_v13  ;;  %v6346_v0 = vld [vmem:[%s6439_s6] ss:$0 sm:$0xff] }
 0xab1   :  { %v2911_v47 = vsel %vm2910_vm8, %v3831_v49, %v2907_v4  ;;  %vm2949_vm15 = vmor %vm2947_vm14, %vm2948_vm13  ;;  %v7198_v49 = vld [vmem:[#allocation83_spill] sm:$0xff] }
 0xab2   :  { %v2916_v63 = vsel %vm2913_vm10, %v2915_v52, %v2911_v47  ;;  %v2930_v28 = vsel %vm2929_vm9, %v3833_v12, %v2926_v53  ;;  %v2944_v37 = vsub.f32 1.0, %v2943_v18  ;;  %v384_v44 = vadd.f32 %v7198_v49, %v7188_v24 }
 0xab3   :  { %v2935_v56 = vsel %vm2932_vm11, %v2934_v16, %v2930_v28  ;;  %v2958_v58 = vmul.f32 %v3837_v8, %v2916_v63 }
 0xab4   :  { %v2957_v33 = vmul.f32 %v2935_v56, %v6288_v23  ;;  %v2945_v11 = vmul.f32 %v3835_v13, %v2944_v37 }
 0xab6   :  { %v2959_v26 = vadd.f32 %v2958_v58, %v2957_v33  ;;  %v2946_v60 = vadd.f32 %v3835_v13, %v2945_v11 }
 0xab8   :  { %3838 = vtanh.f32 %v2959_v26  ;;  %v6334_v46 = vsel %vm2969_vm12, %v2959_v26, %v6288_v23  ;;  %v2950_v22 = vsel %vm2949_vm15, %v3835_v13, %v2946_v60  ;;  %v3567_v23 = vld [vmem:[#allocation3] sm:$0xff]  ;;  %v335_v13 = vadd.f32 %v7199_v38, %v7190_v9 }
 0xab9   :  { %v2955_v51 = vsel %vm2952_vm1, %v2954_v30, %v2950_v22 }
 0xabe   :  { %v3839_v17 = vpop.eup %3838 }
 0xabf   :  { %v2961_v62 = vmul.f32 %v3839_v17, %v2955_v51 }
 0xac1   :  { %v2970_v35 = vsel %vm2969_vm12, %v2961_v62, %v6292_v2  ;;  %v2972_v41 = vsel %vm2969_vm12, %v2961_v62, 0.0  ;;  %v3573_v2 = vld [vmem:[#allocation3 + $0x30] sm:$0xff] }
 0xac2   :  { %v2973_v1 = vpack.c.bf16 %v2972_v41, %v2972_v41  ;;  %2995 = vmatmul.f32.vlgmr.msrb.gmra.mxu0 %v2970_v35  ;;  %3015 = vmatmul.f32.vlgmr.msrb.gmra.mxu1 %v2970_v35 }
 0xac3   :  { %3035 = vmatmul.f32.vlgmr.msrb.gmra.mxu2 %v2970_v35  ;;  %3055 = vmatmul.f32.vlgmr.msrb.gmra.mxu3 %v2970_v35 }
 0xac4   :  { %2974 = vst [vmem:[#allocation3 + $0x38] sm:$0xf] %v2973_v1 }
 0xaca   :  { %3281 = vmatmul.bf16.vlgmr.msra.gmra.mxu0 %v3567_v23 }
 0xada   :  { %3286 = vmatmul.bf16.gmra.mxu0 %v3568_v25 }
 0xaea   :  { %3291 = vmatmul.bf16.gmra.mxu0 %v3569_v14 }
 0xafa   :  { %3296 = vmatmul.bf16.gmra.mxu0 %v3570_v27 }
 0xb0a   :  { %3301 = vmatmul.bf16.gmra.mxu0 %v3571_v55 }
 0xb1a   :  { %3306 = vmatmul.bf16.gmra.mxu0 %v3572_v48 }
 0xb2a   :  { %3311 = vmatmul.bf16.gmra.mxu0 %v3573_v2 }
 0xb3f   :  { %v2996_v21 = vpop.f32.mrf.mxu0  ;;  %v3016_v54 = vpop.f32.mrf.mxu1 }
 0xb40   :  { %v3059_v15 = vadd.f32 %v2996_v21, %v237_v20  ;;  %v3060_v5 = vadd.f32 %v3016_v54, %v286_v61  ;;  %v3132_v21 = vpop.permute.xlu0 %3131 }
 0xb41   :  { %vm3133_vm14 = vcmp.eq.s32.totalorder %v3132_v21, 1 }
 0xb42   :  { %v3484_v42 = vmul.f32 -1.442695, %v3059_v15  ;;  %v3485_v45 = vmul.f32 -1.442695, %v3060_v5 }
 0xb44   :  { %3840 = vpow2.f32 %v3484_v42 }
 0xb45   :  { %3842 = vpow2.f32 %v3485_v45 }
 0xb46   :  { %v3056_v3 = vpop.f32.mrf.mxu3  ;;  %v3036_v19 = vpop.f32.mrf.mxu2 }
 0xb47   :  { %v3062_v12 = vadd.f32 %v3056_v3, %v384_v44  ;;  %v3282_v36 = vpop.f32.mrf.mxu0  ;;  %v3061_v53 = vadd.f32 %v3036_v19, %v335_v13 }
 0xb48   :  { %v3283_v29 = vadd.f32 %v6346_v0, %v3282_v36 }
 0xb49   :  { %v3486_v7 = vmul.f32 -1.442695, %v3062_v12 }
 0xb4a   :  { %v3841_v43 = vpop.eup %3840  ;;  %3322 = vst.msk [vmem:[%s6440_s7] sm:$0xff] %vm165_vm0, %v3283_v29 }
 0xb4b   :  { %v3843_v57 = vpop.eup %3842  ;;  %v3066_v50 = vadd.f32 1.0, %v3841_v43  ;;  %3844 = vpow2.f32 %v3486_v7 }
 0xb4c   :  { %v3085_v39 = vadd.f32 1.0, %v3843_v57 }
 0xb4d   :  { %3846 = vrcp.f32 %v3066_v50  ;;  %v3076_v28 = vand.u32 2147483647, %v3066_v50  ;;  %v3078_v37 = vand.u32 2147483648, %v3066_v50  ;;  %vm3072_vm4 = vweird.f32 %v3066_v50 }
 0xb4e   :  { %3848 = vrcp.f32 %v3085_v39  ;;  %v3097_v58 = vand.u32 2147483648, %v3085_v39  ;;  %v3095_v11 = vand.u32 2147483647, %v3085_v39  ;;  %vm3091_vm5 = vweird.f32 %v3085_v39 }
 0xb4f   :  { %v3284_v24 = vpop.f32.mrf.mxu0  ;;  %v3079_v34 = vor.u32 1.1754944e-38, %v3078_v37  ;;  %vm3077_vm8 = vcmp.eq.f32.partialorder %v3076_v28, 8.507059e+37 }
 0xb50   :  { %v3285_v6 = vadd.f32 %v6346_v0, %v3284_v24  ;;  %v3098_v30 = vor.u32 1.1754944e-38, %v3097_v58  ;;  %vm3096_vm9 = vcmp.eq.f32.partialorder %v3095_v11, 8.507059e+37 }
 0xb51   :  { %v3845_v59 = vpop.eup %3844 }
 0xb52   :  { %v3105_v4 = vadd.f32 1.0, %v3845_v59  ;;  %3323 = vst.msk [vmem:[%s6440_s7 + $0x8] sm:$0xff] %vm165_vm0, %v3285_v6 }
 0xb53   :  { %v3847_v52 = vpop.eup %3846 }
 0xb54   :  { %v3849_v18 = vpop.eup %3848  ;;  %v3068_v16 = vmul.f32 %v3847_v52, %v3066_v50  ;;  %3850 = vrcp.f32 %v3105_v4  ;;  %vm3073_vm2 = vweird.f32 %v3847_v52  ;;  %v3117_v32 = vand.u32 2147483648, %v3105_v4 }
 0xb55   :  { %v3087_v47 = vmul.f32 %v3849_v18, %v3085_v39  ;;  %3852 = vtanh.f32 %v3061_v53  ;;  %vm3092_vm3 = vweird.f32 %v3849_v18  ;;  %vm3074_vm6 = vmor %vm3072_vm4, %vm3073_vm2  ;;  %vm3111_vm11 = vweird.f32 %v3105_v4 }
 0xb56   :  { %v3069_v8 = vsub.f32 1.0, %v3068_v16  ;;  %vm3093_vm7 = vmor %vm3091_vm5, %vm3092_vm3  ;;  %v3115_v20 = vand.u32 2147483647, %v3105_v4  ;;  %v3118_v61 = vor.u32 1.1754944e-38, %v3117_v32 }
 0xb57   :  { %v3088_v63 = vsub.f32 1.0, %v3087_v47  ;;  %v3287_v56 = vpop.f32.mrf.mxu0 }
 0xb58   :  { %v3070_v9 = vmul.f32 %v3847_v52, %v3069_v8  ;;  %v3288_v40 = vadd.f32 %v6346_v0, %v3287_v56  ;;  %vm3116_vm13 = vcmp.eq.f32.partialorder %v3115_v20, 8.507059e+37 }
 0xb59   :  { %v3089_v33 = vmul.f32 %v3849_v18, %v3088_v63 }
 0xb5a   :  { %v3851_v26 = vpop.eup %3850  ;;  %v3071_v60 = vadd.f32 %v3847_v52, %v3070_v9  ;;  %3324 = vst.msk [vmem:[%s6440_s7 + $0x10] sm:$0xff] %vm165_vm0, %v3288_v40 }
 0xb5b   :  { %v3090_v31 = vadd.f32 %v3849_v18, %v3089_v33  ;;  %v3107_v22 = vmul.f32 %v3851_v26, %v3105_v4  ;;  %v3853_v51 = vpop.eup %3852  ;;  %vm3112_vm10 = vweird.f32 %v3851_v26 }
 0xb5c   :  { %v3075_v17 = vsel %vm3074_vm6, %v3847_v52, %v3071_v60  ;;  %vm3113_vm12 = vmor %vm3111_vm11, %vm3112_vm10 }
 0xb5d   :  { %v3080_v62 = vsel %vm3077_vm8, %v3079_v34, %v3075_v17  ;;  %v3094_v35 = vsel %vm3093_vm7, %v3849_v18, %v3090_v31  ;;  %v3108_v41 = vsub.f32 1.0, %v3107_v22 }
 0xb5e   :  { %v3099_v1 = vsel %vm3096_vm9, %v3098_v30, %v3094_v35  ;;  %v3122_v23 = vmul.f32 %v3853_v51, %v3080_v62 }
 0xb5f   :  { %v3121_v25 = vmul.f32 %v3099_v1, %v6334_v46  ;;  %v3109_v14 = vmul.f32 %v3851_v26, %v3108_v41  ;;  %v3289_v27 = vpop.f32.mrf.mxu0 }
 0xb60   :  { %v3290_v55 = vadd.f32 %v6346_v0, %v3289_v27 }
 0xb61   :  { %v3123_v48 = vadd.f32 %v3122_v23, %v3121_v25  ;;  %v3110_v2 = vadd.f32 %v3851_v26, %v3109_v14 }
 0xb62   :  { %3325 = vst.msk [vmem:[%s6440_s7 + $0x18] sm:$0xff] %vm165_vm0, %v3290_v55 }
 0xb63   :  { %3854 = vtanh.f32 %v3123_v48  ;;  %v3114_v10 = vsel %vm3113_vm12, %v3851_v26, %v3110_v2 }
 0xb64   :  { %v3119_v5 = vsel %vm3116_vm13, %v3118_v61, %v3114_v10 }
 0xb67   :  { %v3292_v46 = vpop.f32.mrf.mxu0 }
 0xb68   :  { %v3293_v54 = vadd.f32 %v6346_v0, %v3292_v46 }
 0xb69   :  { %v3855_v15 = vpop.eup %3854 }
 0xb6a   :  { %v3125_v42 = vmul.f32 %v3855_v15, %v3119_v5  ;;  %3326 = vst.msk [vmem:[%s6440_s7 + $0x20] sm:$0xff] %vm165_vm0, %v3293_v54 }
 0xb6c   :  { %v3136_v45 = vsel %vm3133_vm14, %v3125_v42, 0.0 }
 0xb6d   :  { %v3137_v49 = vpack.c.bf16 %v3136_v45, %v3136_v45 }
 0xb6f   :  { %3138 = vst [vmem:[#allocation3 + $0x3c] sm:$0xf] %v3137_v49  ;;  %v3294_v44 = vpop.f32.mrf.mxu0 }
 0xb70   :  { %v3295_v3 = vadd.f32 %v6346_v0, %v3294_v44 }
 0xb72   :  { %3327 = vst.msk [vmem:[%s6440_s7 + $0x28] sm:$0xff] %vm165_vm0, %v3295_v3 }
 0xb76   :  { %v3574_v12 = vld [vmem:[#allocation3 + $0x38] sm:$0xff] }
 0xb77   :  { %v3297_v36 = vpop.f32.mrf.mxu0  ;;  %3316 = vmatmul.bf16.gmra.mxu0 %v3574_v12 }
 0xb78   :  { %v3298_v29 = vadd.f32 %v6346_v0, %v3297_v36 }
 0xb7a   :  { %3328 = vst.msk [vmem:[%s6440_s7 + $0x30] sm:$0xff] %vm165_vm0, %v3298_v29 }
 0xb7f   :  { %v3299_v7 = vpop.f32.mrf.mxu0 }
 0xb80   :  { %v3300_v43 = vadd.f32 %v6346_v0, %v3299_v7 }
 0xb82   :  { %3329 = vst.msk [vmem:[%s6440_s7 + $0x38] sm:$0xff] %vm165_vm0, %v3300_v43 }
 0xb87   :  { %v3302_v57 = vpop.f32.mrf.mxu0 }
 0xb88   :  { %v3303_v50 = vadd.f32 %v6346_v0, %v3302_v57 }
 0xb8a   :  { %3330 = vst.msk [vmem:[%s6440_s7 + $0x40] sm:$0xff] %vm165_vm0, %v3303_v50 }
 0xb8f   :  { %v3304_v39 = vpop.f32.mrf.mxu0 }
 0xb90   :  { %v3305_v24 = vadd.f32 %v6346_v0, %v3304_v39 }
 0xb92   :  { %3331 = vst.msk [vmem:[%s6440_s7 + $0x48] sm:$0xff] %vm165_vm0, %v3305_v24 }
 0xb97   :  { %v3307_v19 = vpop.f32.mrf.mxu0 }
 0xb98   :  { %v3308_v6 = vadd.f32 %v6346_v0, %v3307_v19 }
 0xb9a   :  { %3332 = vst.msk [vmem:[%s6440_s7 + $0x50] sm:$0xff] %vm165_vm0, %v3308_v6 }
 0xb9f   :  { %v3309_v59 = vpop.f32.mrf.mxu0 }
 0xba0   :  { %v3310_v38 = vadd.f32 %v6346_v0, %v3309_v59 }
 0xba2   :  { %3333 = vst.msk [vmem:[%s6440_s7 + $0x58] sm:$0xff] %vm165_vm0, %v3310_v38 }
 0xba7   :  { %v3312_v13 = vpop.f32.mrf.mxu0 }
 0xba8   :  { %v3313_v4 = vadd.f32 %v6346_v0, %v3312_v13 }
 0xbaa   :  { %3334 = vst.msk [vmem:[%s6440_s7 + $0x60] sm:$0xff] %vm165_vm0, %v3313_v4 }
 0xbaf   :  { %v3314_v52 = vpop.f32.mrf.mxu0 }
 0xbb0   :  { %v3315_v53 = vadd.f32 %v6346_v0, %v3314_v52 }
 0xbb2   :  { %3335 = vst.msk [vmem:[%s6440_s7 + $0x68] sm:$0xff] %vm165_vm0, %v3315_v53 }
 0xbf4   :  { %v3317_v18 = vpop.f32.mrf.mxu0 }
 0xbf5   :  { %v3318_v16 = vadd.f32 %v6346_v0, %v3317_v18 }
 0xbf7   :  { %3336 = vst.msk [vmem:[%s6440_s7 + $0x70] sm:$0xff] %vm165_vm0, %v3318_v16 }
 0xbfc   :  { %v3319_v47 = vpop.f32.mrf.mxu0 }
 0xbfd   :  { %v3320_v8 = vadd.f32 %v6346_v0, %v3319_v47 }
 0xbff   :  { %3337 = vst.msk [vmem:[%s6440_s7 + $0x78] sm:$0xff] %vm165_vm0, %v3320_v8 }
 0xc00   :  { %3342 = vsyncpa [#allocation7], 1 }

</bundles_post_ra>
